<compile_context>
chip_gen: v6e
topology: v6e:2x2x1
jax: 0.10.0
libtpu: 0.0.40
codegen_flags: <defaults>
</compile_context>

<pallas_src>
import math
import functools

import jax
import jax.numpy as jnp
from jax import lax
from jax.experimental import pallas as pl
from jax.experimental.pallas import tpu as pltpu


_EPS = 1e-5
_GELU_C = 0.7978845608028654  # sqrt(2/pi), matches nn.GELU(approximate='tanh')


def _vmem_limit_bytes():
    # Generation-aware scoped-VMEM budget: ~3/4 of physical, capped at 96 MiB.
    #   v5e/v6e (128 MiB physical) -> 96 MiB, v7x (64 MiB) -> 48 MiB.
    try:
        phys = pltpu.get_tpu_info().vmem_capacity_bytes
        return int(min(phys * 3 // 4, 96 * 1024 * 1024))
    except Exception:
        return 32 * 1024 * 1024


_VMEM_LIMIT = _vmem_limit_bytes()


def _layernorm_f32(x, gamma, beta, eps=_EPS):
    mu = jnp.mean(x, axis=-1, keepdims=True)
    xc = x - mu
    var = jnp.mean(xc * xc, axis=-1, keepdims=True)
    return xc * lax.rsqrt(var + eps) * gamma + beta


def _pick_row_tile(n, candidates=(512, 256, 128, 64, 32, 16, 8)):
    """Largest divisor tile that still yields >= 2 row steps (v7x megacore)."""
    for c in candidates:
        if c <= n and n % c == 0 and n // c >= 2:
            return c
    for c in candidates:
        if c <= n and n % c == 0:
            return c
    return n


# ------------------- fused attention sub-layer (one kernel) -------------------

def attention_block(x, ln_g, ln_b, w_qkv, b_qkv, w_proj, b_proj, mask_bias, *, n_head):
    """x:(B,T,C) f32 -> x + c_proj(causal_attn(qkv(LN1(x)))), one pallas_call, grid=(B,)."""
    B, T, C = x.shape
    hd = C // n_head
    scale = 1.0 / math.sqrt(hd)

    def kernel(x_ref, g_ref, bt_ref, wq_ref, bq_ref, wp_ref, bp_ref, m_ref, o_ref):
        xb = x_ref[0].astype(jnp.float32)                              # (T, C) residual
        xn = _layernorm_f32(xb, g_ref[...], bt_ref[...])
        qkv = jnp.dot(xn.astype(jnp.bfloat16), wq_ref[...],
                      preferred_element_type=jnp.float32) + bq_ref[...]  # (T, 3C) f32
        bias = m_ref[...]                                              # (T, T) additive causal mask
        acc = jnp.zeros((T, C), jnp.float32)
        for h in range(n_head):                                        # static unroll
            # scale q (T, hd) before QK^T: 4x fewer muls than scaling (T, T) scores
            q = (qkv[:, h * hd:(h + 1) * hd] * scale).astype(jnp.bfloat16)
            k = qkv[:, C + h * hd:C + (h + 1) * hd].astype(jnp.bfloat16)
            v = qkv[:, 2 * C + h * hd:2 * C + (h + 1) * hd].astype(jnp.bfloat16)
            s = lax.dot_general(q, k, (((1,), (1,)), ((), ())),
                                preferred_element_type=jnp.float32) + bias
            m = jnp.max(s, axis=-1, keepdims=True)
            p = jnp.exp(s - m)
            p = p * pl.reciprocal(jnp.sum(p, axis=-1, keepdims=True), approx=True)
            o_h = jnp.dot(p.astype(jnp.bfloat16), v, preferred_element_type=jnp.float32)
            # fold the output projection per head: y @ Wp == sum_h o_h @ Wp[h*hd:(h+1)*hd]
            acc = acc + jnp.dot(o_h.astype(jnp.bfloat16), wp_ref[h * hd:(h + 1) * hd, :],
                                preferred_element_type=jnp.float32)
        o_ref[0] = (xb + acc + bp_ref[...]).astype(o_ref.dtype)

    cost = pl.CostEstimate(
        flops=int(2 * B * T * C * (3 * C) + 4 * B * n_head * T * T * hd + 2 * B * T * C * C),
        transcendentals=int(B * n_head * T * T + B * T),
        bytes_accessed=int(2 * x.size * 4 + w_qkv.size * 2 + w_proj.size * 2 + T * T * 4))

    return pl.pallas_call(
        kernel,
        out_shape=jax.ShapeDtypeStruct((B, T, C), jnp.float32),
        grid_spec=pltpu.PrefetchScalarGridSpec(
            num_scalar_prefetch=0,
            grid=(B,),
            in_specs=[
                pl.BlockSpec((1, T, C), lambda b: (b, 0, 0)),
                pl.BlockSpec((1, C), lambda b: (0, 0)),
                pl.BlockSpec((1, C), lambda b: (0, 0)),
                pl.BlockSpec((C, 3 * C), lambda b: (0, 0)),
                pl.BlockSpec((1, 3 * C), lambda b: (0, 0)),
                pl.BlockSpec((C, C), lambda b: (0, 0)),
                pl.BlockSpec((1, C), lambda b: (0, 0)),
                pl.BlockSpec((T, T), lambda b: (0, 0)),
            ],
            out_specs=pl.BlockSpec((1, T, C), lambda b: (b, 0, 0)),
        ),
        compiler_params=pltpu.CompilerParams(
            dimension_semantics=("parallel",),
            vmem_limit_bytes=_VMEM_LIMIT),
        cost_estimate=cost,
    )(x, ln_g.reshape(1, C), ln_b.reshape(1, C), w_qkv, b_qkv.reshape(1, 3 * C),
      w_proj, b_proj.reshape(1, C), mask_bias)


# ---------------------- fused MLP sub-layer (one kernel) ----------------------

def mlp_block(x, ln_g, ln_b, w_fc, b_fc, w_proj, b_proj):
    """x:(B,T,C) f32 -> x + c_proj(gelu_tanh(c_fc(LN2(x)))), one pallas_call, grid=(B,)."""
    B, T, C = x.shape
    H = w_fc.shape[1]

    def kernel(x_ref, g_ref, bt_ref, wf_ref, bf_ref, wp_ref, bp_ref, o_ref):
        xb = x_ref[0].astype(jnp.float32)                              # (T, C) residual
        xn = _layernorm_f32(xb, g_ref[...], bt_ref[...])
        h = jnp.dot(xn.astype(jnp.bfloat16), wf_ref[...],
                    preferred_element_type=jnp.float32) + bf_ref[...]  # (T, 4C) f32
        h = 0.5 * h * (1.0 + jnp.tanh(_GELU_C * (h + 0.044715 * h * h * h)))
        y = jnp.dot(h.astype(jnp.bfloat16), wp_ref[...],
                    preferred_element_type=jnp.float32) + bp_ref[...]  # (T, C) f32
        o_ref[0] = (xb + y).astype(o_ref.dtype)

    cost = pl.CostEstimate(
        flops=int(4 * B * T * C * H),
        transcendentals=int(B * T * H + B * T),
        bytes_accessed=int(2 * x.size * 4 + w_fc.size * 2 + w_proj.size * 2))

    return pl.pallas_call(
        kernel,
        out_shape=jax.ShapeDtypeStruct((B, T, C), jnp.float32),
        grid_spec=pltpu.PrefetchScalarGridSpec(
            num_scalar_prefetch=0,
            grid=(B,),
            in_specs=[
                pl.BlockSpec((1, T, C), lambda b: (b, 0, 0)),
                pl.BlockSpec((1, C), lambda b: (0, 0)),
                pl.BlockSpec((1, C), lambda b: (0, 0)),
                pl.BlockSpec((C, H), lambda b: (0, 0)),
                pl.BlockSpec((1, H), lambda b: (0, 0)),
                pl.BlockSpec((H, C), lambda b: (0, 0)),
                pl.BlockSpec((1, C), lambda b: (0, 0)),
            ],
            out_specs=pl.BlockSpec((1, T, C), lambda b: (b, 0, 0)),
        ),
        compiler_params=pltpu.CompilerParams(
            dimension_semantics=("parallel",),
            vmem_limit_bytes=_VMEM_LIMIT),
        cost_estimate=cost,
    )(x, ln_g.reshape(1, C), ln_b.reshape(1, C), w_fc, b_fc.reshape(1, H),
      w_proj, b_proj.reshape(1, C))


# ------------------ fused final LayerNorm + tied lm_head ----------------------

def lm_head_fused(x2d, ln_g, ln_b, w):
    """logits = LN_f(x) @ wte^T  (no bias).  Grid (rows, cols); rows>=2 for v7x
    megacore; LN computed once per row tile into VMEM scratch (cols axis is
    'arbitrary' so the scratch legitimately persists across vocab column tiles)."""
    N, C = x2d.shape
    V = w.shape[1]
    tm = _pick_row_tile(N)
    tn = V if V <= 512 else _pick_row_tile(V, (512, 384, 256, 128))
    grid = (N // tm, V // tn)

    def kernel(x_ref, g_ref, b_ref, w_ref, o_ref, xn_ref):
        @pl.when(pl.program_id(1) == 0)
        def _():
            xn = _layernorm_f32(x_ref[...].astype(jnp.float32), g_ref[...], b_ref[...])
            xn_ref[...] = xn.astype(jnp.bfloat16)
        o_ref[...] = jnp.dot(xn_ref[...], w_ref[...],
                             preferred_element_type=jnp.float32).astype(o_ref.dtype)

    cost = pl.CostEstimate(
        flops=int(2 * N * C * V),
        transcendentals=int(N),
        bytes_accessed=int(x2d.size * 4 + w.size * 2 + N * V * 4))

    return pl.pallas_call(
        kernel,
        out_shape=jax.ShapeDtypeStruct((N, V), jnp.float32),
        grid_spec=pltpu.PrefetchScalarGridSpec(
            num_scalar_prefetch=0,
            grid=grid,
            in_specs=[
                pl.BlockSpec((tm, C), lambda i, j: (i, 0)),
                pl.BlockSpec((1, C), lambda i, j: (0, 0)),
                pl.BlockSpec((1, C), lambda i, j: (0, 0)),
                pl.BlockSpec((C, tn), lambda i, j: (0, j)),
            ],
            out_specs=pl.BlockSpec((tm, tn), lambda i, j: (i, j)),
            scratch_shapes=[pltpu.VMEM((tm, C), jnp.bfloat16)],
        ),
        compiler_params=pltpu.CompilerParams(
            dimension_semantics=("parallel", "arbitrary"),
            vmem_limit_bytes=_VMEM_LIMIT),
        cost_estimate=cost,
    )(x2d, ln_g.reshape(1, C), ln_b.reshape(1, C), w)


# ------------------------------ model definition ------------------------------

class GPTConfig:
    def __init__(self, block_size=128, vocab_size=256, n_layer=2, n_head=4, n_embd=128):
        self.block_size = block_size
        self.vocab_size = vocab_size
        self.n_layer = n_layer
        self.n_head = n_head
        self.n_embd = n_embd


def init_params(cfg, key):
    std = 0.02
    proj_std = 0.02 * (2 * cfg.n_layer) ** (-0.5)   # NANOGPT_SCALE_INIT
    C = cfg.n_embd
    keys = iter(jax.random.split(key, 4 + 4 * cfg.n_layer))

    params = {}
    params["wte"] = std * jax.random.normal(next(keys), (cfg.vocab_size, C), jnp.float32)
    params["wpe"] = std * jax.random.normal(next(keys), (cfg.block_size, C), jnp.float32)
    params["ln_f_g"] = jnp.ones((C,), jnp.float32)
    params["ln_f_b"] = jnp.zeros((C,), jnp.float32)
    # Weight-tied lm_head (no bias, as in nanoGPT). Precomputed transpose is a
    # forward-only snapshot of wte; recompute if parameters are ever updated.
    params["lm_head_w"] = params["wte"].T.astype(jnp.bfloat16)

    blocks = []
    for _ in range(cfg.n_layer):
        blk = {
            "ln1_g": jnp.ones((C,), jnp.float32),
            "ln1_b": jnp.zeros((C,), jnp.float32),
            "w_attn": (std * jax.random.normal(next(keys), (C, 3 * C), jnp.float32)
                       ).astype(jnp.bfloat16),
            "b_attn": jnp.zeros((3 * C,), jnp.float32),
            "w_attn_proj": (proj_std * jax.random.normal(next(keys), (C, C), jnp.float32)
                            ).astype(jnp.bfloat16),
            "b_attn_proj": jnp.zeros((C,), jnp.float32),
            "ln2_g": jnp.ones((C,), jnp.float32),
            "ln2_b": jnp.zeros((C,), jnp.float32),
            "w_fc": (std * jax.random.normal(next(keys), (C, 4 * C), jnp.float32)
                     ).astype(jnp.bfloat16),
            "b_fc": jnp.zeros((4 * C,), jnp.float32),
            "w_mlp_proj": (proj_std * jax.random.normal(next(keys), (4 * C, C), jnp.float32)
                           ).astype(jnp.bfloat16),
            "b_mlp_proj": jnp.zeros((C,), jnp.float32),
        }
        blocks.append(blk)
    params["blocks"] = blocks
    return params


def gpt_forward(params, idx, cfg):
    B, T = idx.shape
    C = cfg.n_embd

    # Embedding gathers kept in plain JAX glue (dynamic gather -> XLA).
    tok_emb = jnp.take(params["wte"], idx, axis=0)            # (B, T, C)
    pos_emb = params["wpe"][:T]                               # (T, C)
    x = (tok_emb + pos_emb[None, :, :]).astype(jnp.float32)   # f32 residual stream

    # Additive causal mask built once per forward (constant-folded under jit).
    row = jnp.arange(T, dtype=jnp.int32)[:, None]
    col = jnp.arange(T, dtype=jnp.int32)[None, :]
    causal_bias = jnp.where(col <= row, 0.0, -jnp.inf).astype(jnp.float32)

    for blk in params["blocks"]:
        x = attention_block(x, blk["ln1_g"], blk["ln1_b"],
                            blk["w_attn"], blk["b_attn"],
                            blk["w_attn_proj"], blk["b_attn_proj"],
                            causal_bias, n_head=cfg.n_head)
        x = mlp_block(x, blk["ln2_g"], blk["ln2_b"],
                      blk["w_fc"], blk["b_fc"],
                      blk["w_mlp_proj"], blk["b_mlp_proj"])

    logits = lm_head_fused(x.reshape(B * T, C), params["ln_f_g"], params["ln_f_b"],
                           params["lm_head_w"])
    return logits.reshape(B, T, cfg.vocab_size)


# ----------------------------------- main -------------------------------------

if __name__ == "__main__":
    cfg = GPTConfig(block_size=128, vocab_size=256, n_layer=2, n_head=4, n_embd=128)

    key = jax.random.PRNGKey(0)
    k_params, k_idx = jax.random.split(key)
    params = init_params(cfg, k_params)

    B, T = 2, 128
    idx = jax.random.randint(k_idx, (B, T), 0, cfg.vocab_size, dtype=jnp.int32)

    fwd = jax.jit(functools.partial(gpt_forward, cfg=cfg))
    logits = fwd(params, idx)
    logits = jax.block_until_ready(logits)

    assert logits.shape == (B, T, cfg.vocab_size)
    assert bool(jnp.all(jnp.isfinite(logits)))
    print("KERNEL_OK")
</pallas_src>

<mosaic_0001>
module attributes {stable_mosaic.version = 11 : i64} {
  func.func @kernel(%arg0: i32, %arg1: memref<1x128x128xf32, #tpu.memory_space<vmem>>, %arg2: memref<1x128xf32, #tpu.memory_space<vmem>>, %arg3: memref<1x128xf32, #tpu.memory_space<vmem>>, %arg4: memref<128x384xbf16, #tpu.memory_space<vmem>>, %arg5: memref<1x384xf32, #tpu.memory_space<vmem>>, %arg6: memref<128x128xbf16, #tpu.memory_space<vmem>>, %arg7: memref<1x128xf32, #tpu.memory_space<vmem>>, %arg8: memref<128x128xf32, #tpu.memory_space<vmem>>, %arg9: memref<1x128x128xf32, #tpu.memory_space<vmem>>) attributes {dimension_semantics = [#tpu.dimension_semantics<parallel>], iteration_bounds = array<i64: 2>, scalar_prefetch = 0 : i64, scratch_operands = 0 : i64, tpu.core_type = #tpu.core_type<tc>, window_params = [{transform_indices = @transform_0, window_bounds = array<i64: 1, 128, 128>}, {pipeline_mode = #tpu.pipeline_mode<synchronous>, transform_indices = @transform_1, window_bounds = array<i64: 1, 128>}, {pipeline_mode = #tpu.pipeline_mode<synchronous>, transform_indices = @transform_2, window_bounds = array<i64: 1, 128>}, {pipeline_mode = #tpu.pipeline_mode<synchronous>, transform_indices = @transform_3, window_bounds = array<i64: 128, 384>}, {pipeline_mode = #tpu.pipeline_mode<synchronous>, transform_indices = @transform_4, window_bounds = array<i64: 1, 384>}, {pipeline_mode = #tpu.pipeline_mode<synchronous>, transform_indices = @transform_5, window_bounds = array<i64: 128, 128>}, {pipeline_mode = #tpu.pipeline_mode<synchronous>, transform_indices = @transform_6, window_bounds = array<i64: 1, 128>}, {pipeline_mode = #tpu.pipeline_mode<synchronous>, transform_indices = @transform_7, window_bounds = array<i64: 128, 128>}, {transform_indices = @transform_8, window_bounds = array<i64: 1, 128, 128>}]} {
    %c0 = arith.constant 0 : index
    %c0_0 = arith.constant 0 : index
    %c0_1 = arith.constant 0 : index
    %0 = vector.load %arg1[%c0, %c0_0, %c0_1] : memref<1x128x128xf32, #tpu.memory_space<vmem>>, vector<1x128x128xf32>
    %1 = vector.shape_cast %0 : vector<1x128x128xf32> to vector<128x128xf32>
    %c0_2 = arith.constant 0 : index
    %c0_3 = arith.constant 0 : index
    %2 = vector.load %arg2[%c0_2, %c0_3] : memref<1x128xf32, #tpu.memory_space<vmem>>, vector<1x128xf32>
    %c0_4 = arith.constant 0 : index
    %c0_5 = arith.constant 0 : index
    %3 = vector.load %arg3[%c0_4, %c0_5] : memref<1x128xf32, #tpu.memory_space<vmem>>, vector<1x128xf32>
    %cst = arith.constant dense<0.000000e+00> : vector<128xf32>
    %4 = vector.multi_reduction <add>, %1, %cst [1] : vector<128x128xf32> to vector<128xf32>
    %5 = vector.shape_cast %4 : vector<128xf32> to vector<128x1xf32>
    %cst_6 = arith.constant 1.280000e+02 : f32
    %6 = vector.broadcast %cst_6 : f32 to vector<128x1xf32>
    %7 = arith.divf %5, %6 : vector<128x1xf32>
    %8 = vector.broadcast %7 : vector<128x1xf32> to vector<128x128xf32>
    %9 = arith.subf %1, %8 : vector<128x128xf32>
    %10 = arith.mulf %9, %9 : vector<128x128xf32>
    %cst_7 = arith.constant dense<0.000000e+00> : vector<128xf32>
    %11 = vector.multi_reduction <add>, %10, %cst_7 [1] : vector<128x128xf32> to vector<128xf32>
    %12 = vector.shape_cast %11 : vector<128xf32> to vector<128x1xf32>
    %cst_8 = arith.constant 1.280000e+02 : f32
    %13 = vector.broadcast %cst_8 : f32 to vector<128x1xf32>
    %14 = arith.divf %12, %13 : vector<128x1xf32>
    %cst_9 = arith.constant 9.99999974E-6 : f32
    %15 = vector.broadcast %cst_9 : f32 to vector<128x1xf32>
    %16 = arith.addf %14, %15 : vector<128x1xf32>
    %17 = math.rsqrt %16 : vector<128x1xf32>
    %18 = vector.broadcast %17 : vector<128x1xf32> to vector<128x128xf32>
    %19 = arith.mulf %9, %18 : vector<128x128xf32>
    %20 = vector.broadcast %2 : vector<1x128xf32> to vector<128x128xf32>
    %21 = arith.mulf %19, %20 : vector<128x128xf32>
    %22 = vector.broadcast %3 : vector<1x128xf32> to vector<128x128xf32>
    %23 = arith.addf %21, %22 : vector<128x128xf32>
    %24 = arith.truncf %23 : vector<128x128xf32> to vector<128x128xbf16>
    %c0_10 = arith.constant 0 : index
    %c0_11 = arith.constant 0 : index
    %25 = vector.load %arg4[%c0_10, %c0_11] : memref<128x384xbf16, #tpu.memory_space<vmem>>, vector<128x384xbf16>
    %cst_12 = arith.constant dense<0.000000e+00> : vector<128x384xf32>
    %26 = tpu.matmul %24, %25, %cst_12 {dimension_numbers = #tpu.dot_dimension_numbers<[1], [0], [0], [1], [0, 0, 1, 1], [], []>} : vector<128x128xbf16>, vector<128x384xbf16>, vector<128x384xf32> -> vector<128x384xf32>
    %c0_13 = arith.constant 0 : index
    %c0_14 = arith.constant 0 : index
    %27 = vector.load %arg5[%c0_13, %c0_14] : memref<1x384xf32, #tpu.memory_space<vmem>>, vector<1x384xf32>
    %28 = vector.broadcast %27 : vector<1x384xf32> to vector<128x384xf32>
    %29 = arith.addf %26, %28 : vector<128x384xf32>
    %c0_15 = arith.constant 0 : index
    %c0_16 = arith.constant 0 : index
    %30 = vector.load %arg8[%c0_15, %c0_16] : memref<128x128xf32, #tpu.memory_space<vmem>>, vector<128x128xf32>
    %cst_17 = arith.constant 0.000000e+00 : f32
    %31 = vector.broadcast %cst_17 : f32 to vector<128x128xf32>
    %32 = vector.extract_strided_slice %29 {offsets = [0, 0], sizes = [128, 32], strides = [1, 1]} : vector<128x384xf32> to vector<128x32xf32>
    %cst_18 = arith.constant 0.176776692 : f32
    %33 = vector.broadcast %cst_18 : f32 to vector<128x32xf32>
    %34 = arith.mulf %32, %33 : vector<128x32xf32>
    %35 = arith.truncf %34 : vector<128x32xf32> to vector<128x32xbf16>
    %36 = vector.extract_strided_slice %29 {offsets = [0, 128], sizes = [128, 32], strides = [1, 1]} : vector<128x384xf32> to vector<128x32xf32>
    %37 = arith.truncf %36 : vector<128x32xf32> to vector<128x32xbf16>
    %38 = vector.extract_strided_slice %29 {offsets = [0, 256], sizes = [128, 32], strides = [1, 1]} : vector<128x384xf32> to vector<128x32xf32>
    %39 = arith.truncf %38 : vector<128x32xf32> to vector<128x32xbf16>
    %cst_19 = arith.constant dense<0.000000e+00> : vector<128x128xf32>
    %40 = tpu.matmul %35, %37, %cst_19 {dimension_numbers = #tpu.dot_dimension_numbers<[1], [1], [0], [0], [0, 0, 1, 0], [], []>} : vector<128x32xbf16>, vector<128x32xbf16>, vector<128x128xf32> -> vector<128x128xf32>
    %41 = arith.addf %40, %30 : vector<128x128xf32>
    %cst_20 = arith.constant dense<0xFF800000> : vector<128xf32>
    %42 = vector.multi_reduction <maximumf>, %41, %cst_20 [1] : vector<128x128xf32> to vector<128xf32>
    %43 = vector.shape_cast %42 : vector<128xf32> to vector<128x1xf32>
    %44 = vector.broadcast %43 : vector<128x1xf32> to vector<128x128xf32>
    %45 = arith.subf %41, %44 : vector<128x128xf32>
    %46 = math.exp %45 : vector<128x128xf32>
    %cst_21 = arith.constant dense<0.000000e+00> : vector<128xf32>
    %47 = vector.multi_reduction <add>, %46, %cst_21 [1] : vector<128x128xf32> to vector<128xf32>
    %48 = vector.shape_cast %47 : vector<128xf32> to vector<128x1xf32>
    %49 = tpu.reciprocal %48 {approx = true} : vector<128x1xf32> -> vector<128x1xf32>
    %50 = vector.broadcast %49 : vector<128x1xf32> to vector<128x128xf32>
    %51 = arith.mulf %46, %50 : vector<128x128xf32>
    %52 = arith.truncf %51 : vector<128x128xf32> to vector<128x128xbf16>
    %cst_22 = arith.constant dense<0.000000e+00> : vector<128x32xf32>
    %53 = tpu.matmul %52, %39, %cst_22 {dimension_numbers = #tpu.dot_dimension_numbers<[1], [0], [0], [1], [0, 0, 1, 1], [], []>} : vector<128x128xbf16>, vector<128x32xbf16>, vector<128x32xf32> -> vector<128x32xf32>
    %54 = arith.truncf %53 : vector<128x32xf32> to vector<128x32xbf16>
    %c0_23 = arith.constant 0 : index
    %c0_24 = arith.constant 0 : index
    %55 = vector.load %arg6[%c0_23, %c0_24] : memref<128x128xbf16, #tpu.memory_space<vmem>>, vector<32x128xbf16>
    %cst_25 = arith.constant dense<0.000000e+00> : vector<128x128xf32>
    %56 = tpu.matmul %54, %55, %cst_25 {dimension_numbers = #tpu.dot_dimension_numbers<[1], [0], [0], [1], [0, 0, 1, 1], [], []>} : vector<128x32xbf16>, vector<32x128xbf16>, vector<128x128xf32> -> vector<128x128xf32>
    %57 = arith.addf %31, %56 : vector<128x128xf32>
    %58 = vector.extract_strided_slice %29 {offsets = [0, 32], sizes = [128, 32], strides = [1, 1]} : vector<128x384xf32> to vector<128x32xf32>
    %cst_26 = arith.constant 0.176776692 : f32
    %59 = vector.broadcast %cst_26 : f32 to vector<128x32xf32>
    %60 = arith.mulf %58, %59 : vector<128x32xf32>
    %61 = arith.truncf %60 : vector<128x32xf32> to vector<128x32xbf16>
    %62 = vector.extract_strided_slice %29 {offsets = [0, 160], sizes = [128, 32], strides = [1, 1]} : vector<128x384xf32> to vector<128x32xf32>
    %63 = arith.truncf %62 : vector<128x32xf32> to vector<128x32xbf16>
    %64 = vector.extract_strided_slice %29 {offsets = [0, 288], sizes = [128, 32], strides = [1, 1]} : vector<128x384xf32> to vector<128x32xf32>
    %65 = arith.truncf %64 : vector<128x32xf32> to vector<128x32xbf16>
    %cst_27 = arith.constant dense<0.000000e+00> : vector<128x128xf32>
    %66 = tpu.matmul %61, %63, %cst_27 {dimension_numbers = #tpu.dot_dimension_numbers<[1], [1], [0], [0], [0, 0, 1, 0], [], []>} : vector<128x32xbf16>, vector<128x32xbf16>, vector<128x128xf32> -> vector<128x128xf32>
    %67 = arith.addf %66, %30 : vector<128x128xf32>
    %cst_28 = arith.constant dense<0xFF800000> : vector<128xf32>
    %68 = vector.multi_reduction <maximumf>, %67, %cst_28 [1] : vector<128x128xf32> to vector<128xf32>
    %69 = vector.shape_cast %68 : vector<128xf32> to vector<128x1xf32>
    %70 = vector.broadcast %69 : vector<128x1xf32> to vector<128x128xf32>
    %71 = arith.subf %67, %70 : vector<128x128xf32>
    %72 = math.exp %71 : vector<128x128xf32>
    %cst_29 = arith.constant dense<0.000000e+00> : vector<128xf32>
    %73 = vector.multi_reduction <add>, %72, %cst_29 [1] : vector<128x128xf32> to vector<128xf32>
    %74 = vector.shape_cast %73 : vector<128xf32> to vector<128x1xf32>
    %75 = tpu.reciprocal %74 {approx = true} : vector<128x1xf32> -> vector<128x1xf32>
    %76 = vector.broadcast %75 : vector<128x1xf32> to vector<128x128xf32>
    %77 = arith.mulf %72, %76 : vector<128x128xf32>
    %78 = arith.truncf %77 : vector<128x128xf32> to vector<128x128xbf16>
    %cst_30 = arith.constant dense<0.000000e+00> : vector<128x32xf32>
    %79 = tpu.matmul %78, %65, %cst_30 {dimension_numbers = #tpu.dot_dimension_numbers<[1], [0], [0], [1], [0, 0, 1, 1], [], []>} : vector<128x128xbf16>, vector<128x32xbf16>, vector<128x32xf32> -> vector<128x32xf32>
    %80 = arith.truncf %79 : vector<128x32xf32> to vector<128x32xbf16>
    %c32 = arith.constant 32 : index
    %c0_31 = arith.constant 0 : index
    %81 = vector.load %arg6[%c32, %c0_31] : memref<128x128xbf16, #tpu.memory_space<vmem>>, vector<32x128xbf16>
    %cst_32 = arith.constant dense<0.000000e+00> : vector<128x128xf32>
    %82 = tpu.matmul %80, %81, %cst_32 {dimension_numbers = #tpu.dot_dimension_numbers<[1], [0], [0], [1], [0, 0, 1, 1], [], []>} : vector<128x32xbf16>, vector<32x128xbf16>, vector<128x128xf32> -> vector<128x128xf32>
    %83 = arith.addf %57, %82 : vector<128x128xf32>
    %84 = vector.extract_strided_slice %29 {offsets = [0, 64], sizes = [128, 32], strides = [1, 1]} : vector<128x384xf32> to vector<128x32xf32>
    %cst_33 = arith.constant 0.176776692 : f32
    %85 = vector.broadcast %cst_33 : f32 to vector<128x32xf32>
    %86 = arith.mulf %84, %85 : vector<128x32xf32>
    %87 = arith.truncf %86 : vector<128x32xf32> to vector<128x32xbf16>
    %88 = vector.extract_strided_slice %29 {offsets = [0, 192], sizes = [128, 32], strides = [1, 1]} : vector<128x384xf32> to vector<128x32xf32>
    %89 = arith.truncf %88 : vector<128x32xf32> to vector<128x32xbf16>
    %90 = vector.extract_strided_slice %29 {offsets = [0, 320], sizes = [128, 32], strides = [1, 1]} : vector<128x384xf32> to vector<128x32xf32>
    %91 = arith.truncf %90 : vector<128x32xf32> to vector<128x32xbf16>
    %cst_34 = arith.constant dense<0.000000e+00> : vector<128x128xf32>
    %92 = tpu.matmul %87, %89, %cst_34 {dimension_numbers = #tpu.dot_dimension_numbers<[1], [1], [0], [0], [0, 0, 1, 0], [], []>} : vector<128x32xbf16>, vector<128x32xbf16>, vector<128x128xf32> -> vector<128x128xf32>
    %93 = arith.addf %92, %30 : vector<128x128xf32>
    %cst_35 = arith.constant dense<0xFF800000> : vector<128xf32>
    %94 = vector.multi_reduction <maximumf>, %93, %cst_35 [1] : vector<128x128xf32> to vector<128xf32>
    %95 = vector.shape_cast %94 : vector<128xf32> to vector<128x1xf32>
    %96 = vector.broadcast %95 : vector<128x1xf32> to vector<128x128xf32>
    %97 = arith.subf %93, %96 : vector<128x128xf32>
    %98 = math.exp %97 : vector<128x128xf32>
    %cst_36 = arith.constant dense<0.000000e+00> : vector<128xf32>
    %99 = vector.multi_reduction <add>, %98, %cst_36 [1] : vector<128x128xf32> to vector<128xf32>
    %100 = vector.shape_cast %99 : vector<128xf32> to vector<128x1xf32>
    %101 = tpu.reciprocal %100 {approx = true} : vector<128x1xf32> -> vector<128x1xf32>
    %102 = vector.broadcast %101 : vector<128x1xf32> to vector<128x128xf32>
    %103 = arith.mulf %98, %102 : vector<128x128xf32>
    %104 = arith.truncf %103 : vector<128x128xf32> to vector<128x128xbf16>
    %cst_37 = arith.constant dense<0.000000e+00> : vector<128x32xf32>
    %105 = tpu.matmul %104, %91, %cst_37 {dimension_numbers = #tpu.dot_dimension_numbers<[1], [0], [0], [1], [0, 0, 1, 1], [], []>} : vector<128x128xbf16>, vector<128x32xbf16>, vector<128x32xf32> -> vector<128x32xf32>
    %106 = arith.truncf %105 : vector<128x32xf32> to vector<128x32xbf16>
    %c64 = arith.constant 64 : index
    %c0_38 = arith.constant 0 : index
    %107 = vector.load %arg6[%c64, %c0_38] : memref<128x128xbf16, #tpu.memory_space<vmem>>, vector<32x128xbf16>
    %cst_39 = arith.constant dense<0.000000e+00> : vector<128x128xf32>
    %108 = tpu.matmul %106, %107, %cst_39 {dimension_numbers = #tpu.dot_dimension_numbers<[1], [0], [0], [1], [0, 0, 1, 1], [], []>} : vector<128x32xbf16>, vector<32x128xbf16>, vector<128x128xf32> -> vector<128x128xf32>
    %109 = arith.addf %83, %108 : vector<128x128xf32>
    %110 = vector.extract_strided_slice %29 {offsets = [0, 96], sizes = [128, 32], strides = [1, 1]} : vector<128x384xf32> to vector<128x32xf32>
    %cst_40 = arith.constant 0.176776692 : f32
    %111 = vector.broadcast %cst_40 : f32 to vector<128x32xf32>
    %112 = arith.mulf %110, %111 : vector<128x32xf32>
    %113 = arith.truncf %112 : vector<128x32xf32> to vector<128x32xbf16>
    %114 = vector.extract_strided_slice %29 {offsets = [0, 224], sizes = [128, 32], strides = [1, 1]} : vector<128x384xf32> to vector<128x32xf32>
    %115 = arith.truncf %114 : vector<128x32xf32> to vector<128x32xbf16>
    %116 = vector.extract_strided_slice %29 {offsets = [0, 352], sizes = [128, 32], strides = [1, 1]} : vector<128x384xf32> to vector<128x32xf32>
    %117 = arith.truncf %116 : vector<128x32xf32> to vector<128x32xbf16>
    %cst_41 = arith.constant dense<0.000000e+00> : vector<128x128xf32>
    %118 = tpu.matmul %113, %115, %cst_41 {dimension_numbers = #tpu.dot_dimension_numbers<[1], [1], [0], [0], [0, 0, 1, 0], [], []>} : vector<128x32xbf16>, vector<128x32xbf16>, vector<128x128xf32> -> vector<128x128xf32>
    %119 = arith.addf %118, %30 : vector<128x128xf32>
    %cst_42 = arith.constant dense<0xFF800000> : vector<128xf32>
    %120 = vector.multi_reduction <maximumf>, %119, %cst_42 [1] : vector<128x128xf32> to vector<128xf32>
    %121 = vector.shape_cast %120 : vector<128xf32> to vector<128x1xf32>
    %122 = vector.broadcast %121 : vector<128x1xf32> to vector<128x128xf32>
    %123 = arith.subf %119, %122 : vector<128x128xf32>
    %124 = math.exp %123 : vector<128x128xf32>
    %cst_43 = arith.constant dense<0.000000e+00> : vector<128xf32>
    %125 = vector.multi_reduction <add>, %124, %cst_43 [1] : vector<128x128xf32> to vector<128xf32>
    %126 = vector.shape_cast %125 : vector<128xf32> to vector<128x1xf32>
    %127 = tpu.reciprocal %126 {approx = true} : vector<128x1xf32> -> vector<128x1xf32>
    %128 = vector.broadcast %127 : vector<128x1xf32> to vector<128x128xf32>
    %129 = arith.mulf %124, %128 : vector<128x128xf32>
    %130 = arith.truncf %129 : vector<128x128xf32> to vector<128x128xbf16>
    %cst_44 = arith.constant dense<0.000000e+00> : vector<128x32xf32>
    %131 = tpu.matmul %130, %117, %cst_44 {dimension_numbers = #tpu.dot_dimension_numbers<[1], [0], [0], [1], [0, 0, 1, 1], [], []>} : vector<128x128xbf16>, vector<128x32xbf16>, vector<128x32xf32> -> vector<128x32xf32>
    %132 = arith.truncf %131 : vector<128x32xf32> to vector<128x32xbf16>
    %c96 = arith.constant 96 : index
    %c0_45 = arith.constant 0 : index
    %133 = vector.load %arg6[%c96, %c0_45] : memref<128x128xbf16, #tpu.memory_space<vmem>>, vector<32x128xbf16>
    %cst_46 = arith.constant dense<0.000000e+00> : vector<128x128xf32>
    %134 = tpu.matmul %132, %133, %cst_46 {dimension_numbers = #tpu.dot_dimension_numbers<[1], [0], [0], [1], [0, 0, 1, 1], [], []>} : vector<128x32xbf16>, vector<32x128xbf16>, vector<128x128xf32> -> vector<128x128xf32>
    %135 = arith.addf %109, %134 : vector<128x128xf32>
    %136 = arith.addf %1, %135 : vector<128x128xf32>
    %c0_47 = arith.constant 0 : index
    %c0_48 = arith.constant 0 : index
    %137 = vector.load %arg7[%c0_47, %c0_48] : memref<1x128xf32, #tpu.memory_space<vmem>>, vector<1x128xf32>
    %138 = vector.broadcast %137 : vector<1x128xf32> to vector<128x128xf32>
    %139 = arith.addf %136, %138 : vector<128x128xf32>
    %c0_49 = arith.constant 0 : index
    %c0_50 = arith.constant 0 : index
    %c0_51 = arith.constant 0 : index
    %140 = vector.load %arg9[%c0_49, %c0_50, %c0_51] : memref<1x128x128xf32, #tpu.memory_space<vmem>>, vector<1x128x128xf32>
    %141 = vector.shape_cast %140 : vector<1x128x128xf32> to vector<128x128xf32>
    %142 = vector.shape_cast %139 : vector<128x128xf32> to vector<1x128x128xf32>
    tpu.vector_store %arg9[%c0_49, %c0_50, %c0_51], %142 {strides = array<i32>} : memref<1x128x128xf32, #tpu.memory_space<vmem>>, vector<1x128x128xf32>,
    return
  }
  func.func @transform_0(%arg0: i32) -> (i32, i32, i32) {
    %c0_i32 = arith.constant 0 : i32
    %c0_i32_0 = arith.constant 0 : i32
    %c0_i32_1 = arith.constant 0 : i32
    return %arg0, %c0_i32, %c0_i32_0 : i32, i32, i32
  }
  func.func @transform_1(%arg0: i32) -> (i32, i32) {
    %c0_i32 = arith.constant 0 : i32
    %c0_i32_0 = arith.constant 0 : i32
    %c0_i32_1 = arith.constant 0 : i32
    return %c0_i32, %c0_i32_0 : i32, i32
  }
  func.func @transform_2(%arg0: i32) -> (i32, i32) {
    %c0_i32 = arith.constant 0 : i32
    %c0_i32_0 = arith.constant 0 : i32
    %c0_i32_1 = arith.constant 0 : i32
    return %c0_i32, %c0_i32_0 : i32, i32
  }
  func.func @transform_3(%arg0: i32) -> (i32, i32) {
    %c0_i32 = arith.constant 0 : i32
    %c0_i32_0 = arith.constant 0 : i32
    %c0_i32_1 = arith.constant 0 : i32
    return %c0_i32, %c0_i32_0 : i32, i32
  }
  func.func @transform_4(%arg0: i32) -> (i32, i32) {
    %c0_i32 = arith.constant 0 : i32
    %c0_i32_0 = arith.constant 0 : i32
    %c0_i32_1 = arith.constant 0 : i32
    return %c0_i32, %c0_i32_0 : i32, i32
  }
  func.func @transform_5(%arg0: i32) -> (i32, i32) {
    %c0_i32 = arith.constant 0 : i32
    %c0_i32_0 = arith.constant 0 : i32
    %c0_i32_1 = arith.constant 0 : i32
    return %c0_i32, %c0_i32_0 : i32, i32
  }
  func.func @transform_6(%arg0: i32) -> (i32, i32) {
    %c0_i32 = arith.constant 0 : i32
    %c0_i32_0 = arith.constant 0 : i32
    %c0_i32_1 = arith.constant 0 : i32
    return %c0_i32, %c0_i32_0 : i32, i32
  }
  func.func @transform_7(%arg0: i32) -> (i32, i32) {
    %c0_i32 = arith.constant 0 : i32
    %c0_i32_0 = arith.constant 0 : i32
    %c0_i32_1 = arith.constant 0 : i32
    return %c0_i32, %c0_i32_0 : i32, i32
  }
  func.func @transform_8(%arg0: i32) -> (i32, i32, i32) {
    %c0_i32 = arith.constant 0 : i32
    %c0_i32_0 = arith.constant 0 : i32
    %c0_i32_1 = arith.constant 0 : i32
    return %arg0, %c0_i32, %c0_i32_0 : i32, i32, i32
  }
}

module attributes {stable_mosaic.version = 11 : i64} {
  func.func @kernel(%arg0: i32, %arg1: memref<1x128x128xf32, #tpu.memory_space<vmem>>, %arg2: memref<1x128xf32, #tpu.memory_space<vmem>>, %arg3: memref<1x128xf32, #tpu.memory_space<vmem>>, %arg4: memref<128x512xbf16, #tpu.memory_space<vmem>>, %arg5: memref<1x512xf32, #tpu.memory_space<vmem>>, %arg6: memref<512x128xbf16, #tpu.memory_space<vmem>>, %arg7: memref<1x128xf32, #tpu.memory_space<vmem>>, %arg8: memref<1x128x128xf32, #tpu.memory_space<vmem>>) attributes {dimension_semantics = [#tpu.dimension_semantics<parallel>], iteration_bounds = array<i64: 2>, scalar_prefetch = 0 : i64, scratch_operands = 0 : i64, tpu.core_type = #tpu.core_type<tc>, window_params = [{transform_indices = @transform_0, window_bounds = array<i64: 1, 128, 128>}, {pipeline_mode = #tpu.pipeline_mode<synchronous>, transform_indices = @transform_1, window_bounds = array<i64: 1, 128>}, {pipeline_mode = #tpu.pipeline_mode<synchronous>, transform_indices = @transform_2, window_bounds = array<i64: 1, 128>}, {pipeline_mode = #tpu.pipeline_mode<synchronous>, transform_indices = @transform_3, window_bounds = array<i64: 128, 512>}, {pipeline_mode = #tpu.pipeline_mode<synchronous>, transform_indices = @transform_4, window_bounds = array<i64: 1, 512>}, {pipeline_mode = #tpu.pipeline_mode<synchronous>, transform_indices = @transform_5, window_bounds = array<i64: 512, 128>}, {pipeline_mode = #tpu.pipeline_mode<synchronous>, transform_indices = @transform_6, window_bounds = array<i64: 1, 128>}, {transform_indices = @transform_7, window_bounds = array<i64: 1, 128, 128>}]} {
    %c0 = arith.constant 0 : index
    %c0_0 = arith.constant 0 : index
    %c0_1 = arith.constant 0 : index
    %0 = vector.load %arg1[%c0, %c0_0, %c0_1] : memref<1x128x128xf32, #tpu.memory_space<vmem>>, vector<1x128x128xf32>
    %1 = vector.shape_cast %0 : vector<1x128x128xf32> to vector<128x128xf32>
    %c0_2 = arith.constant 0 : index
    %c0_3 = arith.constant 0 : index
    %2 = vector.load %arg2[%c0_2, %c0_3] : memref<1x128xf32, #tpu.memory_space<vmem>>, vector<1x128xf32>
    %c0_4 = arith.constant 0 : index
    %c0_5 = arith.constant 0 : index
    %3 = vector.load %arg3[%c0_4, %c0_5] : memref<1x128xf32, #tpu.memory_space<vmem>>, vector<1x128xf32>
    %cst = arith.constant dense<0.000000e+00> : vector<128xf32>
    %4 = vector.multi_reduction <add>, %1, %cst [1] : vector<128x128xf32> to vector<128xf32>
    %5 = vector.shape_cast %4 : vector<128xf32> to vector<128x1xf32>
    %cst_6 = arith.constant 1.280000e+02 : f32
    %6 = vector.broadcast %cst_6 : f32 to vector<128x1xf32>
    %7 = arith.divf %5, %6 : vector<128x1xf32>
    %8 = vector.broadcast %7 : vector<128x1xf32> to vector<128x128xf32>
    %9 = arith.subf %1, %8 : vector<128x128xf32>
    %10 = arith.mulf %9, %9 : vector<128x128xf32>
    %cst_7 = arith.constant dense<0.000000e+00> : vector<128xf32>
    %11 = vector.multi_reduction <add>, %10, %cst_7 [1] : vector<128x128xf32> to vector<128xf32>
    %12 = vector.shape_cast %11 : vector<128xf32> to vector<128x1xf32>
    %cst_8 = arith.constant 1.280000e+02 : f32
    %13 = vector.broadcast %cst_8 : f32 to vector<128x1xf32>
    %14 = arith.divf %12, %13 : vector<128x1xf32>
    %cst_9 = arith.constant 9.99999974E-6 : f32
    %15 = vector.broadcast %cst_9 : f32 to vector<128x1xf32>
    %16 = arith.addf %14, %15 : vector<128x1xf32>
    %17 = math.rsqrt %16 : vector<128x1xf32>
    %18 = vector.broadcast %17 : vector<128x1xf32> to vector<128x128xf32>
    %19 = arith.mulf %9, %18 : vector<128x128xf32>
    %20 = vector.broadcast %2 : vector<1x128xf32> to vector<128x128xf32>
    %21 = arith.mulf %19, %20 : vector<128x128xf32>
    %22 = vector.broadcast %3 : vector<1x128xf32> to vector<128x128xf32>
    %23 = arith.addf %21, %22 : vector<128x128xf32>
    %24 = arith.truncf %23 : vector<128x128xf32> to vector<128x128xbf16>
    %c0_10 = arith.constant 0 : index
    %c0_11 = arith.constant 0 : index
    %25 = vector.load %arg4[%c0_10, %c0_11] : memref<128x512xbf16, #tpu.memory_space<vmem>>, vector<128x512xbf16>
    %cst_12 = arith.constant dense<0.000000e+00> : vector<128x512xf32>
    %26 = tpu.matmul %24, %25, %cst_12 {dimension_numbers = #tpu.dot_dimension_numbers<[1], [0], [0], [1], [0, 0, 1, 1], [], []>} : vector<128x128xbf16>, vector<128x512xbf16>, vector<128x512xf32> -> vector<128x512xf32>
    %c0_13 = arith.constant 0 : index
    %c0_14 = arith.constant 0 : index
    %27 = vector.load %arg5[%c0_13, %c0_14] : memref<1x512xf32, #tpu.memory_space<vmem>>, vector<1x512xf32>
    %28 = vector.broadcast %27 : vector<1x512xf32> to vector<128x512xf32>
    %29 = arith.addf %26, %28 : vector<128x512xf32>
    %cst_15 = arith.constant 5.000000e-01 : f32
    %30 = vector.broadcast %cst_15 : f32 to vector<128x512xf32>
    %31 = arith.mulf %30, %29 : vector<128x512xf32>
    %cst_16 = arith.constant 4.471500e-02 : f32
    %32 = vector.broadcast %cst_16 : f32 to vector<128x512xf32>
    %33 = arith.mulf %32, %29 : vector<128x512xf32>
    %34 = arith.mulf %33, %29 : vector<128x512xf32>
    %35 = arith.mulf %34, %29 : vector<128x512xf32>
    %36 = arith.addf %29, %35 : vector<128x512xf32>
    %cst_17 = arith.constant 0.797884583 : f32
    %37 = vector.broadcast %cst_17 : f32 to vector<128x512xf32>
    %38 = arith.mulf %37, %36 : vector<128x512xf32>
    %39 = math.tanh %38 : vector<128x512xf32>
    %cst_18 = arith.constant 1.000000e+00 : f32
    %40 = vector.broadcast %cst_18 : f32 to vector<128x512xf32>
    %41 = arith.addf %40, %39 : vector<128x512xf32>
    %42 = arith.mulf %31, %41 : vector<128x512xf32>
    %43 = arith.truncf %42 : vector<128x512xf32> to vector<128x512xbf16>
    %c0_19 = arith.constant 0 : index
    %c0_20 = arith.constant 0 : index
    %44 = vector.load %arg6[%c0_19, %c0_20] : memref<512x128xbf16, #tpu.memory_space<vmem>>, vector<512x128xbf16>
    %cst_21 = arith.constant dense<0.000000e+00> : vector<128x128xf32>
    %45 = tpu.matmul %43, %44, %cst_21 {dimension_numbers = #tpu.dot_dimension_numbers<[1], [0], [0], [1], [0, 0, 1, 1], [], []>} : vector<128x512xbf16>, vector<512x128xbf16>, vector<128x128xf32> -> vector<128x128xf32>
    %c0_22 = arith.constant 0 : index
    %c0_23 = arith.constant 0 : index
    %46 = vector.load %arg7[%c0_22, %c0_23] : memref<1x128xf32, #tpu.memory_space<vmem>>, vector<1x128xf32>
    %47 = vector.broadcast %46 : vector<1x128xf32> to vector<128x128xf32>
    %48 = arith.addf %45, %47 : vector<128x128xf32>
    %49 = arith.addf %1, %48 : vector<128x128xf32>
    %c0_24 = arith.constant 0 : index
    %c0_25 = arith.constant 0 : index
    %c0_26 = arith.constant 0 : index
    %50 = vector.load %arg8[%c0_24, %c0_25, %c0_26] : memref<1x128x128xf32, #tpu.memory_space<vmem>>, vector<1x128x128xf32>
    %51 = vector.shape_cast %50 : vector<1x128x128xf32> to vector<128x128xf32>
    %52 = vector.shape_cast %49 : vector<128x128xf32> to vector<1x128x128xf32>
    tpu.vector_store %arg8[%c0_24, %c0_25, %c0_26], %52 {strides = array<i32>} : memref<1x128x128xf32, #tpu.memory_space<vmem>>, vector<1x128x128xf32>,
    return
  }
  func.func @transform_0(%arg0: i32) -> (i32, i32, i32) {
    %c0_i32 = arith.constant 0 : i32
    %c0_i32_0 = arith.constant 0 : i32
    %c0_i32_1 = arith.constant 0 : i32
    return %arg0, %c0_i32, %c0_i32_0 : i32, i32, i32
  }
  func.func @transform_1(%arg0: i32) -> (i32, i32) {
    %c0_i32 = arith.constant 0 : i32
    %c0_i32_0 = arith.constant 0 : i32
    %c0_i32_1 = arith.constant 0 : i32
    return %c0_i32, %c0_i32_0 : i32, i32
  }
  func.func @transform_2(%arg0: i32) -> (i32, i32) {
    %c0_i32 = arith.constant 0 : i32
    %c0_i32_0 = arith.constant 0 : i32
    %c0_i32_1 = arith.constant 0 : i32
    return %c0_i32, %c0_i32_0 : i32, i32
  }
  func.func @transform_3(%arg0: i32) -> (i32, i32) {
    %c0_i32 = arith.constant 0 : i32
    %c0_i32_0 = arith.constant 0 : i32
    %c0_i32_1 = arith.constant 0 : i32
    return %c0_i32, %c0_i32_0 : i32, i32
  }
  func.func @transform_4(%arg0: i32) -> (i32, i32) {
    %c0_i32 = arith.constant 0 : i32
    %c0_i32_0 = arith.constant 0 : i32
    %c0_i32_1 = arith.constant 0 : i32
    return %c0_i32, %c0_i32_0 : i32, i32
  }
  func.func @transform_5(%arg0: i32) -> (i32, i32) {
    %c0_i32 = arith.constant 0 : i32
    %c0_i32_0 = arith.constant 0 : i32
    %c0_i32_1 = arith.constant 0 : i32
    return %c0_i32, %c0_i32_0 : i32, i32
  }
  func.func @transform_6(%arg0: i32) -> (i32, i32) {
    %c0_i32 = arith.constant 0 : i32
    %c0_i32_0 = arith.constant 0 : i32
    %c0_i32_1 = arith.constant 0 : i32
    return %c0_i32, %c0_i32_0 : i32, i32
  }
  func.func @transform_7(%arg0: i32) -> (i32, i32, i32) {
    %c0_i32 = arith.constant 0 : i32
    %c0_i32_0 = arith.constant 0 : i32
    %c0_i32_1 = arith.constant 0 : i32
    return %arg0, %c0_i32, %c0_i32_0 : i32, i32, i32
  }
}

module attributes {stable_mosaic.version = 11 : i64} {
  func.func @kernel(%arg0: i32, %arg1: i32, %arg2: memref<128x128xf32, #tpu.memory_space<vmem>>, %arg3: memref<1x128xf32, #tpu.memory_space<vmem>>, %arg4: memref<1x128xf32, #tpu.memory_space<vmem>>, %arg5: memref<128x256xbf16, #tpu.memory_space<vmem>>, %arg6: memref<128x256xf32, #tpu.memory_space<vmem>>, %arg7: memref<128x128xbf16, #tpu.memory_space<vmem>>) attributes {dimension_semantics = [#tpu.dimension_semantics<parallel>, #tpu.dimension_semantics<arbitrary>], iteration_bounds = array<i64: 2, 1>, scalar_prefetch = 0 : i64, scratch_operands = 1 : i64, tpu.core_type = #tpu.core_type<tc>, window_params = [{transform_indices = @transform_0, window_bounds = array<i64: 128, 128>}, {pipeline_mode = #tpu.pipeline_mode<synchronous>, transform_indices = @transform_1, window_bounds = array<i64: 1, 128>}, {pipeline_mode = #tpu.pipeline_mode<synchronous>, transform_indices = @transform_2, window_bounds = array<i64: 1, 128>}, {transform_indices = @transform_3, window_bounds = array<i64: 128, 256>}, {transform_indices = @transform_4, window_bounds = array<i64: 128, 256>}]} {
    %c0_i32 = arith.constant 0 : i32
    %0 = arith.cmpi eq, %arg1, %c0_i32 : i32
    %1 = arith.extui %0 : i1 to i32
    %c0_i32_0 = arith.constant 0 : i32
    %2 = arith.cmpi ne, %1, %c0_i32_0 : i32
    scf.if %2 {
      %c0_6 = arith.constant 0 : index
      %c0_7 = arith.constant 0 : index
      %7 = vector.load %arg2[%c0_6, %c0_7] : memref<128x128xf32, #tpu.memory_space<vmem>>, vector<128x128xf32>
      %c0_8 = arith.constant 0 : index
      %c0_9 = arith.constant 0 : index
      %8 = vector.load %arg3[%c0_8, %c0_9] : memref<1x128xf32, #tpu.memory_space<vmem>>, vector<1x128xf32>
      %c0_10 = arith.constant 0 : index
      %c0_11 = arith.constant 0 : index
      %9 = vector.load %arg4[%c0_10, %c0_11] : memref<1x128xf32, #tpu.memory_space<vmem>>, vector<1x128xf32>
      %cst_12 = arith.constant dense<0.000000e+00> : vector<128xf32>
      %10 = vector.multi_reduction <add>, %7, %cst_12 [1] : vector<128x128xf32> to vector<128xf32>
      %11 = vector.shape_cast %10 : vector<128xf32> to vector<128x1xf32>
      %cst_13 = arith.constant 1.280000e+02 : f32
      %12 = vector.broadcast %cst_13 : f32 to vector<128x1xf32>
      %13 = arith.divf %11, %12 : vector<128x1xf32>
      %14 = vector.broadcast %13 : vector<128x1xf32> to vector<128x128xf32>
      %15 = arith.subf %7, %14 : vector<128x128xf32>
      %16 = arith.mulf %15, %15 : vector<128x128xf32>
      %cst_14 = arith.constant dense<0.000000e+00> : vector<128xf32>
      %17 = vector.multi_reduction <add>, %16, %cst_14 [1] : vector<128x128xf32> to vector<128xf32>
      %18 = vector.shape_cast %17 : vector<128xf32> to vector<128x1xf32>
      %cst_15 = arith.constant 1.280000e+02 : f32
      %19 = vector.broadcast %cst_15 : f32 to vector<128x1xf32>
      %20 = arith.divf %18, %19 : vector<128x1xf32>
      %cst_16 = arith.constant 9.99999974E-6 : f32
      %21 = vector.broadcast %cst_16 : f32 to vector<128x1xf32>
      %22 = arith.addf %20, %21 : vector<128x1xf32>
      %23 = math.rsqrt %22 : vector<128x1xf32>
      %24 = vector.broadcast %23 : vector<128x1xf32> to vector<128x128xf32>
      %25 = arith.mulf %15, %24 : vector<128x128xf32>
      %26 = vector.broadcast %8 : vector<1x128xf32> to vector<128x128xf32>
      %27 = arith.mulf %25, %26 : vector<128x128xf32>
      %28 = vector.broadcast %9 : vector<1x128xf32> to vector<128x128xf32>
      %29 = arith.addf %27, %28 : vector<128x128xf32>
      %30 = arith.truncf %29 : vector<128x128xf32> to vector<128x128xbf16>
      %c0_17 = arith.constant 0 : index
      %c0_18 = arith.constant 0 : index
      %31 = vector.load %arg7[%c0_17, %c0_18] : memref<128x128xbf16, #tpu.memory_space<vmem>>, vector<128x128xbf16>
      tpu.vector_store %arg7[%c0_17, %c0_18], %30 {strides = array<i32>} : memref<128x128xbf16, #tpu.memory_space<vmem>>, vector<128x128xbf16>,
    } else {
    }
    %c0 = arith.constant 0 : index
    %c0_1 = arith.constant 0 : index
    %3 = vector.load %arg7[%c0, %c0_1] : memref<128x128xbf16, #tpu.memory_space<vmem>>, vector<128x128xbf16>
    %c0_2 = arith.constant 0 : index
    %c0_3 = arith.constant 0 : index
    %4 = vector.load %arg5[%c0_2, %c0_3] : memref<128x256xbf16, #tpu.memory_space<vmem>>, vector<128x256xbf16>
    %cst = arith.constant dense<0.000000e+00> : vector<128x256xf32>
    %5 = tpu.matmul %3, %4, %cst {dimension_numbers = #tpu.dot_dimension_numbers<[1], [0], [0], [1], [0, 0, 1, 1], [], []>} : vector<128x128xbf16>, vector<128x256xbf16>, vector<128x256xf32> -> vector<128x256xf32>
    %c0_4 = arith.constant 0 : index
    %c0_5 = arith.constant 0 : index
    %6 = vector.load %arg6[%c0_4, %c0_5] : memref<128x256xf32, #tpu.memory_space<vmem>>, vector<128x256xf32>
    tpu.vector_store %arg6[%c0_4, %c0_5], %5 {strides = array<i32>} : memref<128x256xf32, #tpu.memory_space<vmem>>, vector<128x256xf32>,
    return
  }
  func.func @transform_0(%arg0: i32, %arg1: i32) -> (i32, i32) {
    %c0_i32 = arith.constant 0 : i32
    %c0_i32_0 = arith.constant 0 : i32
    return %arg0, %c0_i32 : i32, i32
  }
  func.func @transform_1(%arg0: i32, %arg1: i32) -> (i32, i32) {
    %c0_i32 = arith.constant 0 : i32
    %c0_i32_0 = arith.constant 0 : i32
    %c0_i32_1 = arith.constant 0 : i32
    return %c0_i32, %c0_i32_0 : i32, i32
  }
  func.func @transform_2(%arg0: i32, %arg1: i32) -> (i32, i32) {
    %c0_i32 = arith.constant 0 : i32
    %c0_i32_0 = arith.constant 0 : i32
    %c0_i32_1 = arith.constant 0 : i32
    return %c0_i32, %c0_i32_0 : i32, i32
  }
  func.func @transform_3(%arg0: i32, %arg1: i32) -> (i32, i32) {
    %c0_i32 = arith.constant 0 : i32
    %c0_i32_0 = arith.constant 0 : i32
    return %c0_i32, %arg1 : i32, i32
  }
  func.func @transform_4(%arg0: i32, %arg1: i32) -> (i32, i32) {
    %c0_i32 = arith.constant 0 : i32
    return %arg0, %arg1 : i32, i32
  }
}

</mosaic_0001>

<bundles_post_ra>
// kernel: gpt_forward.9
= control target key start
LH: loop header
LB: loop body
LE: loop exit
PB: predicated region body
PF: predicated region fallthrough
CT: control target
= control target key end

     0   :  { %9 = vsyncpa [#allocation4], 0  ;;  %s1687_s0 = inlined_call_operand.vmem [shape: f32[256,128], index: 0, kind: input, shape index: {}]   ;;  %s1688_s1 = inlined_call_operand.vmem [shape: f32[1,128], index: 1, kind: input, shape index: {}]   ;;  %s1689_s2 = inlined_call_operand.vmem [shape: f32[1,128], index: 2, kind: input, shape index: {}]   ;;  %s1690_s3 = inlined_call_operand.vmem [shape: bf16[128,256], index: 3, kind: input, shape index: {}]   ;;  %s1691_s4 = inlined_call_operand.hbm [shape: f32[256,256], index: 4, kind: output, shape index: {}]  }
   0x1   :  { %11 = vsyncpa [#allocation4 + $0x1], 0  ;;  %s1337_s15 = smov 0   ;;  %s1339_s16 = smov 0  }
   0x2   :  { %s1341_s17 = smov 0   ;;  %s1343_s18 = smov 0  }
   0x3   :  { %s1345_s19 = smov 0   ;;  %s1347_s20 = smov 0  }
   0x4 LB: > { %s970_s21 = sadd.s32 4294967295, %s1306_s20   ;;  %s971_s22 = sadd.s32 4294967294, %s1306_s20   ;;  %s1306_s20 = sphi %s1347_s20, %s17_s20   ;;  %s1302_s19 = sphi %s1345_s19, %s1698_s19   ;;  %s1298_s18 = sphi %s1343_s18, %s1697_s18   ;;  %s1294_s17 = sphi %s1341_s17, %s1696_s17   ;;  %s1290_s16 = sphi %s1339_s16, %s1695_s16   ;;  %s1286_s15 = sphi %s1337_s15, %s1694_s15  }
   0x5   : > { %s29_s23 = sadd.s32 1, %s1302_s19  ;;  %s132_s24 = sadd.s32 1, %s1294_s17 }
   0x6   : > { %p31_p0 = scmp.ge.s32.totalorder %s29_s23, 2  ;;  %p142_p1 = scmp.ne.s32.totalorder %s1294_s17, %s1290_s16 }
   0x7   : > { %p143_p2 = scmp.eq.s32.totalorder %s970_s21, 1  ;;  %p148_p3 = scmp.ne.s32.totalorder %s1290_s16, %s1286_s15 }
   0x8   : > { %s1700_s23 = smov (%p31_p0, %s29_s23), 0  ;;  %p149_p5 = scmp.eq.s32.totalorder %s971_s22, 1 }
   0x9   : > { %p1377_p4 = por %p143_p2, %p142_p1  ;;  %s127_s26 = ssub.s32 %s1302_s19, %s1700_s23 }
   0xa   : > { %p975_p6 = scmp.ge.s32.totalorder %s1306_s20, 1  ;;  %p130_p7 = scmp.eq.s32.totalorder %s127_s26, 0 }
   0xb   : > { %p1384_p8 = por %p149_p5, %p148_p3  ;;  %p191_p9 = scmp.lt.s32.totalorder %s1306_s20, 3 }
   0xc   : > { %s1390_s28 = scalar_select %p130_p7, %s1294_s17, %s132_s24  }
   0xd   : > { %p192_p10 = pnand %p975_p6, %p191_p9 }
   0xe   : > { %s977_s29 = sshll.u32 (!%p192_p10), %s1298_s18, 4  ;;  %s219_s12 = sand.u32 (!%p192_p10), 1, %s1290_s16  }
   0xf   : > { %195 = sbr.rel (%p192_p10) target bundleno = 585 (0x249), region = 36  ;;  %p223_p11 = scmp.lt.s32.totalorder (!%p192_p10), %s977_s29, 31 }
  0x10   : > { %s976_s13 = sshll.u32 (!%p192_p10), %s219_s12, 8  ;;  %s1044_s21 = sshll.u32 (!%p192_p10), %s1298_s18, 12 }
  0x11   : > { %s1597_s14 = scalar_lea.vmem (!%p192_p10), [#allocation3], %s976_s13  ;;  %s1642_s18 = scalar_lea.sflag (!%p192_p10), [#allocation4], %s219_s12 }
  0x12   : > { %s882_s22 = sshll.u32 (!%p192_p10), %s1597_s14, 4  ;;  %s1309_s5 = smov (!%p192_p10), [#allocation3]   ;;  %s1636_s22 = int_to_ptr.vmem [resolvable:$true] %s882_s22 }
  0x13   : > { %s1234_s6 = sshll.u32 (!%p192_p10), %s1309_s5, 4  ;;  %s1235_s6 = int_to_ptr.vmem [resolvable:$false] %s1234_s6 }
  0x14   : > { %s1702_s29 = smov (!%p223_p11, %s977_s29), 31  ;;  %v1166_v62 = vld [vmem:[%s1690_s3 + $0x74] ss:$8 sps:$4 sm:$0xff]   ;;  %p1237_p1 = scmp.lt.s32.totalorder %s1636_s22, %s1235_s6 }
  0x15   : > { %s978_s30 = sshll.u32 %s1702_s29, 3  ;;  %720 = vmatprep.subr.bf16.mxu0 %v1166_v62  ;;  %1092 = vmatprep.subr.bf16.mxu1 %v1166_v62  ;;  %s1634_s29 = scalar_lea.hbm %s1691_s4, %s1044_s21 }
  0x16   : > { %s226_s7 = scalar_lea.vmem %s1687_s0, %s978_s30  ;;  %s1230_s30 = scalar_lea.vmem %s1636_s22, 4096 }
  0x17   : > { %v241_v0 = vld [vmem:[%s226_s7] sm:$0xff]  ;;  %v242_v2 = vld [vmem:[%s226_s7 + $0x8] sm:$0xff]  ;;  %v243_v4 = vld [vmem:[%s226_s7 + $0x10] sm:$0xff]  ;;  %p1231_p12 = scmp.ne.s32.totalorder %s1636_s22, %s1230_s30 }
  0x18   : > { %v249_v1 = vld [vmem:[%s226_s7 + $0x40] sm:$0xff]  ;;  %259 = vadd.xlane.f32.xlu0 %v241_v0  ;;  %v250_v3 = vld [vmem:[%s226_s7 + $0x48] sm:$0xff]  ;;  %v244_v5 = vld [vmem:[%s226_s7 + $0x18] sm:$0xff] }
  0x19   : > { %275 = vadd.xlane.f32.xlu1 %v249_v1  ;;  %v251_v6 = vld [vmem:[%s226_s7 + $0x50] sm:$0xff]  ;;  %v252_v7 = vld [vmem:[%s226_s7 + $0x58] sm:$0xff]  ;;  %v245_v8 = vld [vmem:[%s226_s7 + $0x20] sm:$0xff]  ;;  %p1232_p13 = pnand %p1231_p12, %p1377_p4 }
  0x1a   : > { %v246_v9 = vld [vmem:[%s226_s7 + $0x28] sm:$0xff]  ;;  %v253_v10 = vld [vmem:[%s226_s7 + $0x60] sm:$0xff]  ;;  %v1399_v12 = vld [vmem:[%s226_s7 + $0x30] sm:$0xff] }
  0x1b   : > { %v1396_v11 = vld [vmem:[%s226_s7 + $0x68] sm:$0xff]  ;;  %v1401_v13 = vld [vmem:[%s226_s7 + $0x38] sm:$0xff]  ;;  %v1405_v14 = vld [vmem:[%s226_s7 + $0x70] sm:$0xff]  ;;  %p1233_p0 = pneg %p1232_p13 }
  0x1c   : > { %261 = vadd.xlane.f32.xlu0 %v242_v2  ;;  %v1407_v15 = vld [vmem:[%s226_s7 + $0x78] sm:$0xff]  ;;  %s1236_s7 = scalar_lea.vmem %s1235_s6, 8192 }
  0x1d   : > { %277 = vadd.xlane.f32.xlu1 %v250_v3  ;;  %p1238_p2 = scmp.lt.s32.totalorder %s1236_s7, %s1230_s30 }
  0x1f   : > { %p1239_p3 = por %p1238_p2, %p1237_p1 }
  0x20   : > { %263 = vadd.xlane.f32.xlu0 %v243_v4 }
  0x21   : > { %265 = vadd.xlane.f32.xlu1 %v244_v5  ;;  %p1240_p5 = pnand %p1239_p3, %p1233_p0 }
  0x24   : > { %279 = vadd.xlane.f32.xlu0 %v251_v6 }
  0x25   : > { %281 = vadd.xlane.f32.xlu1 %v252_v7 }
  0x28   : > { %267 = vadd.xlane.f32.xlu0 %v245_v8 }
  0x29   : > { %269 = vadd.xlane.f32.xlu1 %v246_v9 }
  0x2c   : > { %283 = vadd.xlane.f32.xlu0 %v253_v10 }
  0x2d   : > { %285 = vadd.xlane.f32.xlu1 %v1396_v11 }
  0x30   : > { %271 = vadd.xlane.f32.xlu0 %v1399_v12 }
  0x31   : > { %273 = vadd.xlane.f32.xlu1 %v1401_v13 }
  0x34   : > { %287 = vadd.xlane.f32.xlu0 %v1405_v14 }
  0x35   : > { %289 = vadd.xlane.f32.xlu1 %v1407_v15 }
  0xa1   : > { %v260_v16 = vpop.xlane.xlu0 %259 }
  0xa2   : > { %v276_v17 = vpop.xlane.xlu1 %275  ;;  %v292_v18 = vmul.f32 0.0078125, %v260_v16 }
  0xa3   : > { %v300_v19 = vmul.f32 0.0078125, %v276_v17 }
  0xa4   : > { %v1411_v20 = vsub.f32 %v241_v0, %v292_v18 }
  0xa5   : > { %v1413_v21 = vsub.f32 %v249_v1, %v300_v19  ;;  %v262_v22 = vpop.xlane.xlu0 %261  ;;  %v1168_v1 = vld [vmem:[%s1690_s3 + $0x70] ss:$8 sps:$4 sm:$0xff]  }
  0xa6   : > { %v278_v23 = vpop.xlane.xlu1 %277  ;;  %v293_v24 = vmul.f32 0.0078125, %v262_v22  ;;  %v324_v25 = vmul.f32 %v1411_v20, %v1411_v20  ;;  %721 = vmatpush1.bf16.msra.mxu0 %v1168_v1  ;;  %1100 = vmatpush1.bf16.msra.mxu1 %v1168_v1  ;;  %v1172_v22 = vld [vmem:[%s1690_s3 + $0x54] ss:$8 sps:$4 sm:$0xff]  }
  0xa7   : > { %v301_v26 = vmul.f32 0.0078125, %v278_v23  ;;  %v332_v29 = vmul.f32 %v1413_v21, %v1413_v21  ;;  %v1174_v23 = vld [vmem:[%s1690_s3 + $0x50] ss:$8 sps:$4 sm:$0xff]  }
  0xa8   : > { %v1417_v27 = vsub.f32 %v242_v2, %v293_v24  ;;  %340 = vadd.xlane.f32.xlu0 %v324_v25  ;;  %v1175_v24 = vld [vmem:[%s1690_s3 + $0x44] ss:$8 sps:$4 sm:$0xff]   ;;  %v1177_v25 = vld [vmem:[%s1690_s3 + $0x40] ss:$8 sps:$4 sm:$0xff]  }
  0xa9   : > { %v1419_v28 = vsub.f32 %v250_v3, %v301_v26  ;;  %v264_v30 = vpop.xlane.xlu0 %263  ;;  %v1178_v26 = vld [vmem:[%s1690_s3 + $0x34] ss:$8 sps:$4 sm:$0xff]  }
  0xaa   : > { %v266_v31 = vpop.xlane.xlu1 %265  ;;  %v294_v32 = vmul.f32 0.0078125, %v264_v30  ;;  %v325_v33 = vmul.f32 %v1417_v27, %v1417_v27  ;;  %v1181_v30 = vld [vmem:[%s1690_s3 + $0x24] ss:$8 sps:$4 sm:$0xff]  }
  0xab   : > { %v295_v34 = vmul.f32 0.0078125, %v266_v31  ;;  %v333_v37 = vmul.f32 %v1419_v28, %v1419_v28  ;;  %v1183_v31 = vld [vmem:[%s1690_s3 + $0x20] ss:$8 sps:$4 sm:$0xff]  }
  0xac   : > { %v1425_v35 = vsub.f32 %v243_v4, %v294_v32  ;;  %356 = vadd.xlane.f32.xlu0 %v332_v29  ;;  %342 = vadd.xlane.f32.xlu1 %v325_v33  ;;  %v1180_v29 = vld [vmem:[%s1690_s3 + $0x30] ss:$8 sps:$4 sm:$0xff]   ;;  %v1184_v32 = vld [vmem:[%s1690_s3 + $0x14] ss:$8 sps:$4 sm:$0xff]  }
  0xad   : > { %v1427_v36 = vsub.f32 %v244_v5, %v295_v34  ;;  %v280_v38 = vpop.xlane.xlu0 %279  ;;  %v1186_v33 = vld [vmem:[%s1690_s3 + $0x10] ss:$8 sps:$4 sm:$0xff]   ;;  %v1187_v34 = vld [vmem:[%s1690_s3 + $0x4] ss:$8 sps:$4 sm:$0xff]  }
  0xae   : > { %v282_v39 = vpop.xlane.xlu1 %281  ;;  %v302_v40 = vmul.f32 0.0078125, %v280_v38  ;;  %v326_v41 = vmul.f32 %v1425_v35, %v1425_v35  ;;  %v1308_v38 = vmov 0  }
  0xaf   : > { %v303_v42 = vmul.f32 0.0078125, %v282_v39  ;;  %v327_v45 = vmul.f32 %v1427_v36, %v1427_v36  ;;  %752 = vmatprep.mubr.bf16.mxu0 %v1308_v38  ;;  %792 = vmatprep.mubr.bf16.mxu1 %v1308_v38 }
  0xb0   : > { %v1433_v43 = vsub.f32 %v251_v6, %v302_v40  ;;  %358 = vadd.xlane.f32.xlu1 %v333_v37  ;;  %344 = vadd.xlane.f32.xlu0 %v326_v41  ;;  %v1189_v37 = vld [vmem:[%s1690_s3] ss:$8 sps:$4 sm:$0xff]  }
  0xb1   : > { %v1435_v44 = vsub.f32 %v252_v7, %v303_v42  ;;  %v268_v46 = vpop.xlane.xlu0 %267 }
  0xb2   : > { %v270_v47 = vpop.xlane.xlu1 %269  ;;  %v296_v48 = vmul.f32 0.0078125, %v268_v46  ;;  %v334_v49 = vmul.f32 %v1433_v43, %v1433_v43 }
  0xb3   : > { %v297_v50 = vmul.f32 0.0078125, %v270_v47  ;;  %v335_v53 = vmul.f32 %v1435_v44, %v1435_v44 }
  0xb4   : > { %v1441_v51 = vsub.f32 %v245_v8, %v296_v48  ;;  %346 = vadd.xlane.f32.xlu1 %v327_v45  ;;  %360 = vadd.xlane.f32.xlu0 %v334_v49  ;;  %v1169_v8 = vld [vmem:[%s1690_s3 + $0x64] ss:$8 sps:$4 sm:$0xff]  }
  0xb5   : > { %v1443_v52 = vsub.f32 %v246_v9, %v297_v50  ;;  %v284_v54 = vpop.xlane.xlu0 %283  ;;  %722 = vmatprep.subr.bf16.mxu0 %v1169_v8  ;;  %1093 = vmatprep.subr.bf16.mxu1 %v1169_v8 }
  0xb6   : > { %v286_v55 = vpop.xlane.xlu1 %285  ;;  %v304_v56 = vmul.f32 0.0078125, %v284_v54  ;;  %v328_v57 = vmul.f32 %v1441_v51, %v1441_v51 }
  0xb7   : > { %v305_v58 = vmul.f32 0.0078125, %v286_v55  ;;  %v329_v61 = vmul.f32 %v1443_v52, %v1443_v52 }
  0xb8   : > { %v1449_v59 = vsub.f32 %v253_v10, %v304_v56  ;;  %362 = vadd.xlane.f32.xlu1 %v335_v53  ;;  %348 = vadd.xlane.f32.xlu0 %v328_v57 }
  0xb9   : > { %v1452_v60 = vsub.f32 %v1396_v11, %v305_v58  ;;  %v272_v63 = vpop.xlane.xlu0 %271  ;;  %v1171_v11 = vld [vmem:[%s1690_s3 + $0x60] ss:$8 sps:$4 sm:$0xff]  }
  0xba   : > { %v274_v0 = vpop.xlane.xlu1 %273  ;;  %v298_v2 = vmul.f32 0.0078125, %v272_v63  ;;  %v336_v3 = vmul.f32 %v1449_v59, %v1449_v59  ;;  %723 = vmatpush1.bf16.msra.mxu0 %v1171_v11  ;;  %1101 = vmatpush1.bf16.msra.mxu1 %v1171_v11 }
  0xbb   : > { %v299_v4 = vmul.f32 0.0078125, %v274_v0  ;;  %v337_v7 = vmul.f32 %v1452_v60, %v1452_v60  ;;  %724 = vmatprep.subr.bf16.mxu0 %v1172_v22  ;;  %1094 = vmatprep.subr.bf16.mxu1 %v1172_v22 }
  0xbc   : > { %v1465_v5 = vsub.f32 %v1399_v12, %v298_v2  ;;  %350 = vadd.xlane.f32.xlu1 %v329_v61  ;;  %364 = vadd.xlane.f32.xlu0 %v336_v3 }
  0xbd   : > { %v1468_v6 = vsub.f32 %v1401_v13, %v299_v4  ;;  %v288_v9 = vpop.xlane.xlu0 %287 }
  0xbe   : > { %v290_v10 = vpop.xlane.xlu1 %289  ;;  %v306_v12 = vmul.f32 0.0078125, %v288_v9  ;;  %v330_v16 = vmul.f32 %v1465_v5, %v1465_v5  ;;  %725 = vmatpush1.bf16.msra.mxu0 %v1174_v23  ;;  %1102 = vmatpush1.bf16.msra.mxu1 %v1174_v23  ;;  %v1533_v9 = vld [vmem:[%s1688_s1] ss:$0 sm:$0xff] }
  0xbf   : > { %v307_v17 = vmul.f32 0.0078125, %v290_v10  ;;  %v331_v19 = vmul.f32 %v1468_v6, %v1468_v6  ;;  %726 = vmatprep.subr.bf16.mxu0 %v1175_v24  ;;  %1095 = vmatprep.subr.bf16.mxu1 %v1175_v24  ;;  %v1540_v24 = vld [vmem:[%s1689_s2] ss:$0 sm:$0xff] }
  0xc0   : > { %v1481_v13 = vsub.f32 %v1405_v14, %v306_v12  ;;  %366 = vadd.xlane.f32.xlu1 %v337_v7  ;;  %352 = vadd.xlane.f32.xlu0 %v330_v16 }
  0xc1   : > { %v1484_v18 = vsub.f32 %v1407_v15, %v307_v17 }
  0xc2   : > { %v338_v14 = vmul.f32 %v1481_v13, %v1481_v13  ;;  %727 = vmatpush1.bf16.msra.mxu0 %v1177_v25  ;;  %1103 = vmatpush1.bf16.msra.mxu1 %v1177_v25 }
  0xc3   : > { %v339_v15 = vmul.f32 %v1484_v18, %v1484_v18  ;;  %728 = vmatprep.subr.bf16.mxu0 %v1178_v26  ;;  %1096 = vmatprep.subr.bf16.mxu1 %v1178_v26 }
  0xc4   : > { %354 = vadd.xlane.f32.xlu1 %v331_v19  ;;  %368 = vadd.xlane.f32.xlu0 %v338_v14 }
  0xc6   : > { %729 = vmatpush1.bf16.msra.mxu0 %v1180_v29  ;;  %1104 = vmatpush1.bf16.msra.mxu1 %v1180_v29 }
  0xc7   : > { %730 = vmatprep.subr.bf16.mxu0 %v1181_v30  ;;  %1097 = vmatprep.subr.bf16.mxu1 %v1181_v30 }
  0xc8   : > { %370 = vadd.xlane.f32.xlu1 %v339_v15 }
  0xca   : > { %731 = vmatpush1.bf16.msra.mxu0 %v1183_v31  ;;  %1105 = vmatpush1.bf16.msra.mxu1 %v1183_v31 }
  0xcb   : > { %732 = vmatprep.subr.bf16.mxu0 %v1184_v32  ;;  %1098 = vmatprep.subr.bf16.mxu1 %v1184_v32 }
  0xce   : > { %733 = vmatpush1.bf16.msra.mxu0 %v1186_v33  ;;  %1106 = vmatpush1.bf16.msra.mxu1 %v1186_v33 }
  0xcf   : > { %734 = vmatprep.subr.bf16.mxu0 %v1187_v34  ;;  %1099 = vmatprep.subr.bf16.mxu1 %v1187_v34 }
  0xd2   : > { %735 = vmatpush1.bf16.msra.mxu0 %v1189_v37  ;;  %1107 = vmatpush1.bf16.msra.mxu1 %v1189_v37 }
 0x131   : > { %v341_v39 = vpop.xlane.xlu0 %340 }
 0x132   : > { %v372_v40 = vmul.f32 0.0078125, %v341_v39 }
 0x134   : > { %v388_v41 = vadd.f32 1e-05, %v372_v40 }
 0x135   : > { %v343_v42 = vpop.xlane.xlu1 %342  ;;  %v357_v45 = vpop.xlane.xlu0 %356 }
 0x136   : > { %1198 = vrsqrt.f32 %v388_v41  ;;  %v373_v46 = vmul.f32 0.0078125, %v343_v42  ;;  %v380_v47 = vmul.f32 0.0078125, %v357_v45 }
 0x138   : > { %v389_v48 = vadd.f32 1e-05, %v373_v46  ;;  %v396_v49 = vadd.f32 1e-05, %v380_v47 }
 0x139   : > { %v359_v50 = vpop.xlane.xlu1 %358  ;;  %v345_v53 = vpop.xlane.xlu0 %344 }
 0x13a   : > { %1200 = vrsqrt.f32 %v389_v48  ;;  %v381_v54 = vmul.f32 0.0078125, %v359_v50  ;;  %v374_v55 = vmul.f32 0.0078125, %v345_v53 }
 0x13b   : > { %1202 = vrsqrt.f32 %v396_v49 }
 0x13c   : > { %v397_v56 = vadd.f32 1e-05, %v381_v54  ;;  %v390_v57 = vadd.f32 1e-05, %v374_v55 }
 0x13d   : > { %v347_v58 = vpop.xlane.xlu1 %346  ;;  %v361_v61 = vpop.xlane.xlu0 %360 }
 0x13e   : > { %1204 = vrsqrt.f32 %v397_v56  ;;  %v375_v62 = vmul.f32 0.0078125, %v347_v58  ;;  %v382_v63 = vmul.f32 0.0078125, %v361_v61 }
 0x13f   : > { %1206 = vrsqrt.f32 %v390_v57 }
 0x140   : > { %v391_v0 = vadd.f32 1e-05, %v375_v62  ;;  %v398_v1 = vadd.f32 1e-05, %v382_v63 }
 0x141   : > { %v363_v2 = vpop.xlane.xlu1 %362  ;;  %v349_v3 = vpop.xlane.xlu0 %348 }
 0x142   : > { %1208 = vrsqrt.f32 %v391_v0  ;;  %v383_v4 = vmul.f32 0.0078125, %v363_v2  ;;  %v376_v7 = vmul.f32 0.0078125, %v349_v3 }
 0x143   : > { %v1199_v8 = vpop.eup %1198  ;;  %1210 = vrsqrt.f32 %v398_v1 }
 0x144   : > { %v420_v10 = vmul.f32 %v1199_v8, %v1411_v20  ;;  %v399_v11 = vadd.f32 1e-05, %v383_v4  ;;  %v392_v12 = vadd.f32 1e-05, %v376_v7 }
 0x145   : > { %v351_v16 = vpop.xlane.xlu1 %350  ;;  %v365_v17 = vpop.xlane.xlu0 %364 }
 0x146   : > { %1212 = vrsqrt.f32 %v399_v11  ;;  %v377_v19 = vmul.f32 0.0078125, %v351_v16  ;;  %v384_v22 = vmul.f32 0.0078125, %v365_v17  ;;  %v442_v14 = vmul.f32 %v1533_v9, %v420_v10 }
 0x147   : > { %v1201_v23 = vpop.eup %1200  ;;  %1214 = vrsqrt.f32 %v392_v12 }
 0x148   : > { %v1203_v15 = vpop.eup %1202  ;;  %v421_v25 = vmul.f32 %v1201_v23, %v1417_v27  ;;  %v393_v20 = vadd.f32 1e-05, %v377_v19  ;;  %v400_v26 = vadd.f32 1e-05, %v384_v22  ;;  %v464_v39 = vadd.f32 %v1540_v24, %v442_v14 }
 0x149   : > { %v428_v29 = vmul.f32 %v1203_v15, %v1413_v21  ;;  %v367_v30 = vpop.xlane.xlu1 %366  ;;  %v353_v31 = vpop.xlane.xlu0 %352 }
 0x14a   : > { %v443_v32 = vmul.f32 %v1533_v9, %v421_v25  ;;  %1216 = vrsqrt.f32 %v393_v20  ;;  %v385_v33 = vmul.f32 0.0078125, %v367_v30  ;;  %v378_v34 = vmul.f32 0.0078125, %v353_v31 }
 0x14b   : > { %v1205_v37 = vpop.eup %1204  ;;  %v450_v40 = vmul.f32 %v1533_v9, %v428_v29  ;;  %1218 = vrsqrt.f32 %v400_v26 }
 0x14c   : > { %v1207_v41 = vpop.eup %1206  ;;  %v465_v27 = vadd.f32 %v1540_v24, %v443_v32  ;;  %v429_v42 = vmul.f32 %v1205_v37, %v1419_v28  ;;  %v401_v45 = vadd.f32 1e-05, %v385_v33  ;;  %v394_v21 = vadd.f32 1e-05, %v378_v34 }
 0x14d   : > { %v422_v46 = vmul.f32 %v1207_v41, %v1425_v35  ;;  %v355_v47 = vpop.xlane.xlu1 %354  ;;  %v369_v48 = vpop.xlane.xlu0 %368  ;;  %v472_v28 = vadd.f32 %v1540_v24, %v450_v40 }
 0x14e   : > { %v1048_v49 = vpack.c.bf16 %v465_v27, %v464_v39  ;;  %v451_v50 = vmul.f32 %v1533_v9, %v429_v42  ;;  %1220 = vrsqrt.f32 %v401_v45  ;;  %v379_v53 = vmul.f32 0.0078125, %v355_v47 }
 0x14f   : > { %v1209_v54 = vpop.eup %1208  ;;  %v444_v55 = vmul.f32 %v1533_v9, %v422_v46  ;;  %1222 = vrsqrt.f32 %v394_v21  ;;  %v386_v56 = vmul.f32 0.0078125, %v369_v48 }
 0x150   : > { %v1211_v57 = vpop.eup %1210  ;;  %1049 = vst [vmem:[#allocation2] sm:$0xff] %v1048_v49   ;;  %v473_v58 = vadd.f32 %v1540_v24, %v451_v50  ;;  %v423_v35 = vmul.f32 %v1209_v54, %v1427_v36  ;;  %v395_v61 = vadd.f32 1e-05, %v379_v53 }
 0x151   : > { %v430_v62 = vmul.f32 %v1211_v57, %v1433_v43  ;;  %v402_v63 = vadd.f32 1e-05, %v386_v56  ;;  %v371_v0 = vpop.xlane.xlu1 %370  ;;  %v466_v7 = vadd.f32 %v1540_v24, %v444_v55 }
 0x152   : > { %v1068_v1 = vpack.c.bf16 %v473_v58, %v472_v28  ;;  %v445_v2 = vmul.f32 %v1533_v9, %v423_v35  ;;  %1224 = vrsqrt.f32 %v395_v61  ;;  %v387_v3 = vmul.f32 0.0078125, %v371_v0 }
 0x153   : > { %v1213_v4 = vpop.eup %1212  ;;  %1226 = vrsqrt.f32 %v402_v63  ;;  %v452_v36 = vmul.f32 %v1533_v9, %v430_v62 }
 0x154   : > { %v1215_v8 = vpop.eup %1214  ;;  %1088 = vst [vmem:[#allocation2 + $0x20] sm:$0xff] %v1068_v1   ;;  %v467_v10 = vadd.f32 %v1540_v24, %v445_v2  ;;  %v431_v11 = vmul.f32 %v1213_v4, %v1435_v44  ;;  %v403_v43 = vadd.f32 1e-05, %v387_v3 }
 0x155   : > { %v424_v12 = vmul.f32 %v1215_v8, %v1441_v51  ;;  %v474_v14 = vadd.f32 %v1540_v24, %v452_v36 }
 0x156   : > { %v1053_v16 = vpack.c.bf16 %v467_v10, %v466_v7  ;;  %v453_v17 = vmul.f32 %v1533_v9, %v431_v11  ;;  %1228 = vrsqrt.f32 %v403_v43 }
 0x157   : > { %v1217_v19 = vpop.eup %1216  ;;  %v1190_v22 = vld [vmem:[#allocation2] sm:$0xff]   ;;  %v446_v25 = vmul.f32 %v1533_v9, %v424_v12 }
 0x158   : > { %v1219_v23 = vpop.eup %1218  ;;  %1085 = vst [vmem:[#allocation2 + $0x8] sm:$0xff] %v1053_v16   ;;  %v475_v15 = vadd.f32 %v1540_v24, %v453_v17  ;;  %v425_v20 = vmul.f32 %v1217_v19, %v1443_v52  ;;  %753 = vmatmul.mubr.bf16.vlgmr.msra.gmra.mxu0 %v1190_v22 }
 0x159   : > { %v432_v44 = vmul.f32 %v1219_v23, %v1449_v59  ;;  %762 = vmatprep.mubr.bf16.mxu0 %v1308_v38  ;;  %v468_v32 = vadd.f32 %v1540_v24, %v446_v25 }
 0x15a   : > { %v1073_v51 = vpack.c.bf16 %v475_v15, %v474_v14  ;;  %v447_v26 = vmul.f32 %v1533_v9, %v425_v20 }
 0x15b   : > { %v1221_v29 = vpop.eup %1220  ;;  %v1191_v30 = vld [vmem:[#allocation2 + $0x20] sm:$0xff]   ;;  %v454_v34 = vmul.f32 %v1533_v9, %v432_v44 }
 0x15c   : > { %v1223_v31 = vpop.eup %1222  ;;  %1089 = vst [vmem:[#allocation2 + $0x28] sm:$0xff] %v1073_v51   ;;  %v469_v33 = vadd.f32 %v1540_v24, %v447_v26  ;;  %v433_v52 = vmul.f32 %v1221_v29, %v1452_v60  ;;  %793 = vmatmul.mubr.bf16.vlgmr.msra.gmra.mxu1 %v1191_v30 }
 0x15d   : > { %v426_v59 = vmul.f32 %v1223_v31, %v1465_v5  ;;  %802 = vmatprep.mubr.bf16.mxu1 %v1308_v38  ;;  %v476_v42 = vadd.f32 %v1540_v24, %v454_v34 }
 0x15e   : > { %v1058_v37 = vpack.c.bf16 %v469_v33, %v468_v32  ;;  %v455_v39 = vmul.f32 %v1533_v9, %v433_v52 }
 0x15f   : > { %v1225_v40 = vpop.eup %1224  ;;  %v1192_v41 = vld [vmem:[#allocation2 + $0x8] sm:$0xff]   ;;  %v448_v21 = vmul.f32 %v1533_v9, %v426_v59 }
 0x160   : > { %v1227_v27 = vpop.eup %1226  ;;  %1086 = vst [vmem:[#allocation2 + $0x10] sm:$0xff] %v1058_v37   ;;  %v477_v45 = vadd.f32 %v1540_v24, %v455_v39  ;;  %v427_v60 = vmul.f32 %v1225_v40, %v1468_v6  ;;  %763 = vmatmul.mubr.bf16.gmra.mxu0 %v1192_v41 }
 0x161   : > { %v434_v5 = vmul.f32 %v1227_v27, %v1481_v13  ;;  %772 = vmatprep.mubr.bf16.mxu0 %v1308_v38  ;;  %v470_v50 = vadd.f32 %v1540_v24, %v448_v21 }
 0x162   : > { %v1078_v46 = vpack.c.bf16 %v477_v45, %v476_v42  ;;  %v449_v47 = vmul.f32 %v1533_v9, %v427_v60 }
 0x163   : > { %v1229_v48 = vpop.eup %1228  ;;  %v1193_v49 = vld [vmem:[#allocation2 + $0x28] sm:$0xff]   ;;  %v456_v54 = vmul.f32 %v1533_v9, %v434_v5 }
 0x164   : > { %1090 = vst [vmem:[#allocation2 + $0x30] sm:$0xff] %v1078_v46   ;;  %v471_v53 = vadd.f32 %v1540_v24, %v449_v47  ;;  %v435_v55 = vmul.f32 %v1229_v48, %v1484_v18  ;;  %803 = vmatmul.mubr.bf16.gmra.mxu1 %v1193_v49 }
 0x165   : > { %812 = vmatprep.mubr.bf16.mxu1 %v1308_v38  ;;  %v478_v57 = vadd.f32 %v1540_v24, %v456_v54 }
 0x166   : > { %v1063_v6 = vpack.c.bf16 %v471_v53, %v470_v50  ;;  %v457_v13 = vmul.f32 %v1533_v9, %v435_v55 }
 0x167   : > { %v1194_v56 = vld [vmem:[#allocation2 + $0x10] sm:$0xff]  }
 0x168   : > { %1087 = vst [vmem:[#allocation2 + $0x18] sm:$0xff] %v1063_v6   ;;  %v479_v28 = vadd.f32 %v1540_v24, %v457_v13  ;;  %773 = vmatmul.mubr.bf16.gmra.mxu0 %v1194_v56 }
 0x169   : > { %782 = vmatprep.mubr.bf16.mxu0 %v1308_v38 }
 0x16a   : > { %v1083_v58 = vpack.c.bf16 %v479_v28, %v478_v57 }
 0x16b   : > { %v1195_v35 = vld [vmem:[#allocation2 + $0x30] sm:$0xff]  }
 0x16c   : > { %1091 = vst [vmem:[#allocation2 + $0x38] sm:$0xff] %v1083_v58   ;;  %813 = vmatmul.mubr.bf16.gmra.mxu1 %v1195_v35 }
 0x16d   : > { %822 = vmatprep.mubr.bf16.mxu1 %v1308_v38 }
 0x16f   : > { %v1196_v18 = vld [vmem:[#allocation2 + $0x18] sm:$0xff]  }
 0x170   : > { %783 = vmatmul.mubr.bf16.gmra.mxu0 %v1196_v18 }
 0x173   : > { %v1197_v9 = vld [vmem:[#allocation2 + $0x38] sm:$0xff]  }
 0x174   : > { %823 = vmatmul.mubr.bf16.gmra.mxu1 %v1197_v9 }
 0x218   : > { %v754_v61 = vpop.f32.mrf.mxu0 }
 0x219   : > { %833 = vst [vmem:[%s1597_s14] sm:$0xff] %v754_v61 }
 0x21a   : > { %v756_v38 = vpop.f32.mrf.mxu0 }
 0x21b   : > { %834 = vst [vmem:[%s1597_s14 + $0x8] sm:$0xff] %v756_v38 }
 0x21c   : > { %v758_v24 = vpop.f32.mrf.mxu0  ;;  %v794_v62 = vpop.f32.mrf.mxu1 }
 0x21d   : > { %835 = vst [vmem:[%s1597_s14 + $0x10] sm:$0xff] %v758_v24  ;;  %849 = vst [vmem:[%s1597_s14 + $0x80] sm:$0xff] %v794_v62 }
 0x21e   : > { %v760_v63 = vpop.f32.mrf.mxu0  ;;  %v796_v0 = vpop.f32.mrf.mxu1 }
 0x21f   : > { %836 = vst [vmem:[%s1597_s14 + $0x18] sm:$0xff] %v760_v63  ;;  %850 = vst [vmem:[%s1597_s14 + $0x88] sm:$0xff] %v796_v0 }
 0x220   : > { %v764_v1 = vpop.f32.mrf.mxu0  ;;  %v798_v2 = vpop.f32.mrf.mxu1 }
 0x221   : > { %837 = vst [vmem:[%s1597_s14 + $0x20] sm:$0xff] %v764_v1  ;;  %851 = vst [vmem:[%s1597_s14 + $0x90] sm:$0xff] %v798_v2 }
 0x222   : > { %v766_v3 = vpop.f32.mrf.mxu0  ;;  %v800_v4 = vpop.f32.mrf.mxu1 }
 0x223   : > { %838 = vst [vmem:[%s1597_s14 + $0x28] sm:$0xff] %v766_v3  ;;  %852 = vst [vmem:[%s1597_s14 + $0x98] sm:$0xff] %v800_v4 }
 0x224   : > { %v768_v7 = vpop.f32.mrf.mxu0  ;;  %v804_v8 = vpop.f32.mrf.mxu1 }
 0x225   : > { %839 = vst [vmem:[%s1597_s14 + $0x30] sm:$0xff] %v768_v7  ;;  %853 = vst [vmem:[%s1597_s14 + $0xa0] sm:$0xff] %v804_v8 }
 0x226   : > { %v770_v10 = vpop.f32.mrf.mxu0  ;;  %v806_v36 = vpop.f32.mrf.mxu1 }
 0x227   : > { %840 = vst [vmem:[%s1597_s14 + $0x38] sm:$0xff] %v770_v10  ;;  %854 = vst [vmem:[%s1597_s14 + $0xa8] sm:$0xff] %v806_v36 }
 0x228   : > { %v774_v11 = vpop.f32.mrf.mxu0  ;;  %v808_v43 = vpop.f32.mrf.mxu1 }
 0x229   : > { %841 = vst [vmem:[%s1597_s14 + $0x40] sm:$0xff] %v774_v11  ;;  %855 = vst [vmem:[%s1597_s14 + $0xb0] sm:$0xff] %v808_v43 }
 0x22a   : > { %v776_v12 = vpop.f32.mrf.mxu0  ;;  %v810_v16 = vpop.f32.mrf.mxu1 }
 0x22b   : > { %842 = vst [vmem:[%s1597_s14 + $0x48] sm:$0xff] %v776_v12  ;;  %856 = vst [vmem:[%s1597_s14 + $0xb8] sm:$0xff] %v810_v16 }
 0x22c   : > { %v778_v17 = vpop.f32.mrf.mxu0  ;;  %v814_v19 = vpop.f32.mrf.mxu1 }
 0x22d   : > { %843 = vst [vmem:[%s1597_s14 + $0x50] sm:$0xff] %v778_v17  ;;  %857 = vst [vmem:[%s1597_s14 + $0xc0] sm:$0xff] %v814_v19 }
 0x22e   : > { %v780_v22 = vpop.f32.mrf.mxu0  ;;  %v816_v23 = vpop.f32.mrf.mxu1 }
 0x22f   : > { %844 = vst [vmem:[%s1597_s14 + $0x58] sm:$0xff] %v780_v22  ;;  %858 = vst [vmem:[%s1597_s14 + $0xc8] sm:$0xff] %v816_v23 }
 0x230   : > { %v784_v14 = vpop.f32.mrf.mxu0  ;;  %v818_v15 = vpop.f32.mrf.mxu1 }
 0x231   : > { %845 = vst [vmem:[%s1597_s14 + $0x60] sm:$0xff] %v784_v14  ;;  %859 = vst [vmem:[%s1597_s14 + $0xd0] sm:$0xff] %v818_v15 }
 0x232   : > { %v786_v25 = vpop.f32.mrf.mxu0  ;;  %v820_v20 = vpop.f32.mrf.mxu1 }
 0x233   : > { %846 = vst [vmem:[%s1597_s14 + $0x68] sm:$0xff] %v786_v25  ;;  %860 = vst [vmem:[%s1597_s14 + $0xd8] sm:$0xff] %v820_v20 }
 0x234   : > { %v788_v44 = vpop.f32.mrf.mxu0  ;;  %v824_v51 = vpop.f32.mrf.mxu1 }
 0x235   : > { %847 = vst [vmem:[%s1597_s14 + $0x70] sm:$0xff] %v788_v44  ;;  %861 = vst [vmem:[%s1597_s14 + $0xe0] sm:$0xff] %v824_v51 }
 0x236   : > { %v790_v26 = vpop.f32.mrf.mxu0  ;;  %v826_v29 = vpop.f32.mrf.mxu1 }
 0x237   : > { %848 = vst [vmem:[%s1597_s14 + $0x78] sm:$0xff] %v790_v26  ;;  %862 = vst [vmem:[%s1597_s14 + $0xe8] sm:$0xff] %v826_v29 }
 0x238   : > { %v828_v30 = vpop.f32.mrf.mxu1 }
 0x239   : > { %863 = vst [vmem:[%s1597_s14 + $0xf0] sm:$0xff] %v828_v30 }
 0x23a   : > { %v830_v31 = vpop.f32.mrf.mxu1 }
 0x23b   : > { %864 = vst [vmem:[%s1597_s14 + $0xf8] sm:$0xff] %v830_v31 }
 0x23c   : > { %1243 = shalt.err (!%p1240_p5)
}
 0x23d   : > { %s1244_s8 = scalar_lea.hbm %s1634_s29, 4096  ;;  %s1248_s11 = scalar_lea.hbm %s1691_s4, 8192 }
 0x23e   : > { %p1245_p6 = scmp.ne.s32.totalorder %s1634_s29, %s1244_s8  ;;  %p1249_p10 = scmp.lt.s32.totalorder %s1634_s29, %s1691_s4 }
 0x23f   : > { %p1250_p11 = scmp.lt.s32.totalorder %s1248_s11, %s1244_s8 }
 0x240   : > { %p1246_p7 = pnand %p1245_p6, %p1377_p4 }
 0x241   : > { %p1251_p12 = por %p1250_p11, %p1249_p10 }
 0x242   : > { %p1247_p9 = pneg %p1246_p7 }
 0x244   : > { %p1252_p13 = pnand %p1251_p12, %p1247_p9 }
 0x246   : > { %1255 = shalt.err (!%p1252_p13)
}
 0x247   : > { %s1310_s14 = smov 256   ;;  %s1311_s21 = smov 16  }
 0x248   : > { %1108 = dma.vmem_to_hbm [thread:$0]  (%p1377_p4), %s1636_s22, 4096, %s1634_s29, %s1642_s18, %s1310_s14, %s1310_s14, %s1311_s21  }
 0x249 PF: > { %p1114_p0 = scmp.ge.s32.totalorder %s1306_s20, 2  ;;  %s897_s24 = sand.u32 1, %s1286_s15  }
 0x24a   : > { %s898_s26 = scalar_lea.sflag [#allocation4], %s897_s24 }
 0x24b   : > { %p1111_p1 = pnand %p1114_p0, %p1384_p8 }
 0x24d   : > { %p1112_p2 = pneg %p1111_p1 }
 0x24f   : > { %1281 = dma.done.wait (%p1112_p2), %s898_s26, 4096  }
 0x250   : > { %1283 = vsyncadd (%p1112_p2), %s898_s26, 4294963200  ;;  %s17_s20 = sadd.s32 1, %s1306_s20   ;;  %s1694_s15 = smov %s1290_s16 }
 0x251   : > { %p14_p3 = scmp.ge.s32.totalorder %s17_s20, 4   ;;  %s1695_s16 = smov %s1294_s17 }
 0x252   : > { %s1696_s17 = smov %s1390_s28  ;;  %s1697_s18 = smov %s1302_s19 }
 0x253   : > { %s1698_s19 = smov %s1700_s23  ;;  %16 = sbr.rel (!%p14_p3) target bundleno = 4 (0x4), region = 78 }
 0x258   :  { %903 = vsyncpa [#allocation4], 1 }
 0x259   :  { %905 = vsyncpa [#allocation4 + $0x1], 1 }

// kernel: gpt_forward.6
= control target key start
LH: loop header
LB: loop body
LE: loop exit
PB: predicated region body
PF: predicated region fallthrough
CT: control target
= control target key end

     0   :  { %s2641_s24 = smov 0   ;;  %s3856_s0 = inlined_call_operand.vmem [shape: f32[2,128,128], index: 0, kind: input, shape index: {}]   ;;  %s3857_s1 = inlined_call_operand.vmem [shape: f32[1,128], index: 1, kind: input, shape index: {}]   ;;  %s3858_s2 = inlined_call_operand.vmem [shape: f32[1,128], index: 2, kind: input, shape index: {}]   ;;  %s3859_s3 = inlined_call_operand.vmem [shape: bf16[128,512], index: 3, kind: input, shape index: {}]   ;;  %s3860_s4 = inlined_call_operand.vmem [shape: f32[1,512], index: 4, kind: input, shape index: {}]   ;;  %s3861_s5 = inlined_call_operand.vmem [shape: bf16[512,128], index: 5, kind: input, shape index: {}]   ;;  %s3862_s6 = inlined_call_operand.vmem [shape: f32[1,128], index: 6, kind: input, shape index: {}]   ;;  %s3863_s7 = inlined_call_operand.vmem [shape: f32[2,128,128], index: 7, kind: output, shape index: {}]  }
   0x1 LB: > { %s2119_s25 = sadd.s32 4294967295, %s2598_s24   ;;  %p2123_p0 = scmp.ge.s32.totalorder %s2598_s24, 1  ;;  %s2598_s24 = sphi %s2641_s24, %s17_s24  }
   0x2   : > { %p237_p1 = scmp.lt.s32.totalorder %s2598_s24, 3 }
   0x4   : > { %p238_p2 = pnand %p2123_p0, %p237_p1 }
   0x6   : > { %241 = sbr.rel (%p238_p2) target bundleno = 908 (0x38c), region = 48 }
   0xb   : > { %p269_p3 = scmp.lt.s32.totalorder %s2119_s25, 1  ;;  %v2336_v16 = vld [vmem:[%s3859_s3 + $0xe4] ss:$16 sps:$4 sm:$0xff]   ;;  %v2338_v17 = vld [vmem:[%s3859_s3 + $0xec] ss:$16 sps:$4 sm:$0xff]  }
   0xc   : > { %v2340_v18 = vld [vmem:[%s3859_s3 + $0xe0] ss:$16 sps:$4 sm:$0xff]   ;;  %v2341_v19 = vld [vmem:[%s3859_s3 + $0xe8] ss:$16 sps:$4 sm:$0xff]   ;;  %741 = vmatprep.subr.bf16.mxu0 %v2336_v16  ;;  %854 = vmatprep.subr.bf16.mxu1 %v2338_v17  ;;  %v2342_v55 = vld [vmem:[%s3859_s3 + $0xc4] ss:$16 sps:$4 sm:$0xff]  }
   0xd   : > { %s4048_s25 = smov (!%p269_p3, %s2119_s25), 1  ;;  %742 = vmatpush1.bf16.msra.mxu0 %v2340_v18  ;;  %855 = vmatpush1.bf16.msra.mxu1 %v2341_v19  ;;  %v2344_v56 = vld [vmem:[%s3859_s3 + $0xcc] ss:$16 sps:$4 sm:$0xff]   ;;  %v2346_v57 = vld [vmem:[%s3859_s3 + $0xc0] ss:$16 sps:$4 sm:$0xff]  }
   0xe   : > { %s2197_s26 = sshll.u32 %s4048_s25, 7  ;;  %v2347_v58 = vld [vmem:[%s3859_s3 + $0xc8] ss:$16 sps:$4 sm:$0xff]   ;;  %743 = vmatprep.subr.bf16.mxu0 %v2342_v55  ;;  %856 = vmatprep.subr.bf16.mxu1 %v2344_v56  ;;  %v2354_v19 = vld [vmem:[%s3859_s3 + $0x84] ss:$16 sps:$4 sm:$0xff]   ;;  %v2600_v56 = vmov 0  }
   0xf   : > { %s2657_s29 = scalar_lea.vmem %s3856_s0, %s2197_s26  ;;  %v2383_v55 = vld [vmem:[%s3859_s3 + $0x8] ss:$16 sps:$4 sm:$0xff]   ;;  %773 = vmatprep.mubr.bf16.mxu0 %v2600_v56  ;;  %886 = vmatprep.mubr.bf16.mxu1 %v2600_v56  ;;  %s3804_s12 = scalar_lea.vmem %s3863_s7, %s2197_s26 }
  0x10   : > { %v280_v0 = vld [vmem:[%s2657_s29] sm:$0xff]  ;;  %v282_v1 = vld [vmem:[%s2657_s29 + $0x10] sm:$0xff]  ;;  %v281_v2 = vld [vmem:[%s2657_s29 + $0x8] sm:$0xff] }
  0x11   : > { %298 = vadd.xlane.f32.xlu0 %v280_v0  ;;  %302 = vadd.xlane.f32.xlu1 %v282_v1  ;;  %v283_v3 = vld [vmem:[%s2657_s29 + $0x18] sm:$0xff]  ;;  %v284_v4 = vld [vmem:[%s2657_s29 + $0x20] sm:$0xff]  ;;  %v285_v5 = vld [vmem:[%s2657_s29 + $0x28] sm:$0xff] }
  0x12   : > { %v286_v6 = vld [vmem:[%s2657_s29 + $0x30] sm:$0xff]  ;;  %v287_v7 = vld [vmem:[%s2657_s29 + $0x38] sm:$0xff]  ;;  %v2668_v8 = vld [vmem:[%s2657_s29 + $0x40] sm:$0xff]  ;;  %744 = vmatpush1.bf16.msra.mxu0 %v2346_v57  ;;  %857 = vmatpush1.bf16.msra.mxu1 %v2347_v58 }
  0x13   : > { %v2671_v9 = vld [vmem:[%s2657_s29 + $0x48] sm:$0xff]  ;;  %v2674_v10 = vld [vmem:[%s2657_s29 + $0x50] sm:$0xff]  ;;  %v2677_v11 = vld [vmem:[%s2657_s29 + $0x58] sm:$0xff] }
  0x14   : > { %v2682_v12 = vld [vmem:[%s2657_s29 + $0x60] sm:$0xff]  ;;  %v2685_v13 = vld [vmem:[%s2657_s29 + $0x68] sm:$0xff]  ;;  %v2690_v14 = vld [vmem:[%s2657_s29 + $0x70] sm:$0xff] }
  0x15   : > { %300 = vadd.xlane.f32.xlu0 %v281_v2  ;;  %304 = vadd.xlane.f32.xlu1 %v283_v3  ;;  %v2693_v15 = vld [vmem:[%s2657_s29 + $0x78] sm:$0xff] }
  0x16   : > { %v2384_v57 = vld [vmem:[%s3861_s5 + $0x78] sm:$0xff]  }
  0x17   : > { %v2386_v58 = vld [vmem:[%s3861_s5 + $0xf8] sm:$0xff]  }
  0x19   : > { %306 = vadd.xlane.f32.xlu0 %v284_v4  ;;  %308 = vadd.xlane.f32.xlu1 %v285_v5 }
  0x1d   : > { %310 = vadd.xlane.f32.xlu0 %v286_v6  ;;  %312 = vadd.xlane.f32.xlu1 %v287_v7 }
  0x21   : > { %314 = vadd.xlane.f32.xlu0 %v2668_v8  ;;  %316 = vadd.xlane.f32.xlu1 %v2671_v9 }
  0x25   : > { %318 = vadd.xlane.f32.xlu0 %v2674_v10  ;;  %320 = vadd.xlane.f32.xlu1 %v2677_v11 }
  0x29   : > { %322 = vadd.xlane.f32.xlu0 %v2682_v12  ;;  %324 = vadd.xlane.f32.xlu1 %v2685_v13 }
  0x2d   : > { %326 = vadd.xlane.f32.xlu0 %v2690_v14  ;;  %328 = vadd.xlane.f32.xlu1 %v2693_v15 }
  0x9a   : > { %v299_v20 = vpop.xlane.xlu0 %298  ;;  %v303_v21 = vpop.xlane.xlu1 %302 }
  0x9b   : > { %v331_v22 = vmul.f32 0.0078125, %v299_v20  ;;  %v333_v23 = vmul.f32 0.0078125, %v303_v21  ;;  %v2356_v20 = vld [vmem:[%s3859_s3 + $0x8c] ss:$16 sps:$4 sm:$0xff]  }
  0x9d   : > { %v2711_v24 = vsub.f32 %v280_v0, %v331_v22  ;;  %v2713_v25 = vsub.f32 %v282_v1, %v333_v23 }
  0x9e   : > { %v301_v26 = vpop.xlane.xlu0 %300  ;;  %v305_v27 = vpop.xlane.xlu1 %304 }
  0x9f   : > { %v332_v28 = vmul.f32 0.0078125, %v301_v26  ;;  %v363_v29 = vmul.f32 %v2711_v24, %v2711_v24  ;;  %v334_v30 = vmul.f32 0.0078125, %v305_v27  ;;  %v365_v33 = vmul.f32 %v2713_v25, %v2713_v25  ;;  %v2358_v26 = vld [vmem:[%s3859_s3 + $0x80] ss:$16 sps:$4 sm:$0xff]   ;;  %v2359_v27 = vld [vmem:[%s3859_s3 + $0x88] ss:$16 sps:$4 sm:$0xff]  }
  0xa1   : > { %v2717_v31 = vsub.f32 %v281_v2, %v332_v28  ;;  %379 = vadd.xlane.f32.xlu0 %v363_v29  ;;  %v2719_v32 = vsub.f32 %v283_v3, %v334_v30  ;;  %v2348_v3 = vld [vmem:[%s3859_s3 + $0xa4] ss:$16 sps:$4 sm:$0xff]  }
  0xa2   : > { %v307_v34 = vpop.xlane.xlu0 %306  ;;  %v309_v35 = vpop.xlane.xlu1 %308  ;;  %745 = vmatprep.subr.bf16.mxu0 %v2348_v3 }
  0xa3   : > { %v335_v36 = vmul.f32 0.0078125, %v307_v34  ;;  %v364_v37 = vmul.f32 %v2717_v31, %v2717_v31  ;;  %v336_v38 = vmul.f32 0.0078125, %v309_v35  ;;  %v366_v41 = vmul.f32 %v2719_v32, %v2719_v32  ;;  %v2362_v34 = vld [vmem:[%s3859_s3 + $0x6c] ss:$16 sps:$4 sm:$0xff]  }
  0xa5   : > { %v2725_v39 = vsub.f32 %v284_v4, %v335_v36  ;;  %383 = vadd.xlane.f32.xlu0 %v365_v33  ;;  %381 = vadd.xlane.f32.xlu1 %v364_v37  ;;  %v2727_v40 = vsub.f32 %v285_v5, %v336_v38  ;;  %v2350_v4 = vld [vmem:[%s3859_s3 + $0xac] ss:$16 sps:$4 sm:$0xff]   ;;  %v2360_v33 = vld [vmem:[%s3859_s3 + $0x64] ss:$16 sps:$4 sm:$0xff]   ;;  %v2364_v38 = vld [vmem:[%s3859_s3 + $0x60] ss:$16 sps:$4 sm:$0xff]  }
  0xa6   : > { %v311_v42 = vpop.xlane.xlu0 %310  ;;  %v313_v43 = vpop.xlane.xlu1 %312  ;;  %858 = vmatprep.subr.bf16.mxu1 %v2350_v4 }
  0xa7   : > { %v337_v44 = vmul.f32 0.0078125, %v311_v42  ;;  %v367_v45 = vmul.f32 %v2725_v39, %v2725_v39  ;;  %v338_v46 = vmul.f32 0.0078125, %v313_v43  ;;  %v368_v49 = vmul.f32 %v2727_v40, %v2727_v40  ;;  %v2368_v42 = vld [vmem:[%s3859_s3 + $0x4c] ss:$16 sps:$4 sm:$0xff]  }
  0xa9   : > { %v2733_v47 = vsub.f32 %v286_v6, %v337_v44  ;;  %385 = vadd.xlane.f32.xlu1 %v366_v41  ;;  %387 = vadd.xlane.f32.xlu0 %v367_v45  ;;  %v2735_v48 = vsub.f32 %v287_v7, %v338_v46  ;;  %v2365_v41 = vld [vmem:[%s3859_s3 + $0x68] ss:$16 sps:$4 sm:$0xff]   ;;  %v2370_v44 = vld [vmem:[%s3859_s3 + $0x40] ss:$16 sps:$4 sm:$0xff]   ;;  %v2372_v46 = vld [vmem:[%s3859_s3 + $0x24] ss:$16 sps:$4 sm:$0xff]  }
  0xaa   : > { %v315_v50 = vpop.xlane.xlu0 %314  ;;  %v317_v51 = vpop.xlane.xlu1 %316  ;;  %v2371_v45 = vld [vmem:[%s3859_s3 + $0x48] ss:$16 sps:$4 sm:$0xff]  }
  0xab   : > { %v339_v52 = vmul.f32 0.0078125, %v315_v50  ;;  %v369_v53 = vmul.f32 %v2733_v47, %v2733_v47  ;;  %v340_v54 = vmul.f32 0.0078125, %v317_v51  ;;  %v370_v61 = vmul.f32 %v2735_v48, %v2735_v48  ;;  %v2376_v50 = vld [vmem:[%s3859_s3 + $0x20] ss:$16 sps:$4 sm:$0xff]   ;;  %v2377_v51 = vld [vmem:[%s3859_s3 + $0x28] ss:$16 sps:$4 sm:$0xff]  }
  0xad   : > { %v2754_v59 = vsub.f32 %v2668_v8, %v339_v52  ;;  %389 = vadd.xlane.f32.xlu1 %v368_v49  ;;  %391 = vadd.xlane.f32.xlu0 %v369_v53  ;;  %v2757_v60 = vsub.f32 %v2671_v9, %v340_v54  ;;  %v2352_v8 = vld [vmem:[%s3859_s3 + $0xa0] ss:$16 sps:$4 sm:$0xff]   ;;  %v2353_v9 = vld [vmem:[%s3859_s3 + $0xa8] ss:$16 sps:$4 sm:$0xff]   ;;  %v2374_v49 = vld [vmem:[%s3859_s3 + $0x2c] ss:$16 sps:$4 sm:$0xff]  }
  0xae   : > { %v319_v62 = vpop.xlane.xlu0 %318  ;;  %v321_v63 = vpop.xlane.xlu1 %320  ;;  %746 = vmatpush1.bf16.msra.mxu0 %v2352_v8  ;;  %859 = vmatpush1.bf16.msra.mxu1 %v2353_v9  ;;  %v2378_v52 = vld [vmem:[%s3859_s3 + $0x4] ss:$16 sps:$4 sm:$0xff]   ;;  %v2380_v53 = vld [vmem:[%s3859_s3 + $0xc] ss:$16 sps:$4 sm:$0xff]   ;;  %v2382_v54 = vld [vmem:[%s3859_s3] ss:$16 sps:$4 sm:$0xff]  }
  0xaf   : > { %v341_v0 = vmul.f32 0.0078125, %v319_v62  ;;  %v371_v1 = vmul.f32 %v2754_v59, %v2754_v59  ;;  %v342_v2 = vmul.f32 0.0078125, %v321_v63  ;;  %v372_v7 = vmul.f32 %v2757_v60, %v2757_v60  ;;  %747 = vmatprep.subr.bf16.mxu0 %v2354_v19  ;;  %860 = vmatprep.subr.bf16.mxu1 %v2356_v20 }
  0xb1   : > { %v2770_v5 = vsub.f32 %v2674_v10, %v341_v0  ;;  %393 = vadd.xlane.f32.xlu1 %v370_v61  ;;  %395 = vadd.xlane.f32.xlu0 %v371_v1  ;;  %v2773_v6 = vsub.f32 %v2677_v11, %v342_v2 }
  0xb2   : > { %v323_v16 = vpop.xlane.xlu0 %322  ;;  %v325_v17 = vpop.xlane.xlu1 %324  ;;  %748 = vmatpush1.bf16.msra.mxu0 %v2358_v26  ;;  %861 = vmatpush1.bf16.msra.mxu1 %v2359_v27 }
  0xb3   : > { %v343_v10 = vmul.f32 0.0078125, %v323_v16  ;;  %v373_v11 = vmul.f32 %v2770_v5, %v2770_v5  ;;  %v344_v18 = vmul.f32 0.0078125, %v325_v17  ;;  %v374_v23 = vmul.f32 %v2773_v6, %v2773_v6  ;;  %749 = vmatprep.subr.bf16.mxu0 %v2360_v33  ;;  %862 = vmatprep.subr.bf16.mxu1 %v2362_v34 }
  0xb5   : > { %v2792_v21 = vsub.f32 %v2682_v12, %v343_v10  ;;  %397 = vadd.xlane.f32.xlu1 %v372_v7  ;;  %399 = vadd.xlane.f32.xlu0 %v373_v11  ;;  %v2795_v22 = vsub.f32 %v2685_v13, %v344_v18 }
  0xb6   : > { %v327_v28 = vpop.xlane.xlu0 %326  ;;  %v329_v29 = vpop.xlane.xlu1 %328  ;;  %750 = vmatpush1.bf16.msra.mxu0 %v2364_v38  ;;  %863 = vmatpush1.bf16.msra.mxu1 %v2365_v41 }
  0xb7   : > { %v345_v12 = vmul.f32 0.0078125, %v327_v28  ;;  %v375_v13 = vmul.f32 %v2792_v21, %v2792_v21  ;;  %v346_v30 = vmul.f32 0.0078125, %v329_v29  ;;  %v376_v37 = vmul.f32 %v2795_v22, %v2795_v22  ;;  %864 = vmatprep.subr.bf16.mxu1 %v2368_v42  ;;  %v2886_v42 = vld [vmem:[%s3858_s2] ss:$0 sm:$0xff] }
  0xb9   : > { %v2814_v35 = vsub.f32 %v2690_v14, %v345_v12  ;;  %401 = vadd.xlane.f32.xlu1 %v374_v23  ;;  %403 = vadd.xlane.f32.xlu0 %v375_v13  ;;  %v2817_v36 = vsub.f32 %v2693_v15, %v346_v30  ;;  %v2366_v15 = vld [vmem:[%s3859_s3 + $0x44] ss:$16 sps:$4 sm:$0xff]   ;;  %v2879_v13 = vld [vmem:[%s3857_s1] ss:$0 sm:$0xff] }
  0xba   : > { %751 = vmatprep.subr.bf16.mxu0 %v2366_v15  ;;  %865 = vmatpush1.bf16.msra.mxu1 %v2371_v45 }
  0xbb   : > { %v377_v14 = vmul.f32 %v2814_v35, %v2814_v35  ;;  %v378_v43 = vmul.f32 %v2817_v36, %v2817_v36  ;;  %752 = vmatpush1.bf16.msra.mxu0 %v2370_v44  ;;  %866 = vmatprep.subr.bf16.mxu1 %v2374_v49 }
  0xbc   : > { %753 = vmatprep.subr.bf16.mxu0 %v2372_v46 }
  0xbd   : > { %405 = vadd.xlane.f32.xlu1 %v376_v37  ;;  %407 = vadd.xlane.f32.xlu0 %v377_v14 }
  0xbe   : > { %867 = vmatpush1.bf16.msra.mxu1 %v2377_v51 }
  0xbf   : > { %754 = vmatpush1.bf16.msra.mxu0 %v2376_v50  ;;  %868 = vmatprep.subr.bf16.mxu1 %v2380_v53  ;;  %v2385_v53 = vld [vmem:[%s3861_s5 + $0x38] sm:$0xff]  }
  0xc0   : > { %755 = vmatprep.subr.bf16.mxu0 %v2378_v52 }
  0xc1   : > { %409 = vadd.xlane.f32.xlu1 %v378_v43 }
  0xc2   : > { %869 = vmatpush1.bf16.msra.mxu1 %v2383_v55 }
  0xc3   : > { %756 = vmatpush1.bf16.msra.mxu0 %v2382_v54  ;;  %2263 = vmatprep.subr.bf16.mxu1 %v2386_v58  ;;  %v2387_v54 = vld [vmem:[%s3861_s5 + $0xb8] sm:$0xff]  }
  0xc4   : > { %2199 = vmatprep.subr.bf16.mxu0 %v2384_v57 }
 0x12a   : > { %v380_v61 = vpop.xlane.xlu0 %379 }
 0x12b   : > { %v411_v62 = vmul.f32 0.0078125, %v380_v61 }
 0x12d   : > { %v427_v63 = vadd.f32 1e-05, %v411_v62 }
 0x12e   : > { %v382_v0 = vpop.xlane.xlu1 %381  ;;  %v384_v1 = vpop.xlane.xlu0 %383 }
 0x12f   : > { %2416 = vrsqrt.f32 %v427_v63  ;;  %v412_v2 = vmul.f32 0.0078125, %v382_v0  ;;  %v413_v3 = vmul.f32 0.0078125, %v384_v1 }
 0x131   : > { %v428_v4 = vadd.f32 1e-05, %v412_v2  ;;  %v429_v7 = vadd.f32 1e-05, %v413_v3 }
 0x132   : > { %v386_v8 = vpop.xlane.xlu1 %385  ;;  %v388_v9 = vpop.xlane.xlu0 %387 }
 0x133   : > { %2418 = vrsqrt.f32 %v428_v4  ;;  %v414_v16 = vmul.f32 0.0078125, %v386_v8  ;;  %v415_v10 = vmul.f32 0.0078125, %v388_v9  ;;  %v2389_v4 = vld [vmem:[%s3861_s5 + $0x30] sm:$0xff]   ;;  %v2392_v8 = vld [vmem:[%s3861_s5 + $0x68] sm:$0xff]  }
 0x134   : > { %2420 = vrsqrt.f32 %v429_v7  ;;  %v2391_v7 = vld [vmem:[%s3861_s5 + $0xb0] sm:$0xff]  }
 0x135   : > { %v430_v17 = vadd.f32 1e-05, %v414_v16  ;;  %v431_v19 = vadd.f32 1e-05, %v415_v10 }
 0x136   : > { %v390_v11 = vpop.xlane.xlu1 %389  ;;  %v392_v23 = vpop.xlane.xlu0 %391 }
 0x137   : > { %2422 = vrsqrt.f32 %v430_v17  ;;  %v416_v18 = vmul.f32 0.0078125, %v390_v11  ;;  %v417_v29 = vmul.f32 0.0078125, %v392_v23 }
 0x139   : > { %v432_v20 = vadd.f32 1e-05, %v416_v18  ;;  %v433_v34 = vadd.f32 1e-05, %v417_v29 }
 0x13a   : > { %v394_v26 = vpop.xlane.xlu1 %393  ;;  %v396_v38 = vpop.xlane.xlu0 %395 }
 0x13b   : > { %2424 = vrsqrt.f32 %v432_v20  ;;  %v418_v27 = vmul.f32 0.0078125, %v394_v26  ;;  %v419_v45 = vmul.f32 0.0078125, %v396_v38  ;;  %v2395_v20 = vld [vmem:[%s3861_s5 + $0xa8] sm:$0xff]  }
 0x13c   : > { %v2417_v28 = vpop.eup %2416  ;;  %2426 = vrsqrt.f32 %v431_v19  ;;  %v2393_v19 = vld [vmem:[%s3861_s5 + $0x28] sm:$0xff]  }
 0x13d   : > { %v459_v12 = vmul.f32 %v2417_v28, %v2711_v24  ;;  %v434_v30 = vadd.f32 1e-05, %v418_v27  ;;  %v435_v61 = vadd.f32 1e-05, %v419_v45 }
 0x13e   : > { %v398_v37 = vpop.xlane.xlu1 %397  ;;  %v400_v0 = vpop.xlane.xlu0 %399 }
 0x13f   : > { %v481_v14 = vmul.f32 %v2879_v13, %v459_v12  ;;  %2428 = vrsqrt.f32 %v434_v30  ;;  %v420_v24 = vmul.f32 0.0078125, %v398_v37  ;;  %v421_v9 = vmul.f32 0.0078125, %v400_v0 }
 0x140   : > { %v2419_v33 = vpop.eup %2418  ;;  %2430 = vrsqrt.f32 %v433_v34 }
 0x141   : > { %v460_v41 = vmul.f32 %v2419_v33, %v2717_v31  ;;  %v2421_v15 = vpop.eup %2420  ;;  %v503_v46 = vadd.f32 %v2886_v42, %v481_v14  ;;  %v436_v51 = vadd.f32 1e-05, %v420_v24  ;;  %v437_v28 = vadd.f32 1e-05, %v421_v9 }
 0x142   : > { %v461_v31 = vmul.f32 %v2421_v15, %v2713_v25  ;;  %v402_v57 = vpop.xlane.xlu1 %401  ;;  %v2388_v25 = vld [vmem:[%s3861_s5 + $0x70] sm:$0xff]   ;;  %v404_v12 = vpop.xlane.xlu0 %403 }
 0x143   : > { %v482_v43 = vmul.f32 %v2879_v13, %v460_v41  ;;  %2432 = vrsqrt.f32 %v436_v51  ;;  %v422_v1 = vmul.f32 0.0078125, %v402_v57  ;;  %v423_v37 = vmul.f32 0.0078125, %v404_v12  ;;  %v2404_v12 = vld [vmem:[%s3861_s5 + $0x50] sm:$0xff]  }
 0x144   : > { %v2423_v44 = vpop.eup %2422  ;;  %v483_v62 = vmul.f32 %v2879_v13, %v461_v31  ;;  %2434 = vrsqrt.f32 %v435_v61 }
 0x145   : > { %v504_v49 = vadd.f32 %v2886_v42, %v482_v43  ;;  %v462_v50 = vmul.f32 %v2423_v44, %v2719_v32  ;;  %v2390_v32 = vld [vmem:[%s3861_s5 + $0xf0] sm:$0xff]   ;;  %v438_v10 = vadd.f32 1e-05, %v422_v1  ;;  %v439_v45 = vadd.f32 1e-05, %v423_v37  ;;  %v2408_v37 = vld [vmem:[%s3861_s5 + $0x48] sm:$0xff]  }
 0x146   : > { %v505_v16 = vadd.f32 %v2886_v42, %v483_v62  ;;  %v406_v26 = vpop.xlane.xlu1 %405 }
 0x147   : > { %v519_v52 = vpack.c.bf16 %v504_v49, %v503_v46  ;;  %v484_v58 = vmul.f32 %v2879_v13, %v462_v50  ;;  %2436 = vrsqrt.f32 %v438_v10  ;;  %v424_v30 = vmul.f32 0.0078125, %v406_v26  ;;  %v408_v49 = vpop.xlane.xlu0 %407 }
 0x148   : > { %v2425_v55 = vpop.eup %2424  ;;  %2438 = vrsqrt.f32 %v437_v28  ;;  %v425_v51 = vmul.f32 0.0078125, %v408_v49  ;;  %v2402_v28 = vld [vmem:[%s3861_s5 + $0xd8] sm:$0xff]  }
 0x149   : > { %774 = vmatmul.mubr.bf16.vlgmr.msra.gmra.mxu0 %v519_v52  ;;  %887 = vmatmul.mubr.bf16.vlgmr.msra.gmra.mxu1 %v519_v52  ;;  %v2427_v63 = vpop.eup %2426  ;;  %v506_v2 = vadd.f32 %v2886_v42, %v484_v58  ;;  %v464_v3 = vmul.f32 %v2425_v55, %v2727_v40  ;;  %v2394_v40 = vld [vmem:[%s3861_s5 + $0xe8] sm:$0xff]   ;;  %v440_v14 = vadd.f32 1e-05, %v424_v30  ;;  %v2405_v30 = vld [vmem:[%s3861_s5 + $0x10] sm:$0xff]  }
 0x14a   : > { %783 = vmatprep.mubr.bf16.mxu0 %v2600_v56  ;;  %896 = vmatprep.mubr.bf16.mxu1 %v2600_v56  ;;  %v463_v17 = vmul.f32 %v2427_v63, %v2725_v39  ;;  %v2396_v39 = vld [vmem:[%s3861_s5 + $0x60] sm:$0xff]   ;;  %v410_v44 = vpop.xlane.xlu1 %409 }
 0x14b   : > { %2200 = vmatpush3.bf16.msra.mxu0 %v2385_v53  ;;  %2264 = vmatpush3.bf16.msra.mxu1 %v2387_v54  ;;  %v520_v11 = vpack.c.bf16 %v506_v2, %v505_v16  ;;  %v486_v18 = vmul.f32 %v2879_v13, %v464_v3  ;;  %2440 = vrsqrt.f32 %v440_v14  ;;  %v426_v31 = vmul.f32 0.0078125, %v410_v44  ;;  %v2411_v14 = vld [vmem:[%s3861_s5 + $0x88] sm:$0xff]   ;;  %v2415_v44 = vld [vmem:[%s3861_s5 + $0x80] sm:$0xff]  }
 0x14c   : > { %2201 = vmatprep.subr.bf16.mxu0 %v2388_v25  ;;  %2265 = vmatprep.subr.bf16.mxu1 %v2390_v32  ;;  %v2429_v23 = vpop.eup %2428  ;;  %v485_v29 = vmul.f32 %v2879_v13, %v463_v17  ;;  %2442 = vrsqrt.f32 %v439_v45  ;;  %v441_v25 = vadd.f32 1e-05, %v425_v51  ;;  %v561_v45 = vlaneseq }
 0x14d   : > { %v2431_v27 = vpop.eup %2430  ;;  %v508_v33 = vadd.f32 %v2886_v42, %v486_v18  ;;  %v466_v34 = vmul.f32 %v2429_v23, %v2735_v48  ;;  %v442_v54 = vadd.f32 1e-05, %v426_v31  ;;  %v559_v31 = vld [vmem:[%s3860_s4] sm:$0xf] }
 0x14e   : > { %v507_v38 = vadd.f32 %v2886_v42, %v485_v29  ;;  %v465_v41 = vmul.f32 %v2431_v27, %v2733_v47  ;;  %v2398_v27 = vld [vmem:[%s3861_s5 + $0xe0] sm:$0xff]   ;;  %v2403_v29 = vld [vmem:[%s3861_s5 + $0x98] sm:$0xff]  }
 0x14f   : > { %2202 = vmatpush3.bf16.msra.mxu0 %v2389_v4  ;;  %2266 = vmatpush3.bf16.msra.mxu1 %v2391_v7  ;;  %v488_v24 = vmul.f32 %v2879_v13, %v466_v34  ;;  %2444 = vrsqrt.f32 %v442_v54  ;;  %v2407_v34 = vld [vmem:[%s3861_s5 + $0x90] sm:$0xff]  }
 0x150   : > { %2203 = vmatprep.subr.bf16.mxu0 %v2392_v8  ;;  %2267 = vmatprep.subr.bf16.mxu1 %v2394_v40  ;;  %v521_v15 = vpack.c.bf16 %v508_v33, %v507_v38  ;;  %v2433_v43 = vpop.eup %2432  ;;  %v487_v48 = vmul.f32 %v2879_v13, %v465_v41  ;;  %2446 = vrsqrt.f32 %v441_v25  ;;  %v2406_v33 = vld [vmem:[%s3861_s5 + $0xd0] sm:$0xff]   ;;  %v2409_v38 = vld [vmem:[%s3861_s5 + $0x8] sm:$0xff]  }
 0x151   : > { %784 = vmatmul.mubr.bf16.gmra.mxu0 %v520_v11  ;;  %897 = vmatmul.mubr.bf16.gmra.mxu1 %v520_v11  ;;  %v2435_v46 = vpop.eup %2434  ;;  %v510_v47 = vadd.f32 %v2886_v42, %v488_v24  ;;  %v468_v50 = vmul.f32 %v2433_v43, %v2757_v60  ;;  %v2410_v41 = vld [vmem:[%s3861_s5 + $0xc8] sm:$0xff]   ;;  %v2414_v24 = vld [vmem:[%s3861_s5 + $0xc0] sm:$0xff]  }
 0x152   : > { %793 = vmatprep.mubr.bf16.mxu0 %v2600_v56  ;;  %906 = vmatprep.mubr.bf16.mxu1 %v2600_v56  ;;  %v509_v52 = vadd.f32 %v2886_v42, %v487_v48  ;;  %v467_v53 = vmul.f32 %v2435_v46, %v2754_v59  ;;  %v2413_v43 = vld [vmem:[%s3861_s5] sm:$0xff]   ;;  %v562_v48 = vshrl.u32 %v561_v45, 7 }
 0x153   : > { %2204 = vmatpush3.bf16.msra.mxu0 %v2393_v19  ;;  %2268 = vmatpush3.bf16.msra.mxu1 %v2395_v20  ;;  %v490_v57 = vmul.f32 %v2879_v13, %v468_v50 }
 0x154   : > { %2205 = vmatprep.subr.bf16.mxu0 %v2396_v39  ;;  %v522_v55 = vpack.c.bf16 %v510_v47, %v509_v52  ;;  %v2437_v58 = vpop.eup %2436  ;;  %v489_v32 = vmul.f32 %v2879_v13, %v467_v53  ;;  %2269 = vmatprep.subr.bf16.mxu1 %v2398_v27  ;;  %v563_v46 = vsub.s32 0, %v562_v48  ;;  %v571_v49 = vsub.s32 2, %v562_v48 }
 0x155   : > { %v2439_v61 = vpop.eup %2438  ;;  %v512_v60 = vadd.f32 %v2886_v42, %v490_v57  ;;  %v470_v59 = vmul.f32 %v2437_v58, %v2773_v6  ;;  %v567_v47 = vsub.s32 1, %v562_v48  ;;  %v575_v50 = vsub.s32 3, %v562_v48 }
 0x156   : > { %v511_v62 = vadd.f32 %v2886_v42, %v489_v32  ;;  %v469_v63 = vmul.f32 %v2439_v61, %v2770_v5  ;;  %v3040_v51 = vrot.slane %v559_v31, %v563_v46  ;;  %v3042_v52 = vrot.slane %v559_v31, %v571_v49 }
 0x157   : > { %v492_v1 = vmul.f32 %v2879_v13, %v470_v59  ;;  %v3046_v57 = vrot.slane %v559_v31, %v575_v50 }
 0x158   : > { %v523_v0 = vpack.c.bf16 %v512_v60, %v511_v62  ;;  %v2441_v2 = vpop.eup %2440  ;;  %v491_v3 = vmul.f32 %v2879_v13, %v469_v63 }
 0x159   : > { %794 = vmatmul.mubr.bf16.gmra.mxu0 %v521_v15  ;;  %907 = vmatmul.mubr.bf16.gmra.mxu1 %v521_v15  ;;  %v2443_v4 = vpop.eup %2442  ;;  %v514_v6 = vadd.f32 %v2886_v42, %v492_v1  ;;  %v472_v7 = vmul.f32 %v2441_v2, %v2795_v22  ;;  %v2412_v15 = vld [vmem:[%s3861_s5 + $0x40] sm:$0xff]  }
 0x15a   : > { %803 = vmatprep.mubr.bf16.mxu0 %v2600_v56  ;;  %916 = vmatprep.mubr.bf16.mxu1 %v2600_v56  ;;  %v513_v8 = vadd.f32 %v2886_v42, %v491_v3  ;;  %v471_v5 = vmul.f32 %v2443_v4, %v2792_v21 }
 0x15b   : > { %v494_v9 = vmul.f32 %v2879_v13, %v472_v7 }
 0x15c   : > { %v524_v40 = vpack.c.bf16 %v514_v6, %v513_v8  ;;  %v2445_v16 = vpop.eup %2444  ;;  %v493_v17 = vmul.f32 %v2879_v13, %v471_v5 }
 0x15d   : > { %v2447_v10 = vpop.eup %2446  ;;  %v516_v11 = vadd.f32 %v2886_v42, %v494_v9  ;;  %v474_v22 = vmul.f32 %v2445_v16, %v2817_v36 }
 0x15e   : > { %v515_v18 = vadd.f32 %v2886_v42, %v493_v17  ;;  %v473_v21 = vmul.f32 %v2447_v10, %v2814_v35  ;;  %v2397_v35 = vld [vmem:[%s3861_s5 + $0x20] sm:$0xff]  }
 0x15f   : > { %v496_v20 = vmul.f32 %v2879_v13, %v474_v22  ;;  %2206 = vmatpush3.bf16.msra.mxu0 %v2397_v35 }
 0x160   : > { %v525_v19 = vpack.c.bf16 %v516_v11, %v515_v18  ;;  %v495_v23 = vmul.f32 %v2879_v13, %v473_v21  ;;  %v2399_v13 = vld [vmem:[%s3861_s5 + $0xa0] sm:$0xff]  }
 0x161   : > { %804 = vmatmul.mubr.bf16.gmra.mxu0 %v522_v55  ;;  %917 = vmatmul.mubr.bf16.gmra.mxu1 %v522_v55  ;;  %v518_v26 = vadd.f32 %v2886_v42, %v496_v20  ;;  %v3044_v55 = vrot.slane %v559_v31, %v567_v47 }
 0x162   : > { %813 = vmatprep.mubr.bf16.mxu0 %v2600_v56  ;;  %926 = vmatprep.mubr.bf16.mxu1 %v2600_v56  ;;  %v517_v39 = vadd.f32 %v2886_v42, %v495_v23  ;;  %v2401_v42 = vld [vmem:[%s3861_s5 + $0x18] sm:$0xff]  }
 0x163   : > { %2270 = vmatpush3.bf16.msra.mxu1 %v2399_v13 }
 0x164   : > { %v526_v36 = vpack.c.bf16 %v518_v26, %v517_v39  ;;  %2271 = vmatprep.subr.bf16.mxu1 %v2402_v28 }
 0x167   : > { %2272 = vmatpush3.bf16.msra.mxu1 %v2403_v29 }
 0x168   : > { %2273 = vmatprep.subr.bf16.mxu1 %v2406_v33 }
 0x169   : > { %814 = vmatmul.mubr.bf16.gmra.mxu0 %v523_v0  ;;  %927 = vmatmul.mubr.bf16.gmra.mxu1 %v523_v0 }
 0x16a   : > { %823 = vmatprep.mubr.bf16.mxu0 %v2600_v56  ;;  %936 = vmatprep.mubr.bf16.mxu1 %v2600_v56 }
 0x16b   : > { %2274 = vmatpush3.bf16.msra.mxu1 %v2407_v34 }
 0x16c   : > { %2275 = vmatprep.subr.bf16.mxu1 %v2410_v41 }
 0x16f   : > { %2276 = vmatpush3.bf16.msra.mxu1 %v2411_v14 }
 0x170   : > { %2277 = vmatprep.subr.bf16.mxu1 %v2414_v24 }
 0x171   : > { %824 = vmatmul.mubr.bf16.gmra.mxu0 %v524_v40  ;;  %937 = vmatmul.mubr.bf16.gmra.mxu1 %v524_v40 }
 0x172   : > { %833 = vmatprep.mubr.bf16.mxu0 %v2600_v56  ;;  %946 = vmatprep.mubr.bf16.mxu1 %v2600_v56 }
 0x173   : > { %2278 = vmatpush3.bf16.msra.mxu1 %v2415_v44 }
 0x179   : > { %834 = vmatmul.mubr.bf16.gmra.mxu0 %v525_v19  ;;  %947 = vmatmul.mubr.bf16.gmra.mxu1 %v525_v19 }
 0x17a   : > { %843 = vmatprep.mubr.bf16.mxu0 %v2600_v56  ;;  %956 = vmatprep.mubr.bf16.mxu1 %v2600_v56  ;;  %v2400_v56 = vld [vmem:[%s3861_s5 + $0x58] sm:$0xff]  }
 0x17b   : > { %2207 = vmatprep.subr.bf16.mxu0 %v2400_v56 }
 0x17c   : > { %2208 = vmatpush3.bf16.msra.mxu0 %v2401_v42 }
 0x17d   : > { %2209 = vmatprep.subr.bf16.mxu0 %v2404_v12 }
 0x180   : > { %2210 = vmatpush3.bf16.msra.mxu0 %v2405_v30 }
 0x181   : > { %844 = vmatmul.mubr.bf16.gmra.mxu0 %v526_v36  ;;  %957 = vmatmul.mubr.bf16.gmra.mxu1 %v526_v36 }
 0x182   : > { %2211 = vmatprep.subr.bf16.mxu0 %v2408_v37 }
 0x184   : > { %2212 = vmatpush3.bf16.msra.mxu0 %v2409_v38 }
 0x185   : > { %2213 = vmatprep.subr.bf16.mxu0 %v2412_v15 }
 0x188   : > { %2214 = vmatpush3.bf16.msra.mxu0 %v2413_v43 }
 0x209   : > { %v775_v53 = vpop.f32.mrf.mxu0  ;;  %v888_v54 = vpop.f32.mrf.mxu1 }
 0x20a   : > { %v776_v58 = vadd.f32 %v775_v53, %v3040_v51  ;;  %v889_v25 = vadd.f32 %v888_v54, %v3042_v52 }
 0x20b   : > { %v777_v32 = vpop.f32.mrf.mxu0  ;;  %v890_v61 = vpop.f32.mrf.mxu1 }
 0x20c   : > { %v1031_v60 = vmul.f32 0.044715, %v776_v58  ;;  %v1033_v59 = vmul.f32 0.044715, %v889_v25  ;;  %v3051_v62 = vadd.f32 %v777_v32, %v3044_v55  ;;  %v3054_v63 = vadd.f32 %v890_v61, %v3046_v57 }
 0x20d   : > { %v779_v0 = vpop.f32.mrf.mxu0  ;;  %v892_v1 = vpop.f32.mrf.mxu1  ;;  %v3066_v36 = vmul.f32 0.5, %v776_v58  ;;  %v3068_v13 = vmul.f32 0.5, %v889_v25 }
 0x20e   : > { %v1095_v2 = vmul.f32 %v1031_v60, %v776_v58  ;;  %v1097_v3 = vmul.f32 %v1033_v59, %v889_v25  ;;  %v780_v4 = vadd.f32 %v779_v0, %v3040_v51  ;;  %v893_v6 = vadd.f32 %v892_v1, %v3042_v52 }
 0x20f   : > { %v781_v7 = vpop.f32.mrf.mxu0  ;;  %v894_v8 = vpop.f32.mrf.mxu1  ;;  %v1032_v16 = vmul.f32 0.044715, %v3051_v62  ;;  %v1034_v18 = vmul.f32 0.044715, %v3054_v63  ;;  %v3077_v37 = vmul.f32 0.5, %v3051_v62  ;;  %v3087_v43 = vmul.f32 0.5, %v3054_v63 }
 0x210   : > { %v1159_v5 = vmul.f32 %v1095_v2, %v776_v58  ;;  %v1161_v40 = vmul.f32 %v1097_v3, %v889_v25  ;;  %v1035_v9 = vmul.f32 0.044715, %v780_v4  ;;  %v1037_v17 = vmul.f32 0.044715, %v893_v6 }
 0x211   : > { %v785_v10 = vpop.f32.mrf.mxu0  ;;  %v898_v11 = vpop.f32.mrf.mxu1  ;;  %v3061_v19 = vadd.f32 %v781_v7, %v3044_v55  ;;  %v3064_v23 = vadd.f32 %v894_v8, %v3046_v57  ;;  %v1096_v56 = vmul.f32 %v1032_v16, %v3051_v62  ;;  %v1098_v33 = vmul.f32 %v1034_v18, %v3054_v63  ;;  %3919 = vst [vmem:[#allocation3_spill] sm:$0xff] %v3077_v37 }
 0x212   : > { %v1223_v22 = vadd.f32 %v1159_v5, %v776_v58  ;;  %v1099_v21 = vmul.f32 %v1035_v9, %v780_v4  ;;  %v1101_v20 = vmul.f32 %v1037_v17, %v893_v6  ;;  %v1225_v35 = vadd.f32 %v1161_v40, %v889_v25  ;;  %3921 = vst [vmem:[#allocation5_spill] sm:$0xff] %v3087_v43 }
 0x213   : > { %v787_v26 = vpop.f32.mrf.mxu0  ;;  %v900_v39 = vpop.f32.mrf.mxu1  ;;  %v1036_v28 = vmul.f32 0.044715, %v3061_v19  ;;  %v3074_v34 = vadd.f32 %v785_v10, %v3040_v51  ;;  %v1038_v38 = vmul.f32 0.044715, %v3064_v23  ;;  %v3081_v41 = vadd.f32 %v898_v11, %v3042_v52 }
 0x214   : > { %v1163_v27 = vmul.f32 %v1099_v21, %v780_v4  ;;  %v1165_v42 = vmul.f32 %v1101_v20, %v893_v6  ;;  %v1287_v30 = vmul.f32 0.7978846, %v1223_v22  ;;  %v3084_v14 = vadd.f32 %v787_v26, %v3044_v55 }
 0x215   : > { %v789_v29 = vpop.f32.mrf.mxu0  ;;  %v902_v12 = vpop.f32.mrf.mxu1  ;;  %3918 = vst [vmem:[#allocation2_spill] sm:$0xff] %v3074_v34  ;;  %3920 = vst [vmem:[#allocation4_spill] sm:$0xff] %v3081_v41  ;;  %v1289_v44 = vmul.f32 0.7978846, %v1225_v35  ;;  %v3089_v45 = vmul.f32 0.5, %v780_v4  ;;  %v3091_v46 = vmul.f32 0.5, %v893_v6  ;;  %v3094_v49 = vmul.f32 %v1096_v56, %v3051_v62 }
 0x216   : > { %v1227_v48 = vadd.f32 %v1163_v27, %v780_v4  ;;  %v1229_v31 = vadd.f32 %v1165_v42, %v893_v6  ;;  %v1100_v47 = vmul.f32 %v1036_v28, %v3061_v19  ;;  %v3098_v50 = vadd.f32 %v900_v39, %v3046_v57 }
 0x217   : > { %v791_v15 = vpop.f32.mrf.mxu0  ;;  %v904_v24 = vpop.f32.mrf.mxu1  ;;  %2448 = vtanh.f32 %v1287_v30  ;;  %v3101_v58 = vmul.f32 %v1098_v33, %v3054_v63  ;;  %v1039_v25 = vmul.f32 0.044715, %v3074_v34  ;;  %v3105_v32 = vadd.f32 %v789_v29, %v3040_v51 }
 0x218   : > { %3922 = vst [vmem:[#allocation6_spill] sm:$0xff] %v3098_v50  ;;  %v1102_v61 = vmul.f32 %v1038_v38, %v3064_v23  ;;  %v1041_v60 = vmul.f32 0.044715, %v3081_v41  ;;  %v1040_v59 = vmul.f32 0.044715, %v3084_v14  ;;  %v3111_v0 = vadd.f32 %v902_v12, %v3042_v52 }
 0x219   : > { %v795_v53 = vpop.f32.mrf.mxu0  ;;  %v908_v54 = vpop.f32.mrf.mxu1  ;;  %3923 = vst [vmem:[#allocation7_spill] sm:$0xff] %v3105_v32  ;;  %2450 = vtanh.f32 %v1289_v44  ;;  %v1291_v3 = vmul.f32 0.7978846, %v1227_v48  ;;  %v1042_v4 = vmul.f32 0.044715, %v3098_v50  ;;  %v3115_v6 = vadd.f32 %v791_v15, %v3044_v55 }
 0x21a   : > { %3924 = vst [vmem:[#allocation8_spill] sm:$0xff] %v3111_v0  ;;  %v1293_v7 = vmul.f32 0.7978846, %v1229_v31  ;;  %v3118_v8 = vmul.f32 %v1100_v47, %v3061_v19  ;;  %v3121_v5 = vadd.f32 %v904_v24, %v3046_v57  ;;  %v3124_v40 = vadd.f32 %v795_v53, %v3040_v51 }
 0x21b   : > { %v797_v1 = vpop.f32.mrf.mxu0  ;;  %v910_v2 = vpop.f32.mrf.mxu1  ;;  %v1103_v17 = vmul.f32 %v1039_v25, %v3074_v34  ;;  %v1043_v10 = vmul.f32 0.044715, %v3105_v32  ;;  %v3129_v11 = vadd.f32 %v908_v54, %v3042_v52  ;;  %v3135_v18 = vmul.f32 %v1102_v61, %v3064_v23 }
 0x21c   : > { %3925 = vst [vmem:[#allocation9_spill] sm:$0xff] %v3121_v5  ;;  %3926 = vst [vmem:[#allocation10_spill] sm:$0xff] %v3124_v40  ;;  %v3132_v22 = vadd.f32 %v797_v1, %v3044_v55  ;;  %v1105_v21 = vmul.f32 %v1041_v60, %v3081_v41  ;;  %v1104_v20 = vmul.f32 %v1040_v59, %v3084_v14  ;;  %v1045_v26 = vmul.f32 0.044715, %v3111_v0 }
 0x21d   : > { %v799_v9 = vpop.f32.mrf.mxu0  ;;  %v912_v16 = vpop.f32.mrf.mxu1  ;;  %3927 = vst [vmem:[#allocation11_spill] sm:$0xff] %v3129_v11  ;;  %2452 = vtanh.f32 %v1291_v3  ;;  %v1106_v27 = vmul.f32 %v1042_v4, %v3098_v50  ;;  %v1044_v56 = vmul.f32 0.044715, %v3115_v6  ;;  %v1046_v42 = vmul.f32 0.044715, %v3121_v5 }
 0x21e   : > { %3928 = vst [vmem:[#allocation12_spill] sm:$0xff] %v3132_v22  ;;  %2454 = vtanh.f32 %v1293_v7  ;;  %v1047_v28 = vmul.f32 0.044715, %v3124_v40  ;;  %v1049_v29 = vmul.f32 0.044715, %v3129_v11  ;;  %v3147_v38 = vmul.f32 %v1103_v17, %v3074_v34 }
 0x21f   : > { %v801_v39 = vpop.f32.mrf.mxu0  ;;  %v914_v35 = vpop.f32.mrf.mxu1  ;;  %v1048_v12 = vmul.f32 0.044715, %v3132_v22  ;;  %v1107_v15 = vmul.f32 %v1043_v10, %v3105_v32  ;;  %v3151_v24 = vadd.f32 %v910_v2, %v3046_v57  ;;  %v3154_v44 = vadd.f32 %v799_v9, %v3040_v51 }
 0x220   : > { %3929 = vst [vmem:[#allocation13_spill] sm:$0xff] %v3147_v38  ;;  %v3157_v48 = vmul.f32 %v1105_v21, %v3081_v41  ;;  %v3160_v31 = vmul.f32 %v1104_v20, %v3084_v14  ;;  %v1109_v47 = vmul.f32 %v1045_v26, %v3111_v0  ;;  %v3164_v53 = vadd.f32 %v912_v16, %v3042_v52 }
 0x221   : > { %v805_v30 = vpop.f32.mrf.mxu0  ;;  %v918_v33 = vpop.f32.mrf.mxu1  ;;  %3930 = vst [vmem:[#allocation14_spill] sm:$0xff] %v3151_v24  ;;  %v3167_v61 = vmul.f32 %v1106_v27, %v3098_v50  ;;  %v1108_v60 = vmul.f32 %v1044_v56, %v3115_v6  ;;  %v1110_v59 = vmul.f32 %v1046_v42, %v3121_v5  ;;  %v3172_v1 = vadd.f32 %v801_v39, %v3044_v55 }
 0x222   : > { %3931 = vst [vmem:[#allocation15_spill] sm:$0xff] %v3157_v48  ;;  %v1111_v2 = vmul.f32 %v1047_v28, %v3124_v40  ;;  %v1113_v3 = vmul.f32 %v1049_v29, %v3129_v11  ;;  %v1112_v4 = vmul.f32 %v1048_v12, %v3132_v22  ;;  %v3178_v7 = vadd.f32 %v914_v35, %v3046_v57 }
 0x223   : > { %v807_v54 = vpop.f32.mrf.mxu0  ;;  %v920_v25 = vpop.f32.mrf.mxu1  ;;  %3932 = vst [vmem:[#allocation16_spill] sm:$0xff] %v3167_v61  ;;  %v3181_v17 = vmul.f32 %v1107_v15, %v3105_v32  ;;  %v1050_v10 = vmul.f32 0.044715, %v3151_v24  ;;  %v1051_v21 = vmul.f32 0.044715, %v3154_v44  ;;  %v3186_v20 = vadd.f32 %v805_v30, %v3040_v51 }
 0x224   : > { %v3188_v26 = vpop.eup %2448  ;;  %v3191_v39 = vmul.f32 %v1109_v47, %v3111_v0  ;;  %v1053_v35 = vmul.f32 0.044715, %v3164_v53  ;;  %v1052_v27 = vmul.f32 0.044715, %v3172_v1  ;;  %v3196_v56 = vadd.f32 %v918_v33, %v3042_v52 }
 0x225   : > { %v809_v9 = vpop.f32.mrf.mxu0  ;;  %v922_v16 = vpop.f32.mrf.mxu1  ;;  %3933 = vst [vmem:[#allocation17_spill] sm:$0xff] %v3181_v17  ;;  %v3199_v29 = vmul.f32 %v1108_v60, %v3115_v6  ;;  %v3202_v12 = vmul.f32 %v1110_v59, %v3121_v5  ;;  %v1054_v30 = vmul.f32 0.044715, %v3178_v7  ;;  %v3206_v15 = vadd.f32 %v807_v54, %v3044_v55 }
 0x226   : > { %3934 = vst [vmem:[#allocation18_spill] sm:$0xff] %v3191_v39  ;;  %v3208_v47 = vpop.eup %2450  ;;  %v3211_v39 = vmul.f32 %v1111_v2, %v3124_v40  ;;  %v3214_v33 = vmul.f32 %v1113_v3, %v3129_v11  ;;  %v3217_v0 = vmul.f32 %v1112_v4, %v3132_v22  ;;  %v3220_v60 = vadd.f32 %v920_v25, %v3046_v57 }
 0x227   : > { %v811_v42 = vpop.f32.mrf.mxu0  ;;  %v924_v28 = vpop.f32.mrf.mxu1  ;;  %3935 = vst [vmem:[#allocation19_spill] sm:$0xff] %v3199_v29  ;;  %3936 = vst [vmem:[#allocation20_spill] sm:$0xff] %v3202_v12  ;;  %v1114_v41 = vmul.f32 %v1050_v10, %v3151_v24  ;;  %v1115_v54 = vmul.f32 %v1051_v21, %v3154_v44  ;;  %v1055_v17 = vmul.f32 0.044715, %v3186_v20  ;;  %v3226_v2 = vadd.f32 %v809_v9, %v3040_v51 }
 0x228   : > { %3937 = vst [vmem:[#allocation21_spill] sm:$0xff] %v3211_v39  ;;  %3938 = vst [vmem:[#allocation22_spill] sm:$0xff] %v3214_v33  ;;  %v1117_v3 = vmul.f32 %v1053_v35, %v3164_v53  ;;  %v1116_v33 = vmul.f32 %v1052_v27, %v3172_v1  ;;  %v1057_v4 = vmul.f32 0.044715, %v3196_v56  ;;  %v3232_v25 = vadd.f32 %v922_v16, %v3042_v52 }
 0x229   : > { %3939 = vst [vmem:[#allocation23_spill] sm:$0xff] %v3217_v0  ;;  %v815_v59 = vpop.f32.mrf.mxu0  ;;  %v928_v48 = vpop.f32.mrf.mxu1  ;;  %v1118_v10 = vmul.f32 %v1054_v30, %v3178_v7  ;;  %v1056_v21 = vmul.f32 0.044715, %v3206_v15  ;;  %v1058_v40 = vmul.f32 0.044715, %v3220_v60  ;;  %v3238_v9 = vadd.f32 %v811_v42, %v3044_v55 }
 0x22a   : > { %3940 = vst [vmem:[#allocation24_spill] sm:$0xff] %v3232_v25  ;;  %v3240_v0 = vpop.eup %2452  ;;  %v1059_v35 = vmul.f32 0.044715, %v3226_v2  ;;  %v1061_v27 = vmul.f32 0.044715, %v3232_v25  ;;  %v3245_v16 = vadd.f32 %v924_v28, %v3046_v57  ;;  %v3248_v22 = vadd.f32 %v815_v59, %v3040_v51 }
 0x22b   : > { %v817_v11 = vpop.f32.mrf.mxu0  ;;  %v930_v39 = vpop.f32.mrf.mxu1  ;;  %v1119_v38 = vmul.f32 %v1055_v17, %v3186_v20  ;;  %v1060_v42 = vmul.f32 0.044715, %v3238_v9  ;;  %v3255_v34 = vadd.f32 %v928_v48, %v3042_v52  ;;  %v3261_v37 = vmul.f32 %v1114_v41, %v3151_v24 }
 0x22c   : > { %3941 = vst [vmem:[#allocation25_spill] sm:$0xff] %v3248_v22  ;;  %v3250_v32 = vpop.eup %2454  ;;  %v3258_v43 = vadd.f32 %v817_v11, %v3044_v55  ;;  %v1121_v28 = vmul.f32 %v1057_v4, %v3196_v56  ;;  %v1062_v59 = vmul.f32 0.044715, %v3245_v16  ;;  %v1063_v12 = vmul.f32 0.044715, %v3248_v22 }
 0x22d   : > { %v819_v30 = vpop.f32.mrf.mxu0  ;;  %3942 = vst [vmem:[#allocation26_spill] sm:$0xff] %v3255_v34  ;;  %3944 = vst [vmem:[#allocation28_spill] sm:$0xff] %v3261_v37  ;;  %v932_v5 = vpop.f32.mrf.mxu1  ;;  %v1120_v17 = vmul.f32 %v1056_v21, %v3206_v15  ;;  %v1122_v61 = vmul.f32 %v1058_v40, %v3220_v60  ;;  %v1065_v48 = vmul.f32 0.044715, %v3255_v34  ;;  %v3271_v11 = vmul.f32 %v1115_v54, %v3154_v44 }
 0x22e   : > { %3943 = vst [vmem:[#allocation27_spill] sm:$0xff] %v3258_v43  ;;  %v1064_v50 = vmul.f32 0.044715, %v3258_v43  ;;  %v3274_v41 = vmul.f32 %v1117_v3, %v3164_v53  ;;  %v1123_v4 = vmul.f32 %v1059_v35, %v3226_v2  ;;  %v1125_v37 = vmul.f32 %v1061_v27, %v3232_v25 }
 0x22f   : > { %3945 = vst [vmem:[#allocation29_spill] sm:$0xff] %v3271_v11  ;;  %v821_v24 = vpop.f32.mrf.mxu0  ;;  %v3279_v29 = vmul.f32 %v1116_v33, %v3172_v1  ;;  %v3282_v40 = vmul.f32 %v1118_v10, %v3178_v7  ;;  %v3285_v21 = vmul.f32 %v1119_v38, %v3186_v20  ;;  %v1124_v54 = vmul.f32 %v1060_v42, %v3238_v9  ;;  %v934_v33 = vpop.f32.mrf.mxu1 }
 0x230   : > { %3946 = vst [vmem:[#allocation30_spill] sm:$0xff] %v3274_v41  ;;  %v3289_v11 = vmul.f32 %v1121_v28, %v3196_v56  ;;  %v1126_v3 = vmul.f32 %v1062_v59, %v3245_v16  ;;  %v1127_v35 = vmul.f32 %v1063_v12, %v3248_v22  ;;  %v3294_v27 = vadd.f32 %v930_v39, %v3046_v57 }
 0x231   : > { %v3297_v41 = vmul.f32 %v1120_v17, %v3206_v15  ;;  %v3300_v10 = vmul.f32 %v1122_v61, %v3220_v60  ;;  %v1129_v38 = vmul.f32 %v1065_v48, %v3255_v34  ;;  %v1128_v42 = vmul.f32 %v1064_v50, %v3258_v43  ;;  %v825_v17 = vpop.f32.mrf.mxu0 }
 0x232   : > { %3947 = vst [vmem:[#allocation31_spill] sm:$0xff] %v3289_v11  ;;  %3948 = vst [vmem:[#allocation32_spill] sm:$0xff] %v3294_v27  ;;  %v3305_v28 = vmul.f32 %v1123_v4, %v3226_v2  ;;  %v3308_v59 = vmul.f32 %v1125_v37, %v3232_v25  ;;  %v3311_v39 = vadd.f32 %v819_v30, %v3040_v51 }
 0x233   : > { %v3314_v12 = vadd.f32 %v932_v5, %v3042_v52  ;;  %v3317_v61 = vmul.f32 %v1124_v54, %v3238_v9  ;;  %v3320_v48 = vadd.f32 %v821_v24, %v3044_v55  ;;  %v1224_v50 = vadd.f32 %v3094_v49, %v3051_v62 }
 0x234   : > { %3949 = vst [vmem:[#allocation33_spill] sm:$0xff] %v3308_v59  ;;  %3950 = vst [vmem:[#allocation34_spill] sm:$0xff] %v3311_v39  ;;  %v1228_v37 = vadd.f32 %v3118_v8, %v3061_v19  ;;  %v3327_v4 = vmul.f32 %v1126_v3, %v3245_v16  ;;  %v3330_v30 = vmul.f32 %v1127_v35, %v3248_v22  ;;  %v1066_v5 = vmul.f32 0.044715, %v3294_v27  ;;  %v938_v59 = vpop.f32.mrf.mxu1 }
 0x235   : > { %3951 = vst [vmem:[#allocation35_spill] sm:$0xff] %v3314_v12  ;;  %v3334_v54 = vadd.f32 %v934_v33, %v3046_v57  ;;  %v3337_v24 = vmul.f32 %v1129_v38, %v3255_v34  ;;  %v3340_v62 = vmul.f32 %v1128_v42, %v3258_v43  ;;  %v1288_v49 = vmul.f32 0.7978846, %v1224_v50 }
 0x236   : > { %3952 = vst [vmem:[#allocation36_spill] sm:$0xff] %v3330_v30  ;;  %v1292_v8 = vmul.f32 0.7978846, %v1228_v37  ;;  %v1067_v3 = vmul.f32 0.044715, %v3311_v39  ;;  %v1226_v35 = vadd.f32 %v3101_v58, %v3054_v63  ;;  %v1230_v33 = vadd.f32 %v3135_v18, %v3064_v23  ;;  %v827_v30 = vpop.f32.mrf.mxu0  ;;  %v940_v34 = vpop.f32.mrf.mxu1 }
 0x237   : > { %3953 = vst [vmem:[#allocation37_spill] sm:$0xff] %v3334_v54  ;;  %3954 = vst [vmem:[#allocation38_spill] sm:$0xff] %v3337_v24  ;;  %v1069_v25 = vmul.f32 0.044715, %v3314_v12  ;;  %v1068_v22 = vmul.f32 0.044715, %v3320_v48  ;;  %2456 = vtanh.f32 %v1288_v49  ;;  %v3350_v38 = vadd.f32 %v825_v17, %v3040_v51 }
 0x238   : > { %3955 = vst [vmem:[#allocation39_spill] sm:$0xff] %v3340_v62  ;;  %v3353_v42 = vadd.f32 %v938_v59, %v3042_v52  ;;  %v1070_v50 = vmul.f32 0.044715, %v3334_v54  ;;  %2458 = vtanh.f32 %v1292_v8  ;;  %v1290_v37 = vmul.f32 0.7978846, %v1226_v35  ;;  %v829_v8 = vpop.f32.mrf.mxu0 }
 0x239   : > { %3956 = vst [vmem:[#allocation40_spill] sm:$0xff] %v3350_v38  ;;  %v1294_v24 = vmul.f32 0.7978846, %v1230_v33  ;;  %v1130_v63 = vmul.f32 %v1066_v5, %v3294_v27  ;;  %v3358_v58 = vmul.f32 0.5, %v3061_v19  ;;  %v1071_v18 = vmul.f32 0.044715, %v3350_v38 }
 0x23a   : > { %3957 = vst [vmem:[#allocation41_spill] sm:$0xff] %v3353_v42  ;;  %v1073_v49 = vmul.f32 0.044715, %v3353_v42  ;;  %v1131_v17 = vmul.f32 %v1067_v3, %v3311_v39  ;;  %2460 = vtanh.f32 %v1290_v37  ;;  %v1419_v59 = vadd.f32 1.0, %v3240_v0  ;;  %v942_v0 = vpop.f32.mrf.mxu1 }
 0x23b   : > { %v3365_v62 = vadd.f32 %v827_v30, %v3044_v55  ;;  %v1133_v35 = vmul.f32 %v1069_v25, %v3314_v12  ;;  %v1132_v5 = vmul.f32 %v1068_v22, %v3320_v48  ;;  %2462 = vtanh.f32 %v1294_v24 }
 0x23c   : > { %v1421_v19 = vadd.f32 1.0, %v3250_v32  ;;  %v1134_v33 = vmul.f32 %v1070_v50, %v3334_v54  ;;  %v1415_v43 = vadd.f32 1.0, %v3188_v26  ;;  %v1417_v3 = vadd.f32 1.0, %v3208_v47 }
 0x23d   : > { %3958 = vst [vmem:[#allocation42_spill] sm:$0xff] %v3365_v62  ;;  %v1072_v37 = vmul.f32 0.044715, %v3365_v62  ;;  %v1135_v30 = vmul.f32 %v1071_v18, %v3350_v38  ;;  %v1137_v11 = vmul.f32 %v1073_v49, %v3353_v42  ;;  %v3377_v25 = vadd.f32 %v940_v34, %v3046_v57 }
 0x23e   : > { %v3380_v22 = vadd.f32 %v829_v8, %v3040_v51  ;;  %v3383_v32 = vmul.f32 %v1130_v63, %v3294_v27  ;;  %v3386_v26 = vmul.f32 %v1131_v17, %v3311_v39  ;;  %v974_v47 = vmul.f32 0.5, %v3064_v23  ;;  %v831_v63 = vpop.f32.mrf.mxu0  ;;  %v944_v8 = vpop.f32.mrf.mxu1  ;;  %v3975_v39 = vld [vmem:[#allocation3_spill] sm:$0xff] }
 0x23f   : > { %v3390_v24 = vmul.f32 %v1419_v59, %v3089_v45  ;;  %v3393_v50 = vmul.f32 %v1133_v35, %v3314_v12  ;;  %v3396_v34 = vmul.f32 %v1421_v19, %v3091_v46  ;;  %v1136_v18 = vmul.f32 %v1072_v37, %v3365_v62  ;;  %v3972_v12 = vld [vmem:[#allocation9_spill] sm:$0xff] }
 0x240   : > { %3959 = vst [vmem:[#allocation43_spill] sm:$0xff] %v3380_v22  ;;  %3960 = vst [vmem:[#allocation44_spill] sm:$0xff] %v3383_v32  ;;  %v3400_v49 = vadd.f32 %v942_v0, %v3042_v52  ;;  %v3403_v17 = vmul.f32 %v1132_v5, %v3320_v48  ;;  %v3406_v23 = vmul.f32 %v1134_v33, %v3334_v54  ;;  %v1074_v19 = vmul.f32 0.044715, %v3377_v25 }
 0x241   : > { %3961 = vst [vmem:[#allocation45_spill] sm:$0xff] %v3386_v26  ;;  %3962 = vst [vmem:[#allocation46_spill] sm:$0xff] %v3393_v50  ;;  %v1479_v45 = vmul.f32 %v1415_v43, %v3066_v36  ;;  %v3410_v59 = vmul.f32 %v1417_v3, %v3068_v13  ;;  %v3413_v46 = vmul.f32 %v1135_v30, %v3350_v38  ;;  %v1075_v5 = vmul.f32 0.044715, %v3380_v22  ;;  %v3968_v13 = vld [vmem:[#allocation19_spill] sm:$0xff]  ;;  %v3970_v38 = vld [vmem:[#allocation6_spill] sm:$0xff] }
 0x242   : > { %3963 = vst [vmem:[#allocation47_spill] sm:$0xff] %v3400_v49  ;;  %3964 = vst [vmem:[#allocation48_spill] sm:$0xff] %v3403_v17  ;;  %v3416_v35 = vmul.f32 %v1137_v11, %v3353_v42  ;;  %v3422_v33 = vadd.f32 %v831_v63, %v3044_v55  ;;  %v1232_v36 = vadd.f32 %v3160_v31, %v3084_v14  ;;  %v1077_v0 = vmul.f32 0.044715, %v3400_v49 }
 0x243   : > { %3965 = vst [vmem:[#allocation49_spill] sm:$0xff] %v3406_v23  ;;  %3966 = vst [vmem:[#allocation50_spill] sm:$0xff] %v3413_v46  ;;  %v1543_v37 = vpack.c.bf16 %v3390_v24, %v1479_v45  ;;  %v1236_v43 = vadd.f32 %v3968_v13, %v3115_v6  ;;  %v3431_v11 = vmul.f32 %v1136_v18, %v3365_v62  ;;  %v3438_v63 = vmul.f32 0.5, %v3084_v14  ;;  %v948_v62 = vpop.f32.mrf.mxu1 }
 0x244   : > { %3967 = vst [vmem:[#allocation51_spill] sm:$0xff] %v3416_v35  ;;  %v3435_v30 = vadd.f32 %v944_v8, %v3046_v57  ;;  %v2457_v24 = vpop.eup %2456  ;;  %v3441_v31 = vmul.f32 0.5, %v3115_v6  ;;  %v1296_v45 = vmul.f32 0.7978846, %v1232_v36  ;;  %v835_v35 = vpop.f32.mrf.mxu0  ;;  %v1138_v18 = vmul.f32 %v1074_v19, %v3377_v25  ;;  %v3973_v6 = vld [vmem:[#allocation20_spill] sm:$0xff] }
 0x245   : > { %3969 = vst [vmem:[#allocation19_spill] sm:$0xff] %v3431_v11  ;;  %v1300_v13 = vmul.f32 0.7978846, %v1236_v43  ;;  %v2459_v42 = vpop.eup %2458  ;;  %v1416_v3 = vadd.f32 1.0, %v2457_v24  ;;  %v1139_v46 = vmul.f32 %v1075_v5, %v3380_v22  ;;  %v3971_v11 = vld [vmem:[#allocation16_spill] sm:$0xff]  ;;  %v1238_v26 = vadd.f32 %v3973_v6, %v3972_v12 }
 0x246   : > { %v1234_v8 = vadd.f32 %v3971_v11, %v3970_v38  ;;  %v1420_v50 = vadd.f32 1.0, %v2459_v42  ;;  %v1076_v14 = vmul.f32 0.044715, %v3422_v33  ;;  %2464 = vtanh.f32 %v1296_v45  ;;  %v837_v32 = vpop.f32.mrf.mxu0 }
 0x247   : > { %v2461_v36 = vpop.eup %2460  ;;  %v1078_v43 = vmul.f32 0.044715, %v3435_v30  ;;  %2466 = vtanh.f32 %v1300_v13  ;;  %v3452_v19 = vadd.f32 %v835_v35, %v3040_v51  ;;  %v1480_v23 = vmul.f32 %v1416_v3, %v3975_v39  ;;  %v950_v13 = vpop.f32.mrf.mxu1  ;;  %v3978_v39 = vld [vmem:[#allocation5_spill] sm:$0xff]  ;;  %v3979_v3 = vld [vmem:[#allocation2_spill] sm:$0xff] }
 0x248   : > { %v1298_v24 = vmul.f32 0.7978846, %v1234_v8  ;;  %v2463_v5 = vpop.eup %2462  ;;  %v1484_v11 = vmul.f32 %v1420_v50, %v3358_v58  ;;  %v1418_v42 = vadd.f32 1.0, %v2461_v36  ;;  %v1302_v54 = vmul.f32 0.7978846, %v1238_v26 }
 0x249   : > { %3974 = vst [vmem:[#allocation6_spill] sm:$0xff] %v3452_v19  ;;  %v1422_v45 = vadd.f32 1.0, %v2463_v5  ;;  %v1141_v27 = vmul.f32 %v1077_v0, %v3400_v49  ;;  %v3458_v6 = vadd.f32 %v948_v62, %v3042_v52  ;;  %v3461_v35 = vmul.f32 %v1138_v18, %v3377_v25  ;;  %v3980_v0 = vld [vmem:[#allocation13_spill] sm:$0xff] }
 0x24a   : > { %2468 = vtanh.f32 %v1298_v24  ;;  %v1544_v8 = vpack.c.bf16 %v1484_v11, %v1480_v23  ;;  %v3464_v17 = vmul.f32 0.5, %v3970_v38  ;;  %v1482_v58 = vmul.f32 %v1418_v42, %v3978_v39  ;;  %v3982_v24 = vld [vmem:[#allocation7_spill] sm:$0xff]  ;;  %v3983_v38 = vld [vmem:[#allocation17_spill] sm:$0xff] }
 0x24b   : > { %3976 = vst [vmem:[#allocation16_spill] sm:$0xff] %v3458_v6  ;;  %3977 = vst [vmem:[#allocation9_spill] sm:$0xff] %v3461_v35  ;;  %2470 = vtanh.f32 %v1302_v54  ;;  %v1486_v26 = vmul.f32 %v1422_v45, %v974_v47  ;;  %v1079_v50 = vmul.f32 0.044715, %v3452_v19  ;;  %v1231_v36 = vadd.f32 %v3980_v0, %v3979_v3  ;;  %v839_v54 = vpop.f32.mrf.mxu0  ;;  %v3984_v45 = vld [vmem:[#allocation4_spill] sm:$0xff]  ;;  %v3985_v39 = vld [vmem:[#allocation15_spill] sm:$0xff] }
 0x24c   : > { %1870 = vmatprep.mubr.bf16.mxu0 %v1544_v8  ;;  %v3471_v62 = vmul.f32 %v1139_v46, %v3380_v22  ;;  %v1140_v23 = vmul.f32 %v1076_v14, %v3422_v33  ;;  %v1142_v18 = vmul.f32 %v1078_v43, %v3435_v30  ;;  %v1235_v5 = vadd.f32 %v3983_v38, %v3982_v24  ;;  %v952_v8 = vpop.f32.mrf.mxu1  ;;  %v3986_v46 = vld [vmem:[#allocation8_spill] sm:$0xff] }
 0x24d   : > { %v1546_v11 = vpack.c.bf16 %v1486_v26, %v1482_v58  ;;  %1871 = vmatmul.mubr.bf16.vlgmr.msra.gmra.mxu0 %v1543_v37  ;;  %v1081_v47 = vmul.f32 0.044715, %v3458_v6  ;;  %v1295_v42 = vmul.f32 0.7978846, %v1231_v36  ;;  %v1233_v0 = vadd.f32 %v3985_v39, %v3984_v45 }
 0x24e   : > { %3981 = vst [vmem:[#allocation20_spill] sm:$0xff] %v3471_v62  ;;  %v1299_v35 = vmul.f32 0.7978846, %v1235_v5  ;;  %v3987_v62 = vld [vmem:[#allocation18_spill] sm:$0xff]  ;;  %v3483_v14 = vadd.f32 %v837_v32, %v3044_v55  ;;  %v3486_v43 = vadd.f32 %v950_v13, %v3046_v57  ;;  %v1143_v37 = vmul.f32 %v1079_v50, %v3452_v19 }
 0x24f   : > { %v1237_v22 = vadd.f32 %v3987_v62, %v3986_v46  ;;  %1967 = vmatprep.mubr.bf16.mxu1 %v1546_v11  ;;  %2472 = vtanh.f32 %v1295_v42  ;;  %v1297_v58 = vmul.f32 0.7978846, %v1233_v0  ;;  %v3490_v26 = vadd.f32 %v839_v54, %v3040_v51  ;;  %v841_v54 = vpop.f32.mrf.mxu0 }
 0x250   : > { %3988 = vst [vmem:[#allocation3_spill] sm:$0xff] %v3486_v43  ;;  %v3990_v36 = vpack.c.bf16 %v3396_v34, %v3410_v59  ;;  %v3496_v62 = vmul.f32 %v1141_v27, %v3400_v49  ;;  %2474 = vtanh.f32 %v1299_v35  ;;  %v3499_v13 = vadd.f32 %v952_v8, %v3042_v52 }
 0x251   : > { %3989 = vst [vmem:[#allocation5_spill] sm:$0xff] %v3490_v26  ;;  %v1301_v32 = vmul.f32 0.7978846, %v1237_v22  ;;  %v982_v38 = vmul.f32 0.5, %v3972_v12  ;;  %v1145_v50 = vmul.f32 %v1081_v47, %v3458_v6  ;;  %2476 = vtanh.f32 %v1297_v58 }
 0x252   : > { %1968 = vmatmul.mubr.bf16.vlgmr.msra.gmra.mxu1 %v3990_v36  ;;  %3991 = vst [vmem:[#allocation2_spill] sm:$0xff] %v3496_v62  ;;  %v1080_v5 = vmul.f32 0.044715, %v3483_v14  ;;  %v3505_v11 = vmul.f32 %v1140_v23, %v3422_v33  ;;  %v1082_v27 = vmul.f32 0.044715, %v3486_v43  ;;  %v3510_v59 = vmul.f32 %v1142_v18, %v3435_v30  ;;  %v954_v23 = vpop.f32.mrf.mxu1 }
 0x253   : > { %2478 = vtanh.f32 %v1301_v32  ;;  %v1083_v34 = vmul.f32 0.044715, %v3490_v26  ;;  %v2465_v22 = vpop.eup %2464  ;;  %v3513_v12 = vmul.f32 %v1143_v37, %v3452_v19  ;;  %v3516_v35 = vmul.f32 0.5, %v3979_v3 }
 0x254   : > { %3992 = vst [vmem:[#allocation13_spill] sm:$0xff] %v3510_v59  ;;  %v3519_v47 = vmul.f32 0.5, %v3982_v24  ;;  %v2467_v42 = vpop.eup %2466  ;;  %v1424_v39 = vadd.f32 1.0, %v2465_v22  ;;  %v3522_v0 = vmul.f32 0.5, %v3984_v45  ;;  %v1085_v8 = vmul.f32 0.044715, %v3499_v13 }
 0x255   : > { %3993 = vst [vmem:[#allocation7_spill] sm:$0xff] %v3513_v12  ;;  %v3526_v18 = vadd.f32 %v841_v54, %v3044_v55  ;;  %v1428_v58 = vadd.f32 1.0, %v2467_v42  ;;  %v3529_v37 = vmul.f32 %v1145_v50, %v3458_v6  ;;  %v3532_v3 = vmul.f32 0.5, %v3986_v46  ;;  %v3995_v12 = vld [vmem:[#allocation12_spill] sm:$0xff]  ;;  %v3996_v54 = vld [vmem:[#allocation23_spill] sm:$0xff] }
 0x256   : > { %v1144_v24 = vmul.f32 %v1080_v5, %v3483_v14  ;;  %v1146_v32 = vmul.f32 %v1082_v27, %v3486_v43  ;;  %v1147_v45 = vmul.f32 %v1083_v34, %v3490_v26  ;;  %v3538_v22 = vadd.f32 %v954_v23, %v3046_v57  ;;  %v845_v23 = vpop.f32.mrf.mxu0 }
 0x257   : > { %3994 = vst [vmem:[#allocation17_spill] sm:$0xff] %v3529_v37  ;;  %v2469_v36 = vpop.eup %2468  ;;  %v1240_v19 = vadd.f32 %v3996_v54, %v3995_v12  ;;  %v1488_v50 = vmul.f32 %v1424_v39, %v3438_v63  ;;  %v1492_v37 = vmul.f32 %v1428_v58, %v3441_v31  ;;  %v1244_v5 = vadd.f32 %v3279_v29, %v3172_v1  ;;  %v3997_v31 = vld [vmem:[#allocation14_spill] sm:$0xff]  ;;  %v3998_v58 = vld [vmem:[#allocation28_spill] sm:$0xff] }
 0x258   : > { %v2471_v42 = vpop.eup %2470  ;;  %v1426_v46 = vadd.f32 1.0, %v2469_v36  ;;  %v1149_v27 = vmul.f32 %v1085_v8, %v3499_v13  ;;  %v1084_v34 = vmul.f32 0.044715, %v3526_v18  ;;  %v3550_v54 = vmul.f32 0.5, %v3995_v12  ;;  %v958_v8 = vpop.f32.mrf.mxu1 }
 0x259   : > { %v1430_v6 = vadd.f32 1.0, %v2471_v42  ;;  %v1304_v62 = vmul.f32 0.7978846, %v1240_v19  ;;  %v1548_v49 = vpack.c.bf16 %v1492_v37, %v1488_v50  ;;  %v1308_v63 = vmul.f32 0.7978846, %v1244_v5  ;;  %v847_v50 = vpop.f32.mrf.mxu0  ;;  %v4001_v5 = vld [vmem:[#allocation10_spill] sm:$0xff] }
 0x25a   : > { %v1490_v59 = vmul.f32 %v1426_v46, %v3464_v17  ;;  %v1242_v36 = vadd.f32 %v3998_v58, %v3997_v31  ;;  %v1246_v29 = vadd.f32 %v3282_v40, %v3178_v7  ;;  %v3557_v19 = vmul.f32 %v1144_v24, %v3483_v14 }
 0x25b   : > { %v1494_v39 = vmul.f32 %v1430_v6, %v982_v38  ;;  %2480 = vtanh.f32 %v1304_v62  ;;  %1878 = vmatprep.mubr.bf16.mxu0 %v1548_v49  ;;  %v1086_v37 = vmul.f32 0.044715, %v3538_v22  ;;  %v3561_v17 = vadd.f32 %v845_v23, %v3040_v51 }
 0x25c   : > { %2482 = vtanh.f32 %v1308_v63  ;;  %v2473_v12 = vpop.eup %2472  ;;  %v3564_v62 = vmul.f32 %v1146_v32, %v3486_v43  ;;  %v1306_v38 = vmul.f32 0.7978846, %v1242_v36  ;;  %v1310_v42 = vmul.f32 0.7978846, %v1246_v29  ;;  %v4002_v63 = vld [vmem:[#allocation21_spill] sm:$0xff] }
 0x25d   : > { %v1550_v6 = vpack.c.bf16 %v1494_v39, %v1490_v59  ;;  %v2475_v40 = vpop.eup %2474  ;;  %v1423_v46 = vadd.f32 1.0, %v2473_v12  ;;  %v3567_v49 = vmul.f32 %v1147_v45, %v3490_v26  ;;  %v3570_v24 = vadd.f32 %v958_v8, %v3042_v52  ;;  %v4003_v39 = vld [vmem:[#allocation29_spill] sm:$0xff] }
 0x25e   : > { %3999 = vst [vmem:[#allocation4_spill] sm:$0xff] %v3564_v62  ;;  %v1239_v23 = vadd.f32 %v4002_v63, %v4001_v5  ;;  %v2477_v58 = vpop.eup %2476  ;;  %v1427_v59 = vadd.f32 1.0, %v2475_v40  ;;  %v1148_v32 = vmul.f32 %v1084_v34, %v3526_v18  ;;  %2484 = vtanh.f32 %v1306_v38  ;;  %v849_v62 = vpop.f32.mrf.mxu0 }
 0x25f   : > { %4000 = vst [vmem:[#allocation15_spill] sm:$0xff] %v3567_v49  ;;  %1975 = vmatprep.mubr.bf16.mxu1 %v1550_v6  ;;  %v1243_v36 = vadd.f32 %v4003_v39, %v3154_v44  ;;  %v1425_v12 = vadd.f32 1.0, %v2477_v58  ;;  %v1150_v45 = vmul.f32 %v1086_v37, %v3538_v22  ;;  %2486 = vtanh.f32 %v1310_v42  ;;  %v960_v49 = vpop.f32.mrf.mxu1 }
 0x260   : > { %v2479_v29 = vpop.eup %2478  ;;  %v1087_v8 = vmul.f32 0.044715, %v3561_v17  ;;  %v1487_v26 = vmul.f32 %v1423_v46, %v3516_v35  ;;  %v1491_v63 = vmul.f32 %v1427_v59, %v3519_v47  ;;  %v1303_v40 = vmul.f32 0.7978846, %v1239_v23  ;;  %v4004_v35 = vld [vmem:[#allocation11_spill] sm:$0xff]  ;;  %v4005_v47 = vld [vmem:[#allocation22_spill] sm:$0xff] }
 0x261   : > { %v1429_v6 = vadd.f32 1.0, %v2479_v29  ;;  %v3582_v34 = vmul.f32 %v1149_v27, %v3499_v13  ;;  %v988_v38 = vmul.f32 0.5, %v3172_v1  ;;  %v1089_v58 = vmul.f32 0.044715, %v3570_v24  ;;  %v4006_v23 = vld [vmem:[#allocation30_spill] sm:$0xff]  ;;  %v962_v1 = vpop.f32.mrf.mxu1 }
 0x262   : > { %v1307_v39 = vmul.f32 0.7978846, %v1243_v36  ;;  %v1547_v37 = vpack.c.bf16 %v1491_v63, %v1487_v26  ;;  %v1489_v42 = vmul.f32 %v1425_v12, %v3522_v0  ;;  %2488 = vtanh.f32 %v1303_v40  ;;  %v851_v36 = vpop.f32.mrf.mxu0 }
 0x263   : > { %v1493_v43 = vmul.f32 %v1429_v6, %v3532_v3  ;;  %v1241_v46 = vadd.f32 %v4005_v47, %v4004_v35  ;;  %v1245_v59 = vadd.f32 %v4006_v23, %v3164_v53  ;;  %v3593_v27 = vadd.f32 %v847_v50, %v3044_v55 }
 0x264   : > { %2490 = vtanh.f32 %v1307_v39  ;;  %1879 = vmatmul.mubr.bf16.gmra.mxu0 %v1547_v37  ;;  %v3596_v26 = vmul.f32 %v1148_v32, %v3526_v18  ;;  %v3599_v0 = vmul.f32 %v1150_v45, %v3538_v22  ;;  %v1151_v3 = vmul.f32 %v1087_v8, %v3561_v17 }
 0x265   : > { %v1549_v29 = vpack.c.bf16 %v1493_v43, %v1489_v42  ;;  %v1305_v12 = vmul.f32 0.7978846, %v1241_v46  ;;  %v1309_v63 = vmul.f32 0.7978846, %v1245_v59  ;;  %v3603_v6 = vadd.f32 %v960_v49, %v3046_v57  ;;  %v964_v42 = vpop.f32.mrf.mxu1 }
 0x266   : > { %v3606_v50 = vadd.f32 %v849_v62, %v3040_v51  ;;  %v986_v43 = vmul.f32 0.5, %v3997_v31  ;;  %v1153_v32 = vmul.f32 %v1089_v58, %v3570_v24  ;;  %v1088_v40 = vmul.f32 0.044715, %v3593_v27 }
 0x267   : > { %1976 = vmatmul.mubr.bf16.gmra.mxu1 %v1549_v29  ;;  %v3612_v45 = vadd.f32 %v962_v1, %v3042_v52  ;;  %v990_v39 = vmul.f32 0.5, %v3178_v7  ;;  %v983_v37 = vmul.f32 0.5, %v4001_v5  ;;  %2492 = vtanh.f32 %v1305_v12 }
 0x268   : > { %v2481_v8 = vpop.eup %2480  ;;  %v3617_v49 = vadd.f32 %v851_v36, %v3044_v55  ;;  %v987_v31 = vmul.f32 0.5, %v3154_v44  ;;  %v3621_v58 = vmul.f32 0.5, %v4004_v35  ;;  %2494 = vtanh.f32 %v1309_v63 }
 0x269   : > { %v2483_v51 = vpop.eup %2482  ;;  %v1432_v62 = vadd.f32 1.0, %v2481_v8  ;;  %v3624_v47 = vmul.f32 %v1151_v3, %v3561_v17  ;;  %v1090_v7 = vmul.f32 0.044715, %v3603_v6  ;;  %v1091_v5 = vmul.f32 0.044715, %v3606_v50 }
 0x26a   : > { %v1436_v52 = vadd.f32 1.0, %v2483_v51  ;;  %v3629_v55 = vmul.f32 %v1153_v32, %v3570_v24  ;;  %v3632_v46 = vmul.f32 0.5, %v3164_v53  ;;  %v1152_v44 = vmul.f32 %v1088_v40, %v3593_v27 }
 0x26b   : > { %v1093_v35 = vmul.f32 0.044715, %v3612_v45  ;;  %v2485_v23 = vpop.eup %2484  ;;  %v1496_v59 = vmul.f32 %v1432_v62, %v3550_v54  ;;  %v1092_v29 = vmul.f32 0.044715, %v3617_v49  ;;  %v3639_v3 = vadd.f32 %v964_v42, %v3046_v57 }
 0x26c   : > { %v1500_v1 = vmul.f32 %v1436_v52, %v988_v38  ;;  %v2487_v36 = vpop.eup %2486  ;;  %v1434_v12 = vadd.f32 1.0, %v2485_v23  ;;  %v3642_v63 = vmul.f32 0.5, %v3206_v15  ;;  %v1248_v53 = vadd.f32 %v3297_v41, %v3206_v15 }
 0x26d   : > { %v1252_v32 = vadd.f32 %v3317_v61, %v3238_v9  ;;  %v1438_v8 = vadd.f32 1.0, %v2487_v36  ;;  %v1154_v54 = vmul.f32 %v1090_v7, %v3603_v6  ;;  %v1155_v38 = vmul.f32 %v1091_v5, %v3606_v50 }
 0x26e   : > { %v1552_v40 = vpack.c.bf16 %v1500_v1, %v1496_v59  ;;  %v3651_v57 = vmul.f32 %v1152_v44, %v3593_v27  ;;  %v1157_v51 = vmul.f32 %v1093_v35, %v3612_v45  ;;  %v1312_v62 = vmul.f32 0.7978846, %v1248_v53 }
 0x26f   : > { %v1316_v42 = vmul.f32 0.7978846, %v1252_v32  ;;  %v2489_v52 = vpop.eup %2488  ;;  %v1498_v23 = vmul.f32 %v1434_v12, %v986_v43  ;;  %v1502_v15 = vmul.f32 %v1438_v8, %v990_v39  ;;  %v1250_v41 = vadd.f32 %v3300_v10, %v3220_v60 }
 0x270   : > { %1886 = vmatprep.mubr.bf16.mxu0 %v1552_v40  ;;  %v1254_v61 = vadd.f32 %v3327_v4, %v3245_v16  ;;  %v1431_v59 = vadd.f32 1.0, %v2489_v52  ;;  %v3659_v5 = vmul.f32 %v1092_v29, %v3617_v49  ;;  %2496 = vtanh.f32 %v1312_v62  ;;  %v4007_v40 = vld [vmem:[#allocation31_spill] sm:$0xff]  ;;  %v4009_v62 = vld [vmem:[#allocation33_spill] sm:$0xff] }
 0x271   : > { %v2491_v7 = vpop.eup %2490  ;;  %v1247_v44 = vadd.f32 %v3285_v21, %v3186_v20  ;;  %v1554_v35 = vpack.c.bf16 %v1502_v15, %v1498_v23  ;;  %2498 = vtanh.f32 %v1316_v42  ;;  %v1314_v43 = vmul.f32 0.7978846, %v1250_v41 }
 0x272   : > { %v1435_v1 = vadd.f32 1.0, %v2491_v7  ;;  %v3664_v39 = vmul.f32 %v1154_v54, %v3603_v6  ;;  %v1318_v10 = vmul.f32 0.7978846, %v1254_v61  ;;  %v1251_v4 = vadd.f32 %v3305_v28, %v3226_v2  ;;  %v4008_v54 = vld [vmem:[#allocation24_spill] sm:$0xff]  ;;  %v4011_v7 = vld [vmem:[#allocation27_spill] sm:$0xff] }
 0x273   : > { %v1311_v36 = vmul.f32 0.7978846, %v1247_v44  ;;  %1983 = vmatprep.mubr.bf16.mxu1 %v1554_v35  ;;  %v1495_v12 = vmul.f32 %v1431_v59, %v983_v37  ;;  %v3669_v53 = vmul.f32 %v1155_v38, %v3606_v50  ;;  %2500 = vtanh.f32 %v1314_v43  ;;  %v4012_v59 = vld [vmem:[#allocation39_spill] sm:$0xff]  ;;  %v4013_v35 = vld [vmem:[#allocation48_spill] sm:$0xff] }
 0x274   : > { %v1499_v29 = vmul.f32 %v1435_v1, %v987_v31  ;;  %v2493_v21 = vpop.eup %2492  ;;  %2502 = vtanh.f32 %v1318_v10  ;;  %v1315_v32 = vmul.f32 0.7978846, %v1251_v4  ;;  %v1249_v8 = vadd.f32 %v4007_v40, %v3196_v56 }
 0x275   : > { %v1253_v42 = vadd.f32 %v4009_v62, %v4008_v54  ;;  %v2495_v52 = vpop.eup %2494  ;;  %v1433_v28 = vadd.f32 1.0, %v2493_v21  ;;  %v3676_v15 = vmul.f32 0.044715, %v3639_v3  ;;  %2504 = vtanh.f32 %v1311_v36  ;;  %v4017_v62 = vld [vmem:[#allocation49_spill] sm:$0xff] }
 0x276   : > { %v1551_v23 = vpack.c.bf16 %v1499_v29, %v1495_v12  ;;  %v1437_v37 = vadd.f32 1.0, %v2495_v52  ;;  %2506 = vtanh.f32 %v1315_v32  ;;  %v1313_v31 = vmul.f32 0.7978846, %v1249_v8  ;;  %v4015_v29 = vld [vmem:[#allocation44_spill] sm:$0xff]  ;;  %v4016_v8 = vld [vmem:[#allocation37_spill] sm:$0xff] }
 0x277   : > { %v1317_v38 = vmul.f32 0.7978846, %v1253_v42  ;;  %v3679_v41 = vmul.f32 %v1157_v51, %v3612_v45  ;;  %v996_v61 = vmul.f32 0.5, %v3238_v9  ;;  %v1256_v44 = vadd.f32 %v4012_v59, %v4011_v7  ;;  %v4014_v51 = vld [vmem:[#allocation32_spill] sm:$0xff] }
 0x278   : > { %1887 = vmatmul.mubr.bf16.gmra.mxu0 %v1551_v23  ;;  %v1260_v1 = vadd.f32 %v4013_v35, %v3320_v48  ;;  %v1497_v43 = vmul.f32 %v1433_v28, %v3621_v58  ;;  %v1501_v10 = vmul.f32 %v1437_v37, %v3632_v46  ;;  %v994_v4 = vmul.f32 0.5, %v3220_v60  ;;  %v4018_v46 = vld [vmem:[#allocation25_spill] sm:$0xff]  ;;  %v4019_v52 = vld [vmem:[#allocation36_spill] sm:$0xff]  ;;  %v4020_v23 = vld [vmem:[#allocation34_spill] sm:$0xff] }
 0x279   : > { %4010 = vst [vmem:[#allocation8_spill] sm:$0xff] %v3679_v41  ;;  %2508 = vtanh.f32 %v1313_v31  ;;  %v1320_v36 = vmul.f32 0.7978846, %v1256_v44  ;;  %v1258_v21 = vadd.f32 %v4015_v29, %v4014_v51  ;;  %v998_v32 = vmul.f32 0.5, %v3245_v16  ;;  %v4021_v28 = vld [vmem:[#allocation45_spill] sm:$0xff]  ;;  %v4022_v35 = vld [vmem:[#allocation26_spill] sm:$0xff] }
 0x27a   : > { %2510 = vtanh.f32 %v1317_v38  ;;  %v1324_v12 = vmul.f32 0.7978846, %v1260_v1  ;;  %v1553_v9 = vpack.c.bf16 %v1501_v10, %v1497_v43  ;;  %v991_v40 = vmul.f32 0.5, %v3186_v20  ;;  %v4023_v1 = vld [vmem:[#allocation38_spill] sm:$0xff] }
 0x27b   : > { %v1262_v42 = vadd.f32 %v4017_v62, %v4016_v8  ;;  %2512 = vtanh.f32 %v1320_v36  ;;  %v1322_v58 = vmul.f32 0.7978846, %v1258_v21  ;;  %v1255_v60 = vadd.f32 %v4019_v52, %v4018_v46  ;;  %v4024_v21 = vld [vmem:[#allocation35_spill] sm:$0xff] }
 0x27c   : > { %v1259_v37 = vadd.f32 %v4021_v28, %v4020_v23  ;;  %1984 = vmatmul.mubr.bf16.gmra.mxu1 %v1553_v9  ;;  %v995_v31 = vmul.f32 0.5, %v3226_v2  ;;  %v3701_v38 = vmul.f32 0.5, %v3196_v56  ;;  %2514 = vtanh.f32 %v1324_v12  ;;  %v4025_v9 = vld [vmem:[#allocation46_spill] sm:$0xff]  ;;  %v4027_v28 = vld [vmem:[#allocation19_spill] sm:$0xff] }
 0x27d   : > { %v1326_v16 = vmul.f32 0.7978846, %v1262_v42  ;;  %v2497_v20 = vpop.eup %2496  ;;  %2516 = vtanh.f32 %v1322_v58  ;;  %v1319_v59 = vmul.f32 0.7978846, %v1255_v60  ;;  %v1257_v43 = vadd.f32 %v4023_v1, %v4022_v35  ;;  %v4026_v60 = vld [vmem:[#allocation42_spill] sm:$0xff] }
 0x27e   : > { %v1323_v44 = vmul.f32 0.7978846, %v1259_v37  ;;  %v2499_v10 = vpop.eup %2498  ;;  %v1440_v36 = vadd.f32 1.0, %v2497_v20  ;;  %v997_v29 = vmul.f32 0.5, %v4008_v54  ;;  %v1261_v2 = vadd.f32 %v4025_v9, %v4024_v21 }
 0x27f   : > { %2518 = vtanh.f32 %v1326_v16  ;;  %v1444_v62 = vadd.f32 1.0, %v2499_v10  ;;  %v1000_v56 = vmul.f32 0.5, %v4011_v7  ;;  %v1321_v12 = vmul.f32 0.7978846, %v1257_v43 }
 0x280   : > { %2520 = vtanh.f32 %v1319_v59  ;;  %v2501_v42 = vpop.eup %2500  ;;  %v1504_v58 = vmul.f32 %v1440_v36, %v3642_v63  ;;  %v1325_v52 = vmul.f32 0.7978846, %v1261_v2  ;;  %v1264_v37 = vadd.f32 %v4027_v28, %v4026_v60 }
 0x281   : > { %2522 = vtanh.f32 %v1323_v44  ;;  %v2503_v20 = vpop.eup %2502  ;;  %v1508_v1 = vmul.f32 %v1444_v62, %v996_v61  ;;  %v1442_v54 = vadd.f32 1.0, %v2501_v42  ;;  %v1268_v16 = vadd.f32 %v3505_v11, %v3422_v33  ;;  %v4029_v42 = vld [vmem:[#allocation13_spill] sm:$0xff] }
 0x282   : > { %2524 = vtanh.f32 %v1321_v12  ;;  %v2505_v10 = vpop.eup %2504  ;;  %v1446_v9 = vadd.f32 1.0, %v2503_v20  ;;  %v1004_v7 = vmul.f32 0.5, %v3320_v48  ;;  %v1328_v59 = vmul.f32 0.7978846, %v1264_v37  ;;  %v4028_v12 = vld [vmem:[#allocation9_spill] sm:$0xff] }
 0x283   : > { %2526 = vtanh.f32 %v1325_v52  ;;  %v2507_v43 = vpop.eup %2506  ;;  %v1556_v63 = vpack.c.bf16 %v1508_v1, %v1504_v58  ;;  %v1439_v44 = vadd.f32 1.0, %v2505_v10  ;;  %v1002_v36 = vmul.f32 0.5, %v4014_v51 }
 0x284   : > { %v1332_v2 = vmul.f32 0.7978846, %v1268_v16  ;;  %v1506_v28 = vmul.f32 %v1442_v54, %v994_v4  ;;  %v1510_v41 = vmul.f32 %v1446_v9, %v998_v32  ;;  %v1443_v61 = vadd.f32 1.0, %v2507_v43  ;;  %v4031_v43 = vld [vmem:[#allocation50_spill] sm:$0xff] }
 0x285   : > { %2528 = vtanh.f32 %v1328_v59  ;;  %1894 = vmatprep.mubr.bf16.mxu0 %v1556_v63  ;;  %v1006_v11 = vmul.f32 0.5, %v4016_v8  ;;  %v1266_v48 = vadd.f32 %v4028_v12, %v3377_v25  ;;  %v1270_v52 = vadd.f32 %v4029_v42, %v3435_v30  ;;  %v4030_v59 = vld [vmem:[#allocation40_spill] sm:$0xff] }
 0x286   : > { %v2509_v62 = vpop.eup %2508  ;;  %2530 = vtanh.f32 %v1332_v2  ;;  %v1558_v37 = vpack.c.bf16 %v1510_v41, %v1506_v28  ;;  %v1503_v20 = vmul.f32 %v1439_v44, %v991_v40  ;;  %v1507_v51 = vmul.f32 %v1443_v61, %v995_v31  ;;  %v4032_v2 = vld [vmem:[#allocation43_spill] sm:$0xff]  ;;  %v4033_v12 = vld [vmem:[#allocation20_spill] sm:$0xff] }
 0x287   : > { %v2511_v58 = vpop.eup %2510  ;;  %v1441_v1 = vadd.f32 1.0, %v2509_v62  ;;  %v999_v32 = vmul.f32 0.5, %v4018_v46  ;;  %v1330_v54 = vmul.f32 0.7978846, %v1266_v48  ;;  %v1334_v16 = vmul.f32 0.7978846, %v1270_v52 }
 0x288   : > { %v1445_v4 = vadd.f32 1.0, %v2511_v58  ;;  %v2513_v10 = vpop.eup %2512  ;;  %1991 = vmatprep.mubr.bf16.mxu1 %v1558_v37  ;;  %v1555_v8 = vpack.c.bf16 %v1507_v51, %v1503_v20  ;;  %v1003_v9 = vmul.f32 0.5, %v4020_v23  ;;  %v1263_v63 = vadd.f32 %v4031_v43, %v4030_v59 }
 0x289   : > { %v1267_v42 = vadd.f32 %v4033_v12, %v4032_v2  ;;  %v2515_v41 = vpop.eup %2514  ;;  %v1505_v40 = vmul.f32 %v1441_v1, %v3701_v38  ;;  %v1448_v44 = vadd.f32 1.0, %v2513_v10  ;;  %2532 = vtanh.f32 %v1330_v54  ;;  %v4034_v38 = vld [vmem:[#allocation41_spill] sm:$0xff] }
 0x28a   : > { %v1509_v31 = vmul.f32 %v1445_v4, %v997_v29  ;;  %v2517_v46 = vpop.eup %2516  ;;  %1895 = vmatmul.mubr.bf16.gmra.mxu0 %v1555_v8  ;;  %v1452_v28 = vadd.f32 1.0, %v2515_v41  ;;  %2534 = vtanh.f32 %v1334_v16  ;;  %v1327_v61 = vmul.f32 0.7978846, %v1263_v63  ;;  %v4035_v29 = vld [vmem:[#allocation51_spill] sm:$0xff]  ;;  %v4037_v8 = vld [vmem:[#allocation2_spill] sm:$0xff] }
 0x28b   : > { %v1331_v62 = vmul.f32 0.7978846, %v1267_v42  ;;  %v1512_v52 = vmul.f32 %v1448_v44, %v1000_v56  ;;  %v1450_v58 = vadd.f32 1.0, %v2517_v46  ;;  %v1001_v37 = vmul.f32 0.5, %v4022_v35  ;;  %v4036_v16 = vld [vmem:[#allocation47_spill] sm:$0xff] }
 0x28c   : > { %v2519_v48 = vpop.eup %2518  ;;  %v1557_v23 = vpack.c.bf16 %v1509_v31, %v1505_v40  ;;  %v1516_v51 = vmul.f32 %v1452_v28, %v1004_v7  ;;  %2536 = vtanh.f32 %v1327_v61  ;;  %v1265_v1 = vadd.f32 %v4035_v29, %v4034_v38 }
 0x28d   : > { %v2521_v20 = vpop.eup %2520  ;;  %v1454_v43 = vadd.f32 1.0, %v2519_v48  ;;  %v1514_v54 = vmul.f32 %v1450_v58, %v1002_v36  ;;  %2538 = vtanh.f32 %v1331_v62  ;;  %v1269_v63 = vadd.f32 %v4037_v8, %v4036_v16 }
 0x28e   : > { %v2523_v4 = vpop.eup %2522  ;;  %1992 = vmatmul.mubr.bf16.gmra.mxu1 %v1557_v23  ;;  %v1447_v10 = vadd.f32 1.0, %v2521_v20  ;;  %v1560_v56 = vpack.c.bf16 %v1516_v51, %v1512_v52  ;;  %v1329_v35 = vmul.f32 0.7978846, %v1265_v1  ;;  %v1005_v31 = vmul.f32 0.5, %v4024_v21  ;;  %v4038_v1 = vld [vmem:[#allocation3_spill] sm:$0xff] }
 0x28f   : > { %v2525_v12 = vpop.eup %2524  ;;  %v1518_v42 = vmul.f32 %v1454_v43, %v1006_v11  ;;  %v1451_v41 = vadd.f32 1.0, %v2523_v4  ;;  %v1333_v46 = vmul.f32 0.7978846, %v1269_v63  ;;  %v1220_v48 = vmul.f32 %v3659_v5, %v3617_v49  ;;  %v4039_v4 = vld [vmem:[#allocation4_spill] sm:$0xff] }
 0x290   : > { %v2527_v40 = vpop.eup %2526  ;;  %v1511_v7 = vmul.f32 %v1447_v10, %v999_v32  ;;  %v1449_v44 = vadd.f32 1.0, %v2525_v12  ;;  %1902 = vmatprep.mubr.bf16.mxu0 %v1560_v56  ;;  %2540 = vtanh.f32 %v1329_v35  ;;  %v1272_v11 = vadd.f32 %v3557_v19, %v3483_v14  ;;  %v4040_v12 = vld [vmem:[#allocation6_spill] sm:$0xff] }
 0x291   : > { %v1562_v28 = vpack.c.bf16 %v1518_v42, %v1514_v54  ;;  %v1515_v61 = vmul.f32 %v1451_v41, %v1003_v9  ;;  %v1453_v36 = vadd.f32 1.0, %v2527_v40  ;;  %2542 = vtanh.f32 %v1333_v46 }
 0x292   : > { %v2529_v62 = vpop.eup %2528  ;;  %v1513_v23 = vmul.f32 %v1449_v44, %v1001_v37  ;;  %v1276_v20 = vadd.f32 %v3596_v26, %v3526_v18  ;;  %v1008_v9 = vmul.f32 0.5, %v4026_v60  ;;  %v1012_v51 = vmul.f32 0.5, %v3422_v33 }
 0x293   : > { %v2531_v52 = vpop.eup %2530  ;;  %1999 = vmatprep.mubr.bf16.mxu1 %v1562_v28  ;;  %v1559_v32 = vpack.c.bf16 %v1515_v61, %v1511_v7  ;;  %v1517_v21 = vmul.f32 %v1453_v36, %v1005_v31  ;;  %v1456_v58 = vadd.f32 1.0, %v2529_v62  ;;  %v1336_v29 = vmul.f32 0.7978846, %v1272_v11  ;;  %v4042_v7 = vld [vmem:[#allocation5_spill] sm:$0xff]  ;;  %v4043_v31 = vld [vmem:[#allocation15_spill] sm:$0xff] }
 0x294   : > { %v1460_v43 = vadd.f32 1.0, %v2531_v52  ;;  %v1158_v5 = vmul.f32 %v3676_v15, %v3639_v3  ;;  %v1340_v19 = vmul.f32 0.7978846, %v1276_v20  ;;  %v1274_v54 = vadd.f32 %v4039_v4, %v4038_v1  ;;  %v4041_v15 = vld [vmem:[#allocation7_spill] sm:$0xff] }
 0x295   : > { %1903 = vmatmul.mubr.bf16.gmra.mxu0 %v1559_v32  ;;  %v1561_v37 = vpack.c.bf16 %v1517_v21, %v1513_v23  ;;  %v1520_v10 = vmul.f32 %v1456_v58, %v1008_v9  ;;  %2544 = vtanh.f32 %v1336_v29  ;;  %v1278_v26 = vadd.f32 %v3599_v0, %v3538_v22  ;;  %v4044_v32 = vld [vmem:[#allocation16_spill] sm:$0xff]  ;;  %v4045_v21 = vld [vmem:[#allocation17_spill] sm:$0xff] }
 0x296   : > { %v1524_v8 = vmul.f32 %v1460_v43, %v1012_v51  ;;  %v2533_v60 = vpop.eup %2532  ;;  %v1010_v33 = vmul.f32 0.5, %v3377_v25  ;;  %2546 = vtanh.f32 %v1340_v19  ;;  %v1338_v63 = vmul.f32 0.7978846, %v1274_v54 }
 0x297   : > { %2000 = vmatmul.mubr.bf16.gmra.mxu1 %v1561_v37  ;;  %v1271_v56 = vadd.f32 %v4041_v15, %v4040_v12  ;;  %v2535_v42 = vpop.eup %2534  ;;  %v1458_v35 = vadd.f32 1.0, %v2533_v60  ;;  %v1342_v40 = vmul.f32 0.7978846, %v1278_v26  ;;  %v1275_v44 = vadd.f32 %v4043_v31, %v4042_v7 }
 0x298   : > { %v1564_v41 = vpack.c.bf16 %v1524_v8, %v1520_v10  ;;  %v1014_v46 = vmul.f32 0.5, %v3435_v30  ;;  %v1462_v28 = vadd.f32 1.0, %v2535_v42  ;;  %2548 = vtanh.f32 %v1338_v63 }
 0x299   : > { %v1335_v0 = vmul.f32 0.7978846, %v1271_v56  ;;  %v2537_v61 = vpop.eup %2536  ;;  %v1522_v25 = vmul.f32 %v1458_v35, %v1010_v33  ;;  %v1007_v36 = vmul.f32 0.5, %v4030_v59  ;;  %2550 = vtanh.f32 %v1342_v40 }
 0x29a   : > { %1910 = vmatprep.mubr.bf16.mxu0 %v1564_v41  ;;  %v1339_v62 = vmul.f32 0.7978846, %v1275_v44  ;;  %v2539_v23 = vpop.eup %2538  ;;  %v1526_v11 = vmul.f32 %v1462_v28, %v1014_v46  ;;  %v1455_v52 = vadd.f32 1.0, %v2537_v61  ;;  %v1273_v58 = vadd.f32 %v4045_v21, %v4044_v32 }
 0x29b   : > { %2552 = vtanh.f32 %v1335_v0  ;;  %v1011_v20 = vmul.f32 0.5, %v4032_v2  ;;  %v1459_v30 = vadd.f32 1.0, %v2539_v23  ;;  %v1277_v9 = vadd.f32 %v3582_v34, %v3499_v13 }
 0x29c   : > { %2554 = vtanh.f32 %v1339_v62  ;;  %v1222_v51 = vmul.f32 %v1158_v5, %v3639_v3  ;;  %v1566_v43 = vpack.c.bf16 %v1526_v11, %v1522_v25  ;;  %v1519_v59 = vmul.f32 %v1455_v52, %v1007_v36 }
 0x29d   : > { %v1337_v29 = vmul.f32 0.7978846, %v1273_v58  ;;  %v2541_v37 = vpop.eup %2540  ;;  %v1523_v19 = vmul.f32 %v1459_v30, %v1011_v20  ;;  %v1341_v4 = vmul.f32 0.7978846, %v1277_v9  ;;  %v1280_v54 = vadd.f32 %v3651_v57, %v3593_v27 }
 0x29e   : > { %v1284_v10 = vadd.f32 %v1220_v48, %v3617_v49  ;;  %v2543_v8 = vpop.eup %2542  ;;  %2007 = vmatprep.mubr.bf16.mxu1 %v1566_v43  ;;  %v1009_v2 = vmul.f32 0.5, %v4034_v38  ;;  %v1013_v26 = vmul.f32 0.5, %v4036_v16  ;;  %v1457_v34 = vadd.f32 1.0, %v2541_v37 }
 0x29f   : > { %2556 = vtanh.f32 %v1337_v29  ;;  %v1563_v5 = vpack.c.bf16 %v1523_v19, %v1519_v59  ;;  %v1461_v60 = vadd.f32 1.0, %v2543_v8  ;;  %v1344_v33 = vmul.f32 0.7978846, %v1280_v54 }
 0x2a0   : > { %2558 = vtanh.f32 %v1341_v4  ;;  %v1016_v63 = vmul.f32 0.5, %v3483_v14  ;;  %v1348_v15 = vmul.f32 0.7978846, %v1284_v10  ;;  %v1282_v57 = vadd.f32 %v3664_v39, %v3603_v6 }
 0x2a1   : > { %v1286_v48 = vadd.f32 %v1222_v51, %v3639_v3  ;;  %1911 = vmatmul.mubr.bf16.gmra.mxu0 %v1563_v5  ;;  %v1521_v56 = vmul.f32 %v1457_v34, %v1009_v2  ;;  %v1525_v42 = vmul.f32 %v1461_v60, %v1013_v26  ;;  %v1020_v38 = vmul.f32 0.5, %v3526_v18 }
 0x2a2   : > { %2560 = vtanh.f32 %v1344_v33  ;;  %v2545_v16 = vpop.eup %2544  ;;  %v1346_v41 = vmul.f32 0.7978846, %v1282_v57  ;;  %v1279_v40 = vadd.f32 %v3624_v47, %v3561_v17  ;;  %v1018_v39 = vmul.f32 0.5, %v4038_v1  ;;  %v4046_v1 = vld [vmem:[#allocation8_spill] sm:$0xff] }
 0x2a3   : > { %2562 = vtanh.f32 %v1348_v15  ;;  %v1350_v35 = vmul.f32 0.7978846, %v1286_v48  ;;  %v2547_v14 = vpop.eup %2546  ;;  %v1565_v31 = vpack.c.bf16 %v1525_v42, %v1521_v56  ;;  %v1464_v44 = vadd.f32 1.0, %v2545_v16 }
 0x2a4   : > { %v1283_v46 = vadd.f32 %v3669_v53, %v3606_v50  ;;  %v1468_v28 = vadd.f32 1.0, %v2547_v14  ;;  %v1022_v0 = vmul.f32 0.5, %v3538_v22  ;;  %2564 = vtanh.f32 %v1346_v41 }
 0x2a5   : > { %v1343_v18 = vmul.f32 0.7978846, %v1279_v40  ;;  %v2549_v61 = vpop.eup %2548  ;;  %2008 = vmatmul.mubr.bf16.gmra.mxu1 %v1565_v31  ;;  %v1528_v25 = vmul.f32 %v1464_v44, %v1016_v63  ;;  %2566 = vtanh.f32 %v1350_v35  ;;  %v1281_v47 = vadd.f32 %v3629_v55, %v3570_v24 }
 0x2a6   : > { %v1347_v36 = vmul.f32 0.7978846, %v1283_v46  ;;  %v2551_v62 = vpop.eup %2550  ;;  %v1532_v23 = vmul.f32 %v1468_v28, %v1020_v38  ;;  %v1466_v11 = vadd.f32 1.0, %v2549_v61  ;;  %v1285_v53 = vadd.f32 %v4046_v1, %v3612_v45 }
 0x2a7   : > { %2568 = vtanh.f32 %v1343_v18  ;;  %v1470_v21 = vadd.f32 1.0, %v2551_v62  ;;  %v1015_v22 = vmul.f32 0.5, %v4040_v12  ;;  %v1345_v58 = vmul.f32 0.7978846, %v1281_v47 }
 0x2a8   : > { %v2553_v52 = vpop.eup %2552  ;;  %2570 = vtanh.f32 %v1347_v36  ;;  %v1568_v30 = vpack.c.bf16 %v1532_v23, %v1528_v25  ;;  %v1019_v9 = vmul.f32 0.5, %v4042_v7  ;;  %v1349_v43 = vmul.f32 0.7978846, %v1285_v53 }
 0x2a9   : > { %v2555_v20 = vpop.eup %2554  ;;  %v1463_v51 = vadd.f32 1.0, %v2553_v52  ;;  %v1530_v55 = vmul.f32 %v1466_v11, %v1018_v39  ;;  %v1534_v59 = vmul.f32 %v1470_v21, %v1022_v0  ;;  %2572 = vtanh.f32 %v1345_v58  ;;  %v3796_v52 = vld [vmem:[%s3862_s6] ss:$0 sm:$0xff] }
 0x2aa   : > { %v1467_v29 = vadd.f32 1.0, %v2555_v20  ;;  %1918 = vmatprep.mubr.bf16.mxu0 %v1568_v30  ;;  %2574 = vtanh.f32 %v1349_v43  ;;  %v1017_v2 = vmul.f32 0.5, %v4044_v32  ;;  %v1021_v7 = vmul.f32 0.5, %v3499_v13 }
 0x2ab   : > { %v1570_v19 = vpack.c.bf16 %v1534_v59, %v1530_v55  ;;  %v1527_v4 = vmul.f32 %v1463_v51, %v1015_v22  ;;  %v1024_v15 = vmul.f32 0.5, %v3593_v27  ;;  %v1028_v57 = vmul.f32 0.5, %v3617_v49 }
 0x2ac   : > { %v2557_v37 = vpop.eup %2556  ;;  %v1531_v54 = vmul.f32 %v1467_v29, %v1019_v9  ;;  %v1026_v13 = vmul.f32 0.5, %v3603_v6  ;;  %v1030_v40 = vmul.f32 0.5, %v3639_v3  ;;  %v1023_v27 = vmul.f32 0.5, %v3561_v17 }
 0x2ad   : > { %v2559_v10 = vpop.eup %2558  ;;  %v1465_v12 = vadd.f32 1.0, %v2557_v37  ;;  %2015 = vmatprep.mubr.bf16.mxu1 %v1570_v19  ;;  %v1027_v28 = vmul.f32 0.5, %v3606_v50  ;;  %v1025_v3 = vmul.f32 0.5, %v3570_v24  ;;  %v1029_v62 = vmul.f32 0.5, %v3612_v45  ;;  %v2576_v37 = vld [vmem:[%s2657_s29] sm:$0xff] }
 0x2ae   : > { %v1567_v8 = vpack.c.bf16 %v1531_v54, %v1527_v4  ;;  %v1469_v26 = vadd.f32 1.0, %v2559_v10  ;;  %v2577_v10 = vld [vmem:[%s2657_s29 + $0x8] sm:$0xff] }
 0x2af   : > { %v2561_v34 = vpop.eup %2560  ;;  %v1529_v60 = vmul.f32 %v1465_v12, %v1017_v2 }
 0x2b0   : > { %v2563_v5 = vpop.eup %2562  ;;  %1919 = vmatmul.mubr.bf16.gmra.mxu0 %v1567_v8  ;;  %v1533_v33 = vmul.f32 %v1469_v26, %v1021_v7  ;;  %v1472_v63 = vadd.f32 1.0, %v2561_v34 }
 0x2b1   : > { %v1476_v48 = vadd.f32 1.0, %v2563_v5  ;;  %v2565_v56 = vpop.eup %2564 }
 0x2b2   : > { %v1569_v42 = vpack.c.bf16 %v1533_v33, %v1529_v60  ;;  %v2567_v38 = vpop.eup %2566  ;;  %v1536_v16 = vmul.f32 %v1472_v63, %v1024_v15  ;;  %v1474_v32 = vadd.f32 1.0, %v2565_v56 }
 0x2b3   : > { %v1540_v41 = vmul.f32 %v1476_v48, %v1028_v57  ;;  %v1478_v14 = vadd.f32 1.0, %v2567_v38 }
 0x2b4   : > { %v2569_v35 = vpop.eup %2568  ;;  %2016 = vmatmul.mubr.bf16.gmra.mxu1 %v1569_v42  ;;  %v1538_v49 = vmul.f32 %v1474_v32, %v1026_v13  ;;  %v2578_v42 = vld [vmem:[%s2657_s29 + $0x10] sm:$0xff] }
 0x2b5   : > { %v2571_v31 = vpop.eup %2570  ;;  %v1572_v44 = vpack.c.bf16 %v1540_v41, %v1536_v16  ;;  %v1471_v39 = vadd.f32 1.0, %v2569_v35  ;;  %v1542_v46 = vmul.f32 %v1478_v14, %v1030_v40  ;;  %v2579_v35 = vld [vmem:[%s2657_s29 + $0x18] sm:$0xff] }
 0x2b6   : > { %v1475_v0 = vadd.f32 1.0, %v2571_v31  ;;  %v2573_v18 = vpop.eup %2572 }
 0x2b7   : > { %1926 = vmatprep.mubr.bf16.mxu0 %v1572_v44  ;;  %v2575_v61 = vpop.eup %2574  ;;  %v1574_v25 = vpack.c.bf16 %v1542_v46, %v1538_v49  ;;  %v1535_v36 = vmul.f32 %v1471_v39, %v1023_v27  ;;  %v1473_v6 = vadd.f32 1.0, %v2573_v18 }
 0x2b8   : > { %v1539_v47 = vmul.f32 %v1475_v0, %v1027_v28  ;;  %v1477_v23 = vadd.f32 1.0, %v2575_v61 }
 0x2b9   : > { %2023 = vmatprep.mubr.bf16.mxu1 %v1574_v25  ;;  %v1537_v11 = vmul.f32 %v1473_v6, %v1025_v3 }
 0x2ba   : > { %v1571_v17 = vpack.c.bf16 %v1539_v47, %v1535_v36  ;;  %v1541_v1 = vmul.f32 %v1477_v23, %v1029_v62  ;;  %v2580_v47 = vld [vmem:[%s2657_s29 + $0x20] sm:$0xff]  ;;  %v2581_v23 = vld [vmem:[%s2657_s29 + $0x28] sm:$0xff] }
 0x2bc   : > { %1927 = vmatmul.mubr.bf16.gmra.mxu0 %v1571_v17  ;;  %v1573_v50 = vpack.c.bf16 %v1541_v1, %v1537_v11 }
 0x2be   : > { %2024 = vmatmul.mubr.bf16.gmra.mxu1 %v1573_v50 }
 0x30d   : > { %v2215_v53 = vpop.f32.mrf.mxu0 }
 0x30f   : > { %v2216_v21 = vpop.f32.mrf.mxu0 }
 0x310   : > { %v2217_v22 = vadd.f32 %v2216_v21, %v2215_v53 }
 0x311   : > { %v2218_v45 = vpop.f32.mrf.mxu0 }
 0x312   : > { %v2279_v24 = vpop.f32.mrf.mxu1  ;;  %v1873_v58 = vadd.f32 %v2217_v22, %v3796_v52 }
 0x313   : > { %v2219_v9 = vpop.f32.mrf.mxu0 }
 0x314   : > { %v2280_v20 = vpop.f32.mrf.mxu1  ;;  %v2220_v43 = vadd.f32 %v2219_v9, %v2218_v45 }
 0x315   : > { %v2281_v30 = vadd.f32 %v2280_v20, %v2279_v24 }
 0x316   : > { %v2282_v51 = vpop.f32.mrf.mxu1  ;;  %v1876_v59 = vadd.f32 %v2220_v43, %v3796_v52 }
 0x317   : > { %v1970_v55 = vadd.f32 %v2281_v30, %v1873_v58 }
 0x318   : > { %v2283_v29 = vpop.f32.mrf.mxu1 }
 0x319   : > { %v2032_v19 = vadd.f32 %v2576_v37, %v1970_v55  ;;  %v2284_v4 = vadd.f32 %v2283_v29, %v2282_v51  ;;  %v2582_v55 = vld [vmem:[%s2657_s29 + $0x30] sm:$0xff] }
 0x31b   : > { %2048 = vst [vmem:[%s3804_s12] sm:$0xff] %v2032_v19  ;;  %v1973_v54 = vadd.f32 %v2284_v4, %v1876_v59 }
 0x31d   : > { %v2033_v12 = vadd.f32 %v2577_v10, %v1973_v54 }
 0x31f   : > { %2049 = vst [vmem:[%s3804_s12 + $0x8] sm:$0xff] %v2033_v12  ;;  %v2583_v12 = vld [vmem:[%s2657_s29 + $0x38] sm:$0xff] }
 0x324   : > { %v2221_v8 = vpop.f32.mrf.mxu0 }
 0x326   : > { %v2222_v7 = vpop.f32.mrf.mxu0 }
 0x327   : > { %v2285_v2 = vpop.f32.mrf.mxu1  ;;  %v2223_v26 = vadd.f32 %v2222_v7, %v2221_v8 }
 0x328   : > { %v2224_v5 = vpop.f32.mrf.mxu0 }
 0x329   : > { %v2286_v34 = vpop.f32.mrf.mxu1  ;;  %v1881_v60 = vadd.f32 %v2223_v26, %v3796_v52 }
 0x32a   : > { %v2287_v33 = vadd.f32 %v2286_v34, %v2285_v2  ;;  %v2225_v15 = vpop.f32.mrf.mxu0 }
 0x32b   : > { %v2288_v63 = vpop.f32.mrf.mxu1  ;;  %v2226_v48 = vadd.f32 %v2225_v15, %v2224_v5 }
 0x32c   : > { %v1978_v57 = vadd.f32 %v2287_v33, %v1881_v60 }
 0x32d   : > { %v2289_v56 = vpop.f32.mrf.mxu1  ;;  %v1884_v16 = vadd.f32 %v2226_v48, %v3796_v52 }
 0x32e   : > { %v2034_v38 = vadd.f32 %v2578_v42, %v1978_v57  ;;  %v2290_v41 = vadd.f32 %v2289_v56, %v2288_v63  ;;  %v2584_v57 = vld [vmem:[%s2657_s29 + $0x40] sm:$0xff] }
 0x330   : > { %2050 = vst [vmem:[%s3804_s12 + $0x10] sm:$0xff] %v2034_v38  ;;  %v1981_v32 = vadd.f32 %v2290_v41, %v1884_v16  ;;  %v2585_v16 = vld [vmem:[%s2657_s29 + $0x48] sm:$0xff] }
 0x332   : > { %v2035_v13 = vadd.f32 %v2579_v35, %v1981_v32 }
 0x334   : > { %2051 = vst [vmem:[%s3804_s12 + $0x18] sm:$0xff] %v2035_v13 }
 0x338   : > { %v2227_v40 = vpop.f32.mrf.mxu0 }
 0x33a   : > { %v2228_v14 = vpop.f32.mrf.mxu0 }
 0x33b   : > { %v2229_v31 = vadd.f32 %v2228_v14, %v2227_v40 }
 0x33c   : > { %v2230_v44 = vpop.f32.mrf.mxu0  ;;  %v2291_v27 = vpop.f32.mrf.mxu1 }
 0x33d   : > { %v1889_v39 = vadd.f32 %v2229_v31, %v3796_v52 }
 0x33e   : > { %v2231_v49 = vpop.f32.mrf.mxu0  ;;  %v2292_v46 = vpop.f32.mrf.mxu1 }
 0x33f   : > { %v2232_v28 = vadd.f32 %v2231_v49, %v2230_v44  ;;  %v2293_v0 = vadd.f32 %v2292_v46, %v2291_v27 }
 0x340   : > { %v2294_v18 = vpop.f32.mrf.mxu1 }
 0x341   : > { %v1986_v61 = vadd.f32 %v2293_v0, %v1889_v39  ;;  %v1892_v25 = vadd.f32 %v2232_v28, %v3796_v52 }
 0x342   : > { %v2295_v36 = vpop.f32.mrf.mxu1 }
 0x343   : > { %v2036_v6 = vadd.f32 %v2580_v47, %v1986_v61  ;;  %v2296_v3 = vadd.f32 %v2295_v36, %v2294_v18  ;;  %v2586_v61 = vld [vmem:[%s2657_s29 + $0x50] sm:$0xff] }
 0x345   : > { %2052 = vst [vmem:[%s3804_s12 + $0x20] sm:$0xff] %v2036_v6  ;;  %v1989_v62 = vadd.f32 %v2296_v3, %v1892_v25  ;;  %v2587_v3 = vld [vmem:[%s2657_s29 + $0x58] sm:$0xff] }
 0x347   : > { %v2037_v17 = vadd.f32 %v2581_v23, %v1989_v62 }
 0x349   : > { %2053 = vst [vmem:[%s3804_s12 + $0x28] sm:$0xff] %v2037_v17 }
 0x34a   : > { %v2233_v11 = vpop.f32.mrf.mxu0 }
 0x34c   : > { %v2234_v1 = vpop.f32.mrf.mxu0 }
 0x34d   : > { %v2235_v53 = vadd.f32 %v2234_v1, %v2233_v11 }
 0x34e   : > { %v2297_v50 = vpop.f32.mrf.mxu1  ;;  %v2236_v21 = vpop.f32.mrf.mxu0 }
 0x34f   : > { %v1897_v24 = vadd.f32 %v2235_v53, %v3796_v52 }
 0x350   : > { %v2298_v22 = vpop.f32.mrf.mxu1  ;;  %v2237_v58 = vpop.f32.mrf.mxu0 }
 0x351   : > { %v2299_v45 = vadd.f32 %v2298_v22, %v2297_v50  ;;  %v2238_v30 = vadd.f32 %v2237_v58, %v2236_v21 }
 0x352   : > { %v2300_v20 = vpop.f32.mrf.mxu1 }
 0x353   : > { %v1994_v9 = vadd.f32 %v2299_v45, %v1897_v24  ;;  %v1900_v51 = vadd.f32 %v2238_v30, %v3796_v52 }
 0x354   : > { %v2301_v43 = vpop.f32.mrf.mxu1 }
 0x355   : > { %v2038_v59 = vadd.f32 %v2582_v55, %v1994_v9  ;;  %v2302_v29 = vadd.f32 %v2301_v43, %v2300_v20  ;;  %v2239_v37 = vpop.f32.mrf.mxu0  ;;  %v2588_v9 = vld [vmem:[%s2657_s29 + $0x60] sm:$0xff] }
 0x357   : > { %2054 = vst [vmem:[%s3804_s12 + $0x30] sm:$0xff] %v2038_v59  ;;  %v1997_v19 = vadd.f32 %v2302_v29, %v1900_v51  ;;  %v2303_v4 = vpop.f32.mrf.mxu1  ;;  %v2240_v54 = vpop.f32.mrf.mxu0 }
 0x358   : > { %v2241_v10 = vadd.f32 %v2240_v54, %v2239_v37  ;;  %v2589_v37 = vld [vmem:[%s2657_s29 + $0x68] sm:$0xff] }
 0x359   : > { %v2039_v8 = vadd.f32 %v2583_v12, %v1997_v19  ;;  %v2304_v2 = vpop.f32.mrf.mxu1  ;;  %v2242_v7 = vpop.f32.mrf.mxu0 }
 0x35a   : > { %v1905_v26 = vadd.f32 %v2241_v10, %v3796_v52  ;;  %v2305_v34 = vadd.f32 %v2304_v2, %v2303_v4 }
 0x35b   : > { %2055 = vst [vmem:[%s3804_s12 + $0x38] sm:$0xff] %v2039_v8  ;;  %v2306_v5 = vpop.f32.mrf.mxu1  ;;  %v2243_v60 = vpop.f32.mrf.mxu0 }
 0x35c   : > { %v2002_v33 = vadd.f32 %v2305_v34, %v1905_v26  ;;  %v2244_v63 = vadd.f32 %v2243_v60, %v2242_v7 }
 0x35d   : > { %v2307_v15 = vpop.f32.mrf.mxu1 }
 0x35e   : > { %v2040_v48 = vadd.f32 %v2584_v57, %v2002_v33  ;;  %v1908_v56 = vadd.f32 %v2244_v63, %v3796_v52  ;;  %v2308_v42 = vadd.f32 %v2307_v15, %v2306_v5  ;;  %v2590_v63 = vld [vmem:[%s2657_s29 + $0x70] sm:$0xff] }
 0x360   : > { %2056 = vst [vmem:[%s3804_s12 + $0x40] sm:$0xff] %v2040_v48  ;;  %v2005_v38 = vadd.f32 %v2308_v42, %v1908_v56  ;;  %v2591_v56 = vld [vmem:[%s2657_s29 + $0x78] sm:$0xff] }
 0x361   : > { %v2245_v32 = vpop.f32.mrf.mxu0 }
 0x362   : > { %v2041_v41 = vadd.f32 %v2585_v16, %v2005_v38 }
 0x363   : > { %v2246_v35 = vpop.f32.mrf.mxu0 }
 0x364   : > { %2057 = vst [vmem:[%s3804_s12 + $0x48] sm:$0xff] %v2041_v41  ;;  %v2247_v13 = vadd.f32 %v2246_v35, %v2245_v32 }
 0x365   : > { %v2309_v40 = vpop.f32.mrf.mxu1  ;;  %v2248_v14 = vpop.f32.mrf.mxu0 }
 0x366   : > { %v1913_v31 = vadd.f32 %v2247_v13, %v3796_v52 }
 0x367   : > { %v2310_v44 = vpop.f32.mrf.mxu1  ;;  %v2249_v27 = vpop.f32.mrf.mxu0 }
 0x368   : > { %v2311_v39 = vadd.f32 %v2310_v44, %v2309_v40  ;;  %v2250_v49 = vadd.f32 %v2249_v27, %v2248_v14 }
 0x369   : > { %v2312_v46 = vpop.f32.mrf.mxu1 }
 0x36a   : > { %v2010_v28 = vadd.f32 %v2311_v39, %v1913_v31  ;;  %v1916_v0 = vadd.f32 %v2250_v49, %v3796_v52 }
 0x36b   : > { %v2313_v18 = vpop.f32.mrf.mxu1 }
 0x36c   : > { %v2042_v25 = vadd.f32 %v2586_v61, %v2010_v28  ;;  %v2314_v36 = vadd.f32 %v2313_v18, %v2312_v46 }
 0x36e   : > { %2058 = vst [vmem:[%s3804_s12 + $0x50] sm:$0xff] %v2042_v25  ;;  %v2013_v47 = vadd.f32 %v2314_v36, %v1916_v0 }
 0x370   : > { %v2251_v6 = vpop.f32.mrf.mxu0  ;;  %v2043_v62 = vadd.f32 %v2587_v3, %v2013_v47 }
 0x372   : > { %v2252_v23 = vpop.f32.mrf.mxu0  ;;  %2059 = vst [vmem:[%s3804_s12 + $0x58] sm:$0xff] %v2043_v62 }
 0x373   : > { %v2253_v17 = vadd.f32 %v2252_v23, %v2251_v6 }
 0x374   : > { %v2315_v11 = vpop.f32.mrf.mxu1  ;;  %v2254_v1 = vpop.f32.mrf.mxu0 }
 0x375   : > { %v1921_v50 = vadd.f32 %v2253_v17, %v3796_v52 }
 0x376   : > { %v2316_v53 = vpop.f32.mrf.mxu1  ;;  %v2255_v21 = vpop.f32.mrf.mxu0 }
 0x377   : > { %v2317_v24 = vadd.f32 %v2316_v53, %v2315_v11  ;;  %v2256_v22 = vadd.f32 %v2255_v21, %v2254_v1 }
 0x378   : > { %v2318_v45 = vpop.f32.mrf.mxu1 }
 0x379   : > { %v2018_v58 = vadd.f32 %v2317_v24, %v1921_v50  ;;  %v1924_v20 = vadd.f32 %v2256_v22, %v3796_v52 }
 0x37a   : > { %v2319_v30 = vpop.f32.mrf.mxu1 }
 0x37b   : > { %v2044_v51 = vadd.f32 %v2588_v9, %v2018_v58  ;;  %v2320_v43 = vadd.f32 %v2319_v30, %v2318_v45 }
 0x37c   : > { %v2257_v55 = vpop.f32.mrf.mxu0 }
 0x37d   : > { %2060 = vst [vmem:[%s3804_s12 + $0x60] sm:$0xff] %v2044_v51  ;;  %v2021_v59 = vadd.f32 %v2320_v43, %v1924_v20 }
 0x37e   : > { %v2258_v29 = vpop.f32.mrf.mxu0  ;;  %v2321_v4 = vpop.f32.mrf.mxu1 }
 0x37f   : > { %v2045_v19 = vadd.f32 %v2589_v37, %v2021_v59  ;;  %v2259_v54 = vadd.f32 %v2258_v29, %v2257_v55 }
 0x380   : > { %v2260_v10 = vpop.f32.mrf.mxu0  ;;  %v2322_v8 = vpop.f32.mrf.mxu1 }
 0x381   : > { %2061 = vst [vmem:[%s3804_s12 + $0x68] sm:$0xff] %v2045_v19  ;;  %v1929_v12 = vadd.f32 %v2259_v54, %v3796_v52  ;;  %v2323_v2 = vadd.f32 %v2322_v8, %v2321_v4 }
 0x382   : > { %v2261_v7 = vpop.f32.mrf.mxu0  ;;  %v2324_v26 = vpop.f32.mrf.mxu1 }
 0x383   : > { %v2262_v34 = vadd.f32 %v2261_v7, %v2260_v10  ;;  %v2026_v5 = vadd.f32 %v2323_v2, %v1929_v12 }
 0x384   : > { %v2325_v33 = vpop.f32.mrf.mxu1 }
 0x385   : > { %v1932_v60 = vadd.f32 %v2262_v34, %v3796_v52  ;;  %v2046_v15 = vadd.f32 %v2590_v63, %v2026_v5  ;;  %v2326_v57 = vadd.f32 %v2325_v33, %v2324_v26 }
 0x387   : > { %2062 = vst [vmem:[%s3804_s12 + $0x70] sm:$0xff] %v2046_v15  ;;  %v2029_v48 = vadd.f32 %v2326_v57, %v1932_v60 }
 0x389   : > { %v2047_v42 = vadd.f32 %v2591_v56, %v2029_v48 }
 0x38b   : > { %2063 = vst [vmem:[%s3804_s12 + $0x78] sm:$0xff] %v2047_v42 }
 0x38c PF: > { %s17_s24 = sadd.s32 1, %s2598_s24  }
 0x38d   : > { %p14_p4 = scmp.ge.s32.totalorder %s17_s24, 4  }
 0x38f   :  { %16 = sbr.rel (!%p14_p4) target bundleno = 1 (0x1), region = 78 }

// kernel: gpt_forward.5
= control target key start
LH: loop header
LB: loop body
LE: loop exit
PB: predicated region body
PF: predicated region fallthrough
CT: control target
= control target key end

     0   :  { %s4613_s27 = smov 0   ;;  %s6419_s0 = inlined_call_operand.vmem [shape: f32[2,128,128], index: 0, kind: input, shape index: {}]   ;;  %s6420_s1 = inlined_call_operand.vmem [shape: f32[1,128], index: 1, kind: input, shape index: {}]   ;;  %s6421_s2 = inlined_call_operand.vmem [shape: f32[1,128], index: 2, kind: input, shape index: {}]   ;;  %s6422_s3 = inlined_call_operand.vmem [shape: bf16[128,384], index: 3, kind: input, shape index: {}]   ;;  %s6423_s4 = inlined_call_operand.vmem [shape: f32[1,384], index: 4, kind: input, shape index: {}]   ;;  %s6424_s5 = inlined_call_operand.vmem [shape: bf16[128,128], index: 5, kind: input, shape index: {}]   ;;  %s6425_s6 = inlined_call_operand.vmem [shape: f32[1,128], index: 6, kind: input, shape index: {}]   ;;  %s6426_s7 = inlined_call_operand.vmem [shape: f32[128,128], index: 7, kind: input, shape index: {}]   ;;  %s6427_s8 = inlined_call_operand.vmem [shape: f32[2,128,128], index: 8, kind: output, shape index: {}]  }
   0x1 LB: > { %s3488_s28 = sadd.s32 4294967295, %s4562_s27   ;;  %p3492_p0 = scmp.ge.s32.totalorder %s4562_s27, 1  ;;  %s4562_s27 = sphi %s4613_s27, %s18_s27  }
   0x2   : > { %p262_p1 = scmp.lt.s32.totalorder %s4562_s27, 3 }
   0x4   : > { %p263_p2 = pnand %p3492_p0, %p262_p1 }
   0x6   : > { %266 = sbr.rel (%p263_p2) target bundleno = 3303 (0xce7), region = 52 }
   0xb   : > { %p296_p3 = scmp.lt.s32.totalorder %s3488_s28, 1  ;;  %v4196_v16 = vld [vmem:[%s6422_s3 + $0xac] ss:$12 sps:$4 sm:$0xff]   ;;  %v4198_v17 = vld [vmem:[%s6422_s3 + $0xa8] ss:$12 sps:$4 sm:$0xff]   ;;  %vm997_vm0 = vcmask 261120  }
   0xc   : > { %731 = vmatprep.subr.bf16.mxu0 %v4196_v16  ;;  %v4199_v53 = vld [vmem:[%s6422_s3 + $0x94] ss:$12 sps:$4 sm:$0xff]   ;;  %v4201_v54 = vld [vmem:[%s6422_s3 + $0xb0] ss:$12 sps:$4 sm:$0xff]   ;;  %s4565_s11 = smov 96   ;;  %s4567_s14 = smov 32  }
   0xd   : > { %s6502_s28 = smov (!%p296_p3, %s3488_s28), 1  ;;  %732 = vmatpush1.bf16.msra.mxu0 %v4198_v17  ;;  %v4202_v55 = vld [vmem:[%s6422_s3 + $0x90] ss:$12 sps:$4 sm:$0xff]   ;;  %3784 = vmatprep.subr.bf16.mxu1 %v4201_v54 }
   0xe   : > { %s3598_s29 = sshll.u32 %s6502_s28, 7  ;;  %733 = vmatprep.subr.bf16.mxu0 %v4199_v53  ;;  %3785 = vmatpush3.bf16.msra.mxu1 %v4201_v54 }
   0xf   : > { %s4629_s10 = scalar_lea.vmem %s6419_s0, %s3598_s29  ;;  %s6353_s12 = scalar_lea.vmem %s6427_s8, %s3598_s29 }
  0x10   : > { %v307_v0 = vld [vmem:[%s4629_s10] sm:$0xff]  ;;  %v309_v1 = vld [vmem:[%s4629_s10 + $0x10] sm:$0xff]  ;;  %v308_v2 = vld [vmem:[%s4629_s10 + $0x8] sm:$0xff] }
  0x11   : > { %325 = vadd.xlane.f32.xlu0 %v307_v0  ;;  %329 = vadd.xlane.f32.xlu1 %v309_v1  ;;  %v310_v3 = vld [vmem:[%s4629_s10 + $0x18] sm:$0xff]  ;;  %v311_v4 = vld [vmem:[%s4629_s10 + $0x20] sm:$0xff]  ;;  %v312_v5 = vld [vmem:[%s4629_s10 + $0x28] sm:$0xff] }
  0x12   : > { %v313_v6 = vld [vmem:[%s4629_s10 + $0x30] sm:$0xff]  ;;  %v314_v7 = vld [vmem:[%s4629_s10 + $0x38] sm:$0xff]  ;;  %v4640_v8 = vld [vmem:[%s4629_s10 + $0x40] sm:$0xff]  ;;  %734 = vmatpush1.bf16.msra.mxu0 %v4202_v55 }
  0x13   : > { %v4643_v9 = vld [vmem:[%s4629_s10 + $0x48] sm:$0xff]  ;;  %v4648_v10 = vld [vmem:[%s4629_s10 + $0x50] sm:$0xff]  ;;  %v4651_v11 = vld [vmem:[%s4629_s10 + $0x58] sm:$0xff] }
  0x14   : > { %v4656_v12 = vld [vmem:[%s4629_s10 + $0x60] sm:$0xff]  ;;  %v4659_v13 = vld [vmem:[%s4629_s10 + $0x68] sm:$0xff]  ;;  %v4664_v14 = vld [vmem:[%s4629_s10 + $0x70] sm:$0xff] }
  0x15   : > { %327 = vadd.xlane.f32.xlu0 %v308_v2  ;;  %331 = vadd.xlane.f32.xlu1 %v310_v3  ;;  %v4667_v15 = vld [vmem:[%s4629_s10 + $0x78] sm:$0xff] }
  0x19   : > { %333 = vadd.xlane.f32.xlu0 %v311_v4  ;;  %335 = vadd.xlane.f32.xlu1 %v312_v5 }
  0x1d   : > { %337 = vadd.xlane.f32.xlu0 %v313_v6  ;;  %339 = vadd.xlane.f32.xlu1 %v314_v7 }
  0x21   : > { %341 = vadd.xlane.f32.xlu0 %v4640_v8  ;;  %343 = vadd.xlane.f32.xlu1 %v4643_v9 }
  0x25   : > { %345 = vadd.xlane.f32.xlu0 %v4648_v10  ;;  %347 = vadd.xlane.f32.xlu1 %v4651_v11 }
  0x29   : > { %349 = vadd.xlane.f32.xlu0 %v4656_v12  ;;  %351 = vadd.xlane.f32.xlu1 %v4659_v13 }
  0x2d   : > { %353 = vadd.xlane.f32.xlu0 %v4664_v14  ;;  %355 = vadd.xlane.f32.xlu1 %v4667_v15 }
  0x9a   : > { %v326_v18 = vpop.xlane.xlu0 %325  ;;  %v330_v19 = vpop.xlane.xlu1 %329 }
  0x9b   : > { %v358_v20 = vmul.f32 0.0078125, %v326_v18  ;;  %v360_v21 = vmul.f32 0.0078125, %v330_v19 }
  0x9d   : > { %v4677_v22 = vsub.f32 %v307_v0, %v358_v20  ;;  %v4679_v23 = vsub.f32 %v309_v1, %v360_v21  ;;  %v4203_v0 = vld [vmem:[%s6422_s3 + $0x7c] ss:$12 sps:$4 sm:$0xff]   ;;  %v4205_v1 = vld [vmem:[%s6422_s3 + $0x98] ss:$12 sps:$4 sm:$0xff]   ;;  %v4210_v20 = vld [vmem:[%s6422_s3 + $0x60] ss:$12 sps:$4 sm:$0xff]  }
  0x9e   : > { %v328_v24 = vpop.xlane.xlu0 %327  ;;  %v332_v25 = vpop.xlane.xlu1 %331  ;;  %735 = vmatprep.subr.bf16.mxu0 %v4203_v0  ;;  %3786 = vmatprep.subr.bf16.mxu1 %v4205_v1 }
  0x9f   : > { %v359_v26 = vmul.f32 0.0078125, %v328_v24  ;;  %v390_v27 = vmul.f32 %v4677_v22, %v4677_v22  ;;  %v361_v28 = vmul.f32 0.0078125, %v332_v25  ;;  %v392_v29 = vmul.f32 %v4679_v23, %v4679_v23  ;;  %3787 = vmatpush3.bf16.msra.mxu1 %v4205_v1 }
  0xa1   : > { %406 = vadd.xlane.f32.xlu0 %v390_v27  ;;  %v4685_v30 = vsub.f32 %v308_v2, %v359_v26  ;;  %v4687_v31 = vsub.f32 %v310_v3, %v361_v28 }
  0xa2   : > { %v334_v32 = vpop.xlane.xlu0 %333  ;;  %v336_v33 = vpop.xlane.xlu1 %335 }
  0xa3   : > { %v362_v34 = vmul.f32 0.0078125, %v334_v32  ;;  %v391_v35 = vmul.f32 %v4685_v30, %v4685_v30  ;;  %v363_v36 = vmul.f32 0.0078125, %v336_v33  ;;  %v393_v37 = vmul.f32 %v4687_v31, %v4687_v31  ;;  %v4214_v33 = vld [vmem:[%s6422_s3 + $0x48] ss:$12 sps:$4 sm:$0xff]  }
  0xa5   : > { %410 = vadd.xlane.f32.xlu0 %v392_v29  ;;  %408 = vadd.xlane.f32.xlu1 %v391_v35  ;;  %v4693_v38 = vsub.f32 %v311_v4, %v362_v34  ;;  %v4695_v39 = vsub.f32 %v312_v5, %v363_v36  ;;  %v4206_v5 = vld [vmem:[%s6422_s3 + $0x78] ss:$12 sps:$4 sm:$0xff]   ;;  %v4215_v35 = vld [vmem:[%s6422_s3 + $0x34] ss:$12 sps:$4 sm:$0xff]   ;;  %v4218_v36 = vld [vmem:[%s6422_s3 + $0x30] ss:$12 sps:$4 sm:$0xff]  }
  0xa6   : > { %v338_v40 = vpop.xlane.xlu0 %337  ;;  %v340_v41 = vpop.xlane.xlu1 %339  ;;  %736 = vmatpush1.bf16.msra.mxu0 %v4206_v5 }
  0xa7   : > { %v364_v42 = vmul.f32 0.0078125, %v338_v40  ;;  %v394_v43 = vmul.f32 %v4693_v38, %v4693_v38  ;;  %v365_v44 = vmul.f32 0.0078125, %v340_v41  ;;  %v395_v45 = vmul.f32 %v4695_v39, %v4695_v39  ;;  %v4221_v40 = vld [vmem:[%s6422_s3 + $0x38] ss:$12 sps:$4 sm:$0xff]  }
  0xa8   : > { %v4222_v41 = vld [vmem:[%s6422_s3 + $0x18] ss:$12 sps:$4 sm:$0xff]  }
  0xa9   : > { %412 = vadd.xlane.f32.xlu1 %v393_v37  ;;  %414 = vadd.xlane.f32.xlu0 %v394_v43  ;;  %v4701_v46 = vsub.f32 %v313_v6, %v364_v42  ;;  %v4703_v47 = vsub.f32 %v314_v7, %v365_v44  ;;  %v4219_v37 = vld [vmem:[%s6422_s3 + $0x1c] ss:$12 sps:$4 sm:$0xff]   ;;  %v4223_v42 = vld [vmem:[%s6422_s3 + $0x4] ss:$12 sps:$4 sm:$0xff]   ;;  %v4225_v43 = vld [vmem:[%s6422_s3 + $0x20] ss:$12 sps:$4 sm:$0xff]  }
  0xaa   : > { %v342_v48 = vpop.xlane.xlu0 %341  ;;  %v344_v49 = vpop.xlane.xlu1 %343  ;;  %v4226_v44 = vld [vmem:[%s6422_s3] ss:$12 sps:$4 sm:$0xff]  }
  0xab   : > { %v366_v50 = vmul.f32 0.0078125, %v342_v48  ;;  %v396_v51 = vmul.f32 %v4701_v46, %v4701_v46  ;;  %v367_v52 = vmul.f32 0.0078125, %v344_v49  ;;  %v397_v56 = vmul.f32 %v4703_v47, %v4703_v47 }
  0xac   : > { %v4564_v48 = vmov 0  }
  0xad   : > { %416 = vadd.xlane.f32.xlu1 %v395_v45  ;;  %418 = vadd.xlane.f32.xlu0 %v396_v51  ;;  %v4719_v57 = vsub.f32 %v4640_v8, %v366_v50  ;;  %v4722_v58 = vsub.f32 %v4643_v9, %v367_v52  ;;  %v4227_v45 = vld [vmem:[%s6422_s3 + $0x8] ss:$12 sps:$4 sm:$0xff]  }
  0xae   : > { %v346_v59 = vpop.xlane.xlu0 %345  ;;  %v348_v60 = vpop.xlane.xlu1 %347  ;;  %763 = vmatprep.mubr.bf16.mxu0 %v4564_v48 }
  0xaf   : > { %v368_v61 = vmul.f32 0.0078125, %v346_v59  ;;  %v398_v62 = vmul.f32 %v4719_v57, %v4719_v57  ;;  %v369_v63 = vmul.f32 0.0078125, %v348_v60  ;;  %v399_v2 = vmul.f32 %v4722_v58, %v4722_v58 }
  0xb1   : > { %420 = vadd.xlane.f32.xlu1 %v397_v56  ;;  %422 = vadd.xlane.f32.xlu0 %v398_v62  ;;  %v4735_v3 = vsub.f32 %v4648_v10, %v368_v61  ;;  %v4738_v4 = vsub.f32 %v4651_v11, %v369_v63  ;;  %v4207_v10 = vld [vmem:[%s6422_s3 + $0x64] ss:$12 sps:$4 sm:$0xff]   ;;  %v4209_v11 = vld [vmem:[%s6422_s3 + $0x80] ss:$12 sps:$4 sm:$0xff]  }
  0xb2   : > { %v350_v6 = vpop.xlane.xlu0 %349  ;;  %v352_v7 = vpop.xlane.xlu1 %351  ;;  %737 = vmatprep.subr.bf16.mxu0 %v4207_v10  ;;  %3788 = vmatprep.subr.bf16.mxu1 %v4209_v11 }
  0xb3   : > { %v370_v8 = vmul.f32 0.0078125, %v350_v6  ;;  %v400_v9 = vmul.f32 %v4735_v3, %v4735_v3  ;;  %v371_v16 = vmul.f32 0.0078125, %v352_v7  ;;  %v401_v17 = vmul.f32 %v4738_v4, %v4738_v4  ;;  %738 = vmatpush1.bf16.msra.mxu0 %v4210_v20  ;;  %3789 = vmatpush3.bf16.msra.mxu1 %v4209_v11 }
  0xb5   : > { %424 = vadd.xlane.f32.xlu1 %v399_v2  ;;  %426 = vadd.xlane.f32.xlu0 %v400_v9  ;;  %v4754_v18 = vsub.f32 %v4656_v12, %v370_v8  ;;  %v4757_v19 = vsub.f32 %v4659_v13, %v371_v16  ;;  %v4211_v12 = vld [vmem:[%s6422_s3 + $0x4c] ss:$12 sps:$4 sm:$0xff]   ;;  %v4213_v13 = vld [vmem:[%s6422_s3 + $0x68] ss:$12 sps:$4 sm:$0xff]  }
  0xb6   : > { %v354_v21 = vpop.xlane.xlu0 %353  ;;  %v356_v24 = vpop.xlane.xlu1 %355  ;;  %739 = vmatprep.subr.bf16.mxu0 %v4211_v12  ;;  %3790 = vmatprep.subr.bf16.mxu1 %v4213_v13 }
  0xb7   : > { %v372_v25 = vmul.f32 0.0078125, %v354_v21  ;;  %v402_v26 = vmul.f32 %v4754_v18, %v4754_v18  ;;  %v373_v27 = vmul.f32 0.0078125, %v356_v24  ;;  %v403_v28 = vmul.f32 %v4757_v19, %v4757_v19  ;;  %740 = vmatpush1.bf16.msra.mxu0 %v4214_v33  ;;  %3791 = vmatpush3.bf16.msra.mxu1 %v4213_v13 }
  0xb8   : > { %741 = vmatprep.subr.bf16.mxu0 %v4215_v35 }
  0xb9   : > { %428 = vadd.xlane.f32.xlu1 %v401_v17  ;;  %430 = vadd.xlane.f32.xlu0 %v402_v26  ;;  %v4773_v29 = vsub.f32 %v4664_v14, %v372_v25  ;;  %v4776_v32 = vsub.f32 %v4667_v15, %v373_v27  ;;  %v4217_v14 = vld [vmem:[%s6422_s3 + $0x50] ss:$12 sps:$4 sm:$0xff]   ;;  %v4819_v25 = vld [vmem:[%s6420_s1] ss:$0 sm:$0xff] }
  0xba   : > { %3792 = vmatprep.subr.bf16.mxu1 %v4217_v14 }
  0xbb   : > { %v404_v34 = vmul.f32 %v4773_v29, %v4773_v29  ;;  %v405_v15 = vmul.f32 %v4776_v32, %v4776_v32  ;;  %742 = vmatpush1.bf16.msra.mxu0 %v4218_v36  ;;  %3793 = vmatpush3.bf16.msra.mxu1 %v4217_v14  ;;  %v4826_v36 = vld [vmem:[%s6421_s2] ss:$0 sm:$0xff] }
  0xbc   : > { %743 = vmatprep.subr.bf16.mxu0 %v4219_v37  ;;  %3794 = vmatprep.subr.bf16.mxu1 %v4221_v40 }
  0xbd   : > { %432 = vadd.xlane.f32.xlu1 %v403_v28  ;;  %434 = vadd.xlane.f32.xlu0 %v404_v34 }
  0xbf   : > { %744 = vmatpush1.bf16.msra.mxu0 %v4222_v41  ;;  %3795 = vmatpush3.bf16.msra.mxu1 %v4221_v40 }
  0xc0   : > { %745 = vmatprep.subr.bf16.mxu0 %v4223_v42  ;;  %3796 = vmatprep.subr.bf16.mxu1 %v4225_v43 }
  0xc1   : > { %436 = vadd.xlane.f32.xlu1 %v405_v15 }
  0xc3   : > { %746 = vmatpush1.bf16.msra.mxu0 %v4226_v44  ;;  %3797 = vmatpush3.bf16.msra.mxu1 %v4225_v43 }
  0xc4   : > { %3798 = vmatprep.subr.bf16.mxu1 %v4227_v45 }
  0xc7   : > { %3799 = vmatpush3.bf16.msra.mxu1 %v4227_v45 }
 0x12a   : > { %v407_v49 = vpop.xlane.xlu0 %406 }
 0x12b   : > { %v438_v50 = vmul.f32 0.0078125, %v407_v49 }
 0x12d   : > { %v454_v51 = vadd.f32 1e-05, %v438_v50 }
 0x12e   : > { %v409_v52 = vpop.xlane.xlu1 %408  ;;  %v411_v53 = vpop.xlane.xlu0 %410 }
 0x12f   : > { %4236 = vrsqrt.f32 %v454_v51  ;;  %v439_v54 = vmul.f32 0.0078125, %v409_v52  ;;  %v440_v55 = vmul.f32 0.0078125, %v411_v53 }
 0x131   : > { %v455_v56 = vadd.f32 1e-05, %v439_v54  ;;  %v456_v59 = vadd.f32 1e-05, %v440_v55 }
 0x132   : > { %v413_v60 = vpop.xlane.xlu1 %412  ;;  %v415_v61 = vpop.xlane.xlu0 %414 }
 0x133   : > { %4238 = vrsqrt.f32 %v455_v56  ;;  %v441_v62 = vmul.f32 0.0078125, %v413_v60  ;;  %v442_v63 = vmul.f32 0.0078125, %v415_v61 }
 0x134   : > { %4240 = vrsqrt.f32 %v456_v59 }
 0x135   : > { %v457_v0 = vadd.f32 1e-05, %v441_v62  ;;  %v458_v1 = vadd.f32 1e-05, %v442_v63 }
 0x136   : > { %v417_v2 = vpop.xlane.xlu1 %416  ;;  %v419_v5 = vpop.xlane.xlu0 %418 }
 0x137   : > { %4242 = vrsqrt.f32 %v457_v0  ;;  %v443_v6 = vmul.f32 0.0078125, %v417_v2  ;;  %v444_v7 = vmul.f32 0.0078125, %v419_v5 }
 0x138   : > { %4244 = vrsqrt.f32 %v458_v1 }
 0x139   : > { %v459_v8 = vadd.f32 1e-05, %v443_v6  ;;  %v460_v9 = vadd.f32 1e-05, %v444_v7 }
 0x13a   : > { %v421_v16 = vpop.xlane.xlu1 %420  ;;  %v423_v10 = vpop.xlane.xlu0 %422 }
 0x13b   : > { %4246 = vrsqrt.f32 %v459_v8  ;;  %v445_v11 = vmul.f32 0.0078125, %v421_v16  ;;  %v446_v17 = vmul.f32 0.0078125, %v423_v10 }
 0x13c   : > { %v4237_v20 = vpop.eup %4236  ;;  %4248 = vrsqrt.f32 %v460_v9 }
 0x13d   : > { %v461_v21 = vadd.f32 1e-05, %v445_v11  ;;  %v462_v24 = vadd.f32 1e-05, %v446_v17  ;;  %v486_v26 = vmul.f32 %v4237_v20, %v4677_v22 }
 0x13e   : > { %v425_v27 = vpop.xlane.xlu1 %424  ;;  %v427_v12 = vpop.xlane.xlu0 %426 }
 0x13f   : > { %4250 = vrsqrt.f32 %v461_v21  ;;  %v447_v13 = vmul.f32 0.0078125, %v425_v27  ;;  %v448_v28 = vmul.f32 0.0078125, %v427_v12  ;;  %v508_v34 = vmul.f32 %v4819_v25, %v486_v26 }
 0x140   : > { %v4239_v33 = vpop.eup %4238  ;;  %4252 = vrsqrt.f32 %v462_v24 }
 0x141   : > { %v4241_v35 = vpop.eup %4240  ;;  %v463_v14 = vadd.f32 1e-05, %v447_v13  ;;  %v464_v15 = vadd.f32 1e-05, %v448_v28  ;;  %v487_v37 = vmul.f32 %v4239_v33, %v4685_v30  ;;  %v530_v49 = vadd.f32 %v4826_v36, %v508_v34 }
 0x142   : > { %v429_v22 = vpop.xlane.xlu1 %428  ;;  %v431_v40 = vpop.xlane.xlu0 %430  ;;  %v488_v41 = vmul.f32 %v4241_v35, %v4679_v23 }
 0x143   : > { %4254 = vrsqrt.f32 %v463_v14  ;;  %v449_v42 = vmul.f32 0.0078125, %v429_v22  ;;  %v450_v43 = vmul.f32 0.0078125, %v431_v40  ;;  %v509_v44 = vmul.f32 %v4819_v25, %v487_v37 }
 0x144   : > { %v4243_v45 = vpop.eup %4242  ;;  %4256 = vrsqrt.f32 %v464_v15  ;;  %v510_v23 = vmul.f32 %v4819_v25, %v488_v41 }
 0x145   : > { %v4245_v50 = vpop.eup %4244  ;;  %v465_v51 = vadd.f32 1e-05, %v449_v42  ;;  %v466_v52 = vadd.f32 1e-05, %v450_v43  ;;  %v531_v53 = vadd.f32 %v4826_v36, %v509_v44  ;;  %v489_v30 = vmul.f32 %v4243_v45, %v4687_v31 }
 0x146   : > { %v433_v54 = vpop.xlane.xlu1 %432  ;;  %v435_v55 = vpop.xlane.xlu0 %434  ;;  %v490_v56 = vmul.f32 %v4245_v50, %v4693_v38  ;;  %v532_v38 = vadd.f32 %v4826_v36, %v510_v23 }
 0x147   : > { %4258 = vrsqrt.f32 %v465_v51  ;;  %v451_v59 = vmul.f32 0.0078125, %v433_v54  ;;  %v452_v60 = vmul.f32 0.0078125, %v435_v55  ;;  %v546_v61 = vpack.c.bf16 %v531_v53, %v530_v49 }
 0x148   : > { %v4247_v62 = vpop.eup %4246  ;;  %4260 = vrsqrt.f32 %v466_v52  ;;  %v511_v63 = vmul.f32 %v4819_v25, %v489_v30  ;;  %v512_v5 = vmul.f32 %v4819_v25, %v490_v56 }
 0x149   : > { %v4249_v0 = vpop.eup %4248  ;;  %v467_v1 = vadd.f32 1e-05, %v451_v59  ;;  %v468_v2 = vadd.f32 1e-05, %v452_v60  ;;  %764 = vmatmul.mubr.bf16.vlgmr.msra.gmra.mxu0 %v546_v61  ;;  %3800 = vmatprep.mubr.bf16.mxu1 %v546_v61  ;;  %v491_v31 = vmul.f32 %v4247_v62, %v4695_v39 }
 0x14a   : > { %v437_v6 = vpop.xlane.xlu1 %436  ;;  %v533_v7 = vadd.f32 %v4826_v36, %v511_v63  ;;  %773 = vmatprep.mubr.bf16.mxu0 %v4564_v48  ;;  %v492_v8 = vmul.f32 %v4249_v0, %v4701_v46  ;;  %v534_v21 = vadd.f32 %v4826_v36, %v512_v5 }
 0x14b   : > { %4262 = vrsqrt.f32 %v467_v1  ;;  %v453_v9 = vmul.f32 0.0078125, %v437_v6  ;;  %v513_v16 = vmul.f32 %v4819_v25, %v491_v31 }
 0x14c   : > { %v4251_v10 = vpop.eup %4250  ;;  %4264 = vrsqrt.f32 %v468_v2  ;;  %v547_v11 = vpack.c.bf16 %v533_v7, %v532_v38  ;;  %v514_v39 = vmul.f32 %v4819_v25, %v492_v8 }
 0x14d   : > { %v4253_v17 = vpop.eup %4252  ;;  %v469_v20 = vadd.f32 1e-05, %v453_v9  ;;  %v535_v24 = vadd.f32 %v4826_v36, %v513_v16  ;;  %v493_v26 = vmul.f32 %v4251_v10, %v4703_v47 }
 0x14e   : > { %3801 = vmatmul.mubr.bf16.vlgmr.msra.gmra.mxu1 %v547_v11  ;;  %v494_v46 = vmul.f32 %v4253_v17, %v4719_v57  ;;  %v536_v28 = vadd.f32 %v4826_v36, %v514_v39 }
 0x14f   : > { %4266 = vrsqrt.f32 %v469_v20  ;;  %v548_v27 = vpack.c.bf16 %v535_v24, %v534_v21  ;;  %v515_v12 = vmul.f32 %v4819_v25, %v493_v26 }
 0x150   : > { %v4255_v13 = vpop.eup %4254  ;;  %v516_v14 = vmul.f32 %v4819_v25, %v494_v46 }
 0x151   : > { %v4257_v33 = vpop.eup %4256  ;;  %774 = vmatmul.mubr.bf16.gmra.mxu0 %v547_v11  ;;  %3804 = vmatprep.mubr.bf16.mxu1 %v548_v27  ;;  %v537_v34 = vadd.f32 %v4826_v36, %v515_v12  ;;  %v495_v35 = vmul.f32 %v4255_v13, %v4722_v58 }
 0x152   : > { %783 = vmatprep.mubr.bf16.mxu0 %v4564_v48  ;;  %v496_v47 = vmul.f32 %v4257_v33, %v4735_v3  ;;  %v538_v41 = vadd.f32 %v4826_v36, %v516_v14 }
 0x153   : > { %v549_v57 = vpack.c.bf16 %v537_v34, %v536_v28  ;;  %v517_v15 = vmul.f32 %v4819_v25, %v495_v35 }
 0x154   : > { %v4259_v37 = vpop.eup %4258  ;;  %v518_v22 = vmul.f32 %v4819_v25, %v496_v47 }
 0x155   : > { %v4261_v40 = vpop.eup %4260  ;;  %v539_v42 = vadd.f32 %v4826_v36, %v517_v15  ;;  %v497_v43 = vmul.f32 %v4259_v37, %v4738_v4 }
 0x156   : > { %3805 = vmatmul.mubr.bf16.gmra.mxu1 %v549_v57  ;;  %v498_v58 = vmul.f32 %v4261_v40, %v4754_v18  ;;  %v540_v49 = vadd.f32 %v4826_v36, %v518_v22 }
 0x157   : > { %v550_v44 = vpack.c.bf16 %v539_v42, %v538_v41  ;;  %v519_v45 = vmul.f32 %v4819_v25, %v497_v43 }
 0x158   : > { %v4263_v3 = vpop.eup %4262  ;;  %v520_v53 = vmul.f32 %v4819_v25, %v498_v58 }
 0x159   : > { %v4265_v50 = vpop.eup %4264  ;;  %784 = vmatmul.mubr.bf16.gmra.mxu0 %v548_v27  ;;  %3808 = vmatprep.mubr.bf16.mxu1 %v550_v44  ;;  %v541_v51 = vadd.f32 %v4826_v36, %v519_v45  ;;  %v499_v52 = vmul.f32 %v4263_v3, %v4757_v19 }
 0x15a   : > { %793 = vmatprep.mubr.bf16.mxu0 %v4564_v48  ;;  %v500_v4 = vmul.f32 %v4265_v50, %v4773_v29  ;;  %v542_v55 = vadd.f32 %v4826_v36, %v520_v53 }
 0x15b   : > { %v551_v18 = vpack.c.bf16 %v541_v51, %v540_v49  ;;  %v521_v30 = vmul.f32 %v4819_v25, %v499_v52 }
 0x15c   : > { %v4267_v54 = vpop.eup %4266  ;;  %v522_v59 = vmul.f32 %v4819_v25, %v500_v4 }
 0x15d   : > { %v543_v23 = vadd.f32 %v4826_v36, %v521_v30  ;;  %v501_v56 = vmul.f32 %v4267_v54, %v4776_v32  ;;  %v588_v32 = vlaneseq }
 0x15e   : > { %3809 = vmatmul.mubr.bf16.gmra.mxu1 %v551_v18  ;;  %v544_v29 = vadd.f32 %v4826_v36, %v522_v59 }
 0x15f   : > { %v552_v19 = vpack.c.bf16 %v543_v23, %v542_v55  ;;  %v523_v60 = vmul.f32 %v4819_v25, %v501_v56  ;;  %v4881_v25 = vshrl.u32 %v588_v32, 7 }
 0x161   : > { %794 = vmatmul.mubr.bf16.gmra.mxu0 %v549_v57  ;;  %3812 = vmatprep.mubr.bf16.mxu1 %v552_v19  ;;  %v545_v61 = vadd.f32 %v4826_v36, %v523_v60  ;;  %v590_v63 = vsub.s32 0, %v4881_v25  ;;  %v4887_v36 = vld [vmem:[%s6423_s4] sm:$0x7]  ;;  %v594_v1 = vsub.s32 1, %v4881_v25  ;;  %v598_v59 = vsub.s32 2, %v4881_v25 }
 0x162   : > { %803 = vmatprep.mubr.bf16.mxu0 %v4564_v48 }
 0x163   : > { %v553_v62 = vpack.c.bf16 %v545_v61, %v544_v29  ;;  %v4890_v0 = vrot.slane %v4887_v36, %v590_v63  ;;  %v4895_v5 = vrot.slane %v4887_v36, %v594_v1  ;;  %v4944_v1 = vrot.slane %v4887_v36, %v598_v59 }
 0x166   : > { %3813 = vmatmul.mubr.bf16.gmra.mxu1 %v553_v62 }
 0x169   : > { %804 = vmatmul.mubr.bf16.gmra.mxu0 %v550_v44 }
 0x16a   : > { %813 = vmatprep.mubr.bf16.mxu0 %v4564_v48 }
 0x171   : > { %814 = vmatmul.mubr.bf16.gmra.mxu0 %v551_v18 }
 0x172   : > { %823 = vmatprep.mubr.bf16.mxu0 %v4564_v48 }
 0x179   : > { %824 = vmatmul.mubr.bf16.gmra.mxu0 %v552_v19 }
 0x17a   : > { %833 = vmatprep.mubr.bf16.mxu0 %v4564_v48 }
 0x181   : > { %834 = vmatmul.mubr.bf16.gmra.mxu0 %v553_v62 }
 0x209   : > { %v765_v2 = vpop.f32.mrf.mxu0 }
 0x20a   : > { %v766_v48 = vadd.f32 %v765_v2, %v4890_v0 }
 0x20b   : > { %v767_v31 = vpop.f32.mrf.mxu0 }
 0x20c   : > { %v957_v9 = vmul.f32 0.17677669, %v766_v48  ;;  %v768_v16 = vadd.f32 %v767_v31, %v4895_v5 }
 0x20d   : > { %v769_v6 = vpop.f32.mrf.mxu0 }
 0x20e   : > { %v770_v38 = vadd.f32 %v769_v6, %v4890_v0  ;;  %v4898_v7 = vpop.f32.mrf.mxu1 }
 0x20f   : > { %v771_v8 = vpop.f32.mrf.mxu0 }
 0x210   : > { %v958_v10 = vmul.f32 0.17677669, %v770_v38  ;;  %v772_v11 = vadd.f32 %v771_v8, %v4895_v5  ;;  %v4902_v39 = vpop.f32.mrf.mxu1 }
 0x211   : > { %v775_v17 = vpop.f32.mrf.mxu0 }
 0x212   : > { %v4904_v20 = vpack.c.bf16 %v958_v10, %v957_v9  ;;  %v4906_v21 = vpack.c.bf16 %v772_v11, %v768_v16  ;;  %v776_v24 = vadd.f32 %v775_v17, %v4890_v0  ;;  %v4909_v26 = vpop.f32.mrf.mxu1 }
 0x213   : > { %v777_v46 = vpop.f32.mrf.mxu0 }
 0x214   : > { %v4911_v27 = vpop.f32.mrf.mxu1  ;;  %3832 = vmatprep.mubr.msk.bf16.mxu0 %vm997_vm0, %v4904_v20  ;;  %v959_v34 = vmul.f32 0.17677669, %v776_v24  ;;  %v778_v35 = vadd.f32 %v777_v46, %v4895_v5 }
 0x215   : > { %v779_v12 = vpop.f32.mrf.mxu0 }
 0x216   : > { %v780_v13 = vadd.f32 %v779_v12, %v4890_v0  ;;  %v4916_v28 = vpop.f32.mrf.mxu1 }
 0x217   : > { %v781_v33 = vpop.f32.mrf.mxu0 }
 0x218   : > { %v960_v14 = vmul.f32 0.17677669, %v780_v13  ;;  %v782_v47 = vadd.f32 %v781_v33, %v4895_v5  ;;  %v4920_v57 = vpop.f32.mrf.mxu1 }
 0x219   : > { %v785_v15 = vpop.f32.mrf.mxu0 }
 0x21a   : > { %v4922_v37 = vpack.c.bf16 %v960_v14, %v959_v34  ;;  %v4924_v22 = vpack.c.bf16 %v782_v47, %v778_v35  ;;  %v786_v40 = vadd.f32 %v785_v15, %v4890_v0  ;;  %v3807_v41 = vpop.f32.mrf.mxu1 }
 0x21b   : > { %v787_v42 = vpop.f32.mrf.mxu0 }
 0x21c   : > { %v4927_v43 = vpop.f32.mrf.mxu1  ;;  %v961_v49 = vmul.f32 0.17677669, %v786_v40  ;;  %v788_v50 = vadd.f32 %v787_v42, %v4895_v5 }
 0x21d   : > { %v789_v58 = vpop.f32.mrf.mxu0 }
 0x21e   : > { %v790_v44 = vadd.f32 %v789_v58, %v4890_v0  ;;  %v3810_v45 = vpop.f32.mrf.mxu1 }
 0x21f   : > { %v791_v3 = vpop.f32.mrf.mxu0  ;;  %v919_v34 = vadd.f32 %v3810_v45, %v4944_v1 }
 0x220   : > { %v962_v51 = vmul.f32 0.17677669, %v790_v44  ;;  %v792_v52 = vadd.f32 %v791_v3, %v4895_v5  ;;  %v910_v53 = vpop.f32.mrf.mxu1  ;;  %v906_v3 = vadd.f32 %v3807_v41, %v4944_v1  ;;  %v898_v41 = vadd.f32 %v4927_v43, %v4944_v1 }
 0x221   : > { %v795_v4 = vpop.f32.mrf.mxu0  ;;  %v911_v58 = vadd.f32 %v910_v53, %v4944_v1 }
 0x222   : > { %v4932_v18 = vpack.c.bf16 %v962_v51, %v961_v49  ;;  %v4934_v30 = vpack.c.bf16 %v792_v52, %v788_v50  ;;  %v796_v54 = vadd.f32 %v795_v4, %v4890_v0  ;;  %v3811_v55 = vpop.f32.mrf.mxu1  ;;  %v903_v4 = vadd.f32 %v4916_v28, %v4944_v1 }
 0x223   : > { %v4937_v23 = vpop.f32.mrf.mxu0  ;;  %v922_v24 = vadd.f32 %v3811_v55, %v4944_v1 }
 0x224   : > { %6451 = vst [vmem:[#allocation2_spill] sm:$0xff] %v4934_v30  ;;  %v913_v56 = vpop.f32.mrf.mxu1  ;;  %v963_v62 = vmul.f32 0.17677669, %v796_v54 }
 0x225   : > { %v799_v19 = vpop.f32.mrf.mxu0  ;;  %v4970_v15 = vpack.c.bf16 %v922_v24, %v919_v34  ;;  %v914_v40 = vadd.f32 %v913_v56, %v4944_v1  ;;  %v4989_v56 = vpack.c.bf16 %v906_v3, %v903_v4 }
 0x226   : > { %v800_v60 = vadd.f32 %v799_v19, %v4890_v0  ;;  %v3814_v29 = vpop.f32.mrf.mxu1  ;;  %v895_v19 = vadd.f32 %v4920_v57, %v4944_v1  ;;  %v887_v57 = vadd.f32 %v4898_v7, %v4944_v1  ;;  %v879_v7 = vadd.f32 %v4902_v39, %v4944_v1 }
 0x227   : > { %v4941_v61 = vpop.f32.mrf.mxu0  ;;  %v935_v25 = vadd.f32 %v3814_v29, %v4944_v1  ;;  %6452 = vst [vmem:[#allocation3_spill] sm:$0xff] %v4970_v15  ;;  %v4980_v49 = vpack.c.bf16 %v914_v40, %v911_v58  ;;  %6454 = vst [vmem:[#allocation5_spill] sm:$0xff] %v4989_v56  ;;  %v890_v29 = vadd.f32 %v4909_v26, %v4944_v1 }
 0x228   : > { %v964_v32 = vmul.f32 0.17677669, %v800_v60  ;;  %v926_v63 = vpop.f32.mrf.mxu1 }
 0x229   : > { %v805_v2 = vpop.f32.mrf.mxu0  ;;  %v927_v16 = vadd.f32 %v926_v63, %v4944_v1  ;;  %6453 = vst [vmem:[#allocation4_spill] sm:$0xff] %v4980_v49 }
 0x22a   : > { %v4946_v31 = vpack.c.bf16 %v964_v32, %v963_v62  ;;  %v806_v48 = vadd.f32 %v805_v2, %v4890_v0  ;;  %v3815_v6 = vpop.f32.mrf.mxu1  ;;  %v5000_v62 = vpack.c.bf16 %v898_v41, %v895_v19 }
 0x22b   : > { %v938_v38 = vadd.f32 %v3815_v6, %v4944_v1  ;;  %v4951_v8 = vpop.f32.mrf.mxu0 }
 0x22c   : > { %v929_v9 = vpop.f32.mrf.mxu1  ;;  %v965_v13 = vmul.f32 0.17677669, %v806_v48  ;;  %v808_v3 = vadd.f32 %v4951_v8, %v4895_v5 }
 0x22d   : > { %v4954_v10 = vpack.c.bf16 %v938_v38, %v935_v25  ;;  %v930_v36 = vadd.f32 %v929_v9, %v4944_v1  ;;  %v809_v11 = vpop.f32.mrf.mxu0  ;;  %v5013_v9 = vpack.c.bf16 %v890_v29, %v887_v57 }
 0x22e   : > { %v810_v17 = vadd.f32 %v809_v11, %v4890_v0 }
 0x22f   : > { %v4959_v46 = vpack.c.bf16 %v930_v36, %v927_v16  ;;  %3848 = vmatprep.subr.bf16.mxu1 %v4954_v10  ;;  %v4962_v12 = vpop.f32.mrf.mxu0  ;;  %6456 = vst [vmem:[#allocation7_spill] sm:$0xff] %v5013_v9  ;;  %v882_v16 = vadd.f32 %v4911_v27, %v4944_v1 }
 0x230   : > { %v966_v33 = vmul.f32 0.17677669, %v810_v17  ;;  %3849 = vmatpush3.bf16.msra.mxu1 %v4954_v10 }
 0x231   : > { %3850 = vmatprep.subr.bf16.mxu1 %v4959_v46  ;;  %v815_v35 = vpop.f32.mrf.mxu0  ;;  %v5024_v24 = vpack.c.bf16 %v882_v16, %v879_v7  ;;  %v5155_v7 = vld [vmem:[%s6426_s7 + $0x38] sm:$0xff] }
 0x232   : > { %v4967_v14 = vpack.c.bf16 %v966_v33, %v965_v13  ;;  %v816_v47 = vadd.f32 %v815_v35, %v4890_v0 }
 0x233   : > { %v4973_v42 = vpop.f32.mrf.mxu0  ;;  %6457 = vst [vmem:[#allocation8_spill] sm:$0xff] %v5024_v24 }
 0x234   : > { %3851 = vmatpush3.bf16.msra.mxu1 %v4959_v46  ;;  %v967_v51 = vmul.f32 0.17677669, %v816_v47  ;;  %v818_v40 = vadd.f32 %v4973_v42, %v4895_v5 }
 0x235   : > { %3852 = vmatprep.subr.bf16.mxu1 %v4970_v15  ;;  %v819_v44 = vpop.f32.mrf.mxu0 }
 0x236   : > { %v820_v45 = vadd.f32 %v819_v44, %v4890_v0 }
 0x237   : > { %v821_v50 = vpop.f32.mrf.mxu0 }
 0x238   : > { %v968_v52 = vmul.f32 0.17677669, %v820_v45  ;;  %3853 = vmatpush3.bf16.msra.mxu1 %v4970_v15  ;;  %v822_v1 = vadd.f32 %v821_v50, %v4895_v5  ;;  %v812_v45 = vadd.f32 %v4962_v12, %v4895_v5  ;;  %v802_v50 = vadd.f32 %v4941_v61, %v4895_v5 }
 0x239   : > { %3854 = vmatprep.subr.bf16.mxu1 %v4980_v49  ;;  %v825_v53 = vpop.f32.mrf.mxu0  ;;  %v1029_v61 = vsel %vm997_vm0, %v4934_v30, 0 }
 0x23a   : > { %v4986_v54 = vpack.c.bf16 %v968_v52, %v967_v51  ;;  %v826_v55 = vadd.f32 %v825_v53, %v4890_v0  ;;  %v5046_v58 = vpack.c.bf16 %v822_v1, %v818_v40  ;;  %v5056_v51 = vpack.c.bf16 %v812_v45, %v808_v3  ;;  %v5191_v45 = vld [vmem:[%s6426_s7 + $0x58] sm:$0xff] }
 0x23b   : > { %v827_v59 = vpop.f32.mrf.mxu0  ;;  %v798_v52 = vadd.f32 %v4937_v23, %v4895_v5  ;;  %v1023_v23 = vsel %vm997_vm0, %v4906_v21, 0 }
 0x23c   : > { %3855 = vmatpush3.bf16.msra.mxu1 %v4980_v49  ;;  %v969_v63 = vmul.f32 0.17677669, %v826_v55  ;;  %v828_v43 = vadd.f32 %v827_v59, %v4895_v5  ;;  %6459 = vst [vmem:[#allocation10_spill] sm:$0xff] %v5046_v58  ;;  %6460 = vst [vmem:[#allocation11_spill] sm:$0xff] %v5056_v51  ;;  %v1038_v42 = vsel %vm997_vm0, %v5046_v58, 0  ;;  %v1035_v8 = vsel %vm997_vm0, %v5056_v51, 0 }
 0x23d   : > { %3856 = vmatprep.subr.bf16.mxu1 %v4989_v56  ;;  %v829_v28 = vpop.f32.mrf.mxu0  ;;  %v5066_v4 = vpack.c.bf16 %v802_v50, %v798_v52  ;;  %v5107_v55 = vld [vmem:[%s6426_s7 + $0x10] sm:$0xff] }
 0x23e   : > { %v830_v60 = vadd.f32 %v829_v28, %v4890_v0  ;;  %v5115_v28 = vld [vmem:[%s6426_s7] sm:$0xff] }
 0x23f   : > { %v831_v32 = vpop.f32.mrf.mxu0  ;;  %6461 = vst [vmem:[#allocation12_spill] sm:$0xff] %v5066_v4  ;;  %v1032_v12 = vsel %vm997_vm0, %v5066_v4, 0 }
 0x240   : > { %v970_v2 = vmul.f32 0.17677669, %v830_v60  ;;  %v832_v48 = vadd.f32 %v831_v32, %v4895_v5  ;;  %3857 = vmatpush3.bf16.msra.mxu1 %v4989_v56  ;;  %v5120_v60 = vld [vmem:[%s6426_s7 + $0x18] sm:$0xff] }
 0x241   : > { %3858 = vmatprep.subr.bf16.mxu1 %v5000_v62  ;;  %v835_v6 = vpop.f32.mrf.mxu0 }
 0x242   : > { %v5008_v25 = vpack.c.bf16 %v970_v2, %v969_v63  ;;  %v5010_v26 = vpack.c.bf16 %v832_v48, %v828_v43  ;;  %v836_v38 = vadd.f32 %v835_v6, %v4890_v0  ;;  %v5132_v2 = vld [vmem:[%s6426_s7 + $0x8] sm:$0xff]  ;;  %v5137_v48 = vld [vmem:[%s6426_s7 + $0x30] sm:$0xff] }
 0x243   : > { %v837_v36 = vpop.f32.mrf.mxu0 }
 0x244   : > { %6455 = vst [vmem:[#allocation6_spill] sm:$0xff] %v5010_v26  ;;  %3859 = vmatpush3.bf16.msra.mxu1 %v5000_v62  ;;  %1448 = vrot.lane.b32.xlu1 %v5010_v26, %s4565_s11  ;;  %v971_v33 = vmul.f32 0.17677669, %v836_v38  ;;  %v838_v27 = vadd.f32 %v837_v36, %v4895_v5  ;;  %v1041_v44 = vsel %vm997_vm0, %v5010_v26, 0  ;;  %v5150_v36 = vld [vmem:[%s6426_s7 + $0x20] sm:$0xff] }
 0x245   : > { %3860 = vmatprep.subr.bf16.mxu1 %v5013_v9  ;;  %v839_v11 = vpop.f32.mrf.mxu0 }
 0x246   : > { %v840_v17 = vadd.f32 %v839_v11, %v4890_v0 }
 0x247   : > { %v841_v13 = vpop.f32.mrf.mxu0 }
 0x248   : > { %v972_v34 = vmul.f32 0.17677669, %v840_v17  ;;  %v842_v35 = vadd.f32 %v841_v13, %v4895_v5  ;;  %3861 = vmatpush3.bf16.msra.mxu1 %v5013_v9  ;;  %v1026_v5 = vsel %vm997_vm0, %v4924_v22, 0 }
 0x249   : > { %3862 = vmatprep.subr.bf16.mxu1 %v5024_v24 }
 0x24a   : > { %v5030_v47 = vpack.c.bf16 %v972_v34, %v971_v33  ;;  %v5032_v39 = vpack.c.bf16 %v842_v35, %v838_v27  ;;  %v5168_v27 = vld [vmem:[%s6426_s7 + $0x28] sm:$0xff]  ;;  %v5173_v34 = vld [vmem:[%s6426_s7 + $0x50] sm:$0xff] }
 0x24c   : > { %6458 = vst [vmem:[#allocation9_spill] sm:$0xff] %v5032_v39  ;;  %3863 = vmatpush3.bf16.msra.mxu1 %v5024_v24  ;;  %1450 = vrot.lane.b32.xlu0 %v5032_v39, %s4565_s11  ;;  %v1044_v0 = vsel %vm997_vm0, %v5032_v39, 0 }
 0x24d   : > { %4152 = vmatprep.subr.msk.bf16.mxu0 %vm997_vm0, %v5032_v39 }
 0x24e   : > { %3817 = vmatpush3.bf16.xpose.msra.mxu0 %v1044_v0 }
 0x24f   : > { %4153 = vmatprep.subr.msk.bf16.mxu0 %vm997_vm0, %v5010_v26 }
 0x256   : > { %3819 = vmatpush3.bf16.xpose.msra.mxu0 %v1041_v44  ;;  %v5186_v44 = vld [vmem:[%s6426_s7 + $0x40] sm:$0xff] }
 0x257   : > { %4154 = vmatprep.subr.msk.bf16.mxu0 %vm997_vm0, %v5046_v58 }
 0x25e   : > { %3821 = vmatpush3.bf16.xpose.msra.mxu0 %v1038_v42 }
 0x25f   : > { %4155 = vmatprep.subr.msk.bf16.mxu0 %vm997_vm0, %v5056_v51 }
 0x266   : > { %3823 = vmatpush3.bf16.xpose.msra.mxu0 %v1035_v8  ;;  %v5204_v8 = vld [vmem:[%s6426_s7 + $0x48] sm:$0xff] }
 0x267   : > { %4156 = vmatprep.subr.msk.bf16.mxu0 %vm997_vm0, %v5066_v4 }
 0x26e   : > { %3825 = vmatpush3.bf16.xpose.msra.mxu0 %v1032_v12  ;;  %v5209_v12 = vld [vmem:[%s6426_s7 + $0x70] sm:$0xff] }
 0x26f   : > { %4157 = vmatprep.subr.msk.bf16.mxu0 %vm997_vm0, %v4934_v30 }
 0x276   : > { %3827 = vmatpush3.bf16.xpose.msra.mxu0 %v1029_v61 }
 0x277   : > { %4158 = vmatprep.subr.msk.bf16.mxu0 %vm997_vm0, %v4924_v22 }
 0x27e   : > { %3829 = vmatpush3.bf16.xpose.msra.mxu0 %v1026_v5 }
 0x27f   : > { %4159 = vmatprep.subr.msk.bf16.mxu0 %vm997_vm0, %v4906_v21 }
 0x286   : > { %3831 = vmatpush3.bf16.xpose.msra.mxu0 %v1023_v23 }
 0x28d   : > { %3833 = vmatmul.mubr.msk.bf16.vlgmr.msra.gmra.mxu0 %vm997_vm0, %v4922_v37 }
 0x28e   : > { %3836 = vmatprep.mubr.msk.bf16.mxu0 %vm997_vm0, %v4932_v18 }
 0x295   : > { %3837 = vmatmul.mubr.msk.bf16.gmra.mxu0 %vm997_vm0, %v4946_v31 }
 0x296   : > { %3840 = vmatprep.mubr.msk.bf16.mxu0 %vm997_vm0, %v4967_v14 }
 0x29d   : > { %3841 = vmatmul.mubr.msk.bf16.gmra.mxu0 %vm997_vm0, %v4986_v54 }
 0x29e   : > { %3844 = vmatprep.mubr.msk.bf16.mxu0 %vm997_vm0, %v5008_v25 }
 0x2a5   : > { %3845 = vmatmul.mubr.msk.bf16.gmra.mxu0 %vm997_vm0, %v5030_v47 }
 0x2be   : > { %v5100_v53 = vpop.permute.xlu0 %1450 }
 0x2bf   : > { %4160 = vmatprep.subr.msk.bf16.mxu1 %vm997_vm0, %v5100_v53 }
 0x34d   : > { %v3834_v41 = vpop.f32.mrf.mxu0 }
 0x34e   : > { %v5110_v59 = vadd.f32 %v3834_v41, %v5107_v55 }
 0x34f   : > { %v1080_v19 = vpop.f32.mrf.mxu0 }
 0x350   : > { %1147 = vmax.xlane.f32.xlu0 %v5110_v59  ;;  %v5124_v32 = vadd.f32 %v1080_v19, %v5115_v28  ;;  %v5222_v19 = vld [vmem:[%s6426_s7 + $0x60] sm:$0xff] }
 0x351   : > { %v3835_v29 = vpop.f32.mrf.mxu0  ;;  %6462 = vst [vmem:[#allocation13_spill] sm:$0xff] %v5222_v19 }
 0x352   : > { %v5127_v63 = vadd.f32 %v3835_v29, %v5120_v60 }
 0x353   : > { %v1083_v43 = vpop.f32.mrf.mxu0 }
 0x354   : > { %1149 = vmax.xlane.f32.xlu1 %v5127_v63  ;;  %1143 = vmax.xlane.f32.xlu0 %v5124_v32  ;;  %v5142_v6 = vadd.f32 %v1083_v43, %v5132_v2  ;;  %v5237_v43 = vld [vmem:[%s6426_s7 + $0x78] sm:$0xff] }
 0x355   : > { %v3838_v57 = vpop.f32.mrf.mxu0 }
 0x356   : > { %v5145_v38 = vadd.f32 %v3838_v57, %v5137_v48 }
 0x357   : > { %v1096_v16 = vpop.f32.mrf.mxu0 }
 0x358   : > { %1145 = vmax.xlane.f32.xlu1 %v5142_v6  ;;  %1155 = vmax.xlane.f32.xlu0 %v5145_v38  ;;  %v5160_v17 = vadd.f32 %v1096_v16, %v5150_v36 }
 0x359   : > { %v3839_v11 = vpop.f32.mrf.mxu0 }
 0x35a   : > { %v5163_v13 = vadd.f32 %v3839_v11, %v5155_v7 }
 0x35b   : > { %v1099_v33 = vpop.f32.mrf.mxu0 }
 0x35c   : > { %1157 = vmax.xlane.f32.xlu1 %v5163_v13  ;;  %1151 = vmax.xlane.f32.xlu0 %v5160_v17  ;;  %v5178_v0 = vadd.f32 %v1099_v33, %v5168_v27  ;;  %v5245_v33 = vld [vmem:[%s6426_s7 + $0x68] sm:$0xff] }
 0x35d   : > { %v3842_v35 = vpop.f32.mrf.mxu0 }
 0x35e   : > { %v5181_v1 = vadd.f32 %v3842_v35, %v5173_v34 }
 0x35f   : > { %v1112_v40 = vpop.f32.mrf.mxu0 }
 0x360   : > { %1153 = vmax.xlane.f32.xlu1 %v5178_v0  ;;  %1163 = vmax.xlane.f32.xlu0 %v5181_v1  ;;  %v5196_v42 = vadd.f32 %v1112_v40, %v5186_v44  ;;  %v5252_v40 = vpop.permute.xlu1 %1448 }
 0x361   : > { %v3843_v3 = vpop.f32.mrf.mxu0 }
 0x362   : > { %v5199_v50 = vadd.f32 %v3843_v3, %v5191_v45 }
 0x363   : > { %v1115_v52 = vpop.f32.mrf.mxu0 }
 0x364   : > { %1165 = vmax.xlane.f32.xlu1 %v5199_v50  ;;  %1159 = vmax.xlane.f32.xlu0 %v5196_v42  ;;  %v5214_v5 = vadd.f32 %v1115_v52, %v5204_v8 }
 0x365   : > { %v3846_v61 = vpop.f32.mrf.mxu0 }
 0x366   : > { %v5217_v23 = vadd.f32 %v3846_v61, %v5209_v12 }
 0x367   : > { %v1128_v41 = vpop.f32.mrf.mxu0 }
 0x368   : > { %1161 = vmax.xlane.f32.xlu1 %v5214_v5  ;;  %1171 = vmax.xlane.f32.xlu0 %v5217_v23  ;;  %v5227_v29 = vadd.f32 %v1128_v41, %v5222_v19 }
 0x369   : > { %v3847_v57 = vpop.f32.mrf.mxu0 }
 0x36a   : > { %v5240_v16 = vadd.f32 %v3847_v57, %v5237_v43 }
 0x36b   : > { %v1131_v11 = vpop.f32.mrf.mxu0 }
 0x36c   : > { %1167 = vmax.xlane.f32.xlu0 %v5227_v29  ;;  %v5249_v35 = vadd.f32 %v1131_v11, %v5245_v33 }
 0x379   : > { %1444 = vrot.lane.b32.xlu1 %v5056_v51, %s4565_s11 }
 0x382   : > { %1446 = vrot.lane.b32.xlu0 %v5046_v58, %s4565_s11 }
 0x39d   : > { %1173 = vmax.xlane.f32.xlu1 %v5240_v16 }
 0x3a1   : > { %1169 = vmax.xlane.f32.xlu1 %v5249_v35 }
 0x3d9   : > { %v1148_v3 = vpop.xlane.xlu0 %1147 }
 0x3da   : > { %v1177_v52 = vsub.f32 %v5110_v59, %v1148_v3 }
 0x3dc   : > { %v1195_v61 = vmul.f32 1.442695, %v1177_v52 }
 0x3dd   : > { %v1150_v41 = vpop.xlane.xlu1 %1149  ;;  %v1144_v57 = vpop.xlane.xlu0 %1143 }
 0x3de   : > { %4268 = vpow2.f32 %v1195_v61  ;;  %v1178_v39 = vsub.f32 %v5127_v63, %v1150_v41  ;;  %v1175_v51 = vsub.f32 %v5124_v32, %v1144_v57 }
 0x3e0   : > { %v1197_v58 = vmul.f32 1.442695, %v1178_v39  ;;  %v1191_v26 = vmul.f32 1.442695, %v1175_v51 }
 0x3e1   : > { %v1146_v24 = vpop.xlane.xlu1 %1145 }
 0x3e2   : > { %4270 = vpow2.f32 %v1197_v58  ;;  %v1176_v11 = vsub.f32 %v5142_v6, %v1146_v24  ;;  %v1156_v24 = vpop.xlane.xlu0 %1155 }
 0x3e3   : > { %4272 = vpow2.f32 %v1191_v26  ;;  %v1181_v32 = vsub.f32 %v5145_v38, %v1156_v24 }
 0x3e4   : > { %v1193_v9 = vmul.f32 1.442695, %v1176_v11 }
 0x3e5   : > { %v1158_v58 = vpop.xlane.xlu1 %1157  ;;  %v1203_v61 = vmul.f32 1.442695, %v1181_v32 }
 0x3e6   : > { %4274 = vpow2.f32 %v1193_v9  ;;  %v1152_v26 = vpop.xlane.xlu0 %1151  ;;  %v1182_v11 = vsub.f32 %v5163_v13, %v1158_v58 }
 0x3e7   : > { %v1179_v6 = vsub.f32 %v5160_v17, %v1152_v26  ;;  %4276 = vpow2.f32 %v1203_v61 }
 0x3e8   : > { %v1205_v19 = vmul.f32 1.442695, %v1182_v11 }
 0x3e9   : > { %v1154_v63 = vpop.xlane.xlu1 %1153  ;;  %v1199_v49 = vmul.f32 1.442695, %v1179_v6 }
 0x3ea   : > { %v1164_v9 = vpop.xlane.xlu0 %1163  ;;  %v1180_v41 = vsub.f32 %v5178_v0, %v1154_v63 }
 0x3eb   : > { %v5258_v56 = vpop.eup %4268  ;;  %4278 = vpow2.f32 %v1199_v49  ;;  %v1185_v38 = vsub.f32 %v5181_v1, %v1164_v9 }
 0x3ec   : > { %1227 = vadd.xlane.f32.xlu0 %v5258_v56 }
 0x3ed   : > { %v1166_v57 = vpop.xlane.xlu1 %1165  ;;  %v1211_v0 = vmul.f32 1.442695, %v1185_v38 }
 0x3ee   : > { %v1160_v51 = vpop.xlane.xlu0 %1159  ;;  %v1186_v58 = vsub.f32 %v5199_v50, %v1166_v57 }
 0x3ef   : > { %v5261_v59 = vpop.eup %4270  ;;  %v1183_v32 = vsub.f32 %v5196_v42, %v1160_v51 }
 0x3f0   : > { %v5263_v3 = vpop.eup %4272  ;;  %1229 = vadd.xlane.f32.xlu1 %v5261_v59 }
 0x3f1   : > { %1223 = vadd.xlane.f32.xlu0 %v5263_v3  ;;  %v1162_v24 = vpop.xlane.xlu1 %1161 }
 0x3f2   : > { %v1172_v52 = vpop.xlane.xlu0 %1171 }
 0x3f3   : > { %v5267_v39 = vpop.eup %4274  ;;  %v1189_v15 = vsub.f32 %v5217_v23, %v1172_v52  ;;  %v1207_v23 = vmul.f32 1.442695, %v1183_v32 }
 0x3f4   : > { %1225 = vadd.xlane.f32.xlu1 %v5267_v39  ;;  %v5285_v49 = vpop.eup %4276 }
 0x3f5   : > { %v1219_v17 = vmul.f32 1.442695, %v1189_v15  ;;  %v5283_v63 = vpop.permute.xlu1 %1444 }
 0x3f8   : > { %v5290_v42 = vpop.eup %4278 }
 0x405   : > { %1440 = vrot.lane.b32.xlu1 %v4934_v30, %s4565_s11  ;;  %v1201_v30 = vmul.f32 1.442695, %v1180_v41 }
 0x407   : > { %1442 = vrot.lane.b32.xlu0 %v5066_v4, %s4565_s11  ;;  %v1168_v4 = vpop.xlane.xlu0 %1167  ;;  %4280 = vpow2.f32 %v1201_v30  ;;  %v1213_v30 = vmul.f32 1.442695, %v1186_v58 }
 0x408   : > { %v1187_v26 = vsub.f32 %v5227_v29, %v1168_v4  ;;  %4282 = vpow2.f32 %v1205_v19  ;;  %v1184_v4 = vsub.f32 %v5214_v5, %v1162_v24 }
 0x409   : > { %4284 = vpow2.f32 %v1219_v17 }
 0x40a   : > { %v1215_v13 = vmul.f32 1.442695, %v1187_v26  ;;  %4286 = vpow2.f32 %v1211_v0  ;;  %v1209_v9 = vmul.f32 1.442695, %v1184_v4 }
 0x40b   : > { %v1447_v24 = vpop.permute.xlu0 %1446 }
 0x40c   : > { %4288 = vpow2.f32 %v1215_v13 }
 0x40d   : > { %4290 = vpow2.f32 %v1207_v23 }
 0x40e   : > { %4292 = vpow2.f32 %v1213_v30 }
 0x414   : > { %v5292_v19 = vpop.eup %4280 }
 0x415   : > { %v5297_v6 = vpop.eup %4282 }
 0x416   : > { %v5299_v5 = vpop.eup %4284 }
 0x417   : > { %v5303_v52 = vpop.eup %4286 }
 0x419   : > { %v5305_v61 = vpop.eup %4288 }
 0x426   : > { %1235 = vadd.xlane.f32.xlu0 %v5285_v49  ;;  %v1174_v15 = vpop.xlane.xlu1 %1173 }
 0x427   : > { %v1190_v1 = vsub.f32 %v5240_v16, %v1174_v15 }
 0x429   : > { %v1221_v50 = vmul.f32 1.442695, %v1190_v1  ;;  %1231 = vadd.xlane.f32.xlu1 %v5290_v42 }
 0x42a   : > { %1233 = vadd.xlane.f32.xlu0 %v5292_v19  ;;  %v1170_v29 = vpop.xlane.xlu1 %1169 }
 0x42b   : > { %4294 = vpow2.f32 %v1221_v50  ;;  %v1188_v51 = vsub.f32 %v5249_v35, %v1170_v29  ;;  %v5309_v35 = vpop.eup %4290 }
 0x42c   : > { %4296 = vpow2.f32 %v1209_v9  ;;  %v5312_v41 = vpop.eup %4292 }
 0x42d   : > { %1237 = vadd.xlane.f32.xlu1 %v5297_v6  ;;  %v1217_v16 = vmul.f32 1.442695, %v1188_v51  ;;  %v1498_v51 = vsel %vm997_vm0, %v5100_v53, 0 }
 0x42e   : > { %1251 = vadd.xlane.f32.xlu0 %v5299_v5 }
 0x42f   : > { %4298 = vpow2.f32 %v1217_v16 }
 0x431   : > { %1243 = vadd.xlane.f32.xlu1 %v5303_v52 }
 0x432   : > { %1247 = vadd.xlane.f32.xlu0 %v5305_v61 }
 0x435   : > { %1239 = vadd.xlane.f32.xlu1 %v5309_v35 }
 0x438   : > { %v5314_v57 = vpop.eup %4294 }
 0x439   : > { %1245 = vadd.xlane.f32.xlu1 %v5312_v41  ;;  %1253 = vadd.xlane.f32.xlu0 %v5314_v57  ;;  %v5318_v11 = vpop.eup %4296 }
 0x43c   : > { %v5321_v38 = vpop.eup %4298 }
 0x43d   : > { %1241 = vadd.xlane.f32.xlu1 %v5318_v11 }
 0x441   : > { %1249 = vadd.xlane.f32.xlu1 %v5321_v38 }
 0x44f   : > { %1438 = vrot.lane.b32.xlu0 %v4924_v22, %s4565_s11 }
 0x452   : > { %1436 = vrot.lane.b32.xlu1 %v4906_v21, %s4565_s11 }
 0x453   : > { %1412 = vrot.lane.b32.xlu0 %v4904_v20, %s4565_s11 }
 0x456   : > { %1414 = vrot.lane.b32.xlu1 %v4922_v37, %s4565_s11 }
 0x457   : > { %1416 = vrot.lane.b32.xlu0 %v4932_v18, %s4565_s11 }
 0x45a   : > { %1418 = vrot.lane.b32.xlu1 %v4946_v31, %s4565_s11 }
 0x45b   : > { %1420 = vrot.lane.b32.xlu0 %v4967_v14, %s4565_s11 }
 0x45e   : > { %1422 = vrot.lane.b32.xlu1 %v4986_v54, %s4565_s11 }
 0x45f   : > { %1424 = vrot.lane.b32.xlu0 %v5008_v25, %s4565_s11 }
 0x462   : > { %1426 = vrot.lane.b32.xlu1 %v5030_v47, %s4565_s11 }
 0x466   : > { %1769 = vrot.lane.b32.xlu1 %v4959_v46, %s4565_s11 }
 0x475   : > { %v1228_v17 = vpop.xlane.xlu0 %1227 }
 0x479   : > { %v1230_v26 = vpop.xlane.xlu1 %1229 }
 0x47a   : > { %v1224_v0 = vpop.xlane.xlu0 %1223  ;;  %4300 = vrcp.f32 %v1230_v26 }
 0x47b   : > { %4302 = vrcp.f32 %v1224_v0 }
 0x47c   : > { %4304 = vrcp.f32 %v1228_v17 }
 0x47d   : > { %v1226_v32 = vpop.xlane.xlu1 %1225 }
 0x47e   : > { %4306 = vrcp.f32 %v1226_v32  ;;  %v1443_v53 = vpop.permute.xlu0 %1442 }
 0x487   : > { %v4301_v13 = vpop.eup %4300 }
 0x488   : > { %v4303_v58 = vpop.eup %4302  ;;  %v1274_v15 = vmul.f32 %v4301_v13, %v5261_v59  ;;  %v1495_v59 = vsel %vm997_vm0, %v5252_v40, 0 }
 0x489   : > { %v4305_v23 = vpop.eup %4304  ;;  %v1271_v4 = vmul.f32 %v4303_v58, %v5263_v3  ;;  %v1492_v3 = vsel %vm997_vm0, %v1447_v24, 0 }
 0x48a   : > { %v1273_v50 = vmul.f32 %v4305_v23, %v5258_v56  ;;  %v1489_v56 = vsel %vm997_vm0, %v5283_v63, 0 }
 0x48b   : > { %v4307_v30 = vpop.eup %4306 }
 0x48c   : > { %v1272_v1 = vmul.f32 %v4307_v30, %v5267_v39  ;;  %v1288_v9 = vpack.c.bf16 %v1274_v15, %v1273_v50  ;;  %v1441_v39 = vpop.permute.xlu1 %1440 }
 0x48e   : > { %v1287_v29 = vpack.c.bf16 %v1272_v1, %v1271_v4 }
 0x490   : > { %3864 = vmatprep.mubr.bf16.mxu1 %v1287_v29 }
 0x491   : > { %3865 = vmatmul.mubr.bf16.vlgmr.msra.gmra.mxu1 %v1288_v9 }
 0x492   : > { %3881 = vmatpush3.bf16.xpose.msra.mxu1 %v1498_v51 }
 0x493   : > { %4161 = vmatprep.subr.msk.bf16.mxu1 %vm997_vm0, %v5252_v40  ;;  %v1486_v40 = vsel %vm997_vm0, %v1443_v53, 0 }
 0x49a   : > { %3883 = vmatpush3.bf16.xpose.msra.mxu1 %v1495_v59 }
 0x49b   : > { %4162 = vmatprep.subr.msk.bf16.mxu1 %vm997_vm0, %v1447_v24 }
 0x4a2   : > { %3885 = vmatpush3.bf16.xpose.msra.mxu1 %v1492_v3 }
 0x4a3   : > { %4163 = vmatprep.subr.msk.bf16.mxu1 %vm997_vm0, %v5283_v63  ;;  %v1483_v63 = vsel %vm997_vm0, %v1441_v39, 0 }
 0x4aa   : > { %3887 = vmatpush3.bf16.xpose.msra.mxu1 %v1489_v56 }
 0x4ab   : > { %4164 = vmatprep.subr.msk.bf16.mxu1 %vm997_vm0, %v1443_v53 }
 0x4af   : > { %v1236_v16 = vpop.xlane.xlu0 %1235 }
 0x4b2   : > { %3889 = vmatpush3.bf16.xpose.msra.mxu1 %v1486_v40  ;;  %v1232_v17 = vpop.xlane.xlu1 %1231 }
 0x4b3   : > { %4308 = vrcp.f32 %v1232_v17  ;;  %4165 = vmatprep.subr.msk.bf16.mxu1 %vm997_vm0, %v1441_v39  ;;  %v1234_v24 = vpop.xlane.xlu0 %1233  ;;  %v4228_v17 = vld [vmem:[%s6424_s5 + $0x8] sm:$0xff]  }
 0x4b4   : > { %4310 = vrcp.f32 %v1234_v24 }
 0x4b5   : > { %4312 = vrcp.f32 %v1236_v16 }
 0x4b6   : > { %v1238_v26 = vpop.xlane.xlu1 %1237 }
 0x4b7   : > { %4314 = vrcp.f32 %v1238_v26  ;;  %v1252_v0 = vpop.xlane.xlu0 %1251 }
 0x4ba   : > { %3891 = vmatpush3.bf16.xpose.msra.mxu1 %v1483_v63  ;;  %v1244_v32 = vpop.xlane.xlu1 %1243 }
 0x4bb   : > { %v1248_v13 = vpop.xlane.xlu0 %1247 }
 0x4be   : > { %v1240_v58 = vpop.xlane.xlu1 %1239 }
 0x4c0   : > { %v4309_v23 = vpop.eup %4308 }
 0x4c1   : > { %v4311_v30 = vpop.eup %4310  ;;  %v1275_v15 = vmul.f32 %v4309_v23, %v5290_v42 }
 0x4c2   : > { %v4313_v4 = vpop.eup %4312  ;;  %v1246_v1 = vpop.xlane.xlu1 %1245  ;;  %v1276_v29 = vmul.f32 %v4311_v30, %v5292_v19 }
 0x4c3   : > { %v1254_v50 = vpop.xlane.xlu0 %1253  ;;  %4316 = vrcp.f32 %v1246_v1  ;;  %v1277_v59 = vmul.f32 %v4313_v4, %v5285_v49 }
 0x4c4   : > { %v4315_v9 = vpop.eup %4314  ;;  %v1289_v51 = vpack.c.bf16 %v1276_v29, %v1275_v15  ;;  %4318 = vrcp.f32 %v1240_v58 }
 0x4c5   : > { %v1278_v3 = vmul.f32 %v4315_v9, %v5297_v6  ;;  %4320 = vrcp.f32 %v1244_v32 }
 0x4c6   : > { %3868 = vmatprep.mubr.bf16.mxu1 %v1289_v51  ;;  %v1242_v56 = vpop.xlane.xlu1 %1241 }
 0x4c7   : > { %v1439_v53 = vpop.permute.xlu0 %1438  ;;  %4322 = vrcp.f32 %v1242_v56  ;;  %v1290_v39 = vpack.c.bf16 %v1278_v3, %v1277_v59 }
 0x4c8   : > { %4166 = vmatprep.subr.msk.bf16.mxu1 %vm997_vm0, %v1439_v53  ;;  %v1480_v42 = vsel %vm997_vm0, %v1439_v53, 0  ;;  %4324 = vrcp.f32 %v1248_v13 }
 0x4c9   : > { %3893 = vmatpush3.bf16.xpose.msra.mxu1 %v1480_v42 }
 0x4ca   : > { %3869 = vmatmul.mubr.bf16.gmra.mxu1 %v1290_v39  ;;  %v1250_v19 = vpop.xlane.xlu1 %1249 }
 0x4cb   : > { %4326 = vrcp.f32 %v1250_v19  ;;  %v1413_v51 = vpop.permute.xlu0 %1412 }
 0x4cc   : > { %4328 = vrcp.f32 %v1254_v50 }
 0x4cd   : > { %4330 = vrcp.f32 %v1252_v0 }
 0x4ce   : > { %v1437_v49 = vpop.permute.xlu1 %1436 }
 0x4cf   : > { %4167 = vmatprep.subr.msk.bf16.mxu1 %vm997_vm0, %v1437_v49  ;;  %v1477_v6 = vsel %vm997_vm0, %v1437_v49, 0  ;;  %v1417_v59 = vpop.permute.xlu0 %1416 }
 0x4d0   : > { %v4317_v16 = vpop.eup %4316 }
 0x4d1   : > { %3895 = vmatpush3.bf16.xpose.msra.mxu1 %v1477_v6  ;;  %v4319_v40 = vpop.eup %4318  ;;  %v1282_v63 = vmul.f32 %v4317_v16, %v5312_v41 }
 0x4d2   : > { %v4321_v24 = vpop.eup %4320  ;;  %3964 = vmatprep.subr.bf16.mxu1 %v4228_v17  ;;  %v1279_v32 = vmul.f32 %v4319_v40, %v5309_v35 }
 0x4d3   : > { %v1281_v58 = vmul.f32 %v4321_v24, %v5303_v52  ;;  %v4229_v52 = vld [vmem:[%s6424_s5] sm:$0xff]  }
 0x4d4   : > { %v4323_v26 = vpop.eup %4322 }
 0x4d5   : > { %v1280_v0 = vmul.f32 %v4323_v26, %v5318_v11  ;;  %v4325_v13 = vpop.eup %4324  ;;  %v1292_v15 = vpack.c.bf16 %v1282_v63, %v1281_v58 }
 0x4d6   : > { %v1283_v1 = vmul.f32 %v4325_v13, %v5305_v61  ;;  %v1415_v61 = vpop.permute.xlu1 %1414 }
 0x4d7   : > { %v1291_v23 = vpack.c.bf16 %v1280_v0, %v1279_v32 }
 0x4d8   : > { %v4327_v30 = vpop.eup %4326 }
 0x4d9   : > { %v4329_v4 = vpop.eup %4328  ;;  %3872 = vmatprep.mubr.bf16.mxu1 %v1291_v23  ;;  %v1284_v50 = vmul.f32 %v4327_v30, %v5321_v38 }
 0x4da   : > { %3873 = vmatmul.mubr.bf16.gmra.mxu1 %v1292_v15  ;;  %v4331_v29 = vpop.eup %4330  ;;  %v1286_v9 = vmul.f32 %v4329_v4, %v5314_v57  ;;  %v1419_v57 = vpop.permute.xlu1 %1418 }
 0x4db   : > { %v1293_v41 = vpack.c.bf16 %v1284_v50, %v1283_v1  ;;  %v1285_v35 = vmul.f32 %v4331_v29, %v5299_v5  ;;  %v1421_v5 = vpop.permute.xlu0 %1420 }
 0x4dd   : > { %3876 = vmatprep.mubr.bf16.mxu1 %v1293_v41  ;;  %v1294_v11 = vpack.c.bf16 %v1286_v9, %v1285_v35 }
 0x4de   : > { %v1423_v38 = vpop.permute.xlu1 %1422 }
 0x4df   : > { %v1425_v3 = vpop.permute.xlu0 %1424 }
 0x4e2   : > { %3877 = vmatmul.mubr.bf16.gmra.mxu1 %v1294_v11  ;;  %v1427_v56 = vpop.permute.xlu1 %1426 }
 0x4e3   : > { %3896 = vmatprep.mubr.msk.bf16.mxu1 %vm997_vm0, %v1413_v51 }
 0x4ea   : > { %3897 = vmatmul.mubr.msk.bf16.vlgmr.msra.gmra.mxu1 %vm997_vm0, %v1415_v61 }
 0x4eb   : > { %3900 = vmatprep.mubr.msk.bf16.mxu1 %vm997_vm0, %v1417_v59  ;;  %3965 = vmatpush3.bf16.msra.mxu1 %v4228_v17 }
 0x4ec   : > { %3966 = vmatprep.subr.bf16.mxu1 %v4229_v52 }
 0x4ef   : > { %3967 = vmatpush3.bf16.msra.mxu1 %v4229_v52 }
 0x4f2   : > { %3901 = vmatmul.mubr.msk.bf16.gmra.mxu1 %vm997_vm0, %v1419_v57 }
 0x4f3   : > { %3904 = vmatprep.mubr.msk.bf16.mxu1 %vm997_vm0, %v1421_v5 }
 0x4fa   : > { %3905 = vmatmul.mubr.msk.bf16.gmra.mxu1 %vm997_vm0, %v1423_v38 }
 0x4fb   : > { %3908 = vmatprep.mubr.msk.bf16.mxu1 %vm997_vm0, %v1425_v3 }
 0x502   : > { %3909 = vmatmul.mubr.msk.bf16.gmra.mxu1 %vm997_vm0, %v1427_v56 }
 0x551   : > { %v3866_v53 = vpop.f32.mrf.mxu1 }
 0x553   : > { %v1329_v42 = vpop.f32.mrf.mxu1 }
 0x555   : > { %v3867_v39 = vpop.f32.mrf.mxu1 }
 0x556   : > { %v1393_v6 = vpack.c.bf16 %v3867_v39, %v3866_v53 }
 0x557   : > { %v1332_v19 = vpop.f32.mrf.mxu1 }
 0x558   : > { %v1392_v49 = vpack.c.bf16 %v1332_v19, %v1329_v42 }
 0x55a   : > { %3968 = vmatprep.mubr.msk.bf16.mxu1 %vm997_vm0, %v1392_v49 }
 0x55b   : > { %3969 = vmatmul.mubr.msk.bf16.vlgmr.msra.gmra.mxu1 %vm997_vm0, %v1393_v6 }
 0x58a   : > { %v3870_v16 = vpop.f32.mrf.mxu1 }
 0x58c   : > { %v1345_v40 = vpop.f32.mrf.mxu1 }
 0x58e   : > { %v3871_v17 = vpop.f32.mrf.mxu1 }
 0x58f   : > { %v1395_v63 = vpack.c.bf16 %v3871_v17, %v3870_v16 }
 0x590   : > { %v1348_v24 = vpop.f32.mrf.mxu1 }
 0x591   : > { %v1394_v26 = vpack.c.bf16 %v1348_v24, %v1345_v40 }
 0x593   : > { %3972 = vmatprep.mubr.msk.bf16.mxu1 %vm997_vm0, %v1394_v26  ;;  %v6467_v26 = vld [vmem:[#allocation7_spill] sm:$0xff] }
 0x594   : > { %3973 = vmatmul.mubr.msk.bf16.gmra.mxu1 %vm997_vm0, %v1395_v63 }
 0x59a   : > { %v3874_v32 = vpop.f32.mrf.mxu1 }
 0x59c   : > { %v1361_v0 = vpop.f32.mrf.mxu1 }
 0x59e   : > { %v3875_v13 = vpop.f32.mrf.mxu1 }
 0x59f   : > { %v1397_v30 = vpack.c.bf16 %v3875_v13, %v3874_v32  ;;  %v1770_v32 = vpop.permute.xlu1 %1769 }
 0x5a0   : > { %v1364_v58 = vpop.f32.mrf.mxu1 }
 0x5a1   : > { %v1396_v23 = vpack.c.bf16 %v1364_v58, %v1361_v0 }
 0x5a2   : > { %v3878_v15 = vpop.f32.mrf.mxu1 }
 0x5a3   : > { %3976 = vmatprep.mubr.msk.bf16.mxu1 %vm997_vm0, %v1396_v23 }
 0x5a4   : > { %v1377_v4 = vpop.f32.mrf.mxu1  ;;  %3977 = vmatmul.mubr.msk.bf16.gmra.mxu1 %vm997_vm0, %v1397_v30 }
 0x5a6   : > { %v3879_v1 = vpop.f32.mrf.mxu1 }
 0x5a7   : > { %v1399_v41 = vpack.c.bf16 %v3879_v1, %v3878_v15 }
 0x5a8   : > { %v1380_v50 = vpop.f32.mrf.mxu1 }
 0x5a9   : > { %v1398_v29 = vpack.c.bf16 %v1380_v50, %v1377_v4 }
 0x5aa   : > { %v3898_v9 = vpop.f32.mrf.mxu1 }
 0x5ab   : > { %v1543_v35 = vadd.f32 %v3898_v9, %v5107_v55  ;;  %3980 = vmatprep.mubr.msk.bf16.mxu1 %vm997_vm0, %v1398_v29 }
 0x5ac   : > { %v1534_v11 = vpop.f32.mrf.mxu1  ;;  %3981 = vmatmul.mubr.msk.bf16.gmra.mxu1 %vm997_vm0, %v1399_v41 }
 0x5ad   : > { %1601 = vmax.xlane.f32.xlu0 %v1543_v35  ;;  %v1535_v52 = vadd.f32 %v1534_v11, %v5115_v28 }
 0x5ae   : > { %v3899_v51 = vpop.f32.mrf.mxu1 }
 0x5af   : > { %v1546_v5 = vadd.f32 %v3899_v51, %v5120_v60 }
 0x5b0   : > { %v1537_v61 = vpop.f32.mrf.mxu1 }
 0x5b1   : > { %v1538_v59 = vadd.f32 %v1537_v61, %v5132_v2  ;;  %1597 = vmax.xlane.f32.xlu0 %v1535_v52 }
 0x5b2   : > { %v3902_v57 = vpop.f32.mrf.mxu1 }
 0x5b3   : > { %1599 = vmax.xlane.f32.xlu1 %v1538_v59 }
 0x5b4   : > { %v1550_v38 = vpop.f32.mrf.mxu1 }
 0x5b5   : > { %1603 = vmax.xlane.f32.xlu0 %v1546_v5 }
 0x5b6   : > { %v3903_v55 = vpop.f32.mrf.mxu1 }
 0x5b7   : > { %v5409_v3 = vadd.f32 %v3903_v55, %v5155_v7 }
 0x5b8   : > { %v1553_v56 = vpop.f32.mrf.mxu1 }
 0x5b9   : > { %1611 = vmax.xlane.f32.xlu1 %v5409_v3  ;;  %v5413_v28 = vadd.f32 %v1553_v56, %v5168_v27 }
 0x5ba   : > { %v3906_v53 = vpop.f32.mrf.mxu1 }
 0x5bb   : > { %v5442_v40 = vadd.f32 %v3906_v53, %v5173_v34  ;;  %v6465_v34 = vld [vmem:[#allocation4_spill] sm:$0xff] }
 0x5bc   : > { %v1566_v42 = vpop.f32.mrf.mxu1 }
 0x5bd   : > { %1607 = vmax.xlane.f32.xlu1 %v5413_v28 }
 0x5be   : > { %v3907_v2 = vpop.f32.mrf.mxu1 }
 0x5bf   : > { %v5417_v60 = vadd.f32 %v3907_v2, %v5191_v45 }
 0x5c0   : > { %v1569_v39 = vpop.f32.mrf.mxu1 }
 0x5c1   : > { %1619 = vmax.xlane.f32.xlu1 %v5417_v60  ;;  %v5421_v7 = vadd.f32 %v1569_v39, %v5204_v8  ;;  %v5437_v8 = vadd.f32 %v3902_v57, %v5137_v48  ;;  %v6463_v48 = vld [vmem:[#allocation13_spill] sm:$0xff] }
 0x5c2   : > { %v3910_v19 = vpop.f32.mrf.mxu1 }
 0x5c3   : > { %v5450_v17 = vadd.f32 %v3910_v19, %v5209_v12 }
 0x5c4   : > { %v1582_v49 = vpop.f32.mrf.mxu1 }
 0x5c5   : > { %1615 = vmax.xlane.f32.xlu1 %v5421_v7  ;;  %v5454_v24 = vadd.f32 %v1582_v49, %v6463_v48 }
 0x5c6   : > { %v3911_v6 = vpop.f32.mrf.mxu1 }
 0x5c7   : > { %v5425_v27 = vadd.f32 %v3911_v6, %v5237_v43  ;;  %v1551_v43 = vadd.f32 %v1550_v38, %v5150_v36  ;;  %v6464_v36 = vld [vmem:[#allocation3_spill] sm:$0xff] }
 0x5c8   : > { %v1585_v16 = vpop.f32.mrf.mxu1 }
 0x5c9   : > { %1627 = vmax.xlane.f32.xlu1 %v5425_v27  ;;  %v5429_v45 = vadd.f32 %v1585_v16, %v5245_v33  ;;  %v5446_v33 = vadd.f32 %v1566_v42, %v5186_v44  ;;  %v6466_v44 = vld [vmem:[#allocation5_spill] sm:$0xff] }
 0x5cb   : > { %1771 = vrot.lane.b32.xlu0 %v4954_v10, %s4565_s11 }
 0x5cd   : > { %1623 = vmax.xlane.f32.xlu1 %v5429_v45 }
 0x5de   : > { %1761 = vrot.lane.b32.xlu1 %v5000_v62, %s4565_s11 }
 0x5ea   : > { %1609 = vmax.xlane.f32.xlu0 %v5437_v8 }
 0x5ee   : > { %1605 = vmax.xlane.f32.xlu0 %v1551_v43 }
 0x5f2   : > { %1617 = vmax.xlane.f32.xlu0 %v5442_v40 }
 0x5f6   : > { %1613 = vmax.xlane.f32.xlu0 %v5446_v33 }
 0x5fa   : > { %1625 = vmax.xlane.f32.xlu0 %v5450_v17 }
 0x5fe   : > { %1621 = vmax.xlane.f32.xlu0 %v5454_v24 }
 0x614   : > { %1767 = vrot.lane.b32.xlu0 %v6464_v36, %s4565_s11 }
 0x618   : > { %1765 = vrot.lane.b32.xlu0 %v6465_v34, %s4565_s11 }
 0x61c   : > { %1763 = vrot.lane.b32.xlu0 %v6466_v44, %s4565_s11 }
 0x620   : > { %1759 = vrot.lane.b32.xlu0 %v6467_v26, %s4565_s11 }
 0x636   : > { %v1602_v12 = vpop.xlane.xlu0 %1601 }
 0x637   : > { %v1631_v63 = vsub.f32 %v1543_v35, %v1602_v12 }
 0x639   : > { %v1649_v0 = vmul.f32 1.442695, %v1631_v63 }
 0x63a   : > { %v1598_v13 = vpop.xlane.xlu0 %1597 }
 0x63b   : > { %4332 = vpow2.f32 %v1649_v0  ;;  %v1629_v58 = vsub.f32 %v1535_v52, %v1598_v13 }
 0x63c   : > { %v1600_v23 = vpop.xlane.xlu1 %1599 }
 0x63d   : > { %v1645_v30 = vmul.f32 1.442695, %v1629_v58  ;;  %v1630_v4 = vsub.f32 %v1538_v59, %v1600_v23  ;;  %v6468_v59 = vld [vmem:[#allocation8_spill] sm:$0xff] }
 0x63e   : > { %v1604_v15 = vpop.xlane.xlu0 %1603 }
 0x63f   : > { %4334 = vpow2.f32 %v1645_v30  ;;  %v1632_v1 = vsub.f32 %v1546_v5, %v1604_v15  ;;  %v1647_v41 = vmul.f32 1.442695, %v1630_v4 }
 0x641   : > { %v1651_v50 = vmul.f32 1.442695, %v1632_v1 }
 0x642   : > { %v1772_v29 = vpop.permute.xlu0 %1771  ;;  %v1612_v52 = vpop.xlane.xlu1 %1611 }
 0x643   : > { %4336 = vpow2.f32 %v1651_v50  ;;  %3912 = vmatprep.subr.bf16.mxu0 %v1772_v29  ;;  %v1636_v6 = vsub.f32 %v5409_v3, %v1612_v52 }
 0x644   : > { %3913 = vmatpush3.bf16.msra.mxu0 %v1772_v29  ;;  %4338 = vpow2.f32 %v1647_v41 }
 0x645   : > { %3914 = vmatprep.subr.bf16.mxu0 %v1770_v32 }
 0x646   : > { %v1608_v61 = vpop.xlane.xlu1 %1607 }
 0x647   : > { %v1634_v38 = vsub.f32 %v5413_v28, %v1608_v61  ;;  %v1659_v28 = vmul.f32 1.442695, %v1636_v6  ;;  %v6471_v6 = vld [vmem:[#allocation11_spill] sm:$0xff] }
 0x648   : > { %v5465_v9 = vpop.eup %4332  ;;  %3915 = vmatpush3.bf16.msra.mxu0 %v1770_v32 }
 0x649   : > { %1681 = vadd.xlane.f32.xlu1 %v5465_v9  ;;  %v1655_v53 = vmul.f32 1.442695, %v1634_v38 }
 0x64a   : > { %v1620_v57 = vpop.xlane.xlu1 %1619 }
 0x64b   : > { %4340 = vpow2.f32 %v1655_v53  ;;  %v1640_v12 = vsub.f32 %v5417_v60, %v1620_v57 }
 0x64c   : > { %v5468_v35 = vpop.eup %4334 }
 0x64d   : > { %1677 = vadd.xlane.f32.xlu1 %v5468_v35  ;;  %v1667_v13 = vmul.f32 1.442695, %v1640_v12  ;;  %v6474_v12 = vld [vmem:[#allocation12_spill] sm:$0xff] }
 0x64e   : > { %v1616_v5 = vpop.xlane.xlu1 %1615 }
 0x64f   : > { %v1638_v42 = vsub.f32 %v5421_v7, %v1616_v5 }
 0x650   : > { %v5471_v11 = vpop.eup %4336 }
 0x651   : > { %1683 = vadd.xlane.f32.xlu1 %v5471_v11  ;;  %v5474_v51 = vpop.eup %4338  ;;  %v1663_v16 = vmul.f32 1.442695, %v1638_v42 }
 0x652   : > { %v1628_v56 = vpop.xlane.xlu1 %1627 }
 0x653   : > { %v1644_v3 = vsub.f32 %v5425_v27, %v1628_v56 }
 0x655   : > { %1679 = vadd.xlane.f32.xlu1 %v5474_v51  ;;  %v1675_v30 = vmul.f32 1.442695, %v1644_v3 }
 0x656   : > { %v1624_v63 = vpop.xlane.xlu1 %1623 }
 0x657   : > { %v1642_v0 = vsub.f32 %v5429_v45, %v1624_v63 }
 0x658   : > { %v5488_v4 = vpop.eup %4340 }
 0x666   : > { %1757 = vrot.lane.b32.xlu1 %v6468_v59, %s4565_s11  ;;  %s4566_s11 = smov 64  }
 0x673   : > { %v1610_v55 = vpop.xlane.xlu0 %1609 }
 0x674   : > { %v1635_v39 = vsub.f32 %v5437_v8, %v1610_v55  ;;  %v1762_v55 = vpop.permute.xlu1 %1761 }
 0x676   : > { %v1657_v32 = vmul.f32 1.442695, %v1635_v39 }
 0x677   : > { %v1606_v2 = vpop.xlane.xlu0 %1605 }
 0x678   : > { %v1633_v19 = vsub.f32 %v1551_v43, %v1606_v2  ;;  %v1671_v43 = vmul.f32 1.442695, %v1642_v0 }
 0x67a   : > { %v1653_v49 = vmul.f32 1.442695, %v1633_v19  ;;  %v6469_v19 = vld [vmem:[#allocation6_spill] sm:$0xff] }
 0x67b   : > { %v1618_v48 = vpop.xlane.xlu0 %1617 }
 0x67c   : > { %4342 = vpow2.f32 %v1653_v49  ;;  %v1639_v60 = vsub.f32 %v5442_v40, %v1618_v48  ;;  %v6470_v49 = vld [vmem:[#allocation10_spill] sm:$0xff]  ;;  %v6473_v48 = vld [vmem:[#allocation9_spill] sm:$0xff] }
 0x67d   : > { %4344 = vpow2.f32 %v1663_v16  ;;  %v6472_v16 = vld [vmem:[#allocation2_spill] sm:$0xff] }
 0x67e   : > { %4346 = vpow2.f32 %v1657_v32  ;;  %v1665_v45 = vmul.f32 1.442695, %v1639_v60 }
 0x67f   : > { %v1614_v7 = vpop.xlane.xlu0 %1613  ;;  %4348 = vpow2.f32 %v1659_v28 }
 0x680   : > { %v1637_v8 = vsub.f32 %v5446_v33, %v1614_v7  ;;  %4350 = vpow2.f32 %v1667_v13  ;;  %v4230_v7 = vld [vmem:[%s6424_s5 + $0x18] sm:$0xff]  }
 0x681   : > { %4352 = vpow2.f32 %v1671_v43 }
 0x682   : > { %v1661_v23 = vmul.f32 1.442695, %v1637_v8 }
 0x683   : > { %v1626_v58 = vpop.xlane.xlu0 %1625 }
 0x684   : > { %4354 = vpow2.f32 %v1661_v23  ;;  %v1643_v40 = vsub.f32 %v5450_v17, %v1626_v58 }
 0x685   : > { %4356 = vpow2.f32 %v1675_v30 }
 0x686   : > { %4358 = vpow2.f32 %v1665_v45  ;;  %v1673_v61 = vmul.f32 1.442695, %v1643_v40 }
 0x687   : > { %v1622_v15 = vpop.xlane.xlu0 %1621 }
 0x688   : > { %v1641_v1 = vsub.f32 %v5454_v24, %v1622_v15 }
 0x689   : > { %v5491_v50 = vpop.eup %4342 }
 0x68a   : > { %1687 = vadd.xlane.f32.xlu1 %v5488_v4  ;;  %1685 = vadd.xlane.f32.xlu0 %v5491_v50  ;;  %v5495_v33 = vpop.eup %4344  ;;  %v1669_v29 = vmul.f32 1.442695, %v1641_v1 }
 0x68b   : > { %v1768_v27 = vpop.permute.xlu0 %1767  ;;  %v5498_v41 = vpop.eup %4346 }
 0x68c   : > { %3916 = vmatprep.subr.bf16.mxu0 %v1768_v27  ;;  %v5502_v52 = vpop.eup %4348  ;;  %4360 = vpow2.f32 %v1669_v29 }
 0x68d   : > { %3917 = vmatpush3.bf16.msra.mxu0 %v1768_v27  ;;  %v5504_v57 = vpop.eup %4350  ;;  %4362 = vpow2.f32 %v1673_v61 }
 0x68e   : > { %1695 = vadd.xlane.f32.xlu1 %v5495_v33  ;;  %1689 = vadd.xlane.f32.xlu0 %v5498_v41  ;;  %v5508_v5 = vpop.eup %4352 }
 0x68f   : > { %v1766_v24 = vpop.permute.xlu0 %1765 }
 0x690   : > { %3918 = vmatprep.subr.bf16.mxu0 %v1766_v24 }
 0x691   : > { %3919 = vmatpush3.bf16.msra.mxu0 %v1766_v24  ;;  %v5510_v38 = vpop.eup %4354 }
 0x692   : > { %1699 = vadd.xlane.f32.xlu1 %v5504_v57  ;;  %1691 = vadd.xlane.f32.xlu0 %v5502_v52  ;;  %v5514_v56 = vpop.eup %4356 }
 0x693   : > { %v1764_v17 = vpop.permute.xlu0 %1763  ;;  %v5516_v53 = vpop.eup %4358 }
 0x694   : > { %3920 = vmatprep.subr.bf16.mxu0 %v1764_v17 }
 0x695   : > { %3921 = vmatpush3.bf16.msra.mxu0 %v1764_v17 }
 0x696   : > { %1703 = vadd.xlane.f32.xlu1 %v5508_v5  ;;  %1693 = vadd.xlane.f32.xlu0 %v5510_v38 }
 0x697   : > { %3922 = vmatprep.subr.bf16.mxu0 %v1762_v55  ;;  %v1760_v42 = vpop.permute.xlu0 %1759 }
 0x699   : > { %3923 = vmatpush3.bf16.msra.mxu0 %v1762_v55  ;;  %v5520_v2 = vpop.eup %4360 }
 0x69a   : > { %1707 = vadd.xlane.f32.xlu1 %v5514_v56  ;;  %1697 = vadd.xlane.f32.xlu0 %v5516_v53  ;;  %v5523_v39 = vpop.eup %4362 }
 0x69b   : > { %3924 = vmatprep.subr.bf16.mxu0 %v1760_v42 }
 0x69d   : > { %3925 = vmatpush3.bf16.msra.mxu0 %v1760_v42 }
 0x69e   : > { %1701 = vadd.xlane.f32.xlu0 %v5520_v2 }
 0x6a2   : > { %1705 = vadd.xlane.f32.xlu0 %v5523_v39 }
 0x6ab   : > { %2184 = vrot.lane.b32.xlu1 %v6469_v19, %s4566_s11 }
 0x6af   : > { %2182 = vrot.lane.b32.xlu1 %v6470_v49, %s4566_s11 }
 0x6b3   : > { %2180 = vrot.lane.b32.xlu1 %v6471_v6, %s4566_s11 }
 0x6b7   : > { %2176 = vrot.lane.b32.xlu1 %v6472_v16, %s4566_s11 }
 0x6b8   : > { %2186 = vrot.lane.b32.xlu0 %v6473_v48, %s4566_s11 }
 0x6bb   : > { %2172 = vrot.lane.b32.xlu1 %v4906_v21, %s4566_s11 }
 0x6bc   : > { %2178 = vrot.lane.b32.xlu0 %v6474_v12, %s4566_s11 }
 0x6bf   : > { %2158 = vrot.lane.b32.xlu1 %v4922_v37, %s4566_s11 }
 0x6c0   : > { %2174 = vrot.lane.b32.xlu0 %v4924_v22, %s4566_s11 }
 0x6c3   : > { %2162 = vrot.lane.b32.xlu1 %v4946_v31, %s4566_s11 }
 0x6c4   : > { %2156 = vrot.lane.b32.xlu0 %v4904_v20, %s4566_s11 }
 0x6c7   : > { %2166 = vrot.lane.b32.xlu1 %v4986_v54, %s4566_s11 }
 0x6c8   : > { %2160 = vrot.lane.b32.xlu0 %v4932_v18, %s4566_s11 }
 0x6cb   : > { %2170 = vrot.lane.b32.xlu1 %v5030_v47, %s4566_s11 }
 0x6cc   : > { %2164 = vrot.lane.b32.xlu0 %v4967_v14, %s4566_s11 }
 0x6cf   : > { %2795 = vrot.lane.b32.xlu1 %v6469_v19, %s4567_s14 }
 0x6d0   : > { %2168 = vrot.lane.b32.xlu0 %v5008_v25, %s4566_s11 }
 0x6d2   : > { %v1682_v63 = vpop.xlane.xlu1 %1681 }
 0x6d3   : > { %2791 = vrot.lane.b32.xlu1 %v6471_v6, %s4567_s14 }
 0x6d4   : > { %2797 = vrot.lane.b32.xlu0 %v6473_v48, %s4567_s14 }
 0x6d6   : > { %v1678_v32 = vpop.xlane.xlu1 %1677 }
 0x6d7   : > { %2787 = vrot.lane.b32.xlu1 %v6472_v16, %s4567_s14 }
 0x6d8   : > { %2793 = vrot.lane.b32.xlu0 %v6470_v49, %s4567_s14 }
 0x6da   : > { %v1684_v28 = vpop.xlane.xlu1 %1683 }
 0x6db   : > { %2783 = vrot.lane.b32.xlu1 %v4906_v21, %s4567_s14  ;;  %4364 = vrcp.f32 %v1684_v28 }
 0x6dc   : > { %2789 = vrot.lane.b32.xlu0 %v6474_v12, %s4567_s14  ;;  %4366 = vrcp.f32 %v1678_v32 }
 0x6dd   : > { %4368 = vrcp.f32 %v1682_v63 }
 0x6de   : > { %v1680_v0 = vpop.xlane.xlu1 %1679 }
 0x6df   : > { %4370 = vrcp.f32 %v1680_v0  ;;  %2769 = vrot.lane.b32.xlu1 %v4922_v37, %s4567_s14 }
 0x6e0   : > { %2785 = vrot.lane.b32.xlu0 %v4924_v22, %s4567_s14 }
 0x6e2   : > { %v1758_v13 = vpop.permute.xlu1 %1757 }
 0x6e3   : > { %2773 = vrot.lane.b32.xlu1 %v4946_v31, %s4567_s14  ;;  %3926 = vmatprep.subr.bf16.mxu0 %v1758_v13 }
 0x6e4   : > { %2767 = vrot.lane.b32.xlu0 %v4904_v20, %s4567_s14  ;;  %3927 = vmatpush3.bf16.msra.mxu0 %v1758_v13 }
 0x6e5   : > { %3944 = vmatprep.subr.bf16.mxu0 %v4230_v7 }
 0x6e7   : > { %2777 = vrot.lane.b32.xlu1 %v4986_v54, %s4567_s14 }
 0x6e8   : > { %2771 = vrot.lane.b32.xlu0 %v4932_v18, %s4567_s14  ;;  %v4365_v21 = vpop.eup %4364 }
 0x6e9   : > { %v4367_v37 = vpop.eup %4366  ;;  %v1728_v20 = vmul.f32 %v4365_v21, %v5471_v11 }
 0x6ea   : > { %v4369_v22 = vpop.eup %4368  ;;  %v1725_v31 = vmul.f32 %v4367_v37, %v5468_v35 }
 0x6eb   : > { %2781 = vrot.lane.b32.xlu1 %v5030_v47, %s4567_s14  ;;  %v1727_v54 = vmul.f32 %v4369_v22, %v5465_v9 }
 0x6ec   : > { %v4371_v8 = vpop.eup %4370  ;;  %2775 = vrot.lane.b32.xlu0 %v4967_v14, %s4567_s14  ;;  %v4231_v14 = vld [vmem:[%s6424_s5 + $0x10] sm:$0xff]  }
 0x6ed   : > { %v1726_v3 = vmul.f32 %v4371_v8, %v5474_v51  ;;  %v1742_v47 = vpack.c.bf16 %v1728_v20, %v1727_v54 }
 0x6ef   : > { %2497 = vrot.lane.b32.xlu1 %v4959_v46, %s4566_s11  ;;  %v1741_v18 = vpack.c.bf16 %v1726_v3, %v1725_v31 }
 0x6f0   : > { %2779 = vrot.lane.b32.xlu0 %v5008_v25, %s4567_s14 }
 0x6f1   : > { %3928 = vmatprep.mubr.bf16.mxu0 %v1741_v18 }
 0x6f2   : > { %3929 = vmatmul.mubr.bf16.vlgmr.msra.gmra.mxu0 %v1742_v47 }
 0x6f3   : > { %3945 = vmatpush3.bf16.msra.mxu0 %v4230_v7 }
 0x6f4   : > { %2499 = vrot.lane.b32.xlu0 %v4954_v10, %s4566_s11  ;;  %3946 = vmatprep.subr.bf16.mxu0 %v4231_v14 }
 0x6f7   : > { %3947 = vmatpush3.bf16.msra.mxu0 %v4231_v14 }
 0x6f8   : > { %2495 = vrot.lane.b32.xlu0 %v6464_v36, %s4566_s11 }
 0x713   : > { %v1688_v9 = vpop.xlane.xlu1 %1687  ;;  %v1686_v35 = vpop.xlane.xlu0 %1685 }
 0x714   : > { %4372 = vrcp.f32 %v1688_v9 }
 0x715   : > { %4374 = vrcp.f32 %v1686_v35 }
 0x717   : > { %v1696_v25 = vpop.xlane.xlu1 %1695  ;;  %v1690_v11 = vpop.xlane.xlu0 %1689 }
 0x718   : > { %4376 = vrcp.f32 %v1690_v11 }
 0x71b   : > { %v1700_v51 = vpop.xlane.xlu1 %1699  ;;  %v1692_v43 = vpop.xlane.xlu0 %1691 }
 0x71c   : > { %4378 = vrcp.f32 %v1692_v43 }
 0x71d   : > { %4380 = vrcp.f32 %v1696_v25 }
 0x71f   : > { %v1704_v58 = vpop.xlane.xlu1 %1703  ;;  %v1694_v60 = vpop.xlane.xlu0 %1693 }
 0x720   : > { %4382 = vrcp.f32 %v1694_v60 }
 0x721   : > { %v4373_v23 = vpop.eup %4372  ;;  %4384 = vrcp.f32 %v1700_v51 }
 0x722   : > { %v4375_v30 = vpop.eup %4374  ;;  %v1730_v15 = vmul.f32 %v4373_v23, %v5488_v4 }
 0x723   : > { %v1708_v45 = vpop.xlane.xlu1 %1707  ;;  %v1698_v1 = vpop.xlane.xlu0 %1697  ;;  %v1729_v27 = vmul.f32 %v4375_v30, %v5491_v50 }
 0x724   : > { %4386 = vrcp.f32 %v1698_v1 }
 0x725   : > { %v1743_v40 = vpack.c.bf16 %v1730_v15, %v1729_v27  ;;  %4388 = vrcp.f32 %v1704_v58  ;;  %v4377_v61 = vpop.eup %4376 }
 0x726   : > { %v1731_v4 = vmul.f32 %v4377_v61, %v5498_v41 }
 0x727   : > { %3932 = vmatprep.mubr.bf16.mxu0 %v1743_v40  ;;  %v5608_v29 = vpop.permute.xlu1 %2184  ;;  %v1702_v24 = vpop.xlane.xlu0 %1701 }
 0x728   : > { %4390 = vrcp.f32 %v1702_v24 }
 0x729   : > { %v4379_v17 = vpop.eup %4378  ;;  %4392 = vrcp.f32 %v1708_v45 }
 0x72a   : > { %v1732_v19 = vmul.f32 %v4379_v17, %v5502_v52  ;;  %v4381_v49 = vpop.eup %4380 }
 0x72b   : > { %v5610_v55 = vpop.permute.xlu1 %2182  ;;  %v1706_v42 = vpop.xlane.xlu0 %1705  ;;  %v1734_v63 = vmul.f32 %v4381_v49, %v5495_v33 }
 0x72c   : > { %4394 = vrcp.f32 %v1706_v42  ;;  %v1744_v50 = vpack.c.bf16 %v1732_v19, %v1731_v4 }
 0x72d   : > { %v4383_v6 = vpop.eup %4382 }
 0x72e   : > { %3933 = vmatmul.mubr.bf16.gmra.mxu0 %v1744_v50  ;;  %v1733_v12 = vmul.f32 %v4383_v6, %v5510_v38  ;;  %v4385_v32 = vpop.eup %4384 }
 0x72f   : > { %v5614_v16 = vpop.permute.xlu1 %2180  ;;  %v5616_v48 = vpop.permute.xlu0 %2186  ;;  %v1736_v21 = vmul.f32 %v4385_v32, %v5504_v57 }
 0x730   : > { %4168 = vmatprep.subr.msk.bf16.mxu0 %vm997_vm0, %v5616_v48  ;;  %v1745_v41 = vpack.c.bf16 %v1734_v63, %v1733_v12 }
 0x731   : > { %v4387_v28 = vpop.eup %4386 }
 0x732   : > { %v4389_v52 = vpop.eup %4388  ;;  %3936 = vmatprep.mubr.bf16.mxu0 %v1745_v41  ;;  %v1735_v13 = vmul.f32 %v4387_v28, %v5516_v53  ;;  %v2234_v41 = vsel %vm997_vm0, %v5616_v48, 0  ;;  %v2231_v28 = vsel %vm997_vm0, %v5608_v29, 0  ;;  %v2225_v48 = vsel %vm997_vm0, %v5614_v16, 0 }
 0x733   : > { %v5622_v0 = vpop.permute.xlu1 %2176  ;;  %v5624_v7 = vpop.permute.xlu0 %2178  ;;  %v1738_v22 = vmul.f32 %v4389_v52, %v5508_v5  ;;  %v2228_v52 = vsel %vm997_vm0, %v5610_v55, 0 }
 0x734   : > { %v1746_v38 = vpack.c.bf16 %v1736_v21, %v1735_v13 }
 0x735   : > { %v4391_v37 = vpop.eup %4390 }
 0x736   : > { %v1737_v33 = vmul.f32 %v4391_v37, %v5520_v2  ;;  %v4393_v8 = vpop.eup %4392  ;;  %3937 = vmatmul.mubr.bf16.gmra.mxu0 %v1746_v38 }
 0x737   : > { %v5630_v20 = vpop.permute.xlu1 %2172  ;;  %v5632_v31 = vpop.permute.xlu0 %2174  ;;  %v1740_v53 = vmul.f32 %v4393_v8, %v5514_v56 }
 0x738   : > { %v1747_v3 = vpack.c.bf16 %v1738_v22, %v1737_v33  ;;  %v2213_v37 = vsel %vm997_vm0, %v5630_v20, 0 }
 0x739   : > { %v4395_v54 = vpop.eup %4394 }
 0x73a   : > { %3940 = vmatprep.mubr.bf16.mxu0 %v1747_v3  ;;  %v1739_v18 = vmul.f32 %v4395_v54, %v5523_v39 }
 0x73b   : > { %v5636_v57 = vpop.permute.xlu1 %2158  ;;  %v5638_v47 = vpop.permute.xlu0 %2156 }
 0x73c   : > { %v1748_v2 = vpack.c.bf16 %v1740_v53, %v1739_v18 }
 0x73e   : > { %3941 = vmatmul.mubr.bf16.gmra.mxu0 %v1748_v2 }
 0x73f   : > { %v5640_v5 = vpop.permute.xlu1 %2162  ;;  %v5642_v14 = vpop.permute.xlu0 %2160 }
 0x743   : > { %v5644_v9 = vpop.permute.xlu1 %2166  ;;  %v5646_v35 = vpop.permute.xlu0 %2164 }
 0x747   : > { %v5648_v25 = vpop.permute.xlu1 %2170  ;;  %v5650_v11 = vpop.permute.xlu0 %2168 }
 0x74b   : > { %v5652_v39 = vpop.permute.xlu1 %2795  ;;  %v5654_v56 = vpop.permute.xlu0 %2797 }
 0x74f   : > { %v5656_v51 = vpop.permute.xlu1 %2791  ;;  %v5658_v43 = vpop.permute.xlu0 %2793 }
 0x753   : > { %v5660_v58 = vpop.permute.xlu1 %2787  ;;  %v5662_v60 = vpop.permute.xlu0 %2789 }
 0x757   : > { %v5664_v23 = vpop.permute.xlu1 %2783  ;;  %v5666_v30 = vpop.permute.xlu0 %2785 }
 0x75b   : > { %v5668_v15 = vpop.permute.xlu1 %2769  ;;  %v5670_v45 = vpop.permute.xlu0 %2767 }
 0x75f   : > { %v5672_v1 = vpop.permute.xlu1 %2773  ;;  %v5674_v27 = vpop.permute.xlu0 %2771 }
 0x763   : > { %v5676_v40 = vpop.permute.xlu1 %2777  ;;  %v5678_v24 = vpop.permute.xlu0 %2775 }
 0x767   : > { %v5680_v61 = vpop.permute.xlu1 %2781  ;;  %v5682_v17 = vpop.permute.xlu0 %2779 }
 0x76b   : > { %v2500_v42 = vpop.permute.xlu0 %2499  ;;  %v2498_v4 = vpop.permute.xlu1 %2497 }
 0x76c   : > { %4016 = vmatprep.subr.bf16.mxu1 %v2500_v42 }
 0x76d   : > { %4017 = vmatpush3.bf16.msra.mxu1 %v2500_v42 }
 0x76e   : > { %4018 = vmatprep.subr.bf16.mxu1 %v2498_v4 }
 0x76f   : > { %v2496_v19 = vpop.permute.xlu0 %2495 }
 0x771   : > { %4019 = vmatpush3.bf16.msra.mxu1 %v2498_v4 }
 0x772   : > { %4020 = vmatprep.subr.bf16.mxu1 %v2496_v19 }
 0x775   : > { %4021 = vmatpush3.bf16.msra.mxu1 %v2496_v19 }
 0x7b2   : > { %v3930_v49 = vpop.f32.mrf.mxu0 }
 0x7b4   : > { %v1815_v50 = vpop.f32.mrf.mxu0 }
 0x7b6   : > { %v3931_v6 = vpop.f32.mrf.mxu0 }
 0x7b7   : > { %v1879_v32 = vpack.c.bf16 %v3931_v6, %v3930_v49  ;;  %v2845_v49 = vsel %vm997_vm0, %v5654_v56, 0 }
 0x7b8   : > { %v1818_v12 = vpop.f32.mrf.mxu0 }
 0x7b9   : > { %v1878_v63 = vpack.c.bf16 %v1818_v12, %v1815_v50  ;;  %v2842_v50 = vsel %vm997_vm0, %v5652_v39, 0 }
 0x7bb   : > { %3948 = vmatprep.mubr.msk.bf16.mxu0 %vm997_vm0, %v1878_v63 }
 0x7bc   : > { %3949 = vmatmul.mubr.msk.bf16.vlgmr.msra.gmra.mxu0 %vm997_vm0, %v1879_v32  ;;  %v5830_v32 = vld [vmem:[%s6426_s7] sm:$0xff] }
 0x7bd   : > { %3985 = vmatpush3.bf16.xpose.msra.mxu0 %v2234_v41 }
 0x7be   : > { %4169 = vmatprep.subr.msk.bf16.mxu0 %vm997_vm0, %v5608_v29  ;;  %v2222_v29 = vsel %vm997_vm0, %v5624_v7, 0 }
 0x7c5   : > { %3987 = vmatpush3.bf16.xpose.msra.mxu0 %v2231_v28 }
 0x7c6   : > { %4170 = vmatprep.subr.msk.bf16.mxu0 %vm997_vm0, %v5610_v55  ;;  %v2219_v55 = vsel %vm997_vm0, %v5622_v0, 0 }
 0x7cd   : > { %3989 = vmatpush3.bf16.xpose.msra.mxu0 %v2228_v52  ;;  %v5838_v52 = vld [vmem:[%s6426_s7 + $0x8] sm:$0xff] }
 0x7ce   : > { %4171 = vmatprep.subr.msk.bf16.mxu0 %vm997_vm0, %v5614_v16  ;;  %v2216_v16 = vsel %vm997_vm0, %v5632_v31, 0 }
 0x7d5   : > { %3991 = vmatpush3.bf16.xpose.msra.mxu0 %v2225_v48 }
 0x7d6   : > { %4172 = vmatprep.subr.msk.bf16.mxu0 %vm997_vm0, %v5624_v7 }
 0x7dd   : > { %3993 = vmatpush3.bf16.xpose.msra.mxu0 %v2222_v29 }
 0x7de   : > { %4173 = vmatprep.subr.msk.bf16.mxu0 %vm997_vm0, %v5622_v0 }
 0x7e5   : > { %3995 = vmatpush3.bf16.xpose.msra.mxu0 %v2219_v55  ;;  %v5847_v55 = vld [vmem:[%s6426_s7 + $0x18] sm:$0xff] }
 0x7e6   : > { %4174 = vmatprep.subr.msk.bf16.mxu0 %vm997_vm0, %v5632_v31 }
 0x7ed   : > { %3997 = vmatpush3.bf16.xpose.msra.mxu0 %v2216_v16 }
 0x7ee   : > { %4175 = vmatprep.subr.msk.bf16.mxu0 %vm997_vm0, %v5630_v20  ;;  %v3934_v13 = vpop.f32.mrf.mxu0 }
 0x7f0   : > { %v1831_v7 = vpop.f32.mrf.mxu0 }
 0x7f2   : > { %v3935_v21 = vpop.f32.mrf.mxu0 }
 0x7f3   : > { %v1881_v33 = vpack.c.bf16 %v3935_v21, %v3934_v13  ;;  %v5857_v21 = vld [vmem:[%s6426_s7 + $0x30] sm:$0xff] }
 0x7f4   : > { %v1834_v38 = vpop.f32.mrf.mxu0 }
 0x7f5   : > { %3999 = vmatpush3.bf16.xpose.msra.mxu0 %v2213_v37  ;;  %v1880_v0 = vpack.c.bf16 %v1834_v38, %v1831_v7  ;;  %v5865_v38 = vld [vmem:[%s6426_s7 + $0x38] sm:$0xff] }
 0x7f6   : > { %4176 = vmatprep.subr.msk.bf16.mxu0 %vm997_vm0, %v5654_v56  ;;  %v3938_v22 = vpop.f32.mrf.mxu0 }
 0x7f7   : > { %3952 = vmatprep.mubr.msk.bf16.mxu0 %vm997_vm0, %v1880_v0 }
 0x7f8   : > { %v1847_v8 = vpop.f32.mrf.mxu0  ;;  %3953 = vmatmul.mubr.msk.bf16.gmra.mxu0 %vm997_vm0, %v1881_v33 }
 0x7fa   : > { %v3939_v31 = vpop.f32.mrf.mxu0 }
 0x7fb   : > { %v1883_v18 = vpack.c.bf16 %v3939_v31, %v3938_v22 }
 0x7fc   : > { %v1850_v3 = vpop.f32.mrf.mxu0 }
 0x7fd   : > { %v1882_v54 = vpack.c.bf16 %v1850_v3, %v1847_v8  ;;  %v5875_v8 = vld [vmem:[%s6426_s7 + $0x20] sm:$0xff]  ;;  %v5883_v3 = vld [vmem:[%s6426_s7 + $0x28] sm:$0xff] }
 0x7fe   : > { %v3942_v53 = vpop.f32.mrf.mxu0 }
 0x7ff   : > { %3956 = vmatprep.mubr.msk.bf16.mxu0 %vm997_vm0, %v1882_v54 }
 0x800   : > { %v1863_v20 = vpop.f32.mrf.mxu0  ;;  %3957 = vmatmul.mubr.msk.bf16.gmra.mxu0 %vm997_vm0, %v1883_v18 }
 0x802   : > { %v3943_v2 = vpop.f32.mrf.mxu0 }
 0x803   : > { %v1885_v19 = vpack.c.bf16 %v3943_v2, %v3942_v53 }
 0x804   : > { %v1866_v42 = vpop.f32.mrf.mxu0 }
 0x805   : > { %v1884_v4 = vpack.c.bf16 %v1866_v42, %v1863_v20  ;;  %v5893_v20 = vld [vmem:[%s6426_s7 + $0x50] sm:$0xff]  ;;  %v5901_v42 = vld [vmem:[%s6426_s7 + $0x58] sm:$0xff] }
 0x807   : > { %3960 = vmatprep.mubr.msk.bf16.mxu0 %vm997_vm0, %v1884_v4 }
 0x808   : > { %3961 = vmatmul.mubr.msk.bf16.gmra.mxu0 %vm997_vm0, %v1885_v19 }
 0x809   : > { %4000 = vmatprep.mubr.msk.bf16.mxu0 %vm997_vm0, %v5638_v47  ;;  %v2836_v47 = vsel %vm997_vm0, %v5656_v51, 0 }
 0x810   : > { %4001 = vmatmul.mubr.msk.bf16.vlgmr.msra.gmra.mxu0 %vm997_vm0, %v5636_v57  ;;  %v2839_v57 = vsel %vm997_vm0, %v5658_v43, 0 }
 0x811   : > { %4069 = vmatpush3.bf16.xpose.msra.mxu0 %v2845_v49  ;;  %4004 = vmatprep.mubr.msk.bf16.mxu0 %vm997_vm0, %v5642_v14  ;;  %v2830_v14 = vsel %vm997_vm0, %v5660_v58, 0  ;;  %v5911_v49 = vld [vmem:[%s6426_s7 + $0x40] sm:$0xff] }
 0x812   : > { %4177 = vmatprep.subr.msk.bf16.mxu0 %vm997_vm0, %v5652_v39 }
 0x818   : > { %4005 = vmatmul.mubr.msk.bf16.gmra.mxu0 %vm997_vm0, %v5640_v5  ;;  %v2833_v5 = vsel %vm997_vm0, %v5662_v60, 0 }
 0x819   : > { %4071 = vmatpush3.bf16.xpose.msra.mxu0 %v2842_v50  ;;  %4008 = vmatprep.mubr.msk.bf16.mxu0 %vm997_vm0, %v5646_v35  ;;  %v2824_v35 = vsel %vm997_vm0, %v5664_v23, 0 }
 0x81a   : > { %4178 = vmatprep.subr.msk.bf16.mxu0 %vm997_vm0, %v5658_v43 }
 0x820   : > { %4009 = vmatmul.mubr.msk.bf16.gmra.mxu0 %vm997_vm0, %v5644_v9  ;;  %v2827_v9 = vsel %vm997_vm0, %v5666_v30, 0 }
 0x821   : > { %4073 = vmatpush3.bf16.xpose.msra.mxu0 %v2839_v57  ;;  %4012 = vmatprep.mubr.msk.bf16.mxu0 %vm997_vm0, %v5650_v11  ;;  %v5919_v57 = vld [vmem:[%s6426_s7 + $0x48] sm:$0xff] }
 0x822   : > { %4179 = vmatprep.subr.msk.bf16.mxu0 %vm997_vm0, %v5656_v51 }
 0x828   : > { %4013 = vmatmul.mubr.msk.bf16.gmra.mxu0 %vm997_vm0, %v5648_v25 }
 0x829   : > { %4075 = vmatpush3.bf16.xpose.msra.mxu0 %v2836_v47  ;;  %4084 = vmatprep.mubr.msk.bf16.mxu0 %vm997_vm0, %v5670_v45 }
 0x82a   : > { %4180 = vmatprep.subr.msk.bf16.mxu0 %vm997_vm0, %v5662_v60 }
 0x831   : > { %4077 = vmatpush3.bf16.xpose.msra.mxu0 %v2833_v5 }
 0x832   : > { %4181 = vmatprep.subr.msk.bf16.mxu0 %vm997_vm0, %v5660_v58 }
 0x839   : > { %4079 = vmatpush3.bf16.xpose.msra.mxu0 %v2830_v14  ;;  %v5929_v14 = vld [vmem:[%s6426_s7 + $0x70] sm:$0xff] }
 0x83a   : > { %4182 = vmatprep.subr.msk.bf16.mxu0 %vm997_vm0, %v5666_v30 }
 0x841   : > { %4081 = vmatpush3.bf16.xpose.msra.mxu0 %v2827_v9 }
 0x842   : > { %4183 = vmatprep.subr.msk.bf16.mxu0 %vm997_vm0, %v5664_v23 }
 0x849   : > { %4083 = vmatpush3.bf16.xpose.msra.mxu0 %v2824_v35 }
 0x850   : > { %4085 = vmatmul.mubr.msk.bf16.vlgmr.msra.gmra.mxu0 %vm997_vm0, %v5668_v15 }
 0x851   : > { %4088 = vmatprep.mubr.msk.bf16.mxu0 %vm997_vm0, %v5674_v27 }
 0x858   : > { %4089 = vmatmul.mubr.msk.bf16.gmra.mxu0 %vm997_vm0, %v5672_v1 }
 0x859   : > { %4092 = vmatprep.mubr.msk.bf16.mxu0 %vm997_vm0, %v5678_v24 }
 0x860   : > { %4093 = vmatmul.mubr.msk.bf16.gmra.mxu0 %vm997_vm0, %v5676_v40 }
 0x861   : > { %4096 = vmatprep.mubr.msk.bf16.mxu0 %vm997_vm0, %v5682_v17  ;;  %v5821_v17 = vld [vmem:[%s6426_s7 + $0x10] sm:$0xff] }
 0x868   : > { %4097 = vmatmul.mubr.msk.bf16.gmra.mxu0 %vm997_vm0, %v5680_v61 }
 0x87c   : > { %v5786_v25 = vpop.f32.mrf.mxu0 }
 0x87e   : > { %v5788_v11 = vpop.f32.mrf.mxu0 }
 0x880   : > { %v5790_v39 = vpop.f32.mrf.mxu0 }
 0x882   : > { %v5792_v56 = vpop.f32.mrf.mxu0 }
 0x883   : > { %6475 = vst [vmem:[#allocation13_spill] sm:$0xff] %v5792_v56 }
 0x8b8   : > { %v5794_v51 = vpop.f32.mrf.mxu0 }
 0x8b9   : > { %6476 = vst [vmem:[#allocation3_spill] sm:$0xff] %v5794_v51 }
 0x8ba   : > { %v5796_v43 = vpop.f32.mrf.mxu0 }
 0x8bb   : > { %6477 = vst [vmem:[#allocation4_spill] sm:$0xff] %v5796_v43 }
 0x8bc   : > { %v5798_v58 = vpop.f32.mrf.mxu0 }
 0x8bd   : > { %6478 = vst [vmem:[#allocation5_spill] sm:$0xff] %v5798_v58 }
 0x8be   : > { %v5800_v60 = vpop.f32.mrf.mxu0 }
 0x8bf   : > { %6479 = vst [vmem:[#allocation7_spill] sm:$0xff] %v5800_v60 }
 0x8c0   : > { %v5802_v23 = vpop.f32.mrf.mxu0 }
 0x8c1   : > { %6480 = vst [vmem:[#allocation8_spill] sm:$0xff] %v5802_v23 }
 0x8c2   : > { %v5804_v30 = vpop.f32.mrf.mxu0 }
 0x8c3   : > { %6481 = vst [vmem:[#allocation6_spill] sm:$0xff] %v5804_v30 }
 0x8c4   : > { %v5806_v15 = vpop.f32.mrf.mxu0 }
 0x8c5   : > { %6482 = vst [vmem:[#allocation10_spill] sm:$0xff] %v5806_v15 }
 0x8c6   : > { %v5808_v45 = vpop.f32.mrf.mxu0 }
 0x8c7   : > { %6483 = vst [vmem:[#allocation11_spill] sm:$0xff] %v5808_v45 }
 0x8c8   : > { %v5810_v1 = vpop.f32.mrf.mxu0 }
 0x8c9   : > { %6484 = vst [vmem:[#allocation2_spill] sm:$0xff] %v5810_v1 }
 0x8ca   : > { %v5812_v27 = vpop.f32.mrf.mxu0 }
 0x8cb   : > { %6485 = vst [vmem:[#allocation9_spill] sm:$0xff] %v5812_v27 }
 0x8cc   : > { %v5814_v40 = vpop.f32.mrf.mxu0 }
 0x8cd   : > { %6486 = vst [vmem:[#allocation12_spill] sm:$0xff] %v5814_v40 }
 0x8ce   : > { %v5816_v24 = vpop.f32.mrf.mxu0 }
 0x8cf   : > { %6487 = vst [vmem:[#allocation14_spill] sm:$0xff] %v5816_v24 }
 0x8d0   : > { %v4002_v61 = vpop.f32.mrf.mxu0 }
 0x8d1   : > { %v5824_v6 = vadd.f32 %v5821_v17, %v4002_v61  ;;  %v5938_v61 = vld [vmem:[%s6426_s7 + $0x60] sm:$0xff] }
 0x8d2   : > { %v2270_v12 = vpop.f32.mrf.mxu0 }
 0x8d3   : > { %2337 = vmax.xlane.f32.xlu0 %v5824_v6  ;;  %v5833_v41 = vadd.f32 %v5830_v32, %v2270_v12 }
 0x8d4   : > { %v4003_v63 = vpop.f32.mrf.mxu0 }
 0x8d5   : > { %v5850_v16 = vadd.f32 %v5847_v55, %v4003_v63 }
 0x8d6   : > { %v2273_v28 = vpop.f32.mrf.mxu0 }
 0x8d7   : > { %v5841_v48 = vadd.f32 %v5838_v52, %v2273_v28  ;;  %2333 = vmax.xlane.f32.xlu0 %v5833_v41  ;;  %v5951_v28 = vld [vmem:[%s6426_s7 + $0x78] sm:$0xff] }
 0x8d8   : > { %v4006_v29 = vpop.f32.mrf.mxu0 }
 0x8d9   : > { %2335 = vmax.xlane.f32.xlu1 %v5841_v48  ;;  %v5860_v37 = vadd.f32 %v5857_v21, %v4006_v29 }
 0x8da   : > { %v2286_v13 = vpop.f32.mrf.mxu0 }
 0x8db   : > { %2339 = vmax.xlane.f32.xlu0 %v5850_v16  ;;  %v5878_v31 = vadd.f32 %v5875_v8, %v2286_v13 }
 0x8dc   : > { %v4007_v7 = vpop.f32.mrf.mxu0 }
 0x8dd   : > { %v5868_v0 = vadd.f32 %v5865_v38, %v4007_v7  ;;  %v5960_v7 = vld [vmem:[%s6426_s7 + $0x68] sm:$0xff] }
 0x8de   : > { %v2289_v33 = vpop.f32.mrf.mxu0 }
 0x8df   : > { %2345 = vmax.xlane.f32.xlu0 %v5860_v37  ;;  %2347 = vmax.xlane.f32.xlu1 %v5868_v0  ;;  %v5886_v54 = vadd.f32 %v5883_v3, %v2289_v33 }
 0x8e0   : > { %v4010_v22 = vpop.f32.mrf.mxu0 }
 0x8e1   : > { %v5896_v2 = vadd.f32 %v5893_v20, %v4010_v22 }
 0x8e2   : > { %v2302_v18 = vpop.f32.mrf.mxu0 }
 0x8e3   : > { %2343 = vmax.xlane.f32.xlu1 %v5886_v54  ;;  %2341 = vmax.xlane.f32.xlu0 %v5878_v31  ;;  %v5914_v50 = vadd.f32 %v5911_v49, %v2302_v18 }
 0x8e4   : > { %v4011_v53 = vpop.f32.mrf.mxu0 }
 0x8e5   : > { %v5904_v4 = vadd.f32 %v5901_v42, %v4011_v53 }
 0x8e6   : > { %v2305_v19 = vpop.f32.mrf.mxu0 }
 0x8e7   : > { %2353 = vmax.xlane.f32.xlu0 %v5896_v2  ;;  %2355 = vmax.xlane.f32.xlu1 %v5904_v4  ;;  %v5922_v47 = vadd.f32 %v5919_v57, %v2305_v19 }
 0x8e8   : > { %v4014_v5 = vpop.f32.mrf.mxu0 }
 0x8e9   : > { %v5932_v9 = vadd.f32 %v5929_v14, %v4014_v5 }
 0x8ea   : > { %v2318_v35 = vpop.f32.mrf.mxu0 }
 0x8eb   : > { %2351 = vmax.xlane.f32.xlu1 %v5922_v47  ;;  %2349 = vmax.xlane.f32.xlu0 %v5914_v50  ;;  %v5941_v12 = vadd.f32 %v5938_v61, %v2318_v35 }
 0x8ec   : > { %v4015_v63 = vpop.f32.mrf.mxu0 }
 0x8ed   : > { %v5954_v29 = vadd.f32 %v5951_v28, %v4015_v63 }
 0x8ee   : > { %v2321_v13 = vpop.f32.mrf.mxu0 }
 0x8ef   : > { %2361 = vmax.xlane.f32.xlu0 %v5932_v9  ;;  %v5963_v33 = vadd.f32 %v5960_v7, %v2321_v13 }
 0x8f3   : > { %2357 = vmax.xlane.f32.xlu0 %v5941_v12 }
 0x8fc   : > { %2491 = vrot.lane.b32.xlu1 %v6466_v44, %s4566_s11 }
 0x909   : > { %2493 = vrot.lane.b32.xlu0 %v6465_v34, %s4566_s11 }
 0x920   : > { %2363 = vmax.xlane.f32.xlu1 %v5954_v29 }
 0x924   : > { %2359 = vmax.xlane.f32.xlu1 %v5963_v33 }
 0x935   : > { %2489 = vrot.lane.b32.xlu1 %v5000_v62, %s4566_s11 }
 0x95c   : > { %v2338_v22 = vpop.xlane.xlu0 %2337 }
 0x95d   : > { %v2367_v18 = vsub.f32 %v5824_v6, %v2338_v22 }
 0x95f   : > { %v2385_v53 = vmul.f32 1.442695, %v2367_v18 }
 0x960   : > { %v2334_v19 = vpop.xlane.xlu0 %2333 }
 0x961   : > { %4396 = vpow2.f32 %v2385_v53  ;;  %v2365_v5 = vsub.f32 %v5833_v41, %v2334_v19 }
 0x962   : > { %v2336_v35 = vpop.xlane.xlu1 %2335 }
 0x963   : > { %v2381_v63 = vmul.f32 1.442695, %v2365_v5  ;;  %v2366_v13 = vsub.f32 %v5841_v48, %v2336_v35 }
 0x964   : > { %v2340_v24 = vpop.xlane.xlu0 %2339 }
 0x965   : > { %4398 = vpow2.f32 %v2381_v63  ;;  %v2368_v40 = vsub.f32 %v5850_v16, %v2340_v24  ;;  %v2383_v15 = vmul.f32 1.442695, %v2366_v13 }
 0x967   : > { %v2387_v27 = vmul.f32 1.442695, %v2368_v40 }
 0x968   : > { %v2348_v1 = vpop.xlane.xlu1 %2347  ;;  %v2346_v45 = vpop.xlane.xlu0 %2345 }
 0x969   : > { %4400 = vpow2.f32 %v2387_v27  ;;  %v2371_v6 = vsub.f32 %v5860_v37, %v2346_v45  ;;  %v2372_v48 = vsub.f32 %v5868_v0, %v2348_v1 }
 0x96a   : > { %4402 = vpow2.f32 %v2383_v15 }
 0x96b   : > { %v2393_v22 = vmul.f32 1.442695, %v2371_v6  ;;  %v2395_v15 = vmul.f32 1.442695, %v2372_v48 }
 0x96c   : > { %v2344_v18 = vpop.xlane.xlu1 %2343  ;;  %v2342_v53 = vpop.xlane.xlu0 %2341 }
 0x96d   : > { %v2370_v41 = vsub.f32 %v5886_v54, %v2344_v18  ;;  %v2369_v19 = vsub.f32 %v5878_v31, %v2342_v53  ;;  %4404 = vpow2.f32 %v2393_v22 }
 0x96e   : > { %v5975_v5 = vpop.eup %4396 }
 0x96f   : > { %v2391_v40 = vmul.f32 1.442695, %v2370_v41  ;;  %v2389_v24 = vmul.f32 1.442695, %v2369_v19  ;;  %2417 = vadd.xlane.f32.xlu1 %v5975_v5 }
 0x970   : > { %v2354_v27 = vpop.xlane.xlu0 %2353  ;;  %v2356_v45 = vpop.xlane.xlu1 %2355 }
 0x971   : > { %4406 = vpow2.f32 %v2391_v40  ;;  %v2375_v16 = vsub.f32 %v5896_v2, %v2354_v27  ;;  %v2376_v35 = vsub.f32 %v5904_v4, %v2356_v45 }
 0x972   : > { %v5980_v37 = vpop.eup %4398  ;;  %4408 = vpow2.f32 %v2389_v24 }
 0x973   : > { %2413 = vadd.xlane.f32.xlu1 %v5980_v37  ;;  %v2401_v54 = vmul.f32 1.442695, %v2375_v16  ;;  %4410 = vpow2.f32 %v2395_v15  ;;  %v2403_v18 = vmul.f32 1.442695, %v2376_v35  ;;  %v4086_v35 = vpop.f32.mrf.mxu0 }
 0x974   : > { %v2350_v31 = vpop.xlane.xlu0 %2349  ;;  %v2352_v63 = vpop.xlane.xlu1 %2351 }
 0x975   : > { %v2373_v1 = vsub.f32 %v5914_v50, %v2350_v31  ;;  %4412 = vpow2.f32 %v2401_v54  ;;  %v2374_v53 = vsub.f32 %v5922_v47, %v2352_v63  ;;  %v2881_v63 = vpop.f32.mrf.mxu0 }
 0x976   : > { %v5984_v0 = vpop.eup %4400 }
 0x977   : > { %v2397_v13 = vmul.f32 1.442695, %v2373_v1  ;;  %2419 = vadd.xlane.f32.xlu1 %v5984_v0  ;;  %v5989_v22 = vpop.eup %4402 }
 0x978   : > { %v2362_v2 = vpop.xlane.xlu0 %2361  ;;  %v2492_v27 = vpop.permute.xlu1 %2491 }
 0x979   : > { %v2379_v6 = vsub.f32 %v5932_v9, %v2362_v2  ;;  %4414 = vpow2.f32 %v2397_v13  ;;  %v2399_v9 = vmul.f32 1.442695, %v2374_v53  ;;  %v4087_v13 = vpop.f32.mrf.mxu0 }
 0x97a   : > { %v5992_v50 = vpop.eup %4404 }
 0x97b   : > { %v2409_v41 = vmul.f32 1.442695, %v2379_v6  ;;  %2415 = vadd.xlane.f32.xlu1 %v5989_v22  ;;  %2425 = vadd.xlane.f32.xlu0 %v5992_v50  ;;  %v2884_v2 = vpop.f32.mrf.mxu0 }
 0x97c   : > { %v2358_v4 = vpop.xlane.xlu0 %2357 }
 0x97d   : > { %4416 = vpow2.f32 %v2409_v41  ;;  %v2377_v19 = vsub.f32 %v5941_v12, %v2358_v4  ;;  %v4090_v6 = vpop.f32.mrf.mxu0 }
 0x97e   : > { %v5997_v48 = vpop.eup %4406  ;;  %4418 = vpow2.f32 %v2403_v18 }
 0x97f   : > { %v5999_v40 = vpop.eup %4408  ;;  %v2405_v24 = vmul.f32 1.442695, %v2377_v19  ;;  %2423 = vadd.xlane.f32.xlu1 %v5997_v48  ;;  %v2897_v18 = vpop.f32.mrf.mxu0 }
 0x980   : > { %2421 = vadd.xlane.f32.xlu0 %v5999_v40  ;;  %v2494_v47 = vpop.permute.xlu0 %2493  ;;  %v6003_v45 = vpop.eup %4410  ;;  %v6031_v51 = vadd.f32 %v5875_v8, %v2897_v18  ;;  %v6049_v8 = vadd.f32 %v5838_v52, %v2884_v2  ;;  %v6053_v18 = vadd.f32 %v5821_v17, %v4086_v35  ;;  %v6069_v17 = vadd.f32 %v5857_v21, %v4090_v6 }
 0x981   : > { %4420 = vpow2.f32 %v2405_v24  ;;  %4022 = vmatprep.subr.bf16.mxu1 %v2494_v47  ;;  %v4091_v41 = vpop.f32.mrf.mxu0 }
 0x982   : > { %4422 = vpow2.f32 %v2399_v9  ;;  %4023 = vmatpush3.bf16.msra.mxu1 %v2494_v47  ;;  %v6006_v12 = vpop.eup %4412  ;;  %v6075_v52 = vadd.f32 %v5865_v38, %v4091_v41 }
 0x983   : > { %4024 = vmatprep.subr.bf16.mxu1 %v2492_v27  ;;  %v2900_v9 = vpop.f32.mrf.mxu0 }
 0x984   : > { %2427 = vadd.xlane.f32.xlu0 %v6003_v45 }
 0x985   : > { %v4094_v30 = vpop.f32.mrf.mxu0 }
 0x986   : > { %4025 = vmatpush3.bf16.msra.mxu1 %v2492_v27  ;;  %v6008_v16 = vpop.eup %4414 }
 0x987   : > { %2429 = vadd.xlane.f32.xlu1 %v6008_v16  ;;  %v2913_v60 = vpop.f32.mrf.mxu0 }
 0x988   : > { %2433 = vadd.xlane.f32.xlu0 %v6006_v12 }
 0x989   : > { %v4095_v58 = vpop.f32.mrf.mxu0 }
 0x98a   : > { %v6012_v15 = vpop.eup %4416  ;;  %v6093_v21 = vadd.f32 %v5901_v42, %v4095_v58 }
 0x98b   : > { %v6014_v31 = vpop.eup %4418  ;;  %2441 = vadd.xlane.f32.xlu1 %v6012_v15  ;;  %v2916_v43 = vpop.f32.mrf.mxu0 }
 0x98c   : > { %2435 = vadd.xlane.f32.xlu0 %v6014_v31 }
 0x98e   : > { %v6018_v54 = vpop.eup %4420 }
 0x98f   : > { %v6020_v1 = vpop.eup %4422  ;;  %2437 = vadd.xlane.f32.xlu1 %v6018_v54 }
 0x990   : > { %2431 = vadd.xlane.f32.xlu0 %v6020_v1 }
 0x9a0   : > { %2485 = vrot.lane.b32.xlu1 %v6468_v59, %s4566_s11 }
 0x9a6   : > { %2487 = vrot.lane.b32.xlu0 %v6467_v26, %s4566_s11 }
 0x9a9   : > { %v2364_v53 = vpop.xlane.xlu1 %2363 }
 0x9aa   : > { %v2380_v47 = vsub.f32 %v5954_v29, %v2364_v53 }
 0x9ac   : > { %v2411_v23 = vmul.f32 1.442695, %v2380_v47 }
 0x9ad   : > { %v2360_v4 = vpop.xlane.xlu1 %2359 }
 0x9ae   : > { %v2378_v19 = vsub.f32 %v5963_v33, %v2360_v4  ;;  %v4098_v33 = vpop.f32.mrf.mxu0 }
 0x9af   : > { %v6038_v29 = vadd.f32 %v5929_v14, %v4098_v33  ;;  %v6057_v14 = vadd.f32 %v5847_v55, %v4087_v13 }
 0x9b0   : > { %v2407_v27 = vmul.f32 1.442695, %v2378_v19  ;;  %v2929_v55 = vpop.f32.mrf.mxu0 }
 0x9b1   : > { %v2490_v24 = vpop.permute.xlu1 %2489 }
 0x9b2   : > { %4026 = vmatprep.subr.bf16.mxu1 %v2490_v24  ;;  %4424 = vpow2.f32 %v2407_v27 }
 0x9b3   : > { %4027 = vmatpush3.bf16.msra.mxu1 %v2490_v24  ;;  %4426 = vpow2.f32 %v2411_v23  ;;  %v6045_v23 = vadd.f32 %v5830_v32, %v2881_v63  ;;  %v6063_v32 = vadd.f32 %v5883_v3, %v2900_v9 }
 0x9bf   : > { %v6033_v56 = vpop.eup %4424 }
 0x9c0   : > { %v6040_v53 = vpop.eup %4426 }
 0x9c4   : > { %2952 = vmax.xlane.f32.xlu1 %v6031_v51 }
 0x9c5   : > { %2439 = vadd.xlane.f32.xlu0 %v6033_v56 }
 0x9c8   : > { %2972 = vmax.xlane.f32.xlu1 %v6038_v29 }
 0x9c9   : > { %2443 = vadd.xlane.f32.xlu0 %v6040_v53 }
 0x9cd   : > { %2944 = vmax.xlane.f32.xlu0 %v6045_v23 }
 0x9d1   : > { %2946 = vmax.xlane.f32.xlu0 %v6049_v8 }
 0x9d5   : > { %2948 = vmax.xlane.f32.xlu0 %v6053_v18 }
 0x9d9   : > { %2950 = vmax.xlane.f32.xlu0 %v6057_v14  ;;  %3110 = vrot.lane.b32.xlu1 %v4954_v10, %s4567_s14  ;;  %v6081_v10 = vadd.f32 %v5911_v49, %v2913_v60  ;;  %v6097_v60 = vadd.f32 %v5938_v61, %v2929_v55 }
 0x9dd   : > { %2954 = vmax.xlane.f32.xlu0 %v6063_v32  ;;  %3108 = vrot.lane.b32.xlu1 %v4959_v46, %s4567_s14  ;;  %v6085_v46 = vadd.f32 %v5919_v57, %v2916_v43 }
 0x9e1   : > { %2956 = vmax.xlane.f32.xlu0 %v6069_v17  ;;  %3104 = vrot.lane.b32.xlu1 %v6465_v34, %s4567_s14  ;;  %v6089_v34 = vadd.f32 %v5893_v20, %v4094_v30 }
 0x9e5   : > { %2958 = vmax.xlane.f32.xlu0 %v6075_v52  ;;  %3098 = vrot.lane.b32.xlu1 %v6467_v26, %s4567_s14  ;;  %v4099_v26 = vpop.f32.mrf.mxu0 }
 0x9e6   : > { %v6105_v20 = vadd.f32 %v5951_v28, %v4099_v26  ;;  %v4232_v26 = vld [vmem:[%s6424_s5 + $0x28] sm:$0xff]  }
 0x9e7   : > { %v2932_v38 = vpop.f32.mrf.mxu0 }
 0x9e8   : > { %v6101_v3 = vadd.f32 %v5960_v7, %v2932_v38 }
 0x9e9   : > { %2960 = vmax.xlane.f32.xlu0 %v6081_v10 }
 0x9ed   : > { %2962 = vmax.xlane.f32.xlu0 %v6085_v46 }
 0x9f1   : > { %2964 = vmax.xlane.f32.xlu0 %v6089_v34 }
 0x9f5   : > { %2966 = vmax.xlane.f32.xlu0 %v6093_v21 }
 0x9f8   : > { %v2418_v43 = vpop.xlane.xlu1 %2417 }
 0x9f9   : > { %2968 = vmax.xlane.f32.xlu0 %v6097_v60 }
 0x9fc   : > { %v2414_v30 = vpop.xlane.xlu1 %2413 }
 0x9fd   : > { %2970 = vmax.xlane.f32.xlu0 %v6101_v3  ;;  %4428 = vrcp.f32 %v2414_v30 }
 0xa00   : > { %v2420_v58 = vpop.xlane.xlu1 %2419 }
 0xa01   : > { %2974 = vmax.xlane.f32.xlu0 %v6105_v20 }
 0xa04   : > { %v2416_v42 = vpop.xlane.xlu1 %2415  ;;  %v2426_v49 = vpop.xlane.xlu0 %2425 }
 0xa05   : > { %4430 = vrcp.f32 %v2416_v42 }
 0xa06   : > { %4432 = vrcp.f32 %v2420_v58 }
 0xa08   : > { %v2424_v61 = vpop.xlane.xlu1 %2423 }
 0xa09   : > { %v2422_v57 = vpop.xlane.xlu0 %2421  ;;  %4434 = vrcp.f32 %v2424_v61 }
 0xa0a   : > { %v4429_v63 = vpop.eup %4428  ;;  %4436 = vrcp.f32 %v2422_v57 }
 0xa0b   : > { %4438 = vrcp.f32 %v2418_v43  ;;  %v2461_v28 = vmul.f32 %v4429_v63, %v5980_v37 }
 0xa0d   : > { %v2428_v35 = vpop.xlane.xlu0 %2427 }
 0xa0e   : > { %4440 = vrcp.f32 %v2428_v35 }
 0xa0f   : > { %4442 = vrcp.f32 %v2426_v49 }
 0xa10   : > { %v2430_v7 = vpop.xlane.xlu1 %2429 }
 0xa11   : > { %v2434_v13 = vpop.xlane.xlu0 %2433  ;;  %4444 = vrcp.f32 %v2430_v7 }
 0xa12   : > { %v4431_v2 = vpop.eup %4430 }
 0xa13   : > { %v2462_v6 = vmul.f32 %v4431_v2, %v5989_v22  ;;  %v4433_v47 = vpop.eup %4432 }
 0xa14   : > { %v2442_v41 = vpop.xlane.xlu1 %2441 }
 0xa15   : > { %v2436_v4 = vpop.xlane.xlu0 %2435  ;;  %v2477_v19 = vpack.c.bf16 %v2462_v6, %v2461_v28 }
 0xa16   : > { %v4435_v37 = vpop.eup %4434 }
 0xa17   : > { %3106 = vrot.lane.b32.xlu0 %v6464_v36, %s4567_s14  ;;  %4032 = vmatprep.mubr.bf16.mxu1 %v2477_v19  ;;  %v4437_v22 = vpop.eup %4436  ;;  %v2464_v36 = vmul.f32 %v4433_v47, %v5984_v0  ;;  %v2466_v38 = vmul.f32 %v4435_v37, %v5997_v48 }
 0xa18   : > { %v2438_v9 = vpop.xlane.xlu1 %2437  ;;  %v4439_v33 = vpop.eup %4438 }
 0xa19   : > { %v2432_v24 = vpop.xlane.xlu0 %2431  ;;  %v2463_v43 = vmul.f32 %v4439_v33, %v5975_v5 }
 0xa1a   : > { %4446 = vrcp.f32 %v2432_v24 }
 0xa1b   : > { %3102 = vrot.lane.b32.xlu0 %v6466_v44, %s4567_s14  ;;  %4448 = vrcp.f32 %v2436_v4  ;;  %v2465_v44 = vmul.f32 %v4437_v22, %v5999_v40  ;;  %v2478_v30 = vpack.c.bf16 %v2464_v36, %v2463_v43  ;;  %v4441_v58 = vpop.eup %4440 }
 0xa1c   : > { %v2486_v55 = vpop.permute.xlu1 %2485  ;;  %4450 = vrcp.f32 %v2434_v13  ;;  %v4443_v42 = vpop.eup %4442  ;;  %v2468_v48 = vmul.f32 %v4441_v58, %v6003_v45 }
 0xa1d   : > { %v2488_v27 = vpop.permute.xlu0 %2487  ;;  %v2479_v0 = vpack.c.bf16 %v2466_v38, %v2465_v44  ;;  %v2467_v57 = vmul.f32 %v4443_v42, %v5992_v50  ;;  %4452 = vrcp.f32 %v2438_v9 }
 0xa1e   : > { %4028 = vmatprep.subr.bf16.mxu1 %v2488_v27  ;;  %v4445_v49 = vpop.eup %4444 }
 0xa1f   : > { %3100 = vrot.lane.b32.xlu0 %v5000_v62, %s4567_s14  ;;  %4029 = vmatpush3.bf16.msra.mxu1 %v2488_v27  ;;  %v4233_v62 = vld [vmem:[%s6424_s5 + $0x20] sm:$0xff]   ;;  %v2469_v61 = vmul.f32 %v4445_v49, %v6008_v16  ;;  %v2480_v35 = vpack.c.bf16 %v2468_v48, %v2467_v57 }
 0xa20   : > { %4030 = vmatprep.subr.bf16.mxu1 %v2486_v55 }
 0xa23   : > { %4031 = vmatpush3.bf16.msra.mxu1 %v2486_v55 }
 0xa24   : > { %4048 = vmatprep.subr.bf16.mxu1 %v4232_v26 }
 0xa26   : > { %4033 = vmatmul.mubr.bf16.vlgmr.msra.gmra.mxu1 %v2478_v30 }
 0xa27   : > { %4036 = vmatprep.mubr.bf16.mxu1 %v2479_v0  ;;  %4049 = vmatpush3.bf16.msra.mxu1 %v4232_v26  ;;  %v4447_v40 = vpop.eup %4446 }
 0xa28   : > { %4050 = vmatprep.subr.bf16.mxu1 %v4233_v62  ;;  %v2470_v5 = vmul.f32 %v4447_v40, %v6020_v1  ;;  %v4449_v63 = vpop.eup %4448 }
 0xa29   : > { %v4451_v13 = vpop.eup %4450  ;;  %v2472_v2 = vmul.f32 %v4449_v63, %v6014_v31 }
 0xa2a   : > { %v2481_v7 = vpack.c.bf16 %v2470_v5, %v2469_v61  ;;  %v2471_v28 = vmul.f32 %v4451_v13, %v6006_v12  ;;  %v4453_v24 = vpop.eup %4452 }
 0xa2b   : > { %4051 = vmatpush3.bf16.msra.mxu1 %v4233_v62  ;;  %v2473_v12 = vmul.f32 %v4453_v24, %v6018_v54 }
 0xa2c   : > { %v2482_v6 = vpack.c.bf16 %v2472_v2, %v2471_v28 }
 0xa2e   : > { %4037 = vmatmul.mubr.bf16.gmra.mxu1 %v2480_v35 }
 0xa2f   : > { %4040 = vmatprep.mubr.bf16.mxu1 %v2481_v7 }
 0xa36   : > { %4041 = vmatmul.mubr.bf16.gmra.mxu1 %v2482_v6 }
 0xa4d   : > { %v2953_v45 = vpop.xlane.xlu1 %2952 }
 0xa4e   : > { %v2440_v1 = vpop.xlane.xlu0 %2439  ;;  %v2980_v62 = vsub.f32 %v6031_v51, %v2953_v45 }
 0xa4f   : > { %4454 = vrcp.f32 %v2440_v1 }
 0xa50   : > { %4456 = vrcp.f32 %v2442_v41  ;;  %v3000_v49 = vmul.f32 1.442695, %v2980_v62 }
 0xa51   : > { %v2973_v50 = vpop.xlane.xlu1 %2972 }
 0xa52   : > { %v2444_v16 = vpop.xlane.xlu0 %2443 }
 0xa53   : > { %4458 = vrcp.f32 %v2444_v16 }
 0xa55   : > { %v6132_v4 = vpop.permute.xlu1 %3110 }
 0xa56   : > { %v2945_v19 = vpop.xlane.xlu0 %2944  ;;  %4100 = vmatprep.subr.bf16.mxu1 %v6132_v4 }
 0xa57   : > { %v2976_v22 = vsub.f32 %v6045_v23, %v2945_v19 }
 0xa59   : > { %v2992_v43 = vmul.f32 1.442695, %v2976_v22 }
 0xa5a   : > { %v2947_v47 = vpop.xlane.xlu0 %2946 }
 0xa5b   : > { %v2977_v30 = vsub.f32 %v6049_v8, %v2947_v47 }
 0xa5c   : > { %v4455_v31 = vpop.eup %4454 }
 0xa5d   : > { %v2474_v37 = vmul.f32 %v4455_v31, %v6033_v56  ;;  %v4457_v27 = vpop.eup %4456  ;;  %v2994_v58 = vmul.f32 1.442695, %v2977_v30 }
 0xa5e   : > { %v2949_v9 = vpop.xlane.xlu0 %2948  ;;  %v2475_v44 = vmul.f32 %v4457_v27, %v6012_v15 }
 0xa5f   : > { %v2978_v41 = vsub.f32 %v6053_v18, %v2949_v9  ;;  %v2483_v33 = vpack.c.bf16 %v2474_v37, %v2473_v12 }
 0xa60   : > { %v4459_v55 = vpop.eup %4458 }
 0xa61   : > { %v2996_v36 = vmul.f32 1.442695, %v2978_v41  ;;  %4044 = vmatprep.mubr.bf16.mxu1 %v2483_v33  ;;  %v2476_v38 = vmul.f32 %v4459_v55, %v6040_v53 }
 0xa62   : > { %v2951_v26 = vpop.xlane.xlu0 %2950 }
 0xa63   : > { %4460 = vpow2.f32 %v2996_v36  ;;  %v2979_v54 = vsub.f32 %v6057_v14, %v2951_v26  ;;  %v2484_v56 = vpack.c.bf16 %v2476_v38, %v2475_v44  ;;  %v6203_v26 = vpop.f32.mrf.mxu1 }
 0xa64   : > { %4462 = vpow2.f32 %v2992_v43 }
 0xa65   : > { %4045 = vmatmul.mubr.bf16.gmra.mxu1 %v2484_v56  ;;  %v2998_v18 = vmul.f32 1.442695, %v2979_v54  ;;  %v6207_v44 = vpop.f32.mrf.mxu1 }
 0xa66   : > { %v2955_v23 = vpop.xlane.xlu0 %2954 }
 0xa67   : > { %4464 = vpow2.f32 %v2998_v18  ;;  %v2981_v15 = vsub.f32 %v6063_v32, %v2955_v23  ;;  %v2990_v32 = vsub.f32 %v6038_v29, %v2973_v50  ;;  %v6209_v38 = vpop.f32.mrf.mxu1 }
 0xa68   : > { %4466 = vpow2.f32 %v2994_v58 }
 0xa69   : > { %v3002_v40 = vmul.f32 1.442695, %v2981_v15  ;;  %v3020_v63 = vmul.f32 1.442695, %v2990_v32  ;;  %v6211_v43 = vpop.f32.mrf.mxu1 }
 0xa6a   : > { %v2957_v0 = vpop.xlane.xlu0 %2956 }
 0xa6b   : > { %v2982_v53 = vsub.f32 %v6069_v17, %v2957_v0  ;;  %v6213_v54 = vpop.f32.mrf.mxu1 }
 0xa6d   : > { %v3004_v42 = vmul.f32 1.442695, %v2982_v53  ;;  %v6215_v56 = vpop.f32.mrf.mxu1 }
 0xa6e   : > { %v2959_v14 = vpop.xlane.xlu0 %2958 }
 0xa6f   : > { %4468 = vpow2.f32 %v3004_v42  ;;  %v2983_v8 = vsub.f32 %v6075_v52, %v2959_v14  ;;  %v6217_v30 = vpop.f32.mrf.mxu1 }
 0xa70   : > { %v6147_v48 = vpop.eup %4460  ;;  %4470 = vpow2.f32 %v3000_v49 }
 0xa71   : > { %3028 = vadd.xlane.f32.xlu0 %v6147_v48  ;;  %4472 = vpow2.f32 %v3002_v40  ;;  %v3006_v5 = vmul.f32 1.442695, %v2983_v8  ;;  %v6150_v57 = vpop.eup %4462  ;;  %v6219_v23 = vpop.f32.mrf.mxu1 }
 0xa72   : > { %v2961_v51 = vpop.xlane.xlu0 %2960 }
 0xa73   : > { %4474 = vpow2.f32 %v3006_v5  ;;  %v2984_v2 = vsub.f32 %v6081_v10, %v2961_v51  ;;  %v6221_v18 = vpop.f32.mrf.mxu1 }
 0xa74   : > { %v6155_v35 = vpop.eup %4464 }
 0xa75   : > { %3024 = vadd.xlane.f32.xlu0 %v6150_v57  ;;  %v6158_v13 = vpop.eup %4466  ;;  %v3008_v1 = vmul.f32 1.442695, %v2984_v2  ;;  %v6223_v62 = vpop.f32.mrf.mxu1 }
 0xa76   : > { %v2963_v17 = vpop.xlane.xlu0 %2962 }
 0xa77   : > { %v2985_v61 = vsub.f32 %v6085_v46, %v2963_v17  ;;  %v6225_v58 = vpop.f32.mrf.mxu1 }
 0xa79   : > { %v3010_v52 = vmul.f32 1.442695, %v2985_v61  ;;  %3030 = vadd.xlane.f32.xlu0 %v6155_v35 }
 0xa7a   : > { %v2965_v7 = vpop.xlane.xlu0 %2964 }
 0xa7b   : > { %4476 = vpow2.f32 %v3010_v52  ;;  %v2986_v28 = vsub.f32 %v6089_v34, %v2965_v7  ;;  %v3109_v52 = vpop.permute.xlu1 %3108 }
 0xa7c   : > { %v6162_v6 = vpop.eup %4468  ;;  %4478 = vpow2.f32 %v3020_v63 }
 0xa7d   : > { %v3012_v29 = vmul.f32 1.442695, %v2986_v28  ;;  %3026 = vadd.xlane.f32.xlu0 %v6158_v13  ;;  %3036 = vadd.xlane.f32.xlu1 %v6162_v6  ;;  %v6166_v45 = vpop.eup %4470 }
 0xa7e   : > { %v2967_v46 = vpop.xlane.xlu0 %2966  ;;  %v6169_v16 = vpop.eup %4472 }
 0xa7f   : > { %4480 = vpow2.f32 %v3012_v29  ;;  %v2987_v50 = vsub.f32 %v6093_v21, %v2967_v46 }
 0xa80   : > { %4482 = vpow2.f32 %v3008_v1  ;;  %v6174_v24 = vpop.eup %4474 }
 0xa81   : > { %3034 = vadd.xlane.f32.xlu0 %v6169_v16  ;;  %3032 = vadd.xlane.f32.xlu1 %v6166_v45  ;;  %v3014_v34 = vmul.f32 1.442695, %v2987_v50 }
 0xa82   : > { %v2969_v10 = vpop.xlane.xlu0 %2968 }
 0xa83   : > { %v2988_v19 = vsub.f32 %v6097_v60, %v2969_v10  ;;  %4484 = vpow2.f32 %v3014_v34  ;;  %v3105_v10 = vpop.permute.xlu1 %3104 }
 0xa85   : > { %3038 = vadd.xlane.f32.xlu1 %v6174_v24  ;;  %v3016_v47 = vmul.f32 1.442695, %v2988_v19 }
 0xa86   : > { %v2971_v31 = vpop.xlane.xlu0 %2970 }
 0xa87   : > { %v2989_v21 = vsub.f32 %v6101_v3, %v2971_v31  ;;  %4486 = vpow2.f32 %v3016_v47 }
 0xa88   : > { %v6178_v12 = vpop.eup %4476 }
 0xa89   : > { %v3018_v37 = vmul.f32 1.442695, %v2989_v21  ;;  %3042 = vadd.xlane.f32.xlu0 %v6178_v12  ;;  %v6181_v27 = vpop.eup %4478 }
 0xa8a   : > { %v2975_v9 = vpop.xlane.xlu0 %2974 }
 0xa8b   : > { %4488 = vpow2.f32 %v3018_v37  ;;  %v2991_v60 = vsub.f32 %v6105_v20, %v2975_v9  ;;  %v3099_v37 = vpop.permute.xlu1 %3098 }
 0xa8c   : > { %v6184_v22 = vpop.eup %4480 }
 0xa8d   : > { %v3022_v41 = vmul.f32 1.442695, %v2991_v60  ;;  %3052 = vadd.xlane.f32.xlu0 %v6181_v27  ;;  %3044 = vadd.xlane.f32.xlu1 %v6184_v22  ;;  %v6188_v3 = vpop.eup %4482 }
 0xa8e   : > { %v3107_v8 = vpop.permute.xlu0 %3106 }
 0xa8f   : > { %4490 = vpow2.f32 %v3022_v41 }
 0xa90   : > { %v6191_v33 = vpop.eup %4484 }
 0xa91   : > { %3040 = vadd.xlane.f32.xlu1 %v6188_v3 }
 0xa92   : > { %v3103_v63 = vpop.permute.xlu0 %3102 }
 0xa94   : > { %v6194_v55 = vpop.eup %4486 }
 0xa95   : > { %3046 = vadd.xlane.f32.xlu1 %v6191_v33 }
 0xa96   : > { %v3101_v1 = vpop.permute.xlu0 %3100 }
 0xa98   : > { %v6196_v36 = vpop.eup %4488 }
 0xa99   : > { %3048 = vadd.xlane.f32.xlu1 %v6194_v55  ;;  %3050 = vadd.xlane.f32.xlu0 %v6196_v36 }
 0xa9c   : > { %v6200_v20 = vpop.eup %4490 }
 0xa9d   : > { %3054 = vadd.xlane.f32.xlu1 %v6200_v20 }
 0xaaf   : > { %3096 = vrot.lane.b32.xlu0 %v6468_v59, %s4567_s14  ;;  %v6227_v59 = vpop.f32.mrf.mxu1 }
 0xab1   : > { %v6229_v0 = vpop.f32.mrf.mxu1 }
 0xab3   : > { %v6231_v15 = vpop.f32.mrf.mxu1 }
 0xab5   : > { %v6233_v53 = vpop.f32.mrf.mxu1 }
 0xab7   : > { %v6235_v42 = vpop.f32.mrf.mxu1 }
 0xae6   : > { %v4034_v49 = vpop.f32.mrf.mxu1 }
 0xae8   : > { %v2543_v14 = vpop.f32.mrf.mxu1 }
 0xaea   : > { %v4035_v40 = vpop.f32.mrf.mxu1 }
 0xaeb   : > { %v2607_v32 = vpack.c.bf16 %v4035_v40, %v4034_v49 }
 0xaec   : > { %v2546_v51 = vpop.f32.mrf.mxu1 }
 0xaed   : > { %v2606_v5 = vpack.c.bf16 %v2546_v51, %v2543_v14 }
 0xaee   : > { %v4038_v17 = vpop.f32.mrf.mxu1 }
 0xaef   : > { %4052 = vmatprep.mubr.msk.bf16.mxu1 %vm997_vm0, %v2606_v5 }
 0xaf0   : > { %v2559_v61 = vpop.f32.mrf.mxu1  ;;  %4053 = vmatmul.mubr.msk.bf16.vlgmr.msra.gmra.mxu1 %vm997_vm0, %v2607_v32 }
 0xaf1   : > { %4101 = vmatpush3.bf16.msra.mxu1 %v6132_v4 }
 0xaf2   : > { %4102 = vmatprep.subr.bf16.mxu1 %v3109_v52  ;;  %v4039_v7 = vpop.f32.mrf.mxu1 }
 0xaf3   : > { %v2609_v29 = vpack.c.bf16 %v4039_v7, %v4038_v17 }
 0xaf4   : > { %v2562_v2 = vpop.f32.mrf.mxu1 }
 0xaf5   : > { %v2608_v28 = vpack.c.bf16 %v2562_v2, %v2559_v61  ;;  %4103 = vmatpush3.bf16.msra.mxu1 %v3109_v52 }
 0xaf6   : > { %4104 = vmatprep.subr.bf16.mxu1 %v3107_v8  ;;  %v4042_v46 = vpop.f32.mrf.mxu1 }
 0xaf7   : > { %4056 = vmatprep.mubr.msk.bf16.mxu1 %vm997_vm0, %v2608_v28 }
 0xaf8   : > { %v2575_v50 = vpop.f32.mrf.mxu1  ;;  %4057 = vmatmul.mubr.msk.bf16.gmra.mxu1 %vm997_vm0, %v2609_v29 }
 0xaf9   : > { %4105 = vmatpush3.bf16.msra.mxu1 %v3107_v8 }
 0xafa   : > { %4106 = vmatprep.subr.bf16.mxu1 %v3105_v10  ;;  %v4043_v34 = vpop.f32.mrf.mxu1  ;;  %v3029_v4 = vpop.xlane.xlu0 %3028 }
 0xafb   : > { %v2611_v31 = vpack.c.bf16 %v4043_v34, %v4042_v46 }
 0xafc   : > { %v2578_v19 = vpop.f32.mrf.mxu1 }
 0xafd   : > { %v2610_v47 = vpack.c.bf16 %v2578_v19, %v2575_v50  ;;  %4107 = vmatpush3.bf16.msra.mxu1 %v3105_v10 }
 0xafe   : > { %4108 = vmatprep.subr.bf16.mxu1 %v3103_v63  ;;  %v3025_v21 = vpop.xlane.xlu0 %3024 }
 0xaff   : > { %4060 = vmatprep.mubr.msk.bf16.mxu1 %vm997_vm0, %v2610_v47 }
 0xb00   : > { %4061 = vmatmul.mubr.msk.bf16.gmra.mxu1 %vm997_vm0, %v2611_v31 }
 0xb01   : > { %4109 = vmatpush3.bf16.msra.mxu1 %v3103_v63 }
 0xb02   : > { %4110 = vmatprep.subr.bf16.mxu1 %v3101_v1  ;;  %v3031_v9 = vpop.xlane.xlu0 %3030 }
 0xb05   : > { %4111 = vmatpush3.bf16.msra.mxu1 %v3101_v1 }
 0xb06   : > { %4112 = vmatprep.subr.bf16.mxu1 %v3099_v37  ;;  %v3037_v60 = vpop.xlane.xlu1 %3036  ;;  %v3027_v41 = vpop.xlane.xlu0 %3026 }
 0xb07   : > { %4492 = vrcp.f32 %v3027_v41 }
 0xb08   : > { %4494 = vrcp.f32 %v3025_v21 }
 0xb09   : > { %4113 = vmatpush3.bf16.msra.mxu1 %v3099_v37  ;;  %4496 = vrcp.f32 %v3031_v9 }
 0xb0a   : > { %v3033_v49 = vpop.xlane.xlu1 %3032  ;;  %v3035_v14 = vpop.xlane.xlu0 %3034 }
 0xb0b   : > { %4498 = vrcp.f32 %v3033_v49 }
 0xb0c   : > { %4500 = vrcp.f32 %v3035_v14 }
 0xb0d   : > { %4502 = vrcp.f32 %v3029_v4 }
 0xb0e   : > { %v3039_v8 = vpop.xlane.xlu1 %3038 }
 0xb0f   : > { %4504 = vrcp.f32 %v3039_v8 }
 0xb12   : > { %v3043_v40 = vpop.xlane.xlu0 %3042 }
 0xb14   : > { %v4493_v63 = vpop.eup %4492 }
 0xb15   : > { %v4495_v28 = vpop.eup %4494  ;;  %v3073_v46 = vmul.f32 %v4493_v63, %v6158_v13 }
 0xb16   : > { %v3045_v51 = vpop.xlane.xlu1 %3044  ;;  %v3053_v5 = vpop.xlane.xlu0 %3052  ;;  %v3072_v10 = vmul.f32 %v4495_v28, %v6150_v57 }
 0xb17   : > { %v4497_v34 = vpop.eup %4496 }
 0xb18   : > { %v4499_v19 = vpop.eup %4498  ;;  %v3088_v31 = vpack.c.bf16 %v3073_v46, %v3072_v10  ;;  %v3075_v13 = vmul.f32 %v4497_v34, %v6155_v35  ;;  %v2094_v34 = vadd.f32 %v6207_v44, %v5788_v11  ;;  %v6490_v44 = vld [vmem:[#allocation4_spill] sm:$0xff] }
 0xb19   : > { %v4501_v21 = vpop.eup %4500  ;;  %v3076_v9 = vmul.f32 %v4499_v19, %v6166_v45 }
 0xb1a   : > { %v3041_v17 = vpop.xlane.xlu1 %3040  ;;  %v4503_v37 = vpop.eup %4502  ;;  %v3077_v57 = vmul.f32 %v4501_v21, %v6169_v16 }
 0xb1b   : > { %4506 = vrcp.f32 %v3041_v17 }
 0xb1c   : > { %4508 = vrcp.f32 %v3037_v60  ;;  %v3074_v60 = vmul.f32 %v4503_v37, %v6147_v48  ;;  %v4505_v49 = vpop.eup %4504 }
 0xb1d   : > { %4510 = vrcp.f32 %v3043_v40  ;;  %v3090_v40 = vpack.c.bf16 %v3077_v57, %v3076_v9  ;;  %v3079_v35 = vmul.f32 %v4505_v49, %v6174_v24  ;;  %v2110_v57 = vadd.f32 %v6215_v56, %v6490_v44 }
 0xb1e   : > { %v3047_v2 = vpop.xlane.xlu1 %3046  ;;  %v3089_v41 = vpack.c.bf16 %v3075_v13, %v3074_v60 }
 0xb1f   : > { %4512 = vrcp.f32 %v3047_v2 }
 0xb22   : > { %v3051_v32 = vpop.xlane.xlu0 %3050  ;;  %v3049_v47 = vpop.xlane.xlu1 %3048 }
 0xb23   : > { %4514 = vrcp.f32 %v3049_v47 }
 0xb24   : > { %4516 = vrcp.f32 %v3051_v32 }
 0xb25   : > { %v4046_v61 = vpop.f32.mrf.mxu1  ;;  %4518 = vrcp.f32 %v3045_v51 }
 0xb26   : > { %v3097_v52 = vpop.permute.xlu0 %3096  ;;  %v3055_v14 = vpop.xlane.xlu1 %3054 }
 0xb27   : > { %v2591_v7 = vpop.f32.mrf.mxu1  ;;  %4114 = vmatprep.subr.bf16.mxu1 %v3097_v52  ;;  %4520 = vrcp.f32 %v3055_v14  ;;  %v6492_v14 = vld [vmem:[#allocation7_spill] sm:$0xff] }
 0xb28   : > { %4115 = vmatpush3.bf16.msra.mxu1 %v3097_v52  ;;  %v4507_v8 = vpop.eup %4506  ;;  %4522 = vrcp.f32 %v3053_v5 }
 0xb29   : > { %v4047_v29 = vpop.f32.mrf.mxu1  ;;  %v4509_v17 = vpop.eup %4508  ;;  %v3080_v32 = vmul.f32 %v4507_v8, %v6188_v3 }
 0xb2a   : > { %v2613_v4 = vpack.c.bf16 %v4047_v29, %v4046_v61  ;;  %v4511_v61 = vpop.eup %4510  ;;  %v3078_v45 = vmul.f32 %v4509_v17, %v6162_v6  ;;  %v6493_v17 = vld [vmem:[#allocation8_spill] sm:$0xff] }
 0xb2b   : > { %v2594_v1 = vpop.f32.mrf.mxu1  ;;  %v3081_v16 = vmul.f32 %v4511_v61, %v6178_v12  ;;  %v4234_v12 = vld [vmem:[%s6424_s5 + $0x38] sm:$0xff]   ;;  %v2134_v61 = vadd.f32 %v6221_v18, %v6493_v17 }
 0xb2c   : > { %v2612_v50 = vpack.c.bf16 %v2594_v1, %v2591_v7  ;;  %v4513_v48 = vpop.eup %4512  ;;  %v3091_v51 = vpack.c.bf16 %v3079_v35, %v3078_v45  ;;  %4132 = vmatprep.subr.bf16.mxu1 %v4234_v12 }
 0xb2d   : > { %v3092_v63 = vpack.c.bf16 %v3081_v16, %v3080_v32  ;;  %v3083_v28 = vmul.f32 %v4513_v48, %v6191_v33  ;;  %v6494_v32 = vld [vmem:[#allocation6_spill] sm:$0xff] }
 0xb2e   : > { %4064 = vmatprep.mubr.msk.bf16.mxu1 %vm997_vm0, %v2612_v50  ;;  %v2126_v45 = vadd.f32 %v6223_v62, %v6494_v32  ;;  %v6495_v48 = vld [vmem:[#allocation10_spill] sm:$0xff] }
 0xb2f   : > { %4065 = vmatmul.mubr.msk.bf16.gmra.mxu1 %vm997_vm0, %v2613_v4 }
 0xb30   : > { %4116 = vmatprep.mubr.bf16.mxu1 %v3088_v31  ;;  %v4515_v52 = vpop.eup %4514  ;;  %v6488_v31 = vld [vmem:[#allocation13_spill] sm:$0xff] }
 0xb31   : > { %v4517_v7 = vpop.eup %4516  ;;  %v3084_v29 = vmul.f32 %v4515_v52, %v6194_v55  ;;  %v2097_v21 = vadd.f32 %v6211_v43, %v6488_v31 }
 0xb32   : > { %v4519_v2 = vpop.eup %4518  ;;  %v3085_v24 = vmul.f32 %v4517_v7, %v6196_v36  ;;  %v2102_v36 = vadd.f32 %v6203_v26, %v5786_v25  ;;  %v6489_v25 = vld [vmem:[#allocation3_spill] sm:$0xff] }
 0xb33   : > { %v3082_v3 = vmul.f32 %v4519_v2, %v6184_v22  ;;  %v4235_v22 = vld [vmem:[%s6424_s5 + $0x30] sm:$0xff]   ;;  %v2118_v26 = vadd.f32 %v6213_v54, %v6489_v25 }
 0xb34   : > { %v4521_v6 = vpop.eup %4520  ;;  %v3094_v46 = vpack.c.bf16 %v3085_v24, %v3084_v29  ;;  %v6497_v29 = vld [vmem:[#allocation2_spill] sm:$0xff] }
 0xb35   : > { %v3093_v5 = vpack.c.bf16 %v3083_v28, %v3082_v3  ;;  %v4523_v1 = vpop.eup %4522  ;;  %v3087_v50 = vmul.f32 %v4521_v6, %v6200_v20  ;;  %v2150_v62 = vadd.f32 %v6229_v0, %v6497_v29  ;;  %v6498_v3 = vld [vmem:[#allocation9_spill] sm:$0xff] }
 0xb36   : > { %v3086_v33 = vmul.f32 %v4523_v1, %v6181_v27  ;;  %v2105_v27 = vadd.f32 %v6209_v38, %v5790_v39  ;;  %v6491_v38 = vld [vmem:[#allocation5_spill] sm:$0xff] }
 0xb37   : > { %4117 = vmatmul.mubr.bf16.vlgmr.msra.gmra.mxu1 %v3089_v41  ;;  %v2121_v41 = vadd.f32 %v6217_v30, %v6491_v38  ;;  %v4542_v29 = vld [vmem:[%s4629_s10 + $0x18] sm:$0xff] }
 0xb38   : > { %4120 = vmatprep.mubr.bf16.mxu1 %v3090_v40  ;;  %4133 = vmatpush3.bf16.msra.mxu1 %v4234_v12  ;;  %v3095_v55 = vpack.c.bf16 %v3087_v50, %v3086_v33  ;;  %v2113_v40 = vadd.f32 %v6219_v23, %v6492_v14  ;;  %v6500_v50 = vld [vmem:[#allocation14_spill] sm:$0xff] }
 0xb39   : > { %4134 = vmatprep.subr.bf16.mxu1 %v4235_v22  ;;  %v2145_v33 = vadd.f32 %v6235_v42, %v6500_v50  ;;  %v4544_v50 = vld [vmem:[%s4629_s10 + $0x30] sm:$0xff] }
 0xb3c   : > { %4135 = vmatpush3.bf16.msra.mxu1 %v4235_v22 }
 0xb3f   : > { %4121 = vmatmul.mubr.bf16.gmra.mxu1 %v3091_v51  ;;  %v2137_v51 = vadd.f32 %v6225_v58, %v6495_v48 }
 0xb40   : > { %4124 = vmatprep.mubr.bf16.mxu1 %v3092_v63  ;;  %v6496_v63 = vld [vmem:[#allocation11_spill] sm:$0xff] }
 0xb41   : > { %v2129_v7 = vadd.f32 %v6227_v59, %v6496_v63 }
 0xb47   : > { %4125 = vmatmul.mubr.bf16.gmra.mxu1 %v3093_v5  ;;  %v2142_v5 = vadd.f32 %v6231_v15, %v6498_v3 }
 0xb48   : > { %4128 = vmatprep.mubr.bf16.mxu1 %v3094_v46  ;;  %v6499_v46 = vld [vmem:[#allocation12_spill] sm:$0xff] }
 0xb49   : > { %v2153_v12 = vadd.f32 %v6233_v53, %v6499_v46 }
 0xb4f   : > { %4129 = vmatmul.mubr.bf16.gmra.mxu1 %v3095_v55 }
 0xbb0   : > { %v4054_v10 = vpop.f32.mrf.mxu1 }
 0xbb1   : > { %v6272_v4 = vadd.f32 %v4054_v10, %v2102_v36 }
 0xbb2   : > { %v2688_v20 = vpop.f32.mrf.mxu1 }
 0xbb3   : > { %v6276_v19 = vadd.f32 %v2688_v20, %v2094_v34 }
 0xbb4   : > { %v4055_v47 = vpop.f32.mrf.mxu1 }
 0xbb5   : > { %v6280_v37 = vadd.f32 %v4055_v47, %v2105_v27 }
 0xbb6   : > { %v2691_v13 = vpop.f32.mrf.mxu1 }
 0xbb7   : > { %v6284_v9 = vadd.f32 %v2691_v13, %v2097_v21 }
 0xbb8   : > { %v4058_v11 = vpop.f32.mrf.mxu1 }
 0xbb9   : > { %v6288_v60 = vadd.f32 %v4058_v11, %v2118_v26 }
 0xbba   : > { %v2704_v39 = vpop.f32.mrf.mxu1 }
 0xbbb   : > { %v6292_v49 = vadd.f32 %v2704_v39, %v2110_v57 }
 0xbbc   : > { %v4059_v43 = vpop.f32.mrf.mxu1 }
 0xbbd   : > { %v6296_v8 = vadd.f32 %v4059_v43, %v2121_v41 }
 0xbbe   : > { %v2707_v54 = vpop.f32.mrf.mxu1 }
 0xbbf   : > { %v6300_v35 = vadd.f32 %v2707_v54, %v2113_v40 }
 0xbc0   : > { %v4062_v56 = vpop.f32.mrf.mxu1 }
 0xbc1   : > { %v6304_v16 = vadd.f32 %v4062_v56, %v2134_v61  ;;  %v6344_v56 = vld [vmem:[%s6425_s6] ss:$0 sm:$0xff] }
 0xbc2   : > { %v2720_v30 = vpop.f32.mrf.mxu1 }
 0xbc3   : > { %v6308_v52 = vadd.f32 %v2720_v30, %v2126_v45  ;;  %v4540_v45 = vld [vmem:[%s4629_s10 + $0x10] sm:$0xff] }
 0xbc4   : > { %v4063_v23 = vpop.f32.mrf.mxu1 }
 0xbc5   : > { %v6312_v2 = vadd.f32 %v4063_v23, %v2137_v51  ;;  %v4541_v23 = vld [vmem:[%s4629_s10] sm:$0xff] }
 0xbc6   : > { %v2723_v18 = vpop.f32.mrf.mxu1 }
 0xbc7   : > { %v6314_v28 = vadd.f32 %v2723_v18, %v2129_v7 }
 0xbef   : > { %v4066_v24 = vpop.f32.mrf.mxu1 }
 0xbf0   : > { %v6320_v6 = vadd.f32 %v4066_v24, %v2150_v62 }
 0xbf1   : > { %v2736_v58 = vpop.f32.mrf.mxu1 }
 0xbf2   : > { %v6324_v1 = vadd.f32 %v2736_v58, %v2142_v5  ;;  %v4543_v58 = vld [vmem:[%s4629_s10 + $0x8] sm:$0xff] }
 0xbf3   : > { %v4067_v59 = vpop.f32.mrf.mxu1 }
 0xbf4   : > { %v6328_v55 = vadd.f32 %v4067_v59, %v2153_v12 }
 0xbf5   : > { %v2739_v22 = vpop.f32.mrf.mxu1 }
 0xbf6   : > { %v6330_v0 = vadd.f32 %v2739_v22, %v2145_v33 }
 0xbf7   : > { %v4118_v36 = vpop.f32.mrf.mxu1 }
 0xbf9   : > { %v3154_v10 = vpop.f32.mrf.mxu1 }
 0xbfb   : > { %v4119_v15 = vpop.f32.mrf.mxu1 }
 0xbfc   : > { %v3218_v27 = vpack.c.bf16 %v4119_v15, %v4118_v36 }
 0xbfd   : > { %v3157_v34 = vpop.f32.mrf.mxu1 }
 0xbfe   : > { %v3217_v20 = vpack.c.bf16 %v3157_v34, %v3154_v10  ;;  %v4545_v10 = vld [vmem:[%s4629_s10 + $0x20] sm:$0xff] }
 0xbff   : > { %v4122_v47 = vpop.f32.mrf.mxu1 }
 0xc00   : > { %4136 = vmatprep.mubr.msk.bf16.mxu1 %vm997_vm0, %v3217_v20 }
 0xc01   : > { %v3170_v53 = vpop.f32.mrf.mxu1  ;;  %4137 = vmatmul.mubr.msk.bf16.vlgmr.msra.gmra.mxu1 %vm997_vm0, %v3218_v27  ;;  %v4546_v27 = vld [vmem:[%s4629_s10 + $0x38] sm:$0xff] }
 0xc03   : > { %v4123_v31 = vpop.f32.mrf.mxu1 }
 0xc04   : > { %v3220_v13 = vpack.c.bf16 %v4123_v31, %v4122_v47 }
 0xc05   : > { %v3173_v21 = vpop.f32.mrf.mxu1 }
 0xc06   : > { %v3219_v42 = vpack.c.bf16 %v3173_v21, %v3170_v53  ;;  %v4547_v21 = vld [vmem:[%s4629_s10 + $0x28] sm:$0xff] }
 0xc07   : > { %v4126_v25 = vpop.f32.mrf.mxu1 }
 0xc08   : > { %4140 = vmatprep.mubr.msk.bf16.mxu1 %vm997_vm0, %v3219_v42 }
 0xc09   : > { %v3186_v26 = vpop.f32.mrf.mxu1  ;;  %4141 = vmatmul.mubr.msk.bf16.gmra.mxu1 %vm997_vm0, %v3220_v13 }
 0xc0b   : > { %v4127_v11 = vpop.f32.mrf.mxu1 }
 0xc0c   : > { %v3222_v39 = vpack.c.bf16 %v4127_v11, %v4126_v25 }
 0xc0d   : > { %v3189_v44 = vpop.f32.mrf.mxu1 }
 0xc0e   : > { %v3221_v57 = vpack.c.bf16 %v3189_v44, %v3186_v26  ;;  %v4548_v26 = vld [vmem:[%s4629_s10 + $0x50] sm:$0xff] }
 0xc0f   : > { %v4130_v38 = vpop.f32.mrf.mxu1 }
 0xc10   : > { %4144 = vmatprep.mubr.msk.bf16.mxu1 %vm997_vm0, %v3221_v57 }
 0xc11   : > { %v3202_v41 = vpop.f32.mrf.mxu1  ;;  %4145 = vmatmul.mubr.msk.bf16.gmra.mxu1 %vm997_vm0, %v3222_v39  ;;  %v4549_v39 = vld [vmem:[%s4629_s10 + $0x40] sm:$0xff] }
 0xc13   : > { %v4131_v43 = vpop.f32.mrf.mxu1 }
 0xc14   : > { %v3224_v54 = vpack.c.bf16 %v4131_v43, %v4130_v38 }
 0xc15   : > { %v3205_v14 = vpop.f32.mrf.mxu1 }
 0xc16   : > { %v3223_v40 = vpack.c.bf16 %v3205_v14, %v3202_v41  ;;  %v4550_v14 = vld [vmem:[%s4629_s10 + $0x58] sm:$0xff] }
 0xc18   : > { %4148 = vmatprep.mubr.msk.bf16.mxu1 %vm997_vm0, %v3223_v40 }
 0xc19   : > { %4149 = vmatmul.mubr.msk.bf16.gmra.mxu1 %vm997_vm0, %v3224_v54 }
 0xcc1   : > { %v4138_v17 = vpop.f32.mrf.mxu1 }
 0xcc2   : > { %v3364_v61 = vadd.f32 %v4138_v17, %v6272_v4 }
 0xcc3   : > { %v3299_v32 = vpop.f32.mrf.mxu1 }
 0xcc4   : > { %v3380_v30 = vadd.f32 %v4540_v45, %v3364_v61  ;;  %v3362_v48 = vadd.f32 %v3299_v32, %v6276_v19  ;;  %v4551_v61 = vld [vmem:[%s4629_s10 + $0x48] sm:$0xff] }
 0xcc5   : > { %v4139_v4 = vpop.f32.mrf.mxu1 }
 0xcc6   : > { %v3403_v51 = vadd.f32 %v6344_v56, %v3380_v30  ;;  %v3378_v63 = vadd.f32 %v4541_v23, %v3362_v48  ;;  %v3365_v7 = vadd.f32 %v4139_v4, %v6280_v37  ;;  %v4552_v48 = vld [vmem:[%s4629_s10 + $0x70] sm:$0xff] }
 0xcc7   : > { %v3302_v18 = vpop.f32.mrf.mxu1 }
 0xcc8   : > { %3419 = vst [vmem:[%s6353_s12 + $0x10] sm:$0xff] %v3403_v51  ;;  %v3401_v19 = vadd.f32 %v6344_v56, %v3378_v63  ;;  %v3381_v62 = vadd.f32 %v4542_v29, %v3365_v7  ;;  %v3363_v24 = vadd.f32 %v3302_v18, %v6284_v9  ;;  %v4553_v63 = vld [vmem:[%s4629_s10 + $0x60] sm:$0xff]  ;;  %v4554_v29 = vld [vmem:[%s4629_s10 + $0x78] sm:$0xff] }
 0xcc9   : > { %v4142_v3 = vpop.f32.mrf.mxu1 }
 0xcca   : > { %3417 = vst [vmem:[%s6353_s12] sm:$0xff] %v3401_v19  ;;  %v3404_v5 = vadd.f32 %v6344_v56, %v3381_v62  ;;  %v3379_v46 = vadd.f32 %v4543_v58, %v3363_v24  ;;  %v3368_v37 = vadd.f32 %v4142_v3, %v6288_v60  ;;  %v4555_v3 = vld [vmem:[%s4629_s10 + $0x68] sm:$0xff] }
 0xccb   : > { %v3315_v12 = vpop.f32.mrf.mxu1 }
 0xccc   : > { %3420 = vst [vmem:[%s6353_s12 + $0x18] sm:$0xff] %v3404_v5  ;;  %v3402_v59 = vadd.f32 %v6344_v56, %v3379_v46  ;;  %v3384_v33 = vadd.f32 %v4544_v50, %v3368_v37  ;;  %v3366_v9 = vadd.f32 %v3315_v12, %v6292_v49 }
 0xccd   : > { %v4143_v22 = vpop.f32.mrf.mxu1 }
 0xcce   : > { %3418 = vst [vmem:[%s6353_s12 + $0x8] sm:$0xff] %v3402_v59  ;;  %v3407_v36 = vadd.f32 %v6344_v56, %v3384_v33  ;;  %v3382_v15 = vadd.f32 %v4545_v10, %v3366_v9  ;;  %v3369_v60 = vadd.f32 %v4143_v22, %v6296_v8 }
 0xccf   : > { %v3318_v34 = vpop.f32.mrf.mxu1 }
 0xcd0   : > { %3423 = vst [vmem:[%s6353_s12 + $0x30] sm:$0xff] %v3407_v36  ;;  %v3405_v20 = vadd.f32 %v6344_v56, %v3382_v15  ;;  %v3385_v47 = vadd.f32 %v4546_v27, %v3369_v60  ;;  %v3367_v49 = vadd.f32 %v3318_v34, %v6300_v35 }
 0xcd1   : > { %v4146_v53 = vpop.f32.mrf.mxu1 }
 0xcd2   : > { %3421 = vst [vmem:[%s6353_s12 + $0x20] sm:$0xff] %v3405_v20  ;;  %v3408_v31 = vadd.f32 %v6344_v56, %v3385_v47  ;;  %v3383_v42 = vadd.f32 %v4547_v21, %v3367_v49  ;;  %v3372_v8 = vadd.f32 %v4146_v53, %v6304_v16 }
 0xcd3   : > { %v3331_v13 = vpop.f32.mrf.mxu1 }
 0xcd4   : > { %3424 = vst [vmem:[%s6353_s12 + $0x38] sm:$0xff] %v3408_v31  ;;  %v3406_v25 = vadd.f32 %v6344_v56, %v3383_v42  ;;  %v3388_v11 = vadd.f32 %v4548_v26, %v3372_v8  ;;  %v3370_v35 = vadd.f32 %v3331_v13, %v6308_v52 }
 0xcd5   : > { %v4147_v44 = vpop.f32.mrf.mxu1 }
 0xcd6   : > { %3422 = vst [vmem:[%s6353_s12 + $0x28] sm:$0xff] %v3406_v25  ;;  %v3411_v57 = vadd.f32 %v6344_v56, %v3388_v11  ;;  %v3386_v38 = vadd.f32 %v4549_v39, %v3370_v35  ;;  %v3373_v16 = vadd.f32 %v4147_v44, %v6312_v2 }
 0xcd7   : > { %v3334_v41 = vpop.f32.mrf.mxu1 }
 0xcd8   : > { %3427 = vst [vmem:[%s6353_s12 + $0x50] sm:$0xff] %v3411_v57  ;;  %v3409_v43 = vadd.f32 %v6344_v56, %v3386_v38  ;;  %v3389_v40 = vadd.f32 %v4550_v14, %v3373_v16  ;;  %v3371_v52 = vadd.f32 %v3334_v41, %v6314_v28 }
 0xcd9   : > { %v4150_v54 = vpop.f32.mrf.mxu1 }
 0xcda   : > { %3425 = vst [vmem:[%s6353_s12 + $0x40] sm:$0xff] %v3409_v43  ;;  %v3412_v17 = vadd.f32 %v6344_v56, %v3389_v40  ;;  %v3387_v32 = vadd.f32 %v4551_v61, %v3371_v52  ;;  %v3376_v2 = vadd.f32 %v4150_v54, %v6320_v6 }
 0xcdb   : > { %v3347_v45 = vpop.f32.mrf.mxu1 }
 0xcdc   : > { %3428 = vst [vmem:[%s6353_s12 + $0x58] sm:$0xff] %v3412_v17  ;;  %v3410_v30 = vadd.f32 %v6344_v56, %v3387_v32  ;;  %v3392_v4 = vadd.f32 %v4552_v48, %v3376_v2  ;;  %v3374_v28 = vadd.f32 %v3347_v45, %v6324_v1 }
 0xcdd   : > { %v4151_v51 = vpop.f32.mrf.mxu1 }
 0xcde   : > { %3426 = vst [vmem:[%s6353_s12 + $0x48] sm:$0xff] %v3410_v30  ;;  %v3415_v23 = vadd.f32 %v6344_v56, %v3392_v4  ;;  %v3390_v7 = vadd.f32 %v4553_v63, %v3374_v28  ;;  %v3377_v6 = vadd.f32 %v4151_v51, %v6328_v55 }
 0xcdf   : > { %v3350_v18 = vpop.f32.mrf.mxu1 }
 0xce0   : > { %3431 = vst [vmem:[%s6353_s12 + $0x70] sm:$0xff] %v3415_v23  ;;  %v3413_v19 = vadd.f32 %v6344_v56, %v3390_v7  ;;  %v3393_v62 = vadd.f32 %v4554_v29, %v3377_v6  ;;  %v3375_v24 = vadd.f32 %v3350_v18, %v6330_v0 }
 0xce2   : > { %3429 = vst [vmem:[%s6353_s12 + $0x60] sm:$0xff] %v3413_v19  ;;  %v3416_v1 = vadd.f32 %v6344_v56, %v3393_v62  ;;  %v3391_v5 = vadd.f32 %v4555_v3, %v3375_v24 }
 0xce4   : > { %3432 = vst [vmem:[%s6353_s12 + $0x78] sm:$0xff] %v3416_v1  ;;  %v3414_v58 = vadd.f32 %v6344_v56, %v3391_v5 }
 0xce6   : > { %3430 = vst [vmem:[%s6353_s12 + $0x68] sm:$0xff] %v3414_v58 }
 0xce7 PF: > { %s18_s27 = sadd.s32 1, %s4562_s27  }
 0xce8   : > { %p15_p4 = scmp.ge.s32.totalorder %s18_s27, 4  }
 0xcea   :  { %17 = sbr.rel (!%p15_p4) target bundleno = 1 (0x1), region = 82 }

</bundles_post_ra>
